<compile_context>
chip_gen: v6e
topology: v6e:2x2x1
jax: 0.10.0
libtpu: 0.0.40
codegen_flags: <defaults>
</compile_context>

<pallas_src>
import jax
import jax.numpy as jnp
from jax.experimental import pallas as pl
from jax.experimental.pallas import tpu as pltpu

# ---- static configuration --------------------------------------------------
D_IN = 8
D_LATENT = 16
D_HIDDEN = 32
D_OUT = 4
N_BLOCKS = 3

D_ZX = D_LATENT + D_IN                 # 24  (zx layout is [z | x])
D_BASE = D_HIDDEN * (1 + N_BLOCKS)     # 128 (fused lin_in + lin_z outputs)
D_OUT_PAD = 128                        # lane-dense padded output width
TM = 1024                              # rows per grid step (multiple of 8)


# ---- Pallas kernel ----------------------------------------------------------
def resnetfc_kernel(zx_ref,
                    w_fused_ref, b_fused_ref,
                    w0_ref, b0_ref,
                    w1_ref, b1_ref,
                    w_out_ref, b_out_ref,
                    out_ref):
    # zx tile is already bf16: (TM, 24) with columns [z (16) | x (8)].
    zx = zx_ref[...]

    # Fused lin_in + lin_z[0..2]: one lane-dense (TM, 24) @ (24, 128) matmul.
    base = jnp.dot(zx, w_fused_ref[...],
                   preferred_element_type=jnp.float32) + b_fused_ref[...]

    # base[:, :32]            -> lin_in(x)
    # base[:, 32*(b+1):...]   -> lin_z[b](z)
    x = base[:, :D_HIDDEN]

    for blk in range(N_BLOCKS):
        x = x + base[:, D_HIDDEN * (blk + 1):D_HIDDEN * (blk + 2)]
        net = jnp.dot(jax.nn.relu(x).astype(jnp.bfloat16), w0_ref[blk],
                      preferred_element_type=jnp.float32) + b0_ref[blk]
        dx = jnp.dot(jax.nn.relu(net).astype(jnp.bfloat16), w1_ref[blk],
                     preferred_element_type=jnp.float32) + b1_ref[blk]
        x = x + dx                      # size_in == size_out -> identity shortcut

    # lin_out, zero-padded to 128 columns so the store is a full-lane write.
    out = jnp.dot(jax.nn.relu(x).astype(jnp.bfloat16), w_out_ref[...],
                  preferred_element_type=jnp.float32) + b_out_ref[...]
    out_ref[...] = out.astype(out_ref.dtype)


# ---- parameter preparation for the kernel ------------------------------------
def prepare_fused_params(params):
    """Fuse lin_in + lin_z into one block-structured weight, pad lin_out to 128
    lanes, and pre-cast matmul operands to bf16 (done once, outside the kernel)."""
    (w_in, b_in, w_z, b_z, w0, b0, w1, b1, w_out, b_out) = params

    w_fused = jnp.zeros((D_ZX, D_BASE), jnp.float32)
    # x columns (rows D_LATENT:) feed lin_in -> output columns [0, 32).
    w_fused = w_fused.at[D_LATENT:, :D_HIDDEN].set(w_in)
    b_fused = jnp.zeros((1, D_BASE), jnp.float32)
    b_fused = b_fused.at[:, :D_HIDDEN].set(b_in)
    for blk in range(N_BLOCKS):
        lo, hi = D_HIDDEN * (blk + 1), D_HIDDEN * (blk + 2)
        # z columns (rows :D_LATENT) feed lin_z[blk] -> output columns [lo, hi).
        w_fused = w_fused.at[:D_LATENT, lo:hi].set(w_z[blk])
        b_fused = b_fused.at[:, lo:hi].set(b_z[blk])

    w_out_pad = jnp.zeros((D_HIDDEN, D_OUT_PAD), jnp.float32).at[:, :D_OUT].set(w_out)
    b_out_pad = jnp.zeros((1, D_OUT_PAD), jnp.float32).at[:, :D_OUT].set(b_out)

    return (w_fused.astype(jnp.bfloat16), b_fused,
            w0.astype(jnp.bfloat16), b0,
            w1.astype(jnp.bfloat16), b1,
            w_out_pad.astype(jnp.bfloat16), b_out_pad)


# ---- wrapper -----------------------------------------------------------------
def resnetfc_forward(zx, kernel_params, *, tm=TM):
    """zx: (B, N, D_LATENT + D_IN) -> (B, N, D_OUT)."""
    B, N, Dzx = zx.shape
    assert Dzx == D_ZX
    M = B * N
    num_tiles = pl.cdiv(M, tm)
    M_pad = num_tiles * tm

    # bf16 input stream (halves HBM/DMA traffic; MXU operands are bf16 anyway).
    zx_flat = zx.reshape(M, Dzx).astype(jnp.bfloat16)
    if M_pad != M:
        zx_flat = jnp.pad(zx_flat, ((0, M_pad - M), (0, 0)))

    (w_fused, b_fused, w0, b0, w1, b1, w_out_pad, b_out_pad) = kernel_params

    full = lambda arr: pl.BlockSpec(arr.shape, lambda i: (0,) * arr.ndim)

    flops = 2 * M_pad * (D_ZX * D_BASE
                         + N_BLOCKS * 2 * D_HIDDEN * D_HIDDEN
                         + D_HIDDEN * D_OUT_PAD)
    weight_bytes = sum(int(a.size) * a.dtype.itemsize for a in kernel_params)
    bytes_accessed = M_pad * (D_ZX * 2 + D_OUT_PAD * 4) + weight_bytes

    out_pad = pl.pallas_call(
        resnetfc_kernel,
        out_shape=jax.ShapeDtypeStruct((M_pad, D_OUT_PAD), jnp.float32),
        grid_spec=pltpu.PrefetchScalarGridSpec(
            num_scalar_prefetch=0,
            grid=(num_tiles,),
            in_specs=[
                pl.BlockSpec((tm, D_ZX), lambda i: (i, 0)),   # zx rows
                full(w_fused), full(b_fused),
                full(w0), full(b0),
                full(w1), full(b1),
                full(w_out_pad), full(b_out_pad),
            ],
            out_specs=pl.BlockSpec((tm, D_OUT_PAD), lambda i: (i, 0)),
        ),
        compiler_params=pltpu.CompilerParams(
            dimension_semantics=("parallel",)),
        cost_estimate=pl.CostEstimate(
            flops=flops, transcendentals=0, bytes_accessed=bytes_accessed),
    )(zx_flat, w_fused, b_fused, w0, b0, w1, b1, w_out_pad, b_out_pad)

    return out_pad[:M, :D_OUT].astype(zx.dtype).reshape(B, N, D_OUT)


# ---- deterministic parameter init -------------------------------------------
def kaiming_in(key, fan_in, fan_out):
    # kaiming_normal_(mode='fan_in', a=0): std = sqrt(2 / fan_in).
    # Stored transposed: (fan_in, fan_out) so the kernel computes x @ W.
    return (jnp.sqrt(2.0 / fan_in)
            * jax.random.normal(key, (fan_in, fan_out), jnp.float32))


def init_params(key):
    ks = jax.random.split(key, 2 + 4 * N_BLOCKS + 2)
    it = iter(ks)
    w_in = kaiming_in(next(it), D_IN, D_HIDDEN)
    b_in = jnp.zeros((1, D_HIDDEN), jnp.float32)

    w_z = jnp.stack([kaiming_in(next(it), D_LATENT, D_HIDDEN) for _ in range(N_BLOCKS)])
    b_z = jnp.zeros((N_BLOCKS, 1, D_HIDDEN), jnp.float32)

    w0 = jnp.stack([kaiming_in(next(it), D_HIDDEN, D_HIDDEN) for _ in range(N_BLOCKS)])
    b0 = jnp.zeros((N_BLOCKS, 1, D_HIDDEN), jnp.float32)
    # NOTE: the PyTorch module zero-inits fc_1 (so dx == 0 at init); we use a
    # small deterministic random init instead so the residual path is exercised.
    w1 = jnp.stack([0.01 * kaiming_in(next(it), D_HIDDEN, D_HIDDEN)
                    for _ in range(N_BLOCKS)])
    b1 = jnp.zeros((N_BLOCKS, 1, D_HIDDEN), jnp.float32)

    w_out = kaiming_in(next(it), D_HIDDEN, D_OUT)
    b_out = jnp.zeros((1, D_OUT), jnp.float32)
    return (w_in, b_in, w_z, b_z, w0, b0, w1, b1, w_out, b_out)


# ---- pure-JAX f32 reference (for correctness check) --------------------------
def resnetfc_ref(zx, params):
    (w_in, b_in, w_z, b_z, w0, b0, w1, b1, w_out, b_out) = params
    z = zx[..., :D_LATENT]
    x_in = zx[..., D_LATENT:]
    x = x_in @ w_in + b_in[0]
    for blk in range(N_BLOCKS):
        x = x + (z @ w_z[blk] + b_z[blk, 0])
        net = jax.nn.relu(x) @ w0[blk] + b0[blk, 0]
        dx = jax.nn.relu(net) @ w1[blk] + b1[blk, 0]
        x = x + dx
    return jax.nn.relu(x) @ w_out + b_out[0]


if __name__ == "__main__":
    key = jax.random.PRNGKey(0)
    k_x, k_p = jax.random.split(key)

    B, N = 2, 8                                   # 16 rows total (padded to TM)
    zx = jax.random.normal(k_x, (B, N, D_LATENT + D_IN), jnp.float32)
    params = init_params(k_p)
    kernel_params = prepare_fused_params(params)  # fuse + bf16 cast, once

    out = resnetfc_forward(zx, kernel_params)
    out = jax.block_until_ready(out)

    ref = resnetfc_ref(zx, params)
    assert out.shape == (B, N, D_OUT)
    # bf16 MXU operands with f32 accumulation -> looser tolerance vs f32 ref.
    assert jnp.allclose(out, ref, atol=1e-1, rtol=5e-2), \
        f"mismatch vs JAX reference (max abs err {jnp.max(jnp.abs(out - ref))})"

    print("KERNEL_OK")
</pallas_src>

<mosaic_0001>
module attributes {stable_mosaic.version = 11 : i64} {
  func.func @resnetfc_kernel(%arg0: i32, %arg1: memref<1024x24xbf16, #tpu.memory_space<vmem>>, %arg2: memref<24x128xbf16, #tpu.memory_space<vmem>>, %arg3: memref<1x128xf32, #tpu.memory_space<vmem>>, %arg4: memref<3x32x32xbf16, #tpu.memory_space<vmem>>, %arg5: memref<3x1x32xf32, #tpu.memory_space<vmem>>, %arg6: memref<3x32x32xbf16, #tpu.memory_space<vmem>>, %arg7: memref<3x1x32xf32, #tpu.memory_space<vmem>>, %arg8: memref<32x128xbf16, #tpu.memory_space<vmem>>, %arg9: memref<1x128xf32, #tpu.memory_space<vmem>>, %arg10: memref<1024x128xf32, #tpu.memory_space<vmem>>) attributes {dimension_semantics = [#tpu.dimension_semantics<parallel>], iteration_bounds = array<i64: 1>, scalar_prefetch = 0 : i64, scratch_operands = 0 : i64, tpu.core_type = #tpu.core_type<tc>, window_params = [{transform_indices = @transform_0, window_bounds = array<i64: 1024, 24>}, {pipeline_mode = #tpu.pipeline_mode<synchronous>, transform_indices = @transform_1, window_bounds = array<i64: 24, 128>}, {pipeline_mode = #tpu.pipeline_mode<synchronous>, transform_indices = @transform_2, window_bounds = array<i64: 1, 128>}, {pipeline_mode = #tpu.pipeline_mode<synchronous>, transform_indices = @transform_3, window_bounds = array<i64: 3, 32, 32>}, {pipeline_mode = #tpu.pipeline_mode<synchronous>, transform_indices = @transform_4, window_bounds = array<i64: 3, 1, 32>}, {pipeline_mode = #tpu.pipeline_mode<synchronous>, transform_indices = @transform_5, window_bounds = array<i64: 3, 32, 32>}, {pipeline_mode = #tpu.pipeline_mode<synchronous>, transform_indices = @transform_6, window_bounds = array<i64: 3, 1, 32>}, {pipeline_mode = #tpu.pipeline_mode<synchronous>, transform_indices = @transform_7, window_bounds = array<i64: 32, 128>}, {pipeline_mode = #tpu.pipeline_mode<synchronous>, transform_indices = @transform_8, window_bounds = array<i64: 1, 128>}, {transform_indices = @transform_9, window_bounds = array<i64: 1024, 128>}]} {
    %c0 = arith.constant 0 : index
    %c0_0 = arith.constant 0 : index
    %0 = vector.load %arg1[%c0, %c0_0] : memref<1024x24xbf16, #tpu.memory_space<vmem>>, vector<1024x24xbf16>
    %c0_1 = arith.constant 0 : index
    %c0_2 = arith.constant 0 : index
    %1 = vector.load %arg2[%c0_1, %c0_2] : memref<24x128xbf16, #tpu.memory_space<vmem>>, vector<24x128xbf16>
    %cst = arith.constant dense<0.000000e+00> : vector<1024x128xf32>
    %2 = tpu.matmul %0, %1, %cst {dimension_numbers = #tpu.dot_dimension_numbers<[1], [0], [0], [1], [0, 0, 1, 1], [], []>} : vector<1024x24xbf16>, vector<24x128xbf16>, vector<1024x128xf32> -> vector<1024x128xf32>
    %c0_3 = arith.constant 0 : index
    %c0_4 = arith.constant 0 : index
    %3 = vector.load %arg3[%c0_3, %c0_4] : memref<1x128xf32, #tpu.memory_space<vmem>>, vector<1x128xf32>
    %4 = vector.broadcast %3 : vector<1x128xf32> to vector<1024x128xf32>
    %5 = arith.addf %2, %4 : vector<1024x128xf32>
    %6 = vector.extract_strided_slice %5 {offsets = [0, 0], sizes = [1024, 32], strides = [1, 1]} : vector<1024x128xf32> to vector<1024x32xf32>
    %7 = vector.extract_strided_slice %5 {offsets = [0, 32], sizes = [1024, 32], strides = [1, 1]} : vector<1024x128xf32> to vector<1024x32xf32>
    %8 = arith.addf %6, %7 : vector<1024x32xf32>
    %cst_5 = arith.constant 0.000000e+00 : f32
    %9 = vector.broadcast %cst_5 : f32 to vector<1024x32xf32>
    %10 = arith.maximumf %8, %9 : vector<1024x32xf32>
    %11 = arith.truncf %10 : vector<1024x32xf32> to vector<1024x32xbf16>
    %c0_6 = arith.constant 0 : index
    %c0_7 = arith.constant 0 : index
    %c0_8 = arith.constant 0 : index
    %12 = vector.load %arg4[%c0_6, %c0_7, %c0_8] : memref<3x32x32xbf16, #tpu.memory_space<vmem>>, vector<1x32x32xbf16>
    %13 = vector.shape_cast %12 : vector<1x32x32xbf16> to vector<32x32xbf16>
    %cst_9 = arith.constant dense<0.000000e+00> : vector<1024x32xf32>
    %14 = tpu.matmul %11, %13, %cst_9 {dimension_numbers = #tpu.dot_dimension_numbers<[1], [0], [0], [1], [0, 0, 1, 1], [], []>} : vector<1024x32xbf16>, vector<32x32xbf16>, vector<1024x32xf32> -> vector<1024x32xf32>
    %c0_10 = arith.constant 0 : index
    %c0_11 = arith.constant 0 : index
    %c0_12 = arith.constant 0 : index
    %15 = vector.load %arg5[%c0_10, %c0_11, %c0_12] : memref<3x1x32xf32, #tpu.memory_space<vmem>>, vector<1x1x32xf32>
    %16 = vector.shape_cast %15 : vector<1x1x32xf32> to vector<1x32xf32>
    %17 = vector.broadcast %16 : vector<1x32xf32> to vector<1024x32xf32>
    %18 = arith.addf %14, %17 : vector<1024x32xf32>
    %cst_13 = arith.constant 0.000000e+00 : f32
    %19 = vector.broadcast %cst_13 : f32 to vector<1024x32xf32>
    %20 = arith.maximumf %18, %19 : vector<1024x32xf32>
    %21 = arith.truncf %20 : vector<1024x32xf32> to vector<1024x32xbf16>
    %c0_14 = arith.constant 0 : index
    %c0_15 = arith.constant 0 : index
    %c0_16 = arith.constant 0 : index
    %22 = vector.load %arg6[%c0_14, %c0_15, %c0_16] : memref<3x32x32xbf16, #tpu.memory_space<vmem>>, vector<1x32x32xbf16>
    %23 = vector.shape_cast %22 : vector<1x32x32xbf16> to vector<32x32xbf16>
    %cst_17 = arith.constant dense<0.000000e+00> : vector<1024x32xf32>
    %24 = tpu.matmul %21, %23, %cst_17 {dimension_numbers = #tpu.dot_dimension_numbers<[1], [0], [0], [1], [0, 0, 1, 1], [], []>} : vector<1024x32xbf16>, vector<32x32xbf16>, vector<1024x32xf32> -> vector<1024x32xf32>
    %c0_18 = arith.constant 0 : index
    %c0_19 = arith.constant 0 : index
    %c0_20 = arith.constant 0 : index
    %25 = vector.load %arg7[%c0_18, %c0_19, %c0_20] : memref<3x1x32xf32, #tpu.memory_space<vmem>>, vector<1x1x32xf32>
    %26 = vector.shape_cast %25 : vector<1x1x32xf32> to vector<1x32xf32>
    %27 = vector.broadcast %26 : vector<1x32xf32> to vector<1024x32xf32>
    %28 = arith.addf %24, %27 : vector<1024x32xf32>
    %29 = arith.addf %8, %28 : vector<1024x32xf32>
    %30 = vector.extract_strided_slice %5 {offsets = [0, 64], sizes = [1024, 32], strides = [1, 1]} : vector<1024x128xf32> to vector<1024x32xf32>
    %31 = arith.addf %29, %30 : vector<1024x32xf32>
    %cst_21 = arith.constant 0.000000e+00 : f32
    %32 = vector.broadcast %cst_21 : f32 to vector<1024x32xf32>
    %33 = arith.maximumf %31, %32 : vector<1024x32xf32>
    %34 = arith.truncf %33 : vector<1024x32xf32> to vector<1024x32xbf16>
    %c1 = arith.constant 1 : index
    %c0_22 = arith.constant 0 : index
    %c0_23 = arith.constant 0 : index
    %35 = vector.load %arg4[%c1, %c0_22, %c0_23] : memref<3x32x32xbf16, #tpu.memory_space<vmem>>, vector<1x32x32xbf16>
    %36 = vector.shape_cast %35 : vector<1x32x32xbf16> to vector<32x32xbf16>
    %cst_24 = arith.constant dense<0.000000e+00> : vector<1024x32xf32>
    %37 = tpu.matmul %34, %36, %cst_24 {dimension_numbers = #tpu.dot_dimension_numbers<[1], [0], [0], [1], [0, 0, 1, 1], [], []>} : vector<1024x32xbf16>, vector<32x32xbf16>, vector<1024x32xf32> -> vector<1024x32xf32>
    %c1_25 = arith.constant 1 : index
    %c0_26 = arith.constant 0 : index
    %c0_27 = arith.constant 0 : index
    %38 = vector.load %arg5[%c1_25, %c0_26, %c0_27] : memref<3x1x32xf32, #tpu.memory_space<vmem>>, vector<1x1x32xf32>
    %39 = vector.shape_cast %38 : vector<1x1x32xf32> to vector<1x32xf32>
    %40 = vector.broadcast %39 : vector<1x32xf32> to vector<1024x32xf32>
    %41 = arith.addf %37, %40 : vector<1024x32xf32>
    %cst_28 = arith.constant 0.000000e+00 : f32
    %42 = vector.broadcast %cst_28 : f32 to vector<1024x32xf32>
    %43 = arith.maximumf %41, %42 : vector<1024x32xf32>
    %44 = arith.truncf %43 : vector<1024x32xf32> to vector<1024x32xbf16>
    %c1_29 = arith.constant 1 : index
    %c0_30 = arith.constant 0 : index
    %c0_31 = arith.constant 0 : index
    %45 = vector.load %arg6[%c1_29, %c0_30, %c0_31] : memref<3x32x32xbf16, #tpu.memory_space<vmem>>, vector<1x32x32xbf16>
    %46 = vector.shape_cast %45 : vector<1x32x32xbf16> to vector<32x32xbf16>
    %cst_32 = arith.constant dense<0.000000e+00> : vector<1024x32xf32>
    %47 = tpu.matmul %44, %46, %cst_32 {dimension_numbers = #tpu.dot_dimension_numbers<[1], [0], [0], [1], [0, 0, 1, 1], [], []>} : vector<1024x32xbf16>, vector<32x32xbf16>, vector<1024x32xf32> -> vector<1024x32xf32>
    %c1_33 = arith.constant 1 : index
    %c0_34 = arith.constant 0 : index
    %c0_35 = arith.constant 0 : index
    %48 = vector.load %arg7[%c1_33, %c0_34, %c0_35] : memref<3x1x32xf32, #tpu.memory_space<vmem>>, vector<1x1x32xf32>
    %49 = vector.shape_cast %48 : vector<1x1x32xf32> to vector<1x32xf32>
    %50 = vector.broadcast %49 : vector<1x32xf32> to vector<1024x32xf32>
    %51 = arith.addf %47, %50 : vector<1024x32xf32>
    %52 = arith.addf %31, %51 : vector<1024x32xf32>
    %53 = vector.extract_strided_slice %5 {offsets = [0, 96], sizes = [1024, 32], strides = [1, 1]} : vector<1024x128xf32> to vector<1024x32xf32>
    %54 = arith.addf %52, %53 : vector<1024x32xf32>
    %cst_36 = arith.constant 0.000000e+00 : f32
    %55 = vector.broadcast %cst_36 : f32 to vector<1024x32xf32>
    %56 = arith.maximumf %54, %55 : vector<1024x32xf32>
    %57 = arith.truncf %56 : vector<1024x32xf32> to vector<1024x32xbf16>
    %c2 = arith.constant 2 : index
    %c0_37 = arith.constant 0 : index
    %c0_38 = arith.constant 0 : index
    %58 = vector.load %arg4[%c2, %c0_37, %c0_38] : memref<3x32x32xbf16, #tpu.memory_space<vmem>>, vector<1x32x32xbf16>
    %59 = vector.shape_cast %58 : vector<1x32x32xbf16> to vector<32x32xbf16>
    %cst_39 = arith.constant dense<0.000000e+00> : vector<1024x32xf32>
    %60 = tpu.matmul %57, %59, %cst_39 {dimension_numbers = #tpu.dot_dimension_numbers<[1], [0], [0], [1], [0, 0, 1, 1], [], []>} : vector<1024x32xbf16>, vector<32x32xbf16>, vector<1024x32xf32> -> vector<1024x32xf32>
    %c2_40 = arith.constant 2 : index
    %c0_41 = arith.constant 0 : index
    %c0_42 = arith.constant 0 : index
    %61 = vector.load %arg5[%c2_40, %c0_41, %c0_42] : memref<3x1x32xf32, #tpu.memory_space<vmem>>, vector<1x1x32xf32>
    %62 = vector.shape_cast %61 : vector<1x1x32xf32> to vector<1x32xf32>
    %63 = vector.broadcast %62 : vector<1x32xf32> to vector<1024x32xf32>
    %64 = arith.addf %60, %63 : vector<1024x32xf32>
    %cst_43 = arith.constant 0.000000e+00 : f32
    %65 = vector.broadcast %cst_43 : f32 to vector<1024x32xf32>
    %66 = arith.maximumf %64, %65 : vector<1024x32xf32>
    %67 = arith.truncf %66 : vector<1024x32xf32> to vector<1024x32xbf16>
    %c2_44 = arith.constant 2 : index
    %c0_45 = arith.constant 0 : index
    %c0_46 = arith.constant 0 : index
    %68 = vector.load %arg6[%c2_44, %c0_45, %c0_46] : memref<3x32x32xbf16, #tpu.memory_space<vmem>>, vector<1x32x32xbf16>
    %69 = vector.shape_cast %68 : vector<1x32x32xbf16> to vector<32x32xbf16>
    %cst_47 = arith.constant dense<0.000000e+00> : vector<1024x32xf32>
    %70 = tpu.matmul %67, %69, %cst_47 {dimension_numbers = #tpu.dot_dimension_numbers<[1], [0], [0], [1], [0, 0, 1, 1], [], []>} : vector<1024x32xbf16>, vector<32x32xbf16>, vector<1024x32xf32> -> vector<1024x32xf32>
    %c2_48 = arith.constant 2 : index
    %c0_49 = arith.constant 0 : index
    %c0_50 = arith.constant 0 : index
    %71 = vector.load %arg7[%c2_48, %c0_49, %c0_50] : memref<3x1x32xf32, #tpu.memory_space<vmem>>, vector<1x1x32xf32>
    %72 = vector.shape_cast %71 : vector<1x1x32xf32> to vector<1x32xf32>
    %73 = vector.broadcast %72 : vector<1x32xf32> to vector<1024x32xf32>
    %74 = arith.addf %70, %73 : vector<1024x32xf32>
    %75 = arith.addf %54, %74 : vector<1024x32xf32>
    %cst_51 = arith.constant 0.000000e+00 : f32
    %76 = vector.broadcast %cst_51 : f32 to vector<1024x32xf32>
    %77 = arith.maximumf %75, %76 : vector<1024x32xf32>
    %78 = arith.truncf %77 : vector<1024x32xf32> to vector<1024x32xbf16>
    %c0_52 = arith.constant 0 : index
    %c0_53 = arith.constant 0 : index
    %79 = vector.load %arg8[%c0_52, %c0_53] : memref<32x128xbf16, #tpu.memory_space<vmem>>, vector<32x128xbf16>
    %cst_54 = arith.constant dense<0.000000e+00> : vector<1024x128xf32>
    %80 = tpu.matmul %78, %79, %cst_54 {dimension_numbers = #tpu.dot_dimension_numbers<[1], [0], [0], [1], [0, 0, 1, 1], [], []>} : vector<1024x32xbf16>, vector<32x128xbf16>, vector<1024x128xf32> -> vector<1024x128xf32>
    %c0_55 = arith.constant 0 : index
    %c0_56 = arith.constant 0 : index
    %81 = vector.load %arg9[%c0_55, %c0_56] : memref<1x128xf32, #tpu.memory_space<vmem>>, vector<1x128xf32>
    %82 = vector.broadcast %81 : vector<1x128xf32> to vector<1024x128xf32>
    %83 = arith.addf %80, %82 : vector<1024x128xf32>
    %c0_57 = arith.constant 0 : index
    %c0_58 = arith.constant 0 : index
    %84 = vector.load %arg10[%c0_57, %c0_58] : memref<1024x128xf32, #tpu.memory_space<vmem>>, vector<1024x128xf32>
    tpu.vector_store %arg10[%c0_57, %c0_58], %83 {strides = array<i32>} : memref<1024x128xf32, #tpu.memory_space<vmem>>, vector<1024x128xf32>,
    return
  }
  func.func @transform_0(%arg0: i32) -> (i32, i32) {
    %c0_i32 = arith.constant 0 : i32
    %c0_i32_0 = arith.constant 0 : i32
    return %arg0, %c0_i32 : i32, i32
  }
  func.func @transform_1(%arg0: i32) -> (i32, i32) {
    %c0_i32 = arith.constant 0 : i32
    %c0_i32_0 = arith.constant 0 : i32
    %c0_i32_1 = arith.constant 0 : i32
    return %c0_i32, %c0_i32_0 : i32, i32
  }
  func.func @transform_2(%arg0: i32) -> (i32, i32) {
    %c0_i32 = arith.constant 0 : i32
    %c0_i32_0 = arith.constant 0 : i32
    %c0_i32_1 = arith.constant 0 : i32
    return %c0_i32, %c0_i32_0 : i32, i32
  }
  func.func @transform_3(%arg0: i32) -> (i32, i32, i32) {
    %c0_i32 = arith.constant 0 : i32
    %c0_i32_0 = arith.constant 0 : i32
    %c0_i32_1 = arith.constant 0 : i32
    %c0_i32_2 = arith.constant 0 : i32
    return %c0_i32, %c0_i32_0, %c0_i32_1 : i32, i32, i32
  }
  func.func @transform_4(%arg0: i32) -> (i32, i32, i32) {
    %c0_i32 = arith.constant 0 : i32
    %c0_i32_0 = arith.constant 0 : i32
    %c0_i32_1 = arith.constant 0 : i32
    %c0_i32_2 = arith.constant 0 : i32
    return %c0_i32, %c0_i32_0, %c0_i32_1 : i32, i32, i32
  }
  func.func @transform_5(%arg0: i32) -> (i32, i32, i32) {
    %c0_i32 = arith.constant 0 : i32
    %c0_i32_0 = arith.constant 0 : i32
    %c0_i32_1 = arith.constant 0 : i32
    %c0_i32_2 = arith.constant 0 : i32
    return %c0_i32, %c0_i32_0, %c0_i32_1 : i32, i32, i32
  }
  func.func @transform_6(%arg0: i32) -> (i32, i32, i32) {
    %c0_i32 = arith.constant 0 : i32
    %c0_i32_0 = arith.constant 0 : i32
    %c0_i32_1 = arith.constant 0 : i32
    %c0_i32_2 = arith.constant 0 : i32
    return %c0_i32, %c0_i32_0, %c0_i32_1 : i32, i32, i32
  }
  func.func @transform_7(%arg0: i32) -> (i32, i32) {
    %c0_i32 = arith.constant 0 : i32
    %c0_i32_0 = arith.constant 0 : i32
    %c0_i32_1 = arith.constant 0 : i32
    return %c0_i32, %c0_i32_0 : i32, i32
  }
  func.func @transform_8(%arg0: i32) -> (i32, i32) {
    %c0_i32 = arith.constant 0 : i32
    %c0_i32_0 = arith.constant 0 : i32
    %c0_i32_1 = arith.constant 0 : i32
    return %c0_i32, %c0_i32_0 : i32, i32
  }
  func.func @transform_9(%arg0: i32) -> (i32, i32) {
    %c0_i32 = arith.constant 0 : i32
    %c0_i32_0 = arith.constant 0 : i32
    return %arg0, %c0_i32 : i32, i32
  }
}

</mosaic_0001>

<bundles_post_ra>
// kernel: tpu_custom_call.1
= control target key start
LH: loop header
LB: loop body
LE: loop exit
PB: predicated region body
PF: predicated region fallthrough
CT: control target
= control target key end

     0   :  { %vm694_vm0 = vcmask 1043456   ;;  %vm501_vm1 = vcmask 195584   ;;  %s17774_s0 = inlined_call_operand.vmem [shape: bf16[1024,24], index: 0, kind: input, shape index: {}]   ;;  %s17775_s1 = inlined_call_operand.vmem [shape: bf16[24,128], index: 1, kind: input, shape index: {}]   ;;  %s17776_s2 = inlined_call_operand.vmem [shape: f32[1,128], index: 2, kind: input, shape index: {}]   ;;  %s17777_s3 = inlined_call_operand.vmem [shape: bf16[3,32,32], index: 3, kind: input, shape index: {}]   ;;  %s17778_s4 = inlined_call_operand.vmem [shape: f32[3,1,32], index: 4, kind: input, shape index: {}]   ;;  %s17779_s5 = inlined_call_operand.vmem [shape: bf16[3,32,32], index: 5, kind: input, shape index: {}]   ;;  %s17780_s6 = inlined_call_operand.vmem [shape: f32[3,1,32], index: 6, kind: input, shape index: {}]   ;;  %s17781_s7 = inlined_call_operand.vmem [shape: bf16[32,128], index: 7, kind: input, shape index: {}]   ;;  %s17782_s8 = inlined_call_operand.vmem [shape: f32[1,128], index: 8, kind: input, shape index: {}]   ;;  %s17783_s9 = inlined_call_operand.hbm [shape: f32[1024,128], index: 9, kind: output, shape index: {}]  }
   0x1   :  { %v12319_v0 = vld [vmem:[%s17775_s1 + $0x8] ss:$0 sps:$4 sm:$0xff]   ;;  %v12320_v1 = vld [vmem:[%s17775_s1] sm:$0xff]   ;;  %v12323_v5 = vld [vmem:[%s17774_s0 + $0x10] sm:$0xff]  }
   0x2   :  { %12312 = vmatprep.subr.msk.bf16.mxu0 %vm694_vm0, %v12319_v0  ;;  %v696_v2 = vsel %vm694_vm0, %v12319_v0, 0  ;;  %v12321_v3 = vld [vmem:[%s17774_s0] sm:$0xff]   ;;  %v12322_v4 = vld [vmem:[%s17774_s0 + $0x8] sm:$0xff]   ;;  %v12324_v6 = vld [vmem:[%s17774_s0 + $0x18] sm:$0xff]  }
   0x3   :  { %11257 = vmatpush3.bf16.msra.mxu0 %v696_v2  ;;  %11260 = vmatprep.mubr.msk.bf16.mxu0 %vm501_vm1, %v12321_v3  ;;  %v12325_v7 = vld [vmem:[%s17774_s0 + $0x20] sm:$0xff]   ;;  %v12326_v8 = vld [vmem:[%s17774_s0 + $0x28] sm:$0xff]   ;;  %v12327_v9 = vld [vmem:[%s17774_s0 + $0x30] sm:$0xff]  }
   0x4   :  { %11258 = vmatprep.subr.bf16.mxu0 %v12320_v1  ;;  %v12328_v10 = vld [vmem:[%s17774_s0 + $0x38] sm:$0xff]   ;;  %v12329_v11 = vld [vmem:[%s17774_s0 + $0x40] sm:$0xff]   ;;  %v12330_v12 = vld [vmem:[%s17774_s0 + $0x48] sm:$0xff]  }
   0x5   :  { %v12331_v13 = vld [vmem:[%s17774_s0 + $0x50] sm:$0xff]   ;;  %v12332_v14 = vld [vmem:[%s17774_s0 + $0x58] sm:$0xff]   ;;  %v12333_v15 = vld [vmem:[%s17774_s0 + $0x60] sm:$0xff]  }
   0x6   :  { %v12334_v16 = vld [vmem:[%s17774_s0 + $0x68] sm:$0xff]   ;;  %v12335_v17 = vld [vmem:[%s17774_s0 + $0x70] sm:$0xff]   ;;  %v12336_v18 = vld [vmem:[%s17774_s0 + $0x78] sm:$0xff]  }
   0x7   :  { %11259 = vmatpush3.bf16.msra.mxu0 %v12320_v1  ;;  %v12337_v19 = vld [vmem:[%s17774_s0 + $0x80] sm:$0xff]   ;;  %v12338_v20 = vld [vmem:[%s17774_s0 + $0x88] sm:$0xff]  }
   0xa   :  { %11261 = vmatmul.mubr.msk.bf16.vlgmr.msra.gmra.mxu0 %vm501_vm1, %v12322_v4 }
   0xb   :  { %11264 = vmatprep.mubr.msk.bf16.mxu0 %vm501_vm1, %v12323_v5 }
  0x12   :  { %11265 = vmatmul.mubr.msk.bf16.gmra.mxu0 %vm501_vm1, %v12324_v6 }
  0x13   :  { %11268 = vmatprep.mubr.msk.bf16.mxu0 %vm501_vm1, %v12325_v7 }
  0x1a   :  { %11269 = vmatmul.mubr.msk.bf16.gmra.mxu0 %vm501_vm1, %v12326_v8 }
  0x1b   :  { %11272 = vmatprep.mubr.msk.bf16.mxu0 %vm501_vm1, %v12327_v9 }
  0x22   :  { %11273 = vmatmul.mubr.msk.bf16.gmra.mxu0 %vm501_vm1, %v12328_v10 }
  0x23   :  { %11276 = vmatprep.mubr.msk.bf16.mxu0 %vm501_vm1, %v12329_v11 }
  0x2a   :  { %11277 = vmatmul.mubr.msk.bf16.gmra.mxu0 %vm501_vm1, %v12330_v12 }
  0x2b   :  { %11280 = vmatprep.mubr.msk.bf16.mxu0 %vm501_vm1, %v12331_v13 }
  0x32   :  { %11281 = vmatmul.mubr.msk.bf16.gmra.mxu0 %vm501_vm1, %v12332_v14 }
  0x33   :  { %11284 = vmatprep.mubr.msk.bf16.mxu0 %vm501_vm1, %v12333_v15 }
  0x3a   :  { %11285 = vmatmul.mubr.msk.bf16.gmra.mxu0 %vm501_vm1, %v12334_v16 }
  0x3b   :  { %11288 = vmatprep.mubr.msk.bf16.mxu0 %vm501_vm1, %v12335_v17 }
  0x42   :  { %11289 = vmatmul.mubr.msk.bf16.gmra.mxu0 %vm501_vm1, %v12336_v18 }
  0x43   :  { %11292 = vmatprep.mubr.msk.bf16.mxu0 %vm501_vm1, %v12337_v19 }
  0x44   :  { %14 = vsyncpa [#allocation3], 0  ;;  %v12339_v21 = vld [vmem:[%s17774_s0 + $0x90] sm:$0xff]   ;;  %v12340_v22 = vld [vmem:[%s17774_s0 + $0x98] sm:$0xff]   ;;  %s12431_s13 = smov 96   ;;  %vm2098_vm2 = vcmask 261120  }
  0x45   :  { %v12341_v23 = vld [vmem:[%s17774_s0 + $0xa0] sm:$0xff]   ;;  %v12342_v24 = vld [vmem:[%s17774_s0 + $0xa8] sm:$0xff]   ;;  %v12343_v25 = vld [vmem:[%s17774_s0 + $0xb0] sm:$0xff]   ;;  %s12433_s11 = smov 32   ;;  %s12434_s21 = smov [#allocation2]  }
  0x46   :  { %v12344_v26 = vld [vmem:[%s17774_s0 + $0xb8] sm:$0xff]   ;;  %v12345_v27 = vld [vmem:[%s17774_s0 + $0xc0] sm:$0xff]   ;;  %v12346_v28 = vld [vmem:[%s17774_s0 + $0xc8] sm:$0xff]   ;;  %s10097_s22 = sshll.u32 %s12434_s21, 4  ;;  %s10098_s22 = int_to_ptr.vmem [resolvable:$true] %s10097_s22 }
  0x47   :  { %v12347_v29 = vld [vmem:[%s17774_s0 + $0xd0] sm:$0xff]   ;;  %v12348_v30 = vld [vmem:[%s17774_s0 + $0xd8] sm:$0xff]   ;;  %v12349_v31 = vld [vmem:[%s17774_s0 + $0xe0] sm:$0xff]   ;;  %p12414_p1 = scmp.lt.s32.totalorder %s10098_s22, %s10098_s22 }
  0x48   :  { %v12350_v32 = vld [vmem:[%s17774_s0 + $0xe8] sm:$0xff]   ;;  %v12351_v33 = vld [vmem:[%s17774_s0 + $0xf0] sm:$0xff]   ;;  %v12352_v34 = vld [vmem:[%s17774_s0 + $0xf8] sm:$0xff]  }
  0x49   :  { %v12353_v35 = vld [vmem:[%s17774_s0 + $0x100] sm:$0xff]   ;;  %v12354_v36 = vld [vmem:[%s17774_s0 + $0x108] sm:$0xff]   ;;  %v12355_v37 = vld [vmem:[%s17774_s0 + $0x110] sm:$0xff]  }
  0x4a   :  { %11293 = vmatmul.mubr.msk.bf16.gmra.mxu0 %vm501_vm1, %v12338_v20  ;;  %v12356_v38 = vld [vmem:[%s17774_s0 + $0x118] sm:$0xff]   ;;  %v12357_v39 = vld [vmem:[%s17774_s0 + $0x120] sm:$0xff]   ;;  %v12358_v40 = vld [vmem:[%s17774_s0 + $0x128] sm:$0xff]  }
  0x4b   :  { %11296 = vmatprep.mubr.msk.bf16.mxu0 %vm501_vm1, %v12339_v21  ;;  %v12359_v41 = vld [vmem:[%s17774_s0 + $0x130] sm:$0xff]   ;;  %v12385_v42 = vld [vmem:[%s17779_s5 + $0x8] sm:$0xff]   ;;  %v12360_v43 = vld [vmem:[%s17774_s0 + $0x138] sm:$0xff]  }
  0x4c   :  { %v12361_v44 = vld [vmem:[%s17774_s0 + $0x140] sm:$0xff]   ;;  %11520 = vmatprep.subr.bf16.mxu0 %v12385_v42  ;;  %v12362_v45 = vld [vmem:[%s17774_s0 + $0x148] sm:$0xff]   ;;  %v12363_v46 = vld [vmem:[%s17774_s0 + $0x150] sm:$0xff]  }
  0x4d   :  { %11521 = vmatpush3.bf16.msra.mxu0 %v12385_v42  ;;  %v12364_v47 = vld [vmem:[%s17774_s0 + $0x158] sm:$0xff]   ;;  %v12365_v48 = vld [vmem:[%s17774_s0 + $0x160] sm:$0xff]   ;;  %v12366_v49 = vld [vmem:[%s17774_s0 + $0x168] sm:$0xff]  }
  0x4e   :  { %v12367_v50 = vld [vmem:[%s17774_s0 + $0x170] sm:$0xff]   ;;  %v12368_v51 = vld [vmem:[%s17774_s0 + $0x178] sm:$0xff]   ;;  %v12369_v52 = vld [vmem:[%s17774_s0 + $0x180] sm:$0xff]  }
  0x4f   :  { %v12386_v53 = vld [vmem:[%s17777_s3 + $0x8] sm:$0xff]   ;;  %v12371_v55 = vld [vmem:[%s17774_s0 + $0x190] sm:$0xff]   ;;  %v12387_v56 = vld [vmem:[%s17777_s3] sm:$0xff]  }
  0x50   :  { %11388 = vmatprep.subr.bf16.mxu1 %v12386_v53  ;;  %v12370_v54 = vld [vmem:[%s17774_s0 + $0x188] sm:$0xff]   ;;  %v12707_v57 = vld [vmem:[%s17776_s2] ss:$0 sm:$0xff]  ;;  %v12372_v63 = vld [vmem:[%s17774_s0 + $0x198] sm:$0xff]  }
  0x51   :  { %11389 = vmatpush3.bf16.msra.mxu1 %v12386_v53  ;;  %v12373_v1 = vld [vmem:[%s17774_s0 + $0x1a0] sm:$0xff]   ;;  %v12374_v8 = vld [vmem:[%s17774_s0 + $0x1a8] sm:$0xff]   ;;  %v12375_v10 = vld [vmem:[%s17774_s0 + $0x1b0] sm:$0xff]  }
  0x52   :  { %11297 = vmatmul.mubr.msk.bf16.gmra.mxu0 %vm501_vm1, %v12340_v22  ;;  %11390 = vmatprep.subr.bf16.mxu1 %v12387_v56  ;;  %v12376_v18 = vld [vmem:[%s17774_s0 + $0x1b8] sm:$0xff]   ;;  %v12377_v20 = vld [vmem:[%s17774_s0 + $0x1c0] sm:$0xff]  }
  0x53   :  { %11300 = vmatprep.mubr.msk.bf16.mxu0 %vm501_vm1, %v12341_v23 }
  0x55   :  { %11391 = vmatpush3.bf16.msra.mxu1 %v12387_v56 }
  0x5a   :  { %11301 = vmatmul.mubr.msk.bf16.gmra.mxu0 %vm501_vm1, %v12342_v24 }
  0x5b   :  { %11304 = vmatprep.mubr.msk.bf16.mxu0 %vm501_vm1, %v12343_v25 }
  0x62   :  { %11305 = vmatmul.mubr.msk.bf16.gmra.mxu0 %vm501_vm1, %v12344_v26 }
  0x63   :  { %11308 = vmatprep.mubr.msk.bf16.mxu0 %vm501_vm1, %v12345_v27 }
  0x6a   :  { %11309 = vmatmul.mubr.msk.bf16.gmra.mxu0 %vm501_vm1, %v12346_v28  ;;  %v12378_v28 = vld [vmem:[%s17774_s0 + $0x1c8] sm:$0xff]  }
  0x6b   :  { %11312 = vmatprep.mubr.msk.bf16.mxu0 %vm501_vm1, %v12347_v29 }
  0x72   :  { %11313 = vmatmul.mubr.msk.bf16.gmra.mxu0 %vm501_vm1, %v12348_v30  ;;  %v12379_v30 = vld [vmem:[%s17774_s0 + $0x1d0] sm:$0xff]  }
  0x73   :  { %11316 = vmatprep.mubr.msk.bf16.mxu0 %vm501_vm1, %v12349_v31 }
  0x7a   :  { %11317 = vmatmul.mubr.msk.bf16.gmra.mxu0 %vm501_vm1, %v12350_v32 }
  0x7b   :  { %11320 = vmatprep.mubr.msk.bf16.mxu0 %vm501_vm1, %v12351_v33 }
  0x82   :  { %11321 = vmatmul.mubr.msk.bf16.gmra.mxu0 %vm501_vm1, %v12352_v34 }
  0x83   :  { %11324 = vmatprep.mubr.msk.bf16.mxu0 %vm501_vm1, %v12353_v35 }
  0x8a   :  { %11325 = vmatmul.mubr.msk.bf16.gmra.mxu0 %vm501_vm1, %v12354_v36 }
  0x8b   :  { %11328 = vmatprep.mubr.msk.bf16.mxu0 %vm501_vm1, %v12355_v37 }
  0x92   :  { %11329 = vmatmul.mubr.msk.bf16.gmra.mxu0 %vm501_vm1, %v12356_v38  ;;  %v12380_v38 = vld [vmem:[%s17774_s0 + $0x1d8] sm:$0xff]  }
  0x93   :  { %11332 = vmatprep.mubr.msk.bf16.mxu0 %vm501_vm1, %v12357_v39 }
  0x9a   :  { %11333 = vmatmul.mubr.msk.bf16.gmra.mxu0 %vm501_vm1, %v12358_v40  ;;  %v12381_v40 = vld [vmem:[%s17774_s0 + $0x1e0] sm:$0xff]  }
  0x9b   :  { %11336 = vmatprep.mubr.msk.bf16.mxu0 %vm501_vm1, %v12359_v41 }
  0xa2   :  { %11337 = vmatmul.mubr.msk.bf16.gmra.mxu0 %vm501_vm1, %v12360_v43 }
  0xa3   :  { %11340 = vmatprep.mubr.msk.bf16.mxu0 %vm501_vm1, %v12361_v44 }
  0xaa   :  { %11341 = vmatmul.mubr.msk.bf16.gmra.mxu0 %vm501_vm1, %v12362_v45 }
  0xab   :  { %11344 = vmatprep.mubr.msk.bf16.mxu0 %vm501_vm1, %v12363_v46 }
  0xb2   :  { %11345 = vmatmul.mubr.msk.bf16.gmra.mxu0 %vm501_vm1, %v12364_v47 }
  0xb3   :  { %11348 = vmatprep.mubr.msk.bf16.mxu0 %vm501_vm1, %v12365_v48  ;;  %v12382_v48 = vld [vmem:[%s17774_s0 + $0x1e8] sm:$0xff]  }
  0xba   :  { %11349 = vmatmul.mubr.msk.bf16.gmra.mxu0 %vm501_vm1, %v12366_v49 }
  0xbb   :  { %11352 = vmatprep.mubr.msk.bf16.mxu0 %vm501_vm1, %v12367_v50  ;;  %v12383_v50 = vld [vmem:[%s17774_s0 + $0x1f0] sm:$0xff]  }
  0xc2   :  { %11353 = vmatmul.mubr.msk.bf16.gmra.mxu0 %vm501_vm1, %v12368_v51 }
  0xc3   :  { %11356 = vmatprep.mubr.msk.bf16.mxu0 %vm501_vm1, %v12369_v52 }
  0xca   :  { %v11262_v58 = vpop.f32.mrf.mxu0  ;;  %11357 = vmatmul.mubr.msk.bf16.gmra.mxu0 %vm501_vm1, %v12370_v54 }
  0xcb   :  { %v12711_v59 = vadd.f32 %v11262_v58, %v12707_v57  ;;  %11360 = vmatprep.mubr.msk.bf16.mxu0 %vm501_vm1, %v12371_v55 }
  0xcc   :  { %v732_v60 = vpop.f32.mrf.mxu0 }
  0xcd   :  { %18353 = vst [vmem:[#allocation5_spill] sm:$0xff] %v12711_v59  ;;  %v12715_v61 = vadd.f32 %v12707_v57, %v732_v60  ;;  %1375 = vrot.lane.b32.xlu1 %v12711_v59, %s12431_s13  ;;  %v12384_v60 = vld [vmem:[%s17774_s0 + $0x1f8] sm:$0xff]  }
  0xce   :  { %v11263_v62 = vpop.f32.mrf.mxu0 }
  0xcf   :  { %18354 = vst [vmem:[#allocation6_spill] sm:$0xff] %v12715_v61  ;;  %v12723_v0 = vadd.f32 %v11263_v62, %v12707_v57  ;;  %1371 = vrot.lane.b32.xlu0 %v12715_v61, %s12431_s13 }
  0xd0   :  { %v735_v2 = vpop.f32.mrf.mxu0 }
  0xd1   :  { %18355 = vst [vmem:[#allocation7_spill] sm:$0xff] %v12723_v0  ;;  %v12731_v3 = vadd.f32 %v12707_v57, %v735_v2  ;;  %1377 = vrot.lane.b32.xlu1 %v12723_v0, %s12431_s13 }
  0xd2   :  { %v11266_v4 = vpop.f32.mrf.mxu0  ;;  %11361 = vmatmul.mubr.msk.bf16.gmra.mxu0 %vm501_vm1, %v12372_v63 }
  0xd3   :  { %18356 = vst [vmem:[#allocation8_spill] sm:$0xff] %v12731_v3  ;;  %1373 = vrot.lane.b32.xlu0 %v12731_v3, %s12431_s13  ;;  %11364 = vmatprep.mubr.msk.bf16.mxu0 %vm501_vm1, %v12373_v1  ;;  %v12751_v11 = vadd.f32 %v11266_v4, %v12707_v57 }
  0xd4   :  { %v748_v5 = vpop.f32.mrf.mxu0 }
  0xd5   :  { %v12740_v6 = vadd.f32 %v12707_v57, %v748_v5  ;;  %18358 = vst [vmem:[#allocation10_spill] sm:$0xff] %v12751_v11 }
  0xd6   :  { %v11267_v7 = vpop.f32.mrf.mxu0 }
  0xd7   :  { %18357 = vst [vmem:[#allocation9_spill] sm:$0xff] %v12740_v6  ;;  %1379 = vrot.lane.b32.xlu0 %v12740_v6, %s12431_s13  ;;  %v12763_v15 = vadd.f32 %v11267_v7, %v12707_v57 }
  0xd8   :  { %v751_v9 = vpop.f32.mrf.mxu0 }
  0xd9   :  { %v12754_v12 = vadd.f32 %v12707_v57, %v751_v9  ;;  %18360 = vst [vmem:[#allocation12_spill] sm:$0xff] %v12763_v15 }
  0xda   :  { %v11270_v13 = vpop.f32.mrf.mxu0  ;;  %11365 = vmatmul.mubr.msk.bf16.gmra.mxu0 %vm501_vm1, %v12374_v8 }
  0xdb   :  { %18359 = vst [vmem:[#allocation11_spill] sm:$0xff] %v12754_v12  ;;  %1381 = vrot.lane.b32.xlu1 %v12754_v12, %s12431_s13  ;;  %1383 = vrot.lane.b32.xlu0 %v12751_v11, %s12431_s13  ;;  %v12779_v21 = vadd.f32 %v11270_v13, %v12707_v57 }
  0xdc   :  { %v764_v14 = vpop.f32.mrf.mxu0  ;;  %11368 = vmatprep.mubr.msk.bf16.mxu0 %vm501_vm1, %v12375_v10 }
  0xdd   :  { %v12766_v16 = vadd.f32 %v12707_v57, %v764_v14  ;;  %18362 = vst [vmem:[#allocation14_spill] sm:$0xff] %v12779_v21 }
  0xde   :  { %v11271_v17 = vpop.f32.mrf.mxu0 }
  0xdf   :  { %18361 = vst [vmem:[#allocation13_spill] sm:$0xff] %v12766_v16  ;;  %1385 = vrot.lane.b32.xlu1 %v12763_v15, %s12431_s13  ;;  %1387 = vrot.lane.b32.xlu0 %v12766_v16, %s12431_s13  ;;  %v12791_v25 = vadd.f32 %v11271_v17, %v12707_v57 }
  0xe0   :  { %v767_v19 = vpop.f32.mrf.mxu0 }
  0xe1   :  { %v12782_v22 = vadd.f32 %v12707_v57, %v767_v19  ;;  %18364 = vst [vmem:[#allocation16_spill] sm:$0xff] %v12791_v25 }
  0xe2   :  { %v11274_v23 = vpop.f32.mrf.mxu0  ;;  %11369 = vmatmul.mubr.msk.bf16.gmra.mxu0 %vm501_vm1, %v12376_v18 }
  0xe3   :  { %18363 = vst [vmem:[#allocation15_spill] sm:$0xff] %v12782_v22  ;;  %1389 = vrot.lane.b32.xlu1 %v12782_v22, %s12431_s13  ;;  %1391 = vrot.lane.b32.xlu0 %v12779_v21, %s12431_s13  ;;  %v12807_v31 = vadd.f32 %v11274_v23, %v12707_v57 }
  0xe4   :  { %v780_v24 = vpop.f32.mrf.mxu0  ;;  %11372 = vmatprep.mubr.msk.bf16.mxu0 %vm501_vm1, %v12377_v20 }
  0xe5   :  { %v12794_v26 = vadd.f32 %v12707_v57, %v780_v24  ;;  %18366 = vst [vmem:[#allocation18_spill] sm:$0xff] %v12807_v31 }
  0xe6   :  { %v11275_v27 = vpop.f32.mrf.mxu0 }
  0xe7   :  { %18365 = vst [vmem:[#allocation17_spill] sm:$0xff] %v12794_v26  ;;  %1393 = vrot.lane.b32.xlu1 %v12791_v25, %s12431_s13  ;;  %1395 = vrot.lane.b32.xlu0 %v12794_v26, %s12431_s13  ;;  %v12819_v35 = vadd.f32 %v11275_v27, %v12707_v57 }
  0xe8   :  { %v783_v29 = vpop.f32.mrf.mxu0 }
  0xe9   :  { %v12810_v32 = vadd.f32 %v12707_v57, %v783_v29  ;;  %18368 = vst [vmem:[#allocation20_spill] sm:$0xff] %v12819_v35 }
  0xea   :  { %v11278_v33 = vpop.f32.mrf.mxu0  ;;  %11373 = vmatmul.mubr.msk.bf16.gmra.mxu0 %vm501_vm1, %v12378_v28 }
  0xeb   :  { %18367 = vst [vmem:[#allocation19_spill] sm:$0xff] %v12810_v32  ;;  %1397 = vrot.lane.b32.xlu1 %v12810_v32, %s12431_s13  ;;  %1399 = vrot.lane.b32.xlu0 %v12807_v31, %s12431_s13  ;;  %v12835_v41 = vadd.f32 %v11278_v33, %v12707_v57 }
  0xec   :  { %v796_v34 = vpop.f32.mrf.mxu0  ;;  %11376 = vmatprep.mubr.msk.bf16.mxu0 %vm501_vm1, %v12379_v30 }
  0xed   :  { %v12822_v36 = vadd.f32 %v12707_v57, %v796_v34  ;;  %18370 = vst [vmem:[#allocation22_spill] sm:$0xff] %v12835_v41 }
  0xee   :  { %v11279_v37 = vpop.f32.mrf.mxu0 }
  0xef   :  { %18369 = vst [vmem:[#allocation21_spill] sm:$0xff] %v12822_v36  ;;  %1401 = vrot.lane.b32.xlu1 %v12819_v35, %s12431_s13  ;;  %1403 = vrot.lane.b32.xlu0 %v12822_v36, %s12431_s13  ;;  %v12847_v45 = vadd.f32 %v11279_v37, %v12707_v57 }
  0xf0   :  { %v799_v39 = vpop.f32.mrf.mxu0 }
  0xf1   :  { %v12838_v42 = vadd.f32 %v12707_v57, %v799_v39  ;;  %18372 = vst [vmem:[#allocation24_spill] sm:$0xff] %v12847_v45 }
  0xf2   :  { %v11282_v43 = vpop.f32.mrf.mxu0  ;;  %11377 = vmatmul.mubr.msk.bf16.gmra.mxu0 %vm501_vm1, %v12380_v38 }
  0xf3   :  { %18371 = vst [vmem:[#allocation23_spill] sm:$0xff] %v12838_v42  ;;  %1405 = vrot.lane.b32.xlu1 %v12838_v42, %s12431_s13  ;;  %1407 = vrot.lane.b32.xlu0 %v12835_v41, %s12431_s13  ;;  %v12863_v51 = vadd.f32 %v11282_v43, %v12707_v57 }
  0xf4   :  { %v812_v44 = vpop.f32.mrf.mxu0  ;;  %11380 = vmatprep.mubr.msk.bf16.mxu0 %vm501_vm1, %v12381_v40 }
  0xf5   :  { %v12850_v46 = vadd.f32 %v12707_v57, %v812_v44  ;;  %18374 = vst [vmem:[#allocation26_spill] sm:$0xff] %v12863_v51 }
  0xf6   :  { %v11283_v47 = vpop.f32.mrf.mxu0 }
  0xf7   :  { %18373 = vst [vmem:[#allocation25_spill] sm:$0xff] %v12850_v46  ;;  %1409 = vrot.lane.b32.xlu1 %v12847_v45, %s12431_s13  ;;  %1411 = vrot.lane.b32.xlu0 %v12850_v46, %s12431_s13  ;;  %v12875_v55 = vadd.f32 %v11283_v47, %v12707_v57 }
  0xf8   :  { %v815_v49 = vpop.f32.mrf.mxu0 }
  0xf9   :  { %v12866_v52 = vadd.f32 %v12707_v57, %v815_v49  ;;  %18376 = vst [vmem:[#allocation28_spill] sm:$0xff] %v12875_v55  ;;  %v12388_v49 = vld [vmem:[%s17779_s5] sm:$0xff]  }
  0xfa   :  { %v11286_v53 = vpop.f32.mrf.mxu0  ;;  %11381 = vmatmul.mubr.msk.bf16.gmra.mxu0 %vm501_vm1, %v12382_v48  ;;  %11522 = vmatprep.subr.bf16.mxu0 %v12388_v49 }
  0xfb   :  { %18375 = vst [vmem:[#allocation27_spill] sm:$0xff] %v12866_v52  ;;  %1413 = vrot.lane.b32.xlu1 %v12866_v52, %s12431_s13  ;;  %1415 = vrot.lane.b32.xlu0 %v12863_v51, %s12431_s13  ;;  %v12888_v63 = vadd.f32 %v11286_v53, %v12707_v57 }
  0xfc   :  { %v828_v54 = vpop.f32.mrf.mxu0  ;;  %11384 = vmatprep.mubr.msk.bf16.mxu0 %vm501_vm1, %v12383_v50  ;;  %11523 = vmatpush3.bf16.msra.mxu0 %v12388_v49 }
  0xfd   :  { %v12878_v56 = vadd.f32 %v12707_v57, %v828_v54  ;;  %18378 = vst [vmem:[#allocation30_spill] sm:$0xff] %v12888_v63 }
  0xfe   :  { %v11287_v58 = vpop.f32.mrf.mxu0 }
  0xff   :  { %18377 = vst [vmem:[#allocation29_spill] sm:$0xff] %v12878_v56  ;;  %1417 = vrot.lane.b32.xlu1 %v12875_v55, %s12431_s13  ;;  %1419 = vrot.lane.b32.xlu0 %v12878_v56, %s12431_s13  ;;  %v12899_v5 = vadd.f32 %v11287_v58, %v12707_v57 }
 0x100   :  { %v831_v62 = vpop.f32.mrf.mxu0 }
 0x101   :  { %v12891_v1 = vadd.f32 %v12707_v57, %v831_v62  ;;  %18380 = vst [vmem:[#allocation32_spill] sm:$0xff] %v12899_v5 }
 0x102   :  { %v11290_v2 = vpop.f32.mrf.mxu0  ;;  %11385 = vmatmul.mubr.msk.bf16.gmra.mxu0 %vm501_vm1, %v12384_v60 }
 0x103   :  { %18379 = vst [vmem:[#allocation31_spill] sm:$0xff] %v12891_v1  ;;  %1421 = vrot.lane.b32.xlu1 %v12891_v1, %s12431_s13  ;;  %1423 = vrot.lane.b32.xlu0 %v12888_v63, %s12431_s13  ;;  %v12909_v10 = vadd.f32 %v11290_v2, %v12707_v57 }
 0x104   :  { %v844_v4 = vpop.f32.mrf.mxu0 }
 0x105   :  { %v12902_v7 = vadd.f32 %v12707_v57, %v844_v4  ;;  %18382 = vst [vmem:[#allocation34_spill] sm:$0xff] %v12909_v10 }
 0x106   :  { %v11291_v8 = vpop.f32.mrf.mxu0 }
 0x107   :  { %18381 = vst [vmem:[#allocation33_spill] sm:$0xff] %v12902_v7  ;;  %1425 = vrot.lane.b32.xlu1 %v12899_v5, %s12431_s13  ;;  %1427 = vrot.lane.b32.xlu0 %v12902_v7, %s12431_s13  ;;  %v12919_v18 = vadd.f32 %v11291_v8, %v12707_v57 }
 0x108   :  { %v847_v9 = vpop.f32.mrf.mxu0 }
 0x109   :  { %v12912_v13 = vadd.f32 %v12707_v57, %v847_v9  ;;  %18384 = vst [vmem:[#allocation36_spill] sm:$0xff] %v12919_v18 }
 0x10a   :  { %v11294_v14 = vpop.f32.mrf.mxu0 }
 0x10b   :  { %18383 = vst [vmem:[#allocation35_spill] sm:$0xff] %v12912_v13  ;;  %1429 = vrot.lane.b32.xlu1 %v12912_v13, %s12431_s13  ;;  %1431 = vrot.lane.b32.xlu0 %v12909_v10, %s12431_s13  ;;  %v12929_v24 = vadd.f32 %v11294_v14, %v12707_v57 }
 0x10c   :  { %v860_v17 = vpop.f32.mrf.mxu0 }
 0x10d   :  { %v12922_v19 = vadd.f32 %v12707_v57, %v860_v17  ;;  %18386 = vst [vmem:[#allocation38_spill] sm:$0xff] %v12929_v24 }
 0x10e   :  { %v11295_v20 = vpop.f32.mrf.mxu0 }
 0x10f   :  { %18385 = vst [vmem:[#allocation37_spill] sm:$0xff] %v12922_v19  ;;  %1433 = vrot.lane.b32.xlu1 %v12919_v18, %s12431_s13  ;;  %1435 = vrot.lane.b32.xlu0 %v12922_v19, %s12431_s13  ;;  %v12939_v30 = vadd.f32 %v11295_v20, %v12707_v57 }
 0x110   :  { %v863_v23 = vpop.f32.mrf.mxu0 }
 0x111   :  { %v12932_v27 = vadd.f32 %v12707_v57, %v863_v23  ;;  %18388 = vst [vmem:[#allocation40_spill] sm:$0xff] %v12939_v30 }
 0x112   :  { %v11298_v28 = vpop.f32.mrf.mxu0 }
 0x113   :  { %18387 = vst [vmem:[#allocation39_spill] sm:$0xff] %v12932_v27  ;;  %1437 = vrot.lane.b32.xlu1 %v12932_v27, %s12431_s13  ;;  %1439 = vrot.lane.b32.xlu0 %v12929_v24, %s12431_s13  ;;  %v12949_v38 = vadd.f32 %v11298_v28, %v12707_v57 }
 0x114   :  { %v876_v29 = vpop.f32.mrf.mxu0 }
 0x115   :  { %v12942_v33 = vadd.f32 %v12707_v57, %v876_v29  ;;  %18390 = vst [vmem:[#allocation42_spill] sm:$0xff] %v12949_v38 }
 0x116   :  { %v11299_v34 = vpop.f32.mrf.mxu0 }
 0x117   :  { %18389 = vst [vmem:[#allocation41_spill] sm:$0xff] %v12942_v33  ;;  %1441 = vrot.lane.b32.xlu1 %v12939_v30, %s12431_s13  ;;  %1443 = vrot.lane.b32.xlu0 %v12942_v33, %s12431_s13  ;;  %v12959_v44 = vadd.f32 %v11299_v34, %v12707_v57 }
 0x118   :  { %v879_v37 = vpop.f32.mrf.mxu0 }
 0x119   :  { %v12952_v39 = vadd.f32 %v12707_v57, %v879_v37  ;;  %18392 = vst [vmem:[#allocation44_spill] sm:$0xff] %v12959_v44 }
 0x11a   :  { %v11302_v40 = vpop.f32.mrf.mxu0 }
 0x11b   :  { %18391 = vst [vmem:[#allocation43_spill] sm:$0xff] %v12952_v39  ;;  %1445 = vrot.lane.b32.xlu1 %v12952_v39, %s12431_s13  ;;  %1447 = vrot.lane.b32.xlu0 %v12949_v38, %s12431_s13  ;;  %v12972_v53 = vadd.f32 %v11302_v40, %v12707_v57 }
 0x11c   :  { %v892_v43 = vpop.f32.mrf.mxu0 }
 0x11d   :  { %v12962_v47 = vadd.f32 %v12707_v57, %v892_v43  ;;  %18394 = vst [vmem:[#allocation46_spill] sm:$0xff] %v12972_v53 }
 0x11e   :  { %v11303_v48 = vpop.f32.mrf.mxu0 }
 0x11f   :  { %18393 = vst [vmem:[#allocation45_spill] sm:$0xff] %v12962_v47  ;;  %1449 = vrot.lane.b32.xlu1 %v12959_v44, %s12431_s13  ;;  %1451 = vrot.lane.b32.xlu0 %v12962_v47, %s12431_s13  ;;  %v12982_v62 = vadd.f32 %v11303_v48, %v12707_v57 }
 0x120   :  { %v895_v50 = vpop.f32.mrf.mxu0 }
 0x121   :  { %v12975_v54 = vadd.f32 %v12707_v57, %v895_v50  ;;  %18396 = vst [vmem:[#allocation48_spill] sm:$0xff] %v12982_v62 }
 0x122   :  { %v11306_v58 = vpop.f32.mrf.mxu0 }
 0x123   :  { %18395 = vst [vmem:[#allocation47_spill] sm:$0xff] %v12975_v54  ;;  %1453 = vrot.lane.b32.xlu1 %v12975_v54, %s12431_s13  ;;  %1455 = vrot.lane.b32.xlu0 %v12972_v53, %s12431_s13  ;;  %v12992_v9 = vadd.f32 %v11306_v58, %v12707_v57 }
 0x124   :  { %v908_v60 = vpop.f32.mrf.mxu0 }
 0x125   :  { %v12985_v2 = vadd.f32 %v12707_v57, %v908_v60  ;;  %18398 = vst [vmem:[#allocation50_spill] sm:$0xff] %v12992_v9 }
 0x126   :  { %v11307_v4 = vpop.f32.mrf.mxu0 }
 0x127   :  { %18397 = vst [vmem:[#allocation49_spill] sm:$0xff] %v12985_v2  ;;  %1457 = vrot.lane.b32.xlu1 %v12982_v62, %s12431_s13  ;;  %1459 = vrot.lane.b32.xlu0 %v12985_v2, %s12431_s13  ;;  %v13002_v23 = vadd.f32 %v11307_v4, %v12707_v57 }
 0x128   :  { %v911_v8 = vpop.f32.mrf.mxu0 }
 0x129   :  { %v12995_v14 = vadd.f32 %v12707_v57, %v911_v8  ;;  %18400 = vst [vmem:[#allocation52_spill] sm:$0xff] %v13002_v23 }
 0x12a   :  { %v11310_v17 = vpop.f32.mrf.mxu0 }
 0x12b   :  { %18399 = vst [vmem:[#allocation51_spill] sm:$0xff] %v12995_v14  ;;  %1461 = vrot.lane.b32.xlu1 %v12995_v14, %s12431_s13  ;;  %1463 = vrot.lane.b32.xlu0 %v12992_v9, %s12431_s13  ;;  %v13012_v37 = vadd.f32 %v11310_v17, %v12707_v57 }
 0x12c   :  { %v924_v20 = vpop.f32.mrf.mxu0 }
 0x12d   :  { %v13005_v28 = vadd.f32 %v12707_v57, %v924_v20  ;;  %18402 = vst [vmem:[#allocation54_spill] sm:$0xff] %v13012_v37 }
 0x12e   :  { %v11311_v29 = vpop.f32.mrf.mxu0 }
 0x12f   :  { %18401 = vst [vmem:[#allocation53_spill] sm:$0xff] %v13005_v28  ;;  %1465 = vrot.lane.b32.xlu1 %v13002_v23, %s12431_s13  ;;  %1467 = vrot.lane.b32.xlu0 %v13005_v28, %s12431_s13  ;;  %v13022_v49 = vadd.f32 %v11311_v29, %v12707_v57 }
 0x130   :  { %v927_v34 = vpop.f32.mrf.mxu0 }
 0x131   :  { %v13015_v40 = vadd.f32 %v12707_v57, %v927_v34  ;;  %18404 = vst [vmem:[#allocation56_spill] sm:$0xff] %v13022_v49 }
 0x132   :  { %v11314_v43 = vpop.f32.mrf.mxu0 }
 0x133   :  { %18403 = vst [vmem:[#allocation55_spill] sm:$0xff] %v13015_v40  ;;  %1469 = vrot.lane.b32.xlu1 %v13015_v40, %s12431_s13  ;;  %1471 = vrot.lane.b32.xlu0 %v13012_v37, %s12431_s13  ;;  %v13032_v4 = vadd.f32 %v11314_v43, %v12707_v57 }
 0x134   :  { %v940_v48 = vpop.f32.mrf.mxu0 }
 0x135   :  { %v13025_v50 = vadd.f32 %v12707_v57, %v940_v48  ;;  %18406 = vst [vmem:[#allocation58_spill] sm:$0xff] %v13032_v4 }
 0x136   :  { %v11315_v58 = vpop.f32.mrf.mxu0 }
 0x137   :  { %18405 = vst [vmem:[#allocation57_spill] sm:$0xff] %v13025_v50  ;;  %1473 = vrot.lane.b32.xlu1 %v13022_v49, %s12431_s13  ;;  %1475 = vrot.lane.b32.xlu0 %v13025_v50, %s12431_s13  ;;  %v13042_v29 = vadd.f32 %v11315_v58, %v12707_v57 }
 0x138   :  { %v943_v60 = vpop.f32.mrf.mxu0 }
 0x139   :  { %v13035_v8 = vadd.f32 %v12707_v57, %v943_v60  ;;  %18408 = vst [vmem:[#allocation60_spill] sm:$0xff] %v13042_v29 }
 0x13a   :  { %v11318_v17 = vpop.f32.mrf.mxu0 }
 0x13b   :  { %18407 = vst [vmem:[#allocation59_spill] sm:$0xff] %v13035_v8  ;;  %1477 = vrot.lane.b32.xlu1 %v13035_v8, %s12431_s13  ;;  %1479 = vrot.lane.b32.xlu0 %v13032_v4, %s12431_s13  ;;  %v13052_v8 = vadd.f32 %v11318_v17, %v12707_v57 }
 0x13c   :  { %v956_v20 = vpop.f32.mrf.mxu0 }
 0x13d   :  { %v13045_v34 = vadd.f32 %v12707_v57, %v956_v20  ;;  %18410 = vst [vmem:[#allocation62_spill] sm:$0xff] %v13052_v8 }
 0x13e   :  { %v11319_v48 = vpop.f32.mrf.mxu0 }
 0x13f   :  { %18409 = vst [vmem:[#allocation61_spill] sm:$0xff] %v13045_v34  ;;  %v1376_v43 = vpop.permute.xlu1 %1375  ;;  %1481 = vrot.lane.b32.xlu1 %v13042_v29, %s12431_s13  ;;  %1483 = vrot.lane.b32.xlu0 %v13045_v34, %s12431_s13  ;;  %v13068_v29 = vadd.f32 %v11319_v48, %v12707_v57 }
 0x140   :  { %v959_v60 = vpop.f32.mrf.mxu0 }
 0x141   :  { %v13055_v4 = vadd.f32 %v12707_v57, %v959_v60  ;;  %v1372_v58 = vpop.permute.xlu0 %1371  ;;  %18414 = vst [vmem:[#allocation66_spill] sm:$0xff] %v13068_v29  ;;  %v13071_v60 = vadd.f32 %v1376_v43, %v12711_v59 }
 0x142   :  { %v11322_v50 = vpop.f32.mrf.mxu0  ;;  %v13062_v20 = vadd.f32 %v1372_v58, %v12715_v61 }
 0x143   :  { %18411 = vst [vmem:[#allocation63_spill] sm:$0xff] %v13055_v4  ;;  %v1378_v49 = vpop.permute.xlu1 %1377  ;;  %1485 = vrot.lane.b32.xlu1 %v13055_v4, %s12431_s13  ;;  %1487 = vrot.lane.b32.xlu0 %v13052_v8, %s12431_s13  ;;  %18415 = vst [vmem:[#allocation67_spill] sm:$0xff] %v13071_v60 }
 0x144   :  { %18412 = vst [vmem:[#allocation64_spill] sm:$0xff] %v13062_v20  ;;  %v13065_v34 = vadd.f32 %v1378_v49, %v12723_v0  ;;  %v972_v17 = vpop.f32.mrf.mxu0  ;;  %v1883_v48 = vmax.f32 %v13062_v20, 0.0  ;;  %v13088_v0 = vadd.f32 %v11322_v50, %v12707_v57 }
 0x145   :  { %v13074_v37 = vadd.f32 %v12707_v57, %v972_v17  ;;  %v1374_v4 = vpop.permute.xlu0 %1373  ;;  %v1885_v17 = vmax.f32 %v13071_v60, 0.0 }
 0x146   :  { %18413 = vst [vmem:[#allocation65_spill] sm:$0xff] %v13065_v34  ;;  %v13077_v40 = vadd.f32 %v1374_v4, %v12731_v3  ;;  %v11323_v8 = vpop.f32.mrf.mxu0  ;;  %v1886_v58 = vmax.f32 %v13065_v34, 0.0  ;;  %18418 = vst [vmem:[#allocation70_spill] sm:$0xff] %v13088_v0 }
 0x147   :  { %18416 = vst [vmem:[#allocation68_spill] sm:$0xff] %v13074_v37  ;;  %1489 = vrot.lane.b32.xlu1 %v13068_v29, %s12431_s13  ;;  %1491 = vrot.lane.b32.xlu0 %v13074_v37, %s12431_s13  ;;  %v13102_v50 = vadd.f32 %v11323_v8, %v12707_v57 }
 0x148   :  { %18417 = vst [vmem:[#allocation69_spill] sm:$0xff] %v13077_v40  ;;  %v975_v49 = vpop.f32.mrf.mxu0  ;;  %v1884_v43 = vmax.f32 %v13077_v40, 0.0  ;;  %v2012_v61 = vpack.c.bf16 %v1886_v58, %v1885_v17 }
 0x149   :  { %v13091_v4 = vadd.f32 %v12707_v57, %v975_v49  ;;  %v1380_v34 = vpop.permute.xlu0 %1379  ;;  %18421 = vst [vmem:[#allocation73_spill] sm:$0xff] %v13102_v50 }
 0x14a   :  { %v11326_v59 = vpop.f32.mrf.mxu0  ;;  %v2011_v3 = vpack.c.bf16 %v1884_v43, %v1883_v48  ;;  %v13098_v40 = vadd.f32 %v1380_v34, %v12740_v6 }
 0x14b   :  { %18419 = vst [vmem:[#allocation71_spill] sm:$0xff] %v13091_v4  ;;  %1493 = vrot.lane.b32.xlu1 %v13091_v4, %s12431_s13  ;;  %1495 = vrot.lane.b32.xlu0 %v13088_v0, %s12431_s13 }
 0x14c   :  { %18420 = vst [vmem:[#allocation72_spill] sm:$0xff] %v13098_v40  ;;  %v988_v60 = vpop.f32.mrf.mxu0  ;;  %11392 = vmatprep.mubr.msk.bf16.mxu1 %vm2098_vm2, %v2011_v3  ;;  %v1887_v3 = vmax.f32 %v13098_v40, 0.0 }
 0x14d   :  { %v13105_v49 = vadd.f32 %v12707_v57, %v988_v60  ;;  %v1382_v48 = vpop.permute.xlu1 %1381  ;;  %11393 = vmatmul.mubr.msk.bf16.vlgmr.msra.gmra.mxu1 %vm2098_vm2, %v2012_v61  ;;  %v1384_v58 = vpop.permute.xlu0 %1383  ;;  %v13121_v61 = vadd.f32 %v11326_v59, %v12707_v57 }
 0x14e   :  { %v13109_v43 = vadd.f32 %v1382_v48, %v12754_v12  ;;  %v11327_v17 = vpop.f32.mrf.mxu0  ;;  %v13118_v34 = vadd.f32 %v1384_v58, %v12751_v11 }
 0x14f   :  { %18422 = vst [vmem:[#allocation74_spill] sm:$0xff] %v13105_v49  ;;  %1497 = vrot.lane.b32.xlu1 %v13102_v50, %s12431_s13  ;;  %1499 = vrot.lane.b32.xlu0 %v13105_v49, %s12431_s13  ;;  %18425 = vst [vmem:[#allocation77_spill] sm:$0xff] %v13121_v61 }
 0x150   :  { %18423 = vst [vmem:[#allocation75_spill] sm:$0xff] %v13109_v43  ;;  %v1888_v8 = vmax.f32 %v13109_v43, 0.0  ;;  %18424 = vst [vmem:[#allocation76_spill] sm:$0xff] %v13118_v34  ;;  %v991_v60 = vpop.f32.mrf.mxu0  ;;  %v1889_v58 = vmax.f32 %v13118_v34, 0.0 }
 0x151   :  { %v13124_v48 = vadd.f32 %v12707_v57, %v991_v60  ;;  %v1386_v20 = vpop.permute.xlu1 %1385  ;;  %v1388_v12 = vpop.permute.xlu0 %1387 }
 0x152   :  { %v2013_v6 = vpack.c.bf16 %v1888_v8, %v1887_v3  ;;  %v13127_v50 = vadd.f32 %v1386_v20, %v12763_v15  ;;  %v11330_v49 = vpop.f32.mrf.mxu0  ;;  %v13136_v60 = vadd.f32 %v1388_v12, %v12766_v16  ;;  %v13140_v20 = vadd.f32 %v11327_v17, %v12707_v57 }
 0x153   :  { %18426 = vst [vmem:[#allocation78_spill] sm:$0xff] %v13124_v48  ;;  %1501 = vrot.lane.b32.xlu1 %v13124_v48, %s12431_s13  ;;  %1503 = vrot.lane.b32.xlu0 %v13121_v61, %s12431_s13 }
 0x154   :  { %18427 = vst [vmem:[#allocation79_spill] sm:$0xff] %v13127_v50  ;;  %v1890_v59 = vmax.f32 %v13127_v50, 0.0  ;;  %18428 = vst [vmem:[#allocation80_spill] sm:$0xff] %v13136_v60  ;;  %v1004_v43 = vpop.f32.mrf.mxu0  ;;  %11396 = vmatprep.mubr.msk.bf16.mxu1 %vm2098_vm2, %v2013_v6  ;;  %v1891_v6 = vmax.f32 %v13136_v60, 0.0 }
 0x155   :  { %18429 = vst [vmem:[#allocation81_spill] sm:$0xff] %v13140_v20  ;;  %v13143_v3 = vadd.f32 %v12707_v57, %v1004_v43  ;;  %v1390_v8 = vpop.permute.xlu1 %1389  ;;  %v1392_v40 = vpop.permute.xlu0 %1391 }
 0x156   :  { %v2014_v15 = vpack.c.bf16 %v1890_v59, %v1889_v58  ;;  %v13146_v11 = vadd.f32 %v1390_v8, %v12782_v22  ;;  %v11331_v34 = vpop.f32.mrf.mxu0  ;;  %v13155_v43 = vadd.f32 %v1392_v40, %v12779_v21  ;;  %v13159_v58 = vadd.f32 %v11330_v49, %v12707_v57 }
 0x157   :  { %18430 = vst [vmem:[#allocation82_spill] sm:$0xff] %v13143_v3  ;;  %1505 = vrot.lane.b32.xlu1 %v13140_v20, %s12431_s13  ;;  %1507 = vrot.lane.b32.xlu0 %v13143_v3, %s12431_s13 }
 0x158   :  { %18431 = vst [vmem:[#allocation83_spill] sm:$0xff] %v13146_v11  ;;  %v1892_v12 = vmax.f32 %v13146_v11, 0.0  ;;  %18432 = vst [vmem:[#allocation84_spill] sm:$0xff] %v13155_v43  ;;  %v1007_v17 = vpop.f32.mrf.mxu0  ;;  %11397 = vmatmul.mubr.msk.bf16.gmra.mxu1 %vm2098_vm2, %v2014_v15  ;;  %v1893_v15 = vmax.f32 %v13155_v43, 0.0 }
 0x159   :  { %18433 = vst [vmem:[#allocation85_spill] sm:$0xff] %v13159_v58  ;;  %v13162_v59 = vadd.f32 %v12707_v57, %v1007_v17  ;;  %v1394_v8 = vpop.permute.xlu1 %1393  ;;  %v1396_v50 = vpop.permute.xlu0 %1395 }
 0x15a   :  { %v2015_v22 = vpack.c.bf16 %v1892_v12, %v1891_v6  ;;  %v13165_v16 = vadd.f32 %v1394_v8, %v12791_v25  ;;  %v11334_v60 = vpop.f32.mrf.mxu0  ;;  %v13174_v49 = vadd.f32 %v1396_v50, %v12794_v26  ;;  %v13178_v6 = vadd.f32 %v11331_v34, %v12707_v57 }
 0x15b   :  { %18434 = vst [vmem:[#allocation86_spill] sm:$0xff] %v13162_v59  ;;  %1509 = vrot.lane.b32.xlu1 %v13162_v59, %s12431_s13  ;;  %1511 = vrot.lane.b32.xlu0 %v13159_v58, %s12431_s13 }
 0x15c   :  { %18435 = vst [vmem:[#allocation87_spill] sm:$0xff] %v13165_v16  ;;  %v1894_v40 = vmax.f32 %v13165_v16, 0.0  ;;  %18436 = vst [vmem:[#allocation88_spill] sm:$0xff] %v13174_v49  ;;  %v1020_v17 = vpop.f32.mrf.mxu0  ;;  %11400 = vmatprep.mubr.msk.bf16.mxu1 %vm2098_vm2, %v2015_v22  ;;  %v1895_v22 = vmax.f32 %v13174_v49, 0.0 }
 0x15d   :  { %18437 = vst [vmem:[#allocation89_spill] sm:$0xff] %v13178_v6  ;;  %v13181_v12 = vadd.f32 %v12707_v57, %v1020_v17  ;;  %v1398_v8 = vpop.permute.xlu1 %1397  ;;  %v1400_v11 = vpop.permute.xlu0 %1399 }
 0x15e   :  { %v2016_v25 = vpack.c.bf16 %v1894_v40, %v1893_v15  ;;  %v13184_v21 = vadd.f32 %v1398_v8, %v12810_v32  ;;  %v11335_v43 = vpop.f32.mrf.mxu0  ;;  %v13193_v34 = vadd.f32 %v1400_v11, %v12807_v31  ;;  %v13197_v15 = vadd.f32 %v11334_v60, %v12707_v57 }
 0x15f   :  { %18438 = vst [vmem:[#allocation90_spill] sm:$0xff] %v13181_v12  ;;  %1513 = vrot.lane.b32.xlu1 %v13178_v6, %s12431_s13  ;;  %1515 = vrot.lane.b32.xlu0 %v13181_v12, %s12431_s13 }
 0x160   :  { %18439 = vst [vmem:[#allocation91_spill] sm:$0xff] %v13184_v21  ;;  %v1896_v50 = vmax.f32 %v13184_v21, 0.0  ;;  %18440 = vst [vmem:[#allocation92_spill] sm:$0xff] %v13193_v34  ;;  %v1023_v17 = vpop.f32.mrf.mxu0  ;;  %11401 = vmatmul.mubr.msk.bf16.gmra.mxu1 %vm2098_vm2, %v2016_v25  ;;  %v1897_v11 = vmax.f32 %v13193_v34, 0.0 }
 0x161   :  { %18441 = vst [vmem:[#allocation93_spill] sm:$0xff] %v13197_v15  ;;  %v13200_v40 = vadd.f32 %v12707_v57, %v1023_v17  ;;  %v1402_v8 = vpop.permute.xlu1 %1401  ;;  %v1404_v16 = vpop.permute.xlu0 %1403 }
 0x162   :  { %v2017_v32 = vpack.c.bf16 %v1896_v50, %v1895_v22  ;;  %v13203_v26 = vadd.f32 %v1402_v8, %v12819_v35  ;;  %v11338_v49 = vpop.f32.mrf.mxu0  ;;  %v13212_v60 = vadd.f32 %v1404_v16, %v12822_v36  ;;  %v13216_v22 = vadd.f32 %v11335_v43, %v12707_v57 }
 0x163   :  { %18442 = vst [vmem:[#allocation94_spill] sm:$0xff] %v13200_v40  ;;  %1517 = vrot.lane.b32.xlu1 %v13200_v40, %s12431_s13  ;;  %1519 = vrot.lane.b32.xlu0 %v13197_v15, %s12431_s13 }
 0x164   :  { %18443 = vst [vmem:[#allocation95_spill] sm:$0xff] %v13203_v26  ;;  %v1898_v25 = vmax.f32 %v13203_v26, 0.0  ;;  %18444 = vst [vmem:[#allocation96_spill] sm:$0xff] %v13212_v60  ;;  %v1036_v17 = vpop.f32.mrf.mxu0  ;;  %11404 = vmatprep.mubr.msk.bf16.mxu1 %vm2098_vm2, %v2017_v32  ;;  %v1899_v16 = vmax.f32 %v13212_v60, 0.0 }
 0x165   :  { %18445 = vst [vmem:[#allocation97_spill] sm:$0xff] %v13216_v22  ;;  %v13219_v50 = vadd.f32 %v12707_v57, %v1036_v17  ;;  %v1406_v8 = vpop.permute.xlu1 %1405  ;;  %v1408_v21 = vpop.permute.xlu0 %1407 }
 0x166   :  { %v2018_v35 = vpack.c.bf16 %v1898_v25, %v1897_v11  ;;  %v13222_v31 = vadd.f32 %v1406_v8, %v12838_v42  ;;  %v11339_v34 = vpop.f32.mrf.mxu0  ;;  %v13231_v43 = vadd.f32 %v1408_v21, %v12835_v41  ;;  %v13235_v11 = vadd.f32 %v11338_v49, %v12707_v57 }
 0x167   :  { %18446 = vst [vmem:[#allocation98_spill] sm:$0xff] %v13219_v50  ;;  %1521 = vrot.lane.b32.xlu1 %v13216_v22, %s12431_s13  ;;  %1523 = vrot.lane.b32.xlu0 %v13219_v50, %s12431_s13 }
 0x168   :  { %18447 = vst [vmem:[#allocation99_spill] sm:$0xff] %v13222_v31  ;;  %v1900_v32 = vmax.f32 %v13222_v31, 0.0  ;;  %18448 = vst [vmem:[#allocation100_spill] sm:$0xff] %v13231_v43  ;;  %v1039_v17 = vpop.f32.mrf.mxu0  ;;  %11405 = vmatmul.mubr.msk.bf16.gmra.mxu1 %vm2098_vm2, %v2018_v35  ;;  %v1901_v21 = vmax.f32 %v13231_v43, 0.0 }
 0x169   :  { %18449 = vst [vmem:[#allocation101_spill] sm:$0xff] %v13235_v11  ;;  %v13238_v25 = vadd.f32 %v12707_v57, %v1039_v17  ;;  %v1410_v8 = vpop.permute.xlu1 %1409  ;;  %v1412_v26 = vpop.permute.xlu0 %1411 }
 0x16a   :  { %v2019_v42 = vpack.c.bf16 %v1900_v32, %v1899_v16  ;;  %v13241_v36 = vadd.f32 %v1410_v8, %v12847_v45  ;;  %v11342_v60 = vpop.f32.mrf.mxu0  ;;  %v13250_v49 = vadd.f32 %v1412_v26, %v12850_v46  ;;  %v13254_v16 = vadd.f32 %v11339_v34, %v12707_v57 }
 0x16b   :  { %18450 = vst [vmem:[#allocation102_spill] sm:$0xff] %v13238_v25  ;;  %1525 = vrot.lane.b32.xlu1 %v13238_v25, %s12431_s13  ;;  %1527 = vrot.lane.b32.xlu0 %v13235_v11, %s12431_s13 }
 0x16c   :  { %18451 = vst [vmem:[#allocation103_spill] sm:$0xff] %v13241_v36  ;;  %v1902_v35 = vmax.f32 %v13241_v36, 0.0  ;;  %18452 = vst [vmem:[#allocation104_spill] sm:$0xff] %v13250_v49  ;;  %v1052_v17 = vpop.f32.mrf.mxu0  ;;  %11408 = vmatprep.mubr.msk.bf16.mxu1 %vm2098_vm2, %v2019_v42  ;;  %v1903_v26 = vmax.f32 %v13250_v49, 0.0 }
 0x16d   :  { %18453 = vst [vmem:[#allocation105_spill] sm:$0xff] %v13254_v16  ;;  %v13257_v32 = vadd.f32 %v12707_v57, %v1052_v17  ;;  %v1414_v8 = vpop.permute.xlu1 %1413  ;;  %v1416_v31 = vpop.permute.xlu0 %1415 }
 0x16e   :  { %v2020_v45 = vpack.c.bf16 %v1902_v35, %v1901_v21  ;;  %v13260_v41 = vadd.f32 %v1414_v8, %v12866_v52  ;;  %v11343_v43 = vpop.f32.mrf.mxu0  ;;  %v13269_v34 = vadd.f32 %v1416_v31, %v12863_v51  ;;  %v13273_v21 = vadd.f32 %v11342_v60, %v12707_v57  ;;  %v12389_v31 = vld [vmem:[%s17777_s3 + $0x18] sm:$0xff]  }
 0x16f   :  { %18454 = vst [vmem:[#allocation106_spill] sm:$0xff] %v13257_v32  ;;  %1529 = vrot.lane.b32.xlu1 %v13254_v16, %s12431_s13  ;;  %1531 = vrot.lane.b32.xlu0 %v13257_v32, %s12431_s13 }
 0x170   :  { %18455 = vst [vmem:[#allocation107_spill] sm:$0xff] %v13260_v41  ;;  %v1904_v42 = vmax.f32 %v13260_v41, 0.0  ;;  %18456 = vst [vmem:[#allocation108_spill] sm:$0xff] %v13269_v34  ;;  %v1055_v17 = vpop.f32.mrf.mxu0  ;;  %11409 = vmatmul.mubr.msk.bf16.gmra.mxu1 %vm2098_vm2, %v2020_v45  ;;  %v1905_v45 = vmax.f32 %v13269_v34, 0.0  ;;  %11652 = vmatprep.subr.bf16.mxu1 %v12389_v31 }
 0x171   :  { %18457 = vst [vmem:[#allocation109_spill] sm:$0xff] %v13273_v21  ;;  %v13276_v35 = vadd.f32 %v12707_v57, %v1055_v17  ;;  %v1418_v8 = vpop.permute.xlu1 %1417  ;;  %v1420_v36 = vpop.permute.xlu0 %1419  ;;  %v13295_v17 = vadd.f32 %v11343_v43, %v12707_v57  ;;  %11653 = vmatpush3.bf16.msra.mxu1 %v12389_v31 }
 0x172   :  { %v2021_v52 = vpack.c.bf16 %v1904_v42, %v1903_v26  ;;  %v13279_v46 = vadd.f32 %v1418_v8, %v12875_v55  ;;  %v11346_v49 = vpop.f32.mrf.mxu0  ;;  %v13291_v26 = vadd.f32 %v1420_v36, %v12878_v56 }
 0x173   :  { %18458 = vst [vmem:[#allocation110_spill] sm:$0xff] %v13276_v35  ;;  %1533 = vrot.lane.b32.xlu1 %v13276_v35, %s12431_s13  ;;  %1535 = vrot.lane.b32.xlu0 %v13273_v21, %s12431_s13  ;;  %18461 = vst [vmem:[#allocation113_spill] sm:$0xff] %v13295_v17 }
 0x174   :  { %18459 = vst [vmem:[#allocation111_spill] sm:$0xff] %v13279_v46  ;;  %v1906_v60 = vmax.f32 %v13279_v46, 0.0  ;;  %18460 = vst [vmem:[#allocation112_spill] sm:$0xff] %v13291_v26  ;;  %v1068_v42 = vpop.f32.mrf.mxu0  ;;  %11412 = vmatprep.mubr.msk.bf16.mxu1 %vm2098_vm2, %v2021_v52  ;;  %v1907_v36 = vmax.f32 %v13291_v26, 0.0 }
 0x175   :  { %v13298_v8 = vadd.f32 %v12707_v57, %v1068_v42  ;;  %v1422_v41 = vpop.permute.xlu1 %1421  ;;  %v1424_v55 = vpop.permute.xlu0 %1423 }
 0x176   :  { %v2022_v51 = vpack.c.bf16 %v1906_v60, %v1905_v45  ;;  %v13301_v34 = vadd.f32 %v1422_v41, %v12891_v1  ;;  %v11347_v46 = vpop.f32.mrf.mxu0  ;;  %v13310_v43 = vadd.f32 %v1424_v55, %v12888_v63  ;;  %v13314_v41 = vadd.f32 %v11346_v49, %v12707_v57 }
 0x177   :  { %18462 = vst [vmem:[#allocation114_spill] sm:$0xff] %v13298_v8  ;;  %1537 = vrot.lane.b32.xlu1 %v13295_v17, %s12431_s13  ;;  %1539 = vrot.lane.b32.xlu0 %v13298_v8, %s12431_s13 }
 0x178   :  { %18463 = vst [vmem:[#allocation115_spill] sm:$0xff] %v13301_v34  ;;  %v1908_v52 = vmax.f32 %v13301_v34, 0.0  ;;  %18464 = vst [vmem:[#allocation116_spill] sm:$0xff] %v13310_v43  ;;  %v1071_v42 = vpop.f32.mrf.mxu0  ;;  %11413 = vmatmul.mubr.msk.bf16.gmra.mxu1 %vm2098_vm2, %v2022_v51  ;;  %v1909_v51 = vmax.f32 %v13310_v43, 0.0 }
 0x179   :  { %18465 = vst [vmem:[#allocation117_spill] sm:$0xff] %v13314_v41  ;;  %v13317_v31 = vadd.f32 %v12707_v57, %v1071_v42  ;;  %v1426_v45 = vpop.permute.xlu1 %1425  ;;  %v1428_v60 = vpop.permute.xlu0 %1427 }
 0x17a   :  { %v2023_v1 = vpack.c.bf16 %v1908_v52, %v1907_v36  ;;  %v13320_v56 = vadd.f32 %v1426_v45, %v12899_v5  ;;  %v11350_v26 = vpop.f32.mrf.mxu0  ;;  %v13329_v49 = vadd.f32 %v1428_v60, %v12902_v7  ;;  %v13333_v36 = vadd.f32 %v11347_v46, %v12707_v57 }
 0x17b   :  { %18466 = vst [vmem:[#allocation118_spill] sm:$0xff] %v13317_v31  ;;  %1541 = vrot.lane.b32.xlu1 %v13317_v31, %s12431_s13  ;;  %1543 = vrot.lane.b32.xlu0 %v13314_v41, %s12431_s13 }
 0x17c   :  { %18467 = vst [vmem:[#allocation119_spill] sm:$0xff] %v13320_v56  ;;  %v1910_v55 = vmax.f32 %v13320_v56, 0.0  ;;  %18468 = vst [vmem:[#allocation120_spill] sm:$0xff] %v13329_v49  ;;  %v1084_v42 = vpop.f32.mrf.mxu0  ;;  %11416 = vmatprep.mubr.msk.bf16.mxu1 %vm2098_vm2, %v2023_v1  ;;  %v1911_v1 = vmax.f32 %v13329_v49, 0.0 }
 0x17d   :  { %18469 = vst [vmem:[#allocation121_spill] sm:$0xff] %v13333_v36  ;;  %v13336_v52 = vadd.f32 %v12707_v57, %v1084_v42  ;;  %v1430_v45 = vpop.permute.xlu1 %1429  ;;  %v1432_v34 = vpop.permute.xlu0 %1431 }
 0x17e   :  { %v2024_v5 = vpack.c.bf16 %v1910_v55, %v1909_v51  ;;  %v13339_v63 = vadd.f32 %v1430_v45, %v12912_v13  ;;  %v11351_v43 = vpop.f32.mrf.mxu0  ;;  %v13348_v60 = vadd.f32 %v1432_v34, %v12909_v10  ;;  %v13352_v51 = vadd.f32 %v11350_v26, %v12707_v57 }
 0x17f   :  { %18470 = vst [vmem:[#allocation122_spill] sm:$0xff] %v13336_v52  ;;  %1545 = vrot.lane.b32.xlu1 %v13333_v36, %s12431_s13  ;;  %1547 = vrot.lane.b32.xlu0 %v13336_v52, %s12431_s13 }
 0x180   :  { %18471 = vst [vmem:[#allocation123_spill] sm:$0xff] %v13339_v63  ;;  %v1912_v46 = vmax.f32 %v13339_v63, 0.0  ;;  %18472 = vst [vmem:[#allocation124_spill] sm:$0xff] %v13348_v60  ;;  %v1087_v42 = vpop.f32.mrf.mxu0  ;;  %11417 = vmatmul.mubr.msk.bf16.gmra.mxu1 %vm2098_vm2, %v2024_v5  ;;  %v1913_v5 = vmax.f32 %v13348_v60, 0.0 }
 0x181   :  { %18473 = vst [vmem:[#allocation125_spill] sm:$0xff] %v13352_v51  ;;  %v13355_v55 = vadd.f32 %v12707_v57, %v1087_v42  ;;  %v1434_v45 = vpop.permute.xlu1 %1433  ;;  %v1436_v56 = vpop.permute.xlu0 %1435 }
 0x182   :  { %v2025_v13 = vpack.c.bf16 %v1912_v46, %v1911_v1  ;;  %v13358_v7 = vadd.f32 %v1434_v45, %v12919_v18  ;;  %v11354_v49 = vpop.f32.mrf.mxu0  ;;  %v13367_v26 = vadd.f32 %v1436_v56, %v12922_v19  ;;  %v13371_v1 = vadd.f32 %v11351_v43, %v12707_v57 }
 0x183   :  { %18474 = vst [vmem:[#allocation126_spill] sm:$0xff] %v13355_v55  ;;  %1549 = vrot.lane.b32.xlu1 %v13355_v55, %s12431_s13  ;;  %1551 = vrot.lane.b32.xlu0 %v13352_v51, %s12431_s13 }
 0x184   :  { %18475 = vst [vmem:[#allocation127_spill] sm:$0xff] %v13358_v7  ;;  %v1914_v34 = vmax.f32 %v13358_v7, 0.0  ;;  %18476 = vst [vmem:[#allocation128_spill] sm:$0xff] %v13367_v26  ;;  %v1100_v42 = vpop.f32.mrf.mxu0  ;;  %11420 = vmatprep.mubr.msk.bf16.mxu1 %vm2098_vm2, %v2025_v13  ;;  %v1915_v56 = vmax.f32 %v13367_v26, 0.0 }
 0x185   :  { %18477 = vst [vmem:[#allocation129_spill] sm:$0xff] %v13371_v1  ;;  %v13374_v46 = vadd.f32 %v12707_v57, %v1100_v42  ;;  %v1438_v45 = vpop.permute.xlu1 %1437  ;;  %v1440_v63 = vpop.permute.xlu0 %1439 }
 0x186   :  { %v2026_v18 = vpack.c.bf16 %v1914_v34, %v1913_v5  ;;  %v13377_v10 = vadd.f32 %v1438_v45, %v12932_v27  ;;  %v11355_v60 = vpop.f32.mrf.mxu0  ;;  %v13386_v43 = vadd.f32 %v1440_v63, %v12929_v24  ;;  %v13390_v5 = vadd.f32 %v11354_v49, %v12707_v57 }
 0x187   :  { %18478 = vst [vmem:[#allocation130_spill] sm:$0xff] %v13374_v46  ;;  %1553 = vrot.lane.b32.xlu1 %v13371_v1, %s12431_s13  ;;  %1555 = vrot.lane.b32.xlu0 %v13374_v46, %s12431_s13 }
 0x188   :  { %18479 = vst [vmem:[#allocation131_spill] sm:$0xff] %v13377_v10  ;;  %v1916_v13 = vmax.f32 %v13377_v10, 0.0  ;;  %18480 = vst [vmem:[#allocation132_spill] sm:$0xff] %v13386_v43  ;;  %v1103_v42 = vpop.f32.mrf.mxu0  ;;  %11421 = vmatmul.mubr.msk.bf16.gmra.mxu1 %vm2098_vm2, %v2026_v18  ;;  %v1917_v63 = vmax.f32 %v13386_v43, 0.0 }
 0x189   :  { %18481 = vst [vmem:[#allocation133_spill] sm:$0xff] %v13390_v5  ;;  %v13393_v34 = vadd.f32 %v12707_v57, %v1103_v42  ;;  %v1442_v45 = vpop.permute.xlu1 %1441  ;;  %v1444_v7 = vpop.permute.xlu0 %1443 }
 0x18a   :  { %v2027_v27 = vpack.c.bf16 %v1916_v13, %v1915_v56  ;;  %v13396_v19 = vadd.f32 %v1442_v45, %v12939_v30  ;;  %v11358_v26 = vpop.f32.mrf.mxu0  ;;  %v13405_v49 = vadd.f32 %v1444_v7, %v12942_v33  ;;  %v13409_v56 = vadd.f32 %v11355_v60, %v12707_v57 }
 0x18b   :  { %18482 = vst [vmem:[#allocation134_spill] sm:$0xff] %v13393_v34  ;;  %1557 = vrot.lane.b32.xlu1 %v13393_v34, %s12431_s13  ;;  %1559 = vrot.lane.b32.xlu0 %v13390_v5, %s12431_s13 }
 0x18c   :  { %18483 = vst [vmem:[#allocation135_spill] sm:$0xff] %v13396_v19  ;;  %v1918_v18 = vmax.f32 %v13396_v19, 0.0  ;;  %18484 = vst [vmem:[#allocation136_spill] sm:$0xff] %v13405_v49  ;;  %v1116_v42 = vpop.f32.mrf.mxu0  ;;  %11424 = vmatprep.mubr.msk.bf16.mxu1 %vm2098_vm2, %v2027_v27  ;;  %v1919_v7 = vmax.f32 %v13405_v49, 0.0 }
 0x18d   :  { %18485 = vst [vmem:[#allocation137_spill] sm:$0xff] %v13409_v56  ;;  %v13412_v13 = vadd.f32 %v12707_v57, %v1116_v42  ;;  %v1446_v45 = vpop.permute.xlu1 %1445  ;;  %v1448_v10 = vpop.permute.xlu0 %1447 }
 0x18e   :  { %v2028_v30 = vpack.c.bf16 %v1918_v18, %v1917_v63  ;;  %v13415_v24 = vadd.f32 %v1446_v45, %v12952_v39  ;;  %v11359_v43 = vpop.f32.mrf.mxu0  ;;  %v13424_v60 = vadd.f32 %v1448_v10, %v12949_v38  ;;  %v13428_v63 = vadd.f32 %v11358_v26, %v12707_v57 }
 0x18f   :  { %18486 = vst [vmem:[#allocation138_spill] sm:$0xff] %v13412_v13  ;;  %1561 = vrot.lane.b32.xlu1 %v13409_v56, %s12431_s13  ;;  %1563 = vrot.lane.b32.xlu0 %v13412_v13, %s12431_s13 }
 0x190   :  { %18487 = vst [vmem:[#allocation139_spill] sm:$0xff] %v13415_v24  ;;  %v1920_v27 = vmax.f32 %v13415_v24, 0.0  ;;  %18488 = vst [vmem:[#allocation140_spill] sm:$0xff] %v13424_v60  ;;  %v1119_v42 = vpop.f32.mrf.mxu0  ;;  %11425 = vmatmul.mubr.msk.bf16.gmra.mxu1 %vm2098_vm2, %v2028_v30  ;;  %v1921_v10 = vmax.f32 %v13424_v60, 0.0 }
 0x191   :  { %18489 = vst [vmem:[#allocation141_spill] sm:$0xff] %v13428_v63  ;;  %v13431_v18 = vadd.f32 %v12707_v57, %v1119_v42  ;;  %v1450_v45 = vpop.permute.xlu1 %1449  ;;  %v1452_v19 = vpop.permute.xlu0 %1451 }
 0x192   :  { %v2029_v39 = vpack.c.bf16 %v1920_v27, %v1919_v7  ;;  %v13434_v33 = vadd.f32 %v1450_v45, %v12959_v44  ;;  %v11362_v49 = vpop.f32.mrf.mxu0  ;;  %v13443_v26 = vadd.f32 %v1452_v19, %v12962_v47  ;;  %v13447_v7 = vadd.f32 %v11359_v43, %v12707_v57 }
 0x193   :  { %18490 = vst [vmem:[#allocation142_spill] sm:$0xff] %v13431_v18  ;;  %1565 = vrot.lane.b32.xlu1 %v13431_v18, %s12431_s13  ;;  %1567 = vrot.lane.b32.xlu0 %v13428_v63, %s12431_s13 }
 0x194   :  { %18491 = vst [vmem:[#allocation143_spill] sm:$0xff] %v13434_v33  ;;  %v1922_v30 = vmax.f32 %v13434_v33, 0.0  ;;  %18492 = vst [vmem:[#allocation144_spill] sm:$0xff] %v13443_v26  ;;  %v1132_v42 = vpop.f32.mrf.mxu0  ;;  %11428 = vmatprep.mubr.msk.bf16.mxu1 %vm2098_vm2, %v2029_v39  ;;  %v1923_v19 = vmax.f32 %v13443_v26, 0.0 }
 0x195   :  { %18493 = vst [vmem:[#allocation145_spill] sm:$0xff] %v13447_v7  ;;  %v13450_v27 = vadd.f32 %v12707_v57, %v1132_v42  ;;  %v1454_v45 = vpop.permute.xlu1 %1453  ;;  %v1456_v24 = vpop.permute.xlu0 %1455 }
 0x196   :  { %v2030_v44 = vpack.c.bf16 %v1922_v30, %v1921_v10  ;;  %v13453_v38 = vadd.f32 %v1454_v45, %v12975_v54  ;;  %v11363_v60 = vpop.f32.mrf.mxu0  ;;  %v13462_v57 = vadd.f32 %v1456_v24, %v12972_v53  ;;  %v13468_v10 = vld [vmem:[%s17776_s2] ss:$0 sm:$0xff]  ;;  %s12432_s2 = smov 64  }
 0x197   :  { %18494 = vst [vmem:[#allocation146_spill] sm:$0xff] %v13450_v27  ;;  %1569 = vrot.lane.b32.xlu1 %v13447_v7, %s12431_s13  ;;  %1571 = vrot.lane.b32.xlu0 %v13450_v27, %s12431_s13  ;;  %v13471_v30 = vadd.f32 %v13468_v10, %v11362_v49 }
 0x198   :  { %18495 = vst [vmem:[#allocation147_spill] sm:$0xff] %v13453_v38  ;;  %v1924_v39 = vmax.f32 %v13453_v38, 0.0  ;;  %18496 = vst [vmem:[#allocation148_spill] sm:$0xff] %v13462_v57  ;;  %v1135_v43 = vpop.f32.mrf.mxu0  ;;  %11429 = vmatmul.mubr.msk.bf16.gmra.mxu1 %vm2098_vm2, %v2030_v44  ;;  %v1925_v44 = vmax.f32 %v13462_v57, 0.0 }
 0x199   :  { %18497 = vst [vmem:[#allocation149_spill] sm:$0xff] %v13471_v30  ;;  %v13474_v42 = vadd.f32 %v13468_v10, %v1135_v43  ;;  %v1458_v45 = vpop.permute.xlu1 %1457  ;;  %v1460_v26 = vpop.permute.xlu0 %1459 }
 0x19a   :  { %v2031_v38 = vpack.c.bf16 %v1924_v39, %v1923_v19  ;;  %v13477_v24 = vadd.f32 %v1458_v45, %v12982_v62  ;;  %v11366_v33 = vpop.f32.mrf.mxu0  ;;  %v13486_v43 = vadd.f32 %v1460_v26, %v12985_v2  ;;  %v13490_v19 = vadd.f32 %v13468_v10, %v11363_v60 }
 0x19b   :  { %18498 = vst [vmem:[#allocation150_spill] sm:$0xff] %v13474_v42  ;;  %1573 = vrot.lane.b32.xlu1 %v13474_v42, %s12431_s13  ;;  %1575 = vrot.lane.b32.xlu0 %v13471_v30, %s12431_s13 }
 0x19c   :  { %18499 = vst [vmem:[#allocation151_spill] sm:$0xff] %v13477_v24  ;;  %v1926_v49 = vmax.f32 %v13477_v24, 0.0  ;;  %18500 = vst [vmem:[#allocation152_spill] sm:$0xff] %v13486_v43  ;;  %v1148_v53 = vpop.f32.mrf.mxu0  ;;  %11432 = vmatprep.mubr.msk.bf16.mxu1 %vm2098_vm2, %v2031_v38  ;;  %v1927_v38 = vmax.f32 %v13486_v43, 0.0 }
 0x19d   :  { %18501 = vst [vmem:[#allocation153_spill] sm:$0xff] %v13490_v19  ;;  %v13493_v39 = vadd.f32 %v13468_v10, %v1148_v53  ;;  %v1462_v45 = vpop.permute.xlu1 %1461  ;;  %v1464_v62 = vpop.permute.xlu0 %1463 }
 0x19e   :  { %v2032_v54 = vpack.c.bf16 %v1926_v49, %v1925_v44  ;;  %v13496_v47 = vadd.f32 %v1462_v45, %v12995_v14  ;;  %v11367_v57 = vpop.f32.mrf.mxu0  ;;  %v13505_v53 = vadd.f32 %v1464_v62, %v12992_v9  ;;  %v13509_v44 = vadd.f32 %v13468_v10, %v11366_v33  ;;  %v18511_v9 = vld [vmem:[#allocation55_spill] sm:$0xff] }
 0x19f   :  { %18502 = vst [vmem:[#allocation154_spill] sm:$0xff] %v13493_v39  ;;  %1577 = vrot.lane.b32.xlu1 %v13490_v19, %s12431_s13  ;;  %1579 = vrot.lane.b32.xlu0 %v13493_v39, %s12431_s13 }
 0x1a0   :  { %18503 = vst [vmem:[#allocation155_spill] sm:$0xff] %v13496_v47  ;;  %v1928_v60 = vmax.f32 %v13496_v47, 0.0  ;;  %18504 = vst [vmem:[#allocation156_spill] sm:$0xff] %v13505_v53  ;;  %v1151_v26 = vpop.f32.mrf.mxu0  ;;  %11433 = vmatmul.mubr.msk.bf16.gmra.mxu1 %vm2098_vm2, %v2032_v54  ;;  %v1929_v54 = vmax.f32 %v13505_v53, 0.0 }
 0x1a1   :  { %18505 = vst [vmem:[#allocation157_spill] sm:$0xff] %v13509_v44  ;;  %v13512_v49 = vadd.f32 %v13468_v10, %v1151_v26  ;;  %v1466_v45 = vpop.permute.xlu1 %1465  ;;  %v1468_v24 = vpop.permute.xlu0 %1467 }
 0x1a2   :  { %v2033_v14 = vpack.c.bf16 %v1928_v60, %v1927_v38  ;;  %v13515_v2 = vadd.f32 %v1466_v45, %v13002_v23  ;;  %v11370_v43 = vpop.f32.mrf.mxu0  ;;  %v13524_v62 = vadd.f32 %v1468_v24, %v13005_v28  ;;  %v13528_v38 = vadd.f32 %v13468_v10, %v11367_v57  ;;  %v18513_v24 = vld [vmem:[#allocation54_spill] sm:$0xff] }
 0x1a3   :  { %18506 = vst [vmem:[#allocation158_spill] sm:$0xff] %v13512_v49  ;;  %1581 = vrot.lane.b32.xlu1 %v13512_v49, %s12431_s13  ;;  %1583 = vrot.lane.b32.xlu0 %v13509_v44, %s12431_s13 }
 0x1a4   :  { %18507 = vst [vmem:[#allocation159_spill] sm:$0xff] %v13515_v2  ;;  %v1930_v33 = vmax.f32 %v13515_v2, 0.0  ;;  %18508 = vst [vmem:[#allocation160_spill] sm:$0xff] %v13524_v62  ;;  %v1164_v26 = vpop.f32.mrf.mxu0  ;;  %11436 = vmatprep.mubr.msk.bf16.mxu1 %vm2098_vm2, %v2033_v14  ;;  %v1931_v14 = vmax.f32 %v13524_v62, 0.0 }
 0x1a5   :  { %18509 = vst [vmem:[#allocation161_spill] sm:$0xff] %v13528_v38  ;;  %v13531_v60 = vadd.f32 %v13468_v10, %v1164_v26  ;;  %v1470_v45 = vpop.permute.xlu1 %1469  ;;  %v1472_v47 = vpop.permute.xlu0 %1471 }
 0x1a6   :  { %v2034_v23 = vpack.c.bf16 %v1930_v33, %v1929_v54  ;;  %v13534_v44 = vadd.f32 %v1470_v45, %v18511_v9  ;;  %v11371_v53 = vpop.f32.mrf.mxu0  ;;  %v13543_v26 = vadd.f32 %v1472_v47, %v18513_v24  ;;  %v13547_v54 = vadd.f32 %v13468_v10, %v11370_v43  ;;  %v18519_v43 = vld [vmem:[#allocation57_spill] sm:$0xff] }
 0x1a7   :  { %18510 = vst [vmem:[#allocation162_spill] sm:$0xff] %v13531_v60  ;;  %1585 = vrot.lane.b32.xlu1 %v13528_v38, %s12431_s13  ;;  %1587 = vrot.lane.b32.xlu0 %v13531_v60, %s12431_s13  ;;  %v18517_v60 = vld [vmem:[#allocation56_spill] sm:$0xff] }
 0x1a8   :  { %18512 = vst [vmem:[#allocation163_spill] sm:$0xff] %v13534_v44  ;;  %v1932_v57 = vmax.f32 %v13534_v44, 0.0  ;;  %18514 = vst [vmem:[#allocation164_spill] sm:$0xff] %v13543_v26  ;;  %v1167_v2 = vpop.f32.mrf.mxu0  ;;  %11437 = vmatmul.mubr.msk.bf16.gmra.mxu1 %vm2098_vm2, %v2034_v23  ;;  %v1933_v47 = vmax.f32 %v13543_v26, 0.0 }
 0x1a9   :  { %18515 = vst [vmem:[#allocation165_spill] sm:$0xff] %v13547_v54  ;;  %v13550_v33 = vadd.f32 %v13468_v10, %v1167_v2  ;;  %v1474_v45 = vpop.permute.xlu1 %1473  ;;  %v1476_v9 = vpop.permute.xlu0 %1475 }
 0x1aa   :  { %v2035_v28 = vpack.c.bf16 %v1932_v57, %v1931_v14  ;;  %v13553_v38 = vadd.f32 %v1474_v45, %v18517_v60  ;;  %v11374_v62 = vpop.f32.mrf.mxu0  ;;  %v13562_v2 = vadd.f32 %v1476_v9, %v18519_v43  ;;  %v13566_v14 = vadd.f32 %v13468_v10, %v11371_v53  ;;  %v18525_v53 = vld [vmem:[#allocation58_spill] sm:$0xff] }
 0x1ab   :  { %18516 = vst [vmem:[#allocation166_spill] sm:$0xff] %v13550_v33  ;;  %1589 = vrot.lane.b32.xlu1 %v13550_v33, %s12431_s13  ;;  %1591 = vrot.lane.b32.xlu0 %v13547_v54, %s12431_s13  ;;  %v18523_v54 = vld [vmem:[#allocation59_spill] sm:$0xff] }
 0x1ac   :  { %18518 = vst [vmem:[#allocation167_spill] sm:$0xff] %v13553_v38  ;;  %v1934_v23 = vmax.f32 %v13553_v38, 0.0  ;;  %18520 = vst [vmem:[#allocation168_spill] sm:$0xff] %v13562_v2  ;;  %v1180_v44 = vpop.f32.mrf.mxu0  ;;  %11440 = vmatprep.mubr.msk.bf16.mxu1 %vm2098_vm2, %v2035_v28  ;;  %v1935_v9 = vmax.f32 %v13562_v2, 0.0 }
 0x1ad   :  { %18521 = vst [vmem:[#allocation169_spill] sm:$0xff] %v13566_v14  ;;  %v13569_v57 = vadd.f32 %v13468_v10, %v1180_v44  ;;  %v1478_v45 = vpop.permute.xlu1 %1477  ;;  %v1480_v60 = vpop.permute.xlu0 %1479 }
 0x1ae   :  { %v2036_v24 = vpack.c.bf16 %v1934_v23, %v1933_v47  ;;  %v13572_v33 = vadd.f32 %v1478_v45, %v18523_v54  ;;  %v11375_v26 = vpop.f32.mrf.mxu0  ;;  %v13581_v44 = vadd.f32 %v1480_v60, %v18525_v53  ;;  %v13585_v47 = vadd.f32 %v13468_v10, %v11374_v62 }
 0x1af   :  { %18522 = vst [vmem:[#allocation170_spill] sm:$0xff] %v13569_v57  ;;  %1593 = vrot.lane.b32.xlu1 %v13566_v14, %s12431_s13  ;;  %1595 = vrot.lane.b32.xlu0 %v13569_v57, %s12431_s13  ;;  %v18529_v57 = vld [vmem:[#allocation60_spill] sm:$0xff] }
 0x1b0   :  { %18524 = vst [vmem:[#allocation171_spill] sm:$0xff] %v13572_v33  ;;  %v1936_v28 = vmax.f32 %v13572_v33, 0.0  ;;  %18526 = vst [vmem:[#allocation172_spill] sm:$0xff] %v13581_v44  ;;  %v1183_v38 = vpop.f32.mrf.mxu0  ;;  %11441 = vmatmul.mubr.msk.bf16.gmra.mxu1 %vm2098_vm2, %v2036_v24  ;;  %v1937_v60 = vmax.f32 %v13581_v44, 0.0  ;;  %v18531_v24 = vld [vmem:[#allocation61_spill] sm:$0xff] }
 0x1b1   :  { %18527 = vst [vmem:[#allocation173_spill] sm:$0xff] %v13585_v47  ;;  %v13588_v23 = vadd.f32 %v13468_v10, %v1183_v38  ;;  %v1482_v45 = vpop.permute.xlu1 %1481  ;;  %v1484_v54 = vpop.permute.xlu0 %1483 }
 0x1b2   :  { %v2037_v43 = vpack.c.bf16 %v1936_v28, %v1935_v9  ;;  %v13591_v14 = vadd.f32 %v1482_v45, %v18529_v57  ;;  %v11378_v2 = vpop.f32.mrf.mxu0  ;;  %v13600_v38 = vadd.f32 %v1484_v54, %v18531_v24  ;;  %v13604_v9 = vadd.f32 %v13468_v10, %v11375_v26 }
 0x1b3   :  { %18528 = vst [vmem:[#allocation174_spill] sm:$0xff] %v13588_v23  ;;  %1597 = vrot.lane.b32.xlu1 %v13588_v23, %s12431_s13  ;;  %1599 = vrot.lane.b32.xlu0 %v13585_v47, %s12431_s13  ;;  %v18535_v47 = vld [vmem:[#allocation63_spill] sm:$0xff] }
 0x1b4   :  { %18530 = vst [vmem:[#allocation175_spill] sm:$0xff] %v13591_v14  ;;  %v1938_v62 = vmax.f32 %v13591_v14, 0.0  ;;  %18532 = vst [vmem:[#allocation176_spill] sm:$0xff] %v13600_v38  ;;  %v1196_v33 = vpop.f32.mrf.mxu0  ;;  %11444 = vmatprep.mubr.msk.bf16.mxu1 %vm2098_vm2, %v2037_v43  ;;  %v1939_v54 = vmax.f32 %v13600_v38, 0.0  ;;  %v18537_v43 = vld [vmem:[#allocation62_spill] sm:$0xff] }
 0x1b5   :  { %18533 = vst [vmem:[#allocation177_spill] sm:$0xff] %v13604_v9  ;;  %v13607_v28 = vadd.f32 %v13468_v10, %v1196_v33  ;;  %v1486_v45 = vpop.permute.xlu1 %1485  ;;  %v1488_v57 = vpop.permute.xlu0 %1487 }
 0x1b6   :  { %v2038_v53 = vpack.c.bf16 %v1938_v62, %v1937_v60  ;;  %v13610_v23 = vadd.f32 %v1486_v45, %v18535_v47  ;;  %v11379_v44 = vpop.f32.mrf.mxu0  ;;  %v13619_v33 = vadd.f32 %v1488_v57, %v18537_v43  ;;  %v13623_v60 = vadd.f32 %v13468_v10, %v11378_v2 }
 0x1b7   :  { %18534 = vst [vmem:[#allocation178_spill] sm:$0xff] %v13607_v28  ;;  %1601 = vrot.lane.b32.xlu1 %v13604_v9, %s12431_s13  ;;  %1603 = vrot.lane.b32.xlu0 %v13607_v28, %s12431_s13 }
 0x1b8   :  { %18536 = vst [vmem:[#allocation179_spill] sm:$0xff] %v13610_v23  ;;  %v1940_v26 = vmax.f32 %v13610_v23, 0.0  ;;  %18538 = vst [vmem:[#allocation180_spill] sm:$0xff] %v13619_v33  ;;  %v1199_v14 = vpop.f32.mrf.mxu0  ;;  %11445 = vmatmul.mubr.msk.bf16.gmra.mxu1 %vm2098_vm2, %v2038_v53  ;;  %v1941_v57 = vmax.f32 %v13619_v33, 0.0 }
 0x1b9   :  { %18539 = vst [vmem:[#allocation181_spill] sm:$0xff] %v13623_v60  ;;  %v13626_v62 = vadd.f32 %v13468_v10, %v1199_v14  ;;  %v1490_v45 = vpop.permute.xlu1 %1489  ;;  %v1492_v47 = vpop.permute.xlu0 %1491 }
 0x1ba   :  { %v2039_v24 = vpack.c.bf16 %v1940_v26, %v1939_v54  ;;  %v13629_v28 = vadd.f32 %v1490_v45, %v13068_v29  ;;  %v11382_v38 = vpop.f32.mrf.mxu0  ;;  %v13638_v14 = vadd.f32 %v1492_v47, %v13074_v37  ;;  %v13642_v54 = vadd.f32 %v13468_v10, %v11379_v44  ;;  %v18549_v37 = vld [vmem:[#allocation73_spill] sm:$0xff] }
 0x1bb   :  { %18540 = vst [vmem:[#allocation182_spill] sm:$0xff] %v13626_v62  ;;  %1605 = vrot.lane.b32.xlu1 %v13626_v62, %s12431_s13  ;;  %1607 = vrot.lane.b32.xlu0 %v13623_v60, %s12431_s13 }
 0x1bc   :  { %18541 = vst [vmem:[#allocation183_spill] sm:$0xff] %v13629_v28  ;;  %v1942_v2 = vmax.f32 %v13629_v28, 0.0  ;;  %18542 = vst [vmem:[#allocation184_spill] sm:$0xff] %v13638_v14  ;;  %v1212_v53 = vpop.f32.mrf.mxu0  ;;  %11448 = vmatprep.mubr.msk.bf16.mxu1 %vm2098_vm2, %v2039_v24  ;;  %v1943_v47 = vmax.f32 %v13638_v14, 0.0 }
 0x1bd   :  { %18543 = vst [vmem:[#allocation185_spill] sm:$0xff] %v13642_v54  ;;  %v13645_v26 = vadd.f32 %v13468_v10, %v1212_v53  ;;  %v1494_v45 = vpop.permute.xlu1 %1493  ;;  %v1496_v23 = vpop.permute.xlu0 %1495 }
 0x1be   :  { %v2040_v29 = vpack.c.bf16 %v1942_v2, %v1941_v57  ;;  %v13648_v43 = vadd.f32 %v1494_v45, %v13091_v4  ;;  %v11383_v33 = vpop.f32.mrf.mxu0  ;;  %v13657_v24 = vadd.f32 %v1496_v23, %v13088_v0  ;;  %v13661_v57 = vadd.f32 %v13468_v10, %v11382_v38  ;;  %v18551_v38 = vld [vmem:[#allocation74_spill] sm:$0xff] }
 0x1bf   :  { %18544 = vst [vmem:[#allocation186_spill] sm:$0xff] %v13645_v26  ;;  %1609 = vrot.lane.b32.xlu1 %v13642_v54, %s12431_s13  ;;  %1611 = vrot.lane.b32.xlu0 %v13645_v26, %s12431_s13 }
 0x1c0   :  { %18545 = vst [vmem:[#allocation187_spill] sm:$0xff] %v13648_v43  ;;  %v1944_v44 = vmax.f32 %v13648_v43, 0.0  ;;  %18546 = vst [vmem:[#allocation188_spill] sm:$0xff] %v13657_v24  ;;  %v1215_v53 = vpop.f32.mrf.mxu0  ;;  %11449 = vmatmul.mubr.msk.bf16.gmra.mxu1 %vm2098_vm2, %v2040_v29  ;;  %v1945_v29 = vmax.f32 %v13657_v24, 0.0 }
 0x1c1   :  { %18547 = vst [vmem:[#allocation189_spill] sm:$0xff] %v13661_v57  ;;  %v13664_v2 = vadd.f32 %v13468_v10, %v1215_v53  ;;  %v1498_v45 = vpop.permute.xlu1 %1497  ;;  %v1500_v28 = vpop.permute.xlu0 %1499 }
 0x1c2   :  { %v2041_v4 = vpack.c.bf16 %v1944_v44, %v1943_v47  ;;  %v13667_v26 = vadd.f32 %v1498_v45, %v18549_v37  ;;  %v11386_v14 = vpop.f32.mrf.mxu0  ;;  %v13676_v53 = vadd.f32 %v1500_v28, %v18551_v38  ;;  %v13680_v47 = vadd.f32 %v13468_v10, %v11383_v33 }
 0x1c3   :  { %18548 = vst [vmem:[#allocation190_spill] sm:$0xff] %v13664_v2  ;;  %1613 = vrot.lane.b32.xlu1 %v13664_v2, %s12431_s13  ;;  %1615 = vrot.lane.b32.xlu0 %v13661_v57, %s12431_s13 }
 0x1c4   :  { %18550 = vst [vmem:[#allocation191_spill] sm:$0xff] %v13667_v26  ;;  %v1946_v23 = vmax.f32 %v13667_v26, 0.0  ;;  %18552 = vst [vmem:[#allocation192_spill] sm:$0xff] %v13676_v53  ;;  %v1228_v43 = vpop.f32.mrf.mxu0  ;;  %11452 = vmatprep.mubr.msk.bf16.mxu1 %vm2098_vm2, %v2041_v4  ;;  %v1947_v4 = vmax.f32 %v13676_v53, 0.0  ;;  %v18567_v53 = vld [vmem:[#allocation5_spill] sm:$0xff] }
 0x1c5   :  { %18553 = vst [vmem:[#allocation193_spill] sm:$0xff] %v13680_v47  ;;  %v13683_v44 = vadd.f32 %v13468_v10, %v1228_v43  ;;  %v1502_v45 = vpop.permute.xlu1 %1501  ;;  %v1504_v37 = vpop.permute.xlu0 %1503 }
 0x1c6   :  { %v2042_v0 = vpack.c.bf16 %v1946_v23, %v1945_v29  ;;  %v13686_v57 = vadd.f32 %v1502_v45, %v13124_v48  ;;  %v11387_v24 = vpop.f32.mrf.mxu0  ;;  %v13695_v43 = vadd.f32 %v1504_v37, %v13121_v61  ;;  %v13699_v29 = vadd.f32 %v13468_v10, %v11386_v14 }
 0x1c7   :  { %18554 = vst [vmem:[#allocation194_spill] sm:$0xff] %v13683_v44  ;;  %1617 = vrot.lane.b32.xlu1 %v13680_v47, %s12431_s13  ;;  %1619 = vrot.lane.b32.xlu0 %v13683_v44, %s12431_s13 }
 0x1c8   :  { %18555 = vst [vmem:[#allocation195_spill] sm:$0xff] %v13686_v57  ;;  %v1948_v28 = vmax.f32 %v13686_v57, 0.0  ;;  %18556 = vst [vmem:[#allocation196_spill] sm:$0xff] %v13695_v43  ;;  %v1231_v33 = vpop.f32.mrf.mxu0  ;;  %11453 = vmatmul.mubr.msk.bf16.gmra.mxu1 %vm2098_vm2, %v2042_v0  ;;  %v1949_v0 = vmax.f32 %v13695_v43, 0.0  ;;  %v18566_v43 = vld [vmem:[#allocation8_spill] sm:$0xff] }
 0x1c9   :  { %18557 = vst [vmem:[#allocation197_spill] sm:$0xff] %v13699_v29  ;;  %v13702_v23 = vadd.f32 %v13468_v10, %v1231_v33  ;;  %v1506_v45 = vpop.permute.xlu1 %1505  ;;  %v1508_v26 = vpop.permute.xlu0 %1507 }
 0x1ca   :  { %v2043_v48 = vpack.c.bf16 %v1948_v28, %v1947_v4  ;;  %v13705_v38 = vadd.f32 %v1506_v45, %v13140_v20  ;;  %v13714_v14 = vadd.f32 %v1508_v26, %v13143_v3  ;;  %v13718_v4 = vadd.f32 %v13468_v10, %v11387_v24 }
 0x1cb   :  { %18558 = vst [vmem:[#allocation198_spill] sm:$0xff] %v13702_v23  ;;  %1621 = vrot.lane.b32.xlu1 %v13702_v23, %s12431_s13  ;;  %1623 = vrot.lane.b32.xlu0 %v13699_v29, %s12431_s13 }
 0x1cc   :  { %18559 = vst [vmem:[#allocation199_spill] sm:$0xff] %v13705_v38  ;;  %v1950_v37 = vmax.f32 %v13705_v38, 0.0  ;;  %18560 = vst [vmem:[#allocation200_spill] sm:$0xff] %v13714_v14  ;;  %11456 = vmatprep.mubr.msk.bf16.mxu1 %vm2098_vm2, %v2043_v48  ;;  %v18563_v38 = vld [vmem:[#allocation6_spill] sm:$0xff]  ;;  %v1951_v26 = vmax.f32 %v13714_v14, 0.0 }
 0x1cd   :  { %18561 = vst [vmem:[#allocation201_spill] sm:$0xff] %v13718_v4  ;;  %v1510_v28 = vpop.permute.xlu1 %1509  ;;  %v1512_v33 = vpop.permute.xlu0 %1511 }
 0x1ce   :  { %v2044_v45 = vpack.c.bf16 %v1950_v37, %v1949_v0  ;;  %v13721_v57 = vadd.f32 %v1510_v28, %v13162_v59  ;;  %v13730_v10 = vadd.f32 %v1512_v33, %v13159_v58 }
 0x1cf   :  { %1625 = vrot.lane.b32.xlu1 %v13718_v4, %s12431_s13  ;;  %3916 = vrot.lane.b32.xlu0 %v18563_v38, %s12432_s2 }
 0x1d0   :  { %18562 = vst [vmem:[#allocation202_spill] sm:$0xff] %v13721_v57  ;;  %v1952_v48 = vmax.f32 %v13721_v57, 0.0  ;;  %18564 = vst [vmem:[#allocation203_spill] sm:$0xff] %v13730_v10  ;;  %11457 = vmatmul.mubr.msk.bf16.gmra.mxu1 %vm2098_vm2, %v2044_v45  ;;  %v1953_v14 = vmax.f32 %v13730_v10, 0.0 }
 0x1d1   :  { %v1514_v24 = vpop.permute.xlu1 %1513  ;;  %v1516_v0 = vpop.permute.xlu0 %1515 }
 0x1d2   :  { %v2045_v37 = vpack.c.bf16 %v1952_v48, %v1951_v26  ;;  %v13734_v28 = vadd.f32 %v1514_v24, %v13178_v6  ;;  %v13743_v33 = vadd.f32 %v1516_v0, %v13181_v12 }
 0x1d3   :  { %3918 = vrot.lane.b32.xlu1 %v18566_v43, %s12432_s2  ;;  %3920 = vrot.lane.b32.xlu0 %v18567_v53, %s12432_s2  ;;  %v18570_v43 = vld [vmem:[#allocation7_spill] sm:$0xff]  ;;  %v18571_v53 = vld [vmem:[#allocation9_spill] sm:$0xff] }
 0x1d4   :  { %18565 = vst [vmem:[#allocation204_spill] sm:$0xff] %v13734_v28  ;;  %v1954_v57 = vmax.f32 %v13734_v28, 0.0  ;;  %18568 = vst [vmem:[#allocation205_spill] sm:$0xff] %v13743_v33  ;;  %11460 = vmatprep.mubr.msk.bf16.mxu1 %vm2098_vm2, %v2045_v37  ;;  %v1955_v10 = vmax.f32 %v13743_v33, 0.0 }
 0x1d5   :  { %v1518_v45 = vpop.permute.xlu1 %1517  ;;  %v1520_v26 = vpop.permute.xlu0 %1519 }
 0x1d6   :  { %v2046_v48 = vpack.c.bf16 %v1954_v57, %v1953_v14  ;;  %v13747_v24 = vadd.f32 %v1518_v45, %v13200_v40  ;;  %v13756_v0 = vadd.f32 %v1520_v26, %v13197_v15 }
 0x1d7   :  { %3922 = vrot.lane.b32.xlu1 %v18570_v43, %s12432_s2  ;;  %3924 = vrot.lane.b32.xlu0 %v18571_v53, %s12432_s2  ;;  %v18574_v43 = vld [vmem:[#allocation11_spill] sm:$0xff]  ;;  %v18575_v53 = vld [vmem:[#allocation10_spill] sm:$0xff] }
 0x1d8   :  { %18569 = vst [vmem:[#allocation206_spill] sm:$0xff] %v13747_v24  ;;  %v1956_v28 = vmax.f32 %v13747_v24, 0.0  ;;  %18572 = vst [vmem:[#allocation207_spill] sm:$0xff] %v13756_v0  ;;  %11461 = vmatmul.mubr.msk.bf16.gmra.mxu1 %vm2098_vm2, %v2046_v48  ;;  %v1957_v33 = vmax.f32 %v13756_v0, 0.0 }
 0x1d9   :  { %v1522_v37 = vpop.permute.xlu1 %1521  ;;  %v1524_v57 = vpop.permute.xlu0 %1523 }
 0x1da   :  { %v2047_v14 = vpack.c.bf16 %v1956_v28, %v1955_v10  ;;  %v13760_v45 = vadd.f32 %v1522_v37, %v13216_v22  ;;  %v13769_v26 = vadd.f32 %v1524_v57, %v13219_v50 }
 0x1db   :  { %3926 = vrot.lane.b32.xlu1 %v18574_v43, %s12432_s2  ;;  %3928 = vrot.lane.b32.xlu0 %v18575_v53, %s12432_s2  ;;  %v18578_v43 = vld [vmem:[#allocation12_spill] sm:$0xff]  ;;  %v18579_v53 = vld [vmem:[#allocation13_spill] sm:$0xff] }
 0x1dc   :  { %18573 = vst [vmem:[#allocation208_spill] sm:$0xff] %v13760_v45  ;;  %v1958_v24 = vmax.f32 %v13760_v45, 0.0  ;;  %18576 = vst [vmem:[#allocation209_spill] sm:$0xff] %v13769_v26  ;;  %11464 = vmatprep.mubr.msk.bf16.mxu1 %vm2098_vm2, %v2047_v14  ;;  %v1959_v0 = vmax.f32 %v13769_v26, 0.0 }
 0x1dd   :  { %v1526_v48 = vpop.permute.xlu1 %1525  ;;  %v1528_v10 = vpop.permute.xlu0 %1527 }
 0x1de   :  { %v2048_v28 = vpack.c.bf16 %v1958_v24, %v1957_v33  ;;  %v13773_v37 = vadd.f32 %v1526_v48, %v13238_v25  ;;  %v13782_v57 = vadd.f32 %v1528_v10, %v13235_v11 }
 0x1df   :  { %3930 = vrot.lane.b32.xlu1 %v18578_v43, %s12432_s2  ;;  %3932 = vrot.lane.b32.xlu0 %v18579_v53, %s12432_s2  ;;  %v18582_v43 = vld [vmem:[#allocation15_spill] sm:$0xff]  ;;  %v18583_v53 = vld [vmem:[#allocation14_spill] sm:$0xff] }
 0x1e0   :  { %18577 = vst [vmem:[#allocation210_spill] sm:$0xff] %v13773_v37  ;;  %v1960_v45 = vmax.f32 %v13773_v37, 0.0  ;;  %18580 = vst [vmem:[#allocation211_spill] sm:$0xff] %v13782_v57  ;;  %11465 = vmatmul.mubr.msk.bf16.gmra.mxu1 %vm2098_vm2, %v2048_v28  ;;  %v1961_v26 = vmax.f32 %v13782_v57, 0.0 }
 0x1e1   :  { %v1530_v14 = vpop.permute.xlu1 %1529  ;;  %v1532_v33 = vpop.permute.xlu0 %1531 }
 0x1e2   :  { %v2049_v24 = vpack.c.bf16 %v1960_v45, %v1959_v0  ;;  %v13786_v48 = vadd.f32 %v1530_v14, %v13254_v16  ;;  %v13795_v10 = vadd.f32 %v1532_v33, %v13257_v32 }
 0x1e3   :  { %3934 = vrot.lane.b32.xlu1 %v18582_v43, %s12432_s2  ;;  %3936 = vrot.lane.b32.xlu0 %v18583_v53, %s12432_s2  ;;  %v18586_v43 = vld [vmem:[#allocation16_spill] sm:$0xff]  ;;  %v18587_v53 = vld [vmem:[#allocation17_spill] sm:$0xff] }
 0x1e4   :  { %18581 = vst [vmem:[#allocation212_spill] sm:$0xff] %v13786_v48  ;;  %v1962_v37 = vmax.f32 %v13786_v48, 0.0  ;;  %18584 = vst [vmem:[#allocation213_spill] sm:$0xff] %v13795_v10  ;;  %11468 = vmatprep.mubr.msk.bf16.mxu1 %vm2098_vm2, %v2049_v24  ;;  %v1963_v57 = vmax.f32 %v13795_v10, 0.0 }
 0x1e5   :  { %v1534_v28 = vpop.permute.xlu1 %1533  ;;  %v1536_v0 = vpop.permute.xlu0 %1535 }
 0x1e6   :  { %v2050_v45 = vpack.c.bf16 %v1962_v37, %v1961_v26  ;;  %v13799_v14 = vadd.f32 %v1534_v28, %v13276_v35  ;;  %v13808_v33 = vadd.f32 %v1536_v0, %v13273_v21 }
 0x1e7   :  { %3938 = vrot.lane.b32.xlu1 %v18586_v43, %s12432_s2  ;;  %3940 = vrot.lane.b32.xlu0 %v18587_v53, %s12432_s2  ;;  %v18590_v43 = vld [vmem:[#allocation19_spill] sm:$0xff]  ;;  %v18591_v53 = vld [vmem:[#allocation18_spill] sm:$0xff] }
 0x1e8   :  { %18585 = vst [vmem:[#allocation214_spill] sm:$0xff] %v13799_v14  ;;  %v1964_v48 = vmax.f32 %v13799_v14, 0.0  ;;  %18588 = vst [vmem:[#allocation215_spill] sm:$0xff] %v13808_v33  ;;  %11469 = vmatmul.mubr.msk.bf16.gmra.mxu1 %vm2098_vm2, %v2050_v45  ;;  %v1965_v10 = vmax.f32 %v13808_v33, 0.0 }
 0x1e9   :  { %v1538_v24 = vpop.permute.xlu1 %1537  ;;  %v1540_v26 = vpop.permute.xlu0 %1539 }
 0x1ea   :  { %v2051_v37 = vpack.c.bf16 %v1964_v48, %v1963_v57  ;;  %v13812_v28 = vadd.f32 %v1538_v24, %v13295_v17  ;;  %v13821_v0 = vadd.f32 %v1540_v26, %v13298_v8 }
 0x1eb   :  { %3942 = vrot.lane.b32.xlu1 %v18590_v43, %s12432_s2  ;;  %3944 = vrot.lane.b32.xlu0 %v18591_v53, %s12432_s2  ;;  %v18594_v43 = vld [vmem:[#allocation20_spill] sm:$0xff]  ;;  %v18595_v53 = vld [vmem:[#allocation21_spill] sm:$0xff] }
 0x1ec   :  { %18589 = vst [vmem:[#allocation216_spill] sm:$0xff] %v13812_v28  ;;  %v1966_v14 = vmax.f32 %v13812_v28, 0.0  ;;  %18592 = vst [vmem:[#allocation217_spill] sm:$0xff] %v13821_v0  ;;  %11472 = vmatprep.mubr.msk.bf16.mxu1 %vm2098_vm2, %v2051_v37  ;;  %v1967_v33 = vmax.f32 %v13821_v0, 0.0 }
 0x1ed   :  { %v1542_v45 = vpop.permute.xlu1 %1541  ;;  %v1544_v57 = vpop.permute.xlu0 %1543 }
 0x1ee   :  { %v2052_v48 = vpack.c.bf16 %v1966_v14, %v1965_v10  ;;  %v13825_v24 = vadd.f32 %v1542_v45, %v13317_v31  ;;  %v13834_v26 = vadd.f32 %v1544_v57, %v13314_v41 }
 0x1ef   :  { %3946 = vrot.lane.b32.xlu1 %v18594_v43, %s12432_s2  ;;  %3948 = vrot.lane.b32.xlu0 %v18595_v53, %s12432_s2  ;;  %v18598_v43 = vld [vmem:[#allocation23_spill] sm:$0xff]  ;;  %v18599_v53 = vld [vmem:[#allocation22_spill] sm:$0xff] }
 0x1f0   :  { %18593 = vst [vmem:[#allocation218_spill] sm:$0xff] %v13825_v24  ;;  %v1968_v28 = vmax.f32 %v13825_v24, 0.0  ;;  %18596 = vst [vmem:[#allocation219_spill] sm:$0xff] %v13834_v26  ;;  %11473 = vmatmul.mubr.msk.bf16.gmra.mxu1 %vm2098_vm2, %v2052_v48  ;;  %v12390_v24 = vld [vmem:[%s17777_s3 + $0x10] sm:$0xff]   ;;  %v1969_v57 = vmax.f32 %v13834_v26, 0.0  ;;  %v18603_v26 = vld [vmem:[#allocation25_spill] sm:$0xff] }
 0x1f1   :  { %v1546_v37 = vpop.permute.xlu1 %1545  ;;  %v1548_v10 = vpop.permute.xlu0 %1547  ;;  %11654 = vmatprep.subr.bf16.mxu1 %v12390_v24 }
 0x1f2   :  { %v2053_v14 = vpack.c.bf16 %v1968_v28, %v1967_v33  ;;  %v13838_v45 = vadd.f32 %v1546_v37, %v13333_v36  ;;  %v13850_v0 = vadd.f32 %v1548_v10, %v13336_v52  ;;  %11655 = vmatpush3.bf16.msra.mxu1 %v12390_v24 }
 0x1f3   :  { %3950 = vrot.lane.b32.xlu1 %v18598_v43, %s12432_s2  ;;  %3952 = vrot.lane.b32.xlu0 %v18599_v53, %s12432_s2  ;;  %v18602_v53 = vld [vmem:[#allocation24_spill] sm:$0xff] }
 0x1f4   :  { %18597 = vst [vmem:[#allocation220_spill] sm:$0xff] %v13838_v45  ;;  %v1970_v48 = vmax.f32 %v13838_v45, 0.0  ;;  %18600 = vst [vmem:[#allocation221_spill] sm:$0xff] %v13850_v0  ;;  %11476 = vmatprep.mubr.msk.bf16.mxu1 %vm2098_vm2, %v2053_v14  ;;  %v1971_v45 = vmax.f32 %v13850_v0, 0.0 }
 0x1f5   :  { %v1550_v33 = vpop.permute.xlu1 %1549  ;;  %v1552_v28 = vpop.permute.xlu0 %1551 }
 0x1f6   :  { %v2054_v37 = vpack.c.bf16 %v1970_v48, %v1969_v57  ;;  %v13854_v43 = vadd.f32 %v1550_v33, %v13355_v55  ;;  %v13863_v14 = vadd.f32 %v1552_v28, %v13352_v51 }
 0x1f7   :  { %3954 = vrot.lane.b32.xlu1 %v18602_v53, %s12432_s2  ;;  %3956 = vrot.lane.b32.xlu0 %v18603_v26, %s12432_s2  ;;  %v18606_v53 = vld [vmem:[#allocation27_spill] sm:$0xff]  ;;  %v18607_v26 = vld [vmem:[#allocation26_spill] sm:$0xff] }
 0x1f8   :  { %18601 = vst [vmem:[#allocation222_spill] sm:$0xff] %v13854_v43  ;;  %v1972_v10 = vmax.f32 %v13854_v43, 0.0  ;;  %18604 = vst [vmem:[#allocation223_spill] sm:$0xff] %v13863_v14  ;;  %11477 = vmatmul.mubr.msk.bf16.gmra.mxu1 %vm2098_vm2, %v2054_v37  ;;  %v1973_v0 = vmax.f32 %v13863_v14, 0.0 }
 0x1f9   :  { %v1554_v57 = vpop.permute.xlu1 %1553  ;;  %v1556_v48 = vpop.permute.xlu0 %1555 }
 0x1fa   :  { %v2055_v33 = vpack.c.bf16 %v1972_v10, %v1971_v45  ;;  %v13867_v24 = vadd.f32 %v1554_v57, %v13371_v1  ;;  %v13876_v28 = vadd.f32 %v1556_v48, %v13374_v46 }
 0x1fb   :  { %3958 = vrot.lane.b32.xlu1 %v18606_v53, %s12432_s2  ;;  %3960 = vrot.lane.b32.xlu0 %v18607_v26, %s12432_s2  ;;  %v18610_v53 = vld [vmem:[#allocation28_spill] sm:$0xff]  ;;  %v18611_v26 = vld [vmem:[#allocation29_spill] sm:$0xff] }
 0x1fc   :  { %18605 = vst [vmem:[#allocation224_spill] sm:$0xff] %v13867_v24  ;;  %v1974_v43 = vmax.f32 %v13867_v24, 0.0  ;;  %18608 = vst [vmem:[#allocation225_spill] sm:$0xff] %v13876_v28  ;;  %11480 = vmatprep.mubr.msk.bf16.mxu1 %vm2098_vm2, %v2055_v33  ;;  %v1975_v14 = vmax.f32 %v13876_v28, 0.0 }
 0x1fd   :  { %v1558_v37 = vpop.permute.xlu1 %1557  ;;  %v1560_v45 = vpop.permute.xlu0 %1559 }
 0x1fe   :  { %v2056_v10 = vpack.c.bf16 %v1974_v43, %v1973_v0  ;;  %v13880_v57 = vadd.f32 %v1558_v37, %v13393_v34  ;;  %v13889_v48 = vadd.f32 %v1560_v45, %v13390_v5 }
 0x1ff   :  { %3962 = vrot.lane.b32.xlu1 %v18610_v53, %s12432_s2  ;;  %3964 = vrot.lane.b32.xlu0 %v18611_v26, %s12432_s2  ;;  %v18614_v53 = vld [vmem:[#allocation31_spill] sm:$0xff]  ;;  %v18615_v26 = vld [vmem:[#allocation30_spill] sm:$0xff] }
 0x200   :  { %18609 = vst [vmem:[#allocation226_spill] sm:$0xff] %v13880_v57  ;;  %v1976_v24 = vmax.f32 %v13880_v57, 0.0  ;;  %18612 = vst [vmem:[#allocation227_spill] sm:$0xff] %v13889_v48  ;;  %11481 = vmatmul.mubr.msk.bf16.gmra.mxu1 %vm2098_vm2, %v2056_v10  ;;  %v1977_v28 = vmax.f32 %v13889_v48, 0.0 }
 0x201   :  { %v1562_v33 = vpop.permute.xlu1 %1561  ;;  %v1564_v43 = vpop.permute.xlu0 %1563 }
 0x202   :  { %v2057_v0 = vpack.c.bf16 %v1976_v24, %v1975_v14  ;;  %v13893_v37 = vadd.f32 %v1562_v33, %v13409_v56  ;;  %v13902_v45 = vadd.f32 %v1564_v43, %v13412_v13 }
 0x203   :  { %3966 = vrot.lane.b32.xlu1 %v18614_v53, %s12432_s2  ;;  %3968 = vrot.lane.b32.xlu0 %v18615_v26, %s12432_s2  ;;  %v18618_v53 = vld [vmem:[#allocation32_spill] sm:$0xff]  ;;  %v18619_v26 = vld [vmem:[#allocation33_spill] sm:$0xff] }
 0x204   :  { %18613 = vst [vmem:[#allocation228_spill] sm:$0xff] %v13893_v37  ;;  %v1978_v57 = vmax.f32 %v13893_v37, 0.0  ;;  %18616 = vst [vmem:[#allocation229_spill] sm:$0xff] %v13902_v45  ;;  %11484 = vmatprep.mubr.msk.bf16.mxu1 %vm2098_vm2, %v2057_v0  ;;  %v1979_v48 = vmax.f32 %v13902_v45, 0.0 }
 0x205   :  { %v1566_v10 = vpop.permute.xlu1 %1565  ;;  %v1568_v14 = vpop.permute.xlu0 %1567 }
 0x206   :  { %v2058_v24 = vpack.c.bf16 %v1978_v57, %v1977_v28  ;;  %v13906_v33 = vadd.f32 %v1566_v10, %v13431_v18  ;;  %v13915_v43 = vadd.f32 %v1568_v14, %v13428_v63 }
 0x207   :  { %3970 = vrot.lane.b32.xlu1 %v18618_v53, %s12432_s2  ;;  %3972 = vrot.lane.b32.xlu0 %v18619_v26, %s12432_s2  ;;  %v18622_v53 = vld [vmem:[#allocation35_spill] sm:$0xff]  ;;  %v18623_v26 = vld [vmem:[#allocation34_spill] sm:$0xff] }
 0x208   :  { %18617 = vst [vmem:[#allocation230_spill] sm:$0xff] %v13906_v33  ;;  %v1980_v37 = vmax.f32 %v13906_v33, 0.0  ;;  %18620 = vst [vmem:[#allocation231_spill] sm:$0xff] %v13915_v43  ;;  %11485 = vmatmul.mubr.msk.bf16.gmra.mxu1 %vm2098_vm2, %v2058_v24  ;;  %v1981_v45 = vmax.f32 %v13915_v43, 0.0  ;;  %v18627_v43 = vld [vmem:[#allocation37_spill] sm:$0xff] }
 0x209   :  { %v1570_v0 = vpop.permute.xlu1 %1569  ;;  %v1572_v28 = vpop.permute.xlu0 %1571 }
 0x20a   :  { %v2059_v57 = vpack.c.bf16 %v1980_v37, %v1979_v48  ;;  %v13919_v10 = vadd.f32 %v1570_v0, %v13447_v7  ;;  %v13928_v14 = vadd.f32 %v1572_v28, %v13450_v27  ;;  %v18630_v7 = vld [vmem:[#allocation39_spill] sm:$0xff] }
 0x20b   :  { %3974 = vrot.lane.b32.xlu1 %v18622_v53, %s12432_s2  ;;  %3976 = vrot.lane.b32.xlu0 %v18623_v26, %s12432_s2  ;;  %v18626_v53 = vld [vmem:[#allocation36_spill] sm:$0xff] }
 0x20c   :  { %18621 = vst [vmem:[#allocation232_spill] sm:$0xff] %v13919_v10  ;;  %v1982_v33 = vmax.f32 %v13919_v10, 0.0  ;;  %18624 = vst [vmem:[#allocation233_spill] sm:$0xff] %v13928_v14  ;;  %11488 = vmatprep.mubr.msk.bf16.mxu1 %vm2098_vm2, %v2059_v57  ;;  %v1983_v10 = vmax.f32 %v13928_v14, 0.0  ;;  %v13943_v57 = vld [vmem:[%s17778_s4] ss:$0 sm:$0xff] }
 0x20d   :  { %v1574_v24 = vpop.permute.xlu1 %1573  ;;  %v11394_v48 = vpop.f32.mrf.mxu1 }
 0x20e   :  { %v2060_v37 = vpack.c.bf16 %v1982_v33, %v1981_v45  ;;  %v13932_v0 = vadd.f32 %v1574_v24, %v13474_v42  ;;  %v1576_v38 = vpop.permute.xlu0 %1575  ;;  %v2334_v27 = vadd.f32 %v11394_v48, %v13943_v57 }
 0x20f   :  { %3978 = vrot.lane.b32.xlu1 %v18626_v53, %s12432_s2  ;;  %v2325_v26 = vpop.f32.mrf.mxu1  ;;  %3980 = vrot.lane.b32.xlu0 %v18627_v43, %s12432_s2  ;;  %v13946_v45 = vadd.f32 %v1576_v38, %v13471_v30  ;;  %v18631_v30 = vld [vmem:[#allocation38_spill] sm:$0xff] }
 0x210   :  { %18625 = vst [vmem:[#allocation234_spill] sm:$0xff] %v13932_v0  ;;  %v1984_v28 = vmax.f32 %v13932_v0, 0.0  ;;  %11489 = vmatmul.mubr.msk.bf16.gmra.mxu1 %vm2098_vm2, %v2060_v37  ;;  %v2326_v42 = vadd.f32 %v13943_v57, %v2325_v26  ;;  %v2838_v18 = vmax.f32 %v2334_v27, 0.0 }
 0x211   :  { %18628 = vst [vmem:[#allocation235_spill] sm:$0xff] %v13946_v45  ;;  %v1578_v33 = vpop.permute.xlu1 %1577  ;;  %v11395_v24 = vpop.f32.mrf.mxu1  ;;  %v1985_v37 = vmax.f32 %v13946_v45, 0.0  ;;  %v18634_v45 = vld [vmem:[#allocation40_spill] sm:$0xff] }
 0x212   :  { %v2061_v53 = vpack.c.bf16 %v1984_v28, %v1983_v10  ;;  %v13951_v43 = vadd.f32 %v1578_v33, %v13490_v19  ;;  %v2337_v0 = vadd.f32 %v11395_v24, %v13943_v57  ;;  %v1580_v14 = vpop.permute.xlu0 %1579  ;;  %v2836_v24 = vmax.f32 %v2326_v42, 0.0 }
 0x213   :  { %3982 = vrot.lane.b32.xlu1 %v18630_v7, %s12432_s2  ;;  %v2328_v38 = vpop.f32.mrf.mxu1  ;;  %3984 = vrot.lane.b32.xlu0 %v18631_v30, %s12432_s2  ;;  %v13962_v26 = vadd.f32 %v1580_v14, %v13493_v39  ;;  %v18635_v14 = vld [vmem:[#allocation41_spill] sm:$0xff] }
 0x214   :  { %18629 = vst [vmem:[#allocation236_spill] sm:$0xff] %v13951_v43  ;;  %v1986_v10 = vmax.f32 %v13951_v43, 0.0  ;;  %v2329_v28 = vadd.f32 %v13943_v57, %v2328_v38  ;;  %11492 = vmatprep.mubr.msk.bf16.mxu1 %vm2098_vm2, %v2061_v53  ;;  %v2839_v33 = vmax.f32 %v2337_v0, 0.0  ;;  %v18636_v0 = vld [vmem:[#allocation157_spill] sm:$0xff] }
 0x215   :  { %18632 = vst [vmem:[#allocation237_spill] sm:$0xff] %v13962_v26  ;;  %v1582_v48 = vpop.permute.xlu1 %1581  ;;  %v1987_v38 = vmax.f32 %v13962_v26, 0.0 }
 0x216   :  { %v2062_v19 = vpack.c.bf16 %v1986_v10, %v1985_v37  ;;  %v2837_v7 = vmax.f32 %v2329_v28, 0.0  ;;  %v13967_v63 = vadd.f32 %v1582_v48, %v13512_v49  ;;  %v1584_v30 = vpop.permute.xlu0 %1583  ;;  %v2965_v10 = vpack.c.bf16 %v2839_v33, %v2838_v18  ;;  %v18638_v48 = vld [vmem:[#allocation161_spill] sm:$0xff]  ;;  %v18643_v33 = vld [vmem:[#allocation42_spill] sm:$0xff] }
 0x217   :  { %3986 = vrot.lane.b32.xlu1 %v18634_v45, %s12432_s2  ;;  %3988 = vrot.lane.b32.xlu0 %v18635_v14, %s12432_s2  ;;  %v13976_v42 = vadd.f32 %v1584_v30, %v18636_v0 }
 0x218   :  { %18633 = vst [vmem:[#allocation238_spill] sm:$0xff] %v13967_v63  ;;  %v2964_v43 = vpack.c.bf16 %v2837_v7, %v2836_v24  ;;  %v1988_v53 = vmax.f32 %v13967_v63, 0.0  ;;  %v11398_v37 = vpop.f32.mrf.mxu1  ;;  %11493 = vmatmul.mubr.msk.bf16.gmra.mxu1 %vm2098_vm2, %v2062_v19  ;;  %v18640_v7 = vld [vmem:[#allocation43_spill] sm:$0xff]  ;;  %v18641_v19 = vld [vmem:[#allocation162_spill] sm:$0xff] }
 0x219   :  { %18637 = vst [vmem:[#allocation239_spill] sm:$0xff] %v13976_v42  ;;  %v1586_v28 = vpop.permute.xlu1 %1585  ;;  %v1989_v30 = vmax.f32 %v13976_v42, 0.0  ;;  %v18644_v42 = vld [vmem:[#allocation166_spill] sm:$0xff] }
 0x21a   :  { %v2063_v27 = vpack.c.bf16 %v1988_v53, %v1987_v38  ;;  %v13980_v49 = vadd.f32 %v1586_v28, %v18638_v48  ;;  %v1588_v45 = vpop.permute.xlu0 %1587  ;;  %v2341_v39 = vpop.f32.mrf.mxu1  ;;  %11524 = vmatprep.mubr.msk.bf16.mxu0 %vm2098_vm2, %v2964_v43 }
 0x21b   :  { %3990 = vrot.lane.b32.xlu1 %v18640_v7, %s12432_s2  ;;  %11525 = vmatmul.mubr.msk.bf16.vlgmr.msra.gmra.mxu0 %vm2098_vm2, %v2965_v10  ;;  %v13989_v18 = vadd.f32 %v1588_v45, %v18641_v19  ;;  %v2342_v43 = vadd.f32 %v13943_v57, %v2341_v39  ;;  %v2350_v10 = vadd.f32 %v11398_v37, %v13943_v57  ;;  %v18649_v37 = vld [vmem:[#allocation45_spill] sm:$0xff] }
 0x21c   :  { %18639 = vst [vmem:[#allocation240_spill] sm:$0xff] %v13980_v49  ;;  %v1990_v24 = vmax.f32 %v13980_v49, 0.0  ;;  %3992 = vrot.lane.b32.xlu0 %v18643_v33, %s12432_s2  ;;  %v11399_v38 = vpop.f32.mrf.mxu1  ;;  %11496 = vmatprep.mubr.msk.bf16.mxu1 %vm2098_vm2, %v2063_v27  ;;  %v18646_v33 = vld [vmem:[#allocation44_spill] sm:$0xff] }
 0x21d   :  { %18642 = vst [vmem:[#allocation241_spill] sm:$0xff] %v13989_v18  ;;  %v2353_v53 = vadd.f32 %v11399_v38, %v13943_v57  ;;  %v1590_v28 = vpop.permute.xlu1 %1589  ;;  %v1991_v27 = vmax.f32 %v13989_v18, 0.0  ;;  %v18647_v38 = vld [vmem:[#allocation165_spill] sm:$0xff] }
 0x21e   :  { %v2064_v63 = vpack.c.bf16 %v1990_v24, %v1989_v30  ;;  %v13998_v26 = vadd.f32 %v1590_v28, %v18644_v42  ;;  %v1592_v49 = vpop.permute.xlu0 %1591  ;;  %v2344_v45 = vpop.f32.mrf.mxu1  ;;  %v2840_v24 = vmax.f32 %v2342_v43, 0.0  ;;  %v2842_v42 = vmax.f32 %v2350_v10, 0.0 }
 0x21f   :  { %v2345_v7 = vadd.f32 %v13943_v57, %v2344_v45  ;;  %3994 = vrot.lane.b32.xlu1 %v18646_v33, %s12432_s2  ;;  %v2843_v14 = vmax.f32 %v2353_v53, 0.0  ;;  %v14006_v19 = vadd.f32 %v1592_v49, %v18647_v38  ;;  %v18650_v33 = vld [vmem:[#allocation169_spill] sm:$0xff]  ;;  %v18652_v49 = vld [vmem:[#allocation47_spill] sm:$0xff] }
 0x220   :  { %18645 = vst [vmem:[#allocation242_spill] sm:$0xff] %v13998_v26  ;;  %v1992_v39 = vmax.f32 %v13998_v26, 0.0  ;;  %3996 = vrot.lane.b32.xlu0 %v18649_v37, %s12432_s2  ;;  %v11402_v30 = vpop.f32.mrf.mxu1  ;;  %11497 = vmatmul.mubr.msk.bf16.gmra.mxu1 %vm2098_vm2, %v2064_v63  ;;  %v18653_v63 = vld [vmem:[#allocation170_spill] sm:$0xff] }
 0x221   :  { %18648 = vst [vmem:[#allocation243_spill] sm:$0xff] %v14006_v19  ;;  %v2841_v28 = vmax.f32 %v2345_v7, 0.0  ;;  %v1594_v45 = vpop.permute.xlu1 %1593  ;;  %v2967_v38 = vpack.c.bf16 %v2843_v14, %v2842_v42  ;;  %v1993_v37 = vmax.f32 %v14006_v19, 0.0  ;;  %v18655_v7 = vld [vmem:[#allocation46_spill] sm:$0xff]  ;;  %v2366_v14 = vadd.f32 %v11402_v30, %v13943_v57 }
 0x222   :  { %v2065_v48 = vpack.c.bf16 %v1992_v39, %v1991_v27  ;;  %v14012_v0 = vadd.f32 %v1594_v45, %v18650_v33  ;;  %v1596_v53 = vpop.permute.xlu0 %1595  ;;  %v2357_v18 = vpop.f32.mrf.mxu1 }
 0x223   :  { %v2966_v26 = vpack.c.bf16 %v2841_v28, %v2840_v24  ;;  %3998 = vrot.lane.b32.xlu1 %v18652_v49, %s12432_s2  ;;  %v14019_v43 = vadd.f32 %v1596_v53, %v18653_v63  ;;  %v2358_v27 = vadd.f32 %v13943_v57, %v2357_v18  ;;  %v18656_v28 = vld [vmem:[#allocation174_spill] sm:$0xff]  ;;  %v2846_v49 = vmax.f32 %v2366_v14, 0.0 }
 0x224   :  { %18651 = vst [vmem:[#allocation244_spill] sm:$0xff] %v14012_v0  ;;  %v1994_v13 = vmax.f32 %v14012_v0, 0.0  ;;  %4000 = vrot.lane.b32.xlu0 %v18655_v7, %s12432_s2  ;;  %v11403_v10 = vpop.f32.mrf.mxu1  ;;  %11500 = vmatprep.mubr.msk.bf16.mxu1 %vm2098_vm2, %v2065_v48  ;;  %v18658_v48 = vld [vmem:[#allocation48_spill] sm:$0xff]  ;;  %v18659_v7 = vld [vmem:[#allocation173_spill] sm:$0xff] }
 0x225   :  { %18654 = vst [vmem:[#allocation245_spill] sm:$0xff] %v14019_v43  ;;  %v2369_v39 = vadd.f32 %v11403_v10, %v13943_v57  ;;  %v1598_v24 = vpop.permute.xlu1 %1597  ;;  %11528 = vmatprep.mubr.msk.bf16.mxu0 %vm2098_vm2, %v2966_v26  ;;  %v1995_v18 = vmax.f32 %v14019_v43, 0.0 }
 0x226   :  { %v2066_v42 = vpack.c.bf16 %v1994_v13, %v1993_v37  ;;  %v14029_v45 = vadd.f32 %v1598_v24, %v18656_v28  ;;  %v1600_v53 = vpop.permute.xlu0 %1599  ;;  %v2360_v0 = vpop.f32.mrf.mxu1  ;;  %11529 = vmatmul.mubr.msk.bf16.gmra.mxu0 %vm2098_vm2, %v2967_v38  ;;  %v18661_v13 = vld [vmem:[#allocation49_spill] sm:$0xff]  ;;  %v2844_v38 = vmax.f32 %v2358_v27, 0.0 }
 0x227   :  { %v2361_v19 = vadd.f32 %v13943_v57, %v2360_v0  ;;  %4002 = vrot.lane.b32.xlu1 %v18658_v48, %s12432_s2  ;;  %v2847_v10 = vmax.f32 %v2369_v39, 0.0  ;;  %v14038_v30 = vadd.f32 %v1600_v53, %v18659_v7  ;;  %v18663_v53 = vld [vmem:[#allocation51_spill] sm:$0xff] }
 0x228   :  { %18657 = vst [vmem:[#allocation246_spill] sm:$0xff] %v14029_v45  ;;  %v1996_v26 = vmax.f32 %v14029_v45, 0.0  ;;  %4004 = vrot.lane.b32.xlu0 %v18661_v13, %s12432_s2  ;;  %v11406_v37 = vpop.f32.mrf.mxu1  ;;  %11501 = vmatmul.mubr.msk.bf16.gmra.mxu1 %vm2098_vm2, %v2066_v42  ;;  %v18664_v42 = vld [vmem:[#allocation178_spill] sm:$0xff] }
 0x229   :  { %18660 = vst [vmem:[#allocation247_spill] sm:$0xff] %v14038_v30  ;;  %v2845_v24 = vmax.f32 %v2361_v19, 0.0  ;;  %v1602_v0 = vpop.permute.xlu1 %1601  ;;  %v2969_v7 = vpack.c.bf16 %v2847_v10, %v2846_v49  ;;  %v1997_v13 = vmax.f32 %v14038_v30, 0.0  ;;  %v18666_v19 = vld [vmem:[#allocation50_spill] sm:$0xff]  ;;  %v2382_v49 = vadd.f32 %v11406_v37, %v13943_v57 }
 0x22a   :  { %v2067_v28 = vpack.c.bf16 %v1996_v26, %v1995_v18  ;;  %v14044_v48 = vadd.f32 %v1602_v0, %v13604_v9  ;;  %v1604_v39 = vpop.permute.xlu0 %1603  ;;  %v2373_v43 = vpop.f32.mrf.mxu1 }
 0x22b   :  { %v2968_v45 = vpack.c.bf16 %v2845_v24, %v2844_v38  ;;  %4006 = vrot.lane.b32.xlu1 %v18663_v53, %s12432_s2  ;;  %v14051_v27 = vadd.f32 %v1604_v39, %v18664_v42  ;;  %v2374_v18 = vadd.f32 %v13943_v57, %v2373_v43  ;;  %v2850_v30 = vmax.f32 %v2382_v49, 0.0 }
 0x22c   :  { %18662 = vst [vmem:[#allocation248_spill] sm:$0xff] %v14044_v48  ;;  %v1998_v63 = vmax.f32 %v14044_v48, 0.0  ;;  %4008 = vrot.lane.b32.xlu0 %v18666_v19, %s12432_s2  ;;  %v11407_v14 = vpop.f32.mrf.mxu1  ;;  %11504 = vmatprep.mubr.msk.bf16.mxu1 %vm2098_vm2, %v2067_v28  ;;  %v18668_v28 = vld [vmem:[#allocation52_spill] sm:$0xff] }
 0x22d   :  { %18665 = vst [vmem:[#allocation249_spill] sm:$0xff] %v14051_v27  ;;  %v2385_v26 = vadd.f32 %v11407_v14, %v13943_v57  ;;  %v1606_v38 = vpop.permute.xlu1 %1605  ;;  %11532 = vmatprep.mubr.msk.bf16.mxu0 %vm2098_vm2, %v2968_v45  ;;  %v1999_v43 = vmax.f32 %v14051_v27, 0.0 }
 0x22e   :  { %v2068_v10 = vpack.c.bf16 %v1998_v63, %v1997_v13  ;;  %v14061_v24 = vadd.f32 %v1606_v38, %v13626_v62  ;;  %v1608_v0 = vpop.permute.xlu0 %1607  ;;  %v2376_v39 = vpop.f32.mrf.mxu1  ;;  %11533 = vmatmul.mubr.msk.bf16.gmra.mxu0 %vm2098_vm2, %v2969_v7  ;;  %v18670_v63 = vld [vmem:[#allocation53_spill] sm:$0xff]  ;;  %v2848_v7 = vmax.f32 %v2374_v18, 0.0 }
 0x22f   :  { %v2377_v48 = vadd.f32 %v13943_v57, %v2376_v39  ;;  %4010 = vrot.lane.b32.xlu1 %v18668_v28, %s12432_s2  ;;  %v2851_v14 = vmax.f32 %v2385_v26, 0.0  ;;  %v14070_v37 = vadd.f32 %v1608_v0, %v13623_v60  ;;  %v18672_v0 = vld [vmem:[#allocation55_spill] sm:$0xff] }
 0x230   :  { %18667 = vst [vmem:[#allocation250_spill] sm:$0xff] %v14061_v24  ;;  %v2000_v45 = vmax.f32 %v14061_v24, 0.0  ;;  %4012 = vrot.lane.b32.xlu0 %v18670_v63, %s12432_s2  ;;  %v11410_v13 = vpop.f32.mrf.mxu1  ;;  %11505 = vmatmul.mubr.msk.bf16.gmra.mxu1 %vm2098_vm2, %v2068_v10  ;;  %v18673_v10 = vld [vmem:[#allocation186_spill] sm:$0xff] }
 0x231   :  { %18669 = vst [vmem:[#allocation251_spill] sm:$0xff] %v14070_v37  ;;  %v2849_v38 = vmax.f32 %v2377_v48, 0.0  ;;  %v1610_v39 = vpop.permute.xlu1 %1609  ;;  %v2971_v53 = vpack.c.bf16 %v2851_v14, %v2850_v30  ;;  %v2001_v63 = vmax.f32 %v14070_v37, 0.0  ;;  %v18675_v48 = vld [vmem:[#allocation54_spill] sm:$0xff]  ;;  %v2398_v30 = vadd.f32 %v11410_v13, %v13943_v57  ;;  %v18678_v37 = vld [vmem:[#allocation189_spill] sm:$0xff] }
 0x232   :  { %v2069_v19 = vpack.c.bf16 %v2000_v45, %v1999_v43  ;;  %v14076_v28 = vadd.f32 %v1610_v39, %v13642_v54  ;;  %v1612_v26 = vpop.permute.xlu0 %1611  ;;  %v2389_v27 = vpop.f32.mrf.mxu1 }
 0x233   :  { %v2970_v24 = vpack.c.bf16 %v2849_v38, %v2848_v7  ;;  %4014 = vrot.lane.b32.xlu1 %v18672_v0, %s12432_s2  ;;  %v14083_v18 = vadd.f32 %v1612_v26, %v18673_v10  ;;  %v2390_v43 = vadd.f32 %v13943_v57, %v2389_v27 }
 0x234   :  { %18671 = vst [vmem:[#allocation252_spill] sm:$0xff] %v14076_v28  ;;  %v2002_v60 = vmax.f32 %v14076_v28, 0.0  ;;  %4016 = vrot.lane.b32.xlu0 %v18675_v48, %s12432_s2  ;;  %v11411_v49 = vpop.f32.mrf.mxu1  ;;  %11508 = vmatprep.mubr.msk.bf16.mxu1 %vm2098_vm2, %v2069_v19  ;;  %v18677_v19 = vld [vmem:[#allocation56_spill] sm:$0xff]  ;;  %v2854_v48 = vmax.f32 %v2398_v30, 0.0 }
 0x235   :  { %18674 = vst [vmem:[#allocation253_spill] sm:$0xff] %v14083_v18  ;;  %v2401_v45 = vadd.f32 %v11411_v49, %v13943_v57  ;;  %v1614_v7 = vpop.permute.xlu1 %1613  ;;  %11536 = vmatprep.mubr.msk.bf16.mxu0 %vm2098_vm2, %v2970_v24  ;;  %v2003_v27 = vmax.f32 %v14083_v18, 0.0 }
 0x236   :  { %v2070_v14 = vpack.c.bf16 %v2002_v60, %v2001_v63  ;;  %v14093_v38 = vadd.f32 %v1614_v7, %v13664_v2  ;;  %v1616_v39 = vpop.permute.xlu0 %1615  ;;  %v2392_v26 = vpop.f32.mrf.mxu1  ;;  %11537 = vmatmul.mubr.msk.bf16.gmra.mxu0 %vm2098_vm2, %v2971_v53  ;;  %v18680_v60 = vld [vmem:[#allocation57_spill] sm:$0xff]  ;;  %v2852_v53 = vmax.f32 %v2390_v43, 0.0 }
 0x237   :  { %v2393_v28 = vadd.f32 %v13943_v57, %v2392_v26  ;;  %4018 = vrot.lane.b32.xlu1 %v18677_v19, %s12432_s2  ;;  %v2855_v49 = vmax.f32 %v2401_v45, 0.0  ;;  %v14102_v13 = vadd.f32 %v1616_v39, %v18678_v37  ;;  %v18682_v39 = vld [vmem:[#allocation59_spill] sm:$0xff] }
 0x238   :  { %18676 = vst [vmem:[#allocation254_spill] sm:$0xff] %v14093_v38  ;;  %v2004_v24 = vmax.f32 %v14093_v38, 0.0  ;;  %4020 = vrot.lane.b32.xlu0 %v18680_v60, %s12432_s2  ;;  %v11414_v63 = vpop.f32.mrf.mxu1  ;;  %11509 = vmatmul.mubr.msk.bf16.gmra.mxu1 %vm2098_vm2, %v2070_v14 }
 0x239   :  { %18679 = vst [vmem:[#allocation255_spill] sm:$0xff] %v14102_v13  ;;  %v2853_v7 = vmax.f32 %v2393_v28, 0.0  ;;  %v1618_v26 = vpop.permute.xlu1 %1617  ;;  %v2973_v37 = vpack.c.bf16 %v2855_v49, %v2854_v48  ;;  %v2005_v60 = vmax.f32 %v14102_v13, 0.0  ;;  %v18684_v28 = vld [vmem:[#allocation58_spill] sm:$0xff]  ;;  %v2414_v48 = vadd.f32 %v11414_v63, %v13943_v57 }
 0x23a   :  { %v2071_v0 = vpack.c.bf16 %v2004_v24, %v2003_v27  ;;  %v14108_v19 = vadd.f32 %v1618_v26, %v13680_v47  ;;  %v1620_v45 = vpop.permute.xlu0 %1619  ;;  %v2405_v18 = vpop.f32.mrf.mxu1 }
 0x23b   :  { %v2972_v38 = vpack.c.bf16 %v2853_v7, %v2852_v53  ;;  %4022 = vrot.lane.b32.xlu1 %v18682_v39, %s12432_s2  ;;  %v14115_v43 = vadd.f32 %v1620_v45, %v13683_v44  ;;  %v2406_v14 = vadd.f32 %v13943_v57, %v2405_v18 }
 0x23c   :  { %18681 = vst [vmem:[#allocation256_spill] sm:$0xff] %v14108_v19  ;;  %v2006_v2 = vmax.f32 %v14108_v19, 0.0  ;;  %4024 = vrot.lane.b32.xlu0 %v18684_v28, %s12432_s2  ;;  %v11415_v30 = vpop.f32.mrf.mxu1  ;;  %11512 = vmatprep.mubr.msk.bf16.mxu1 %vm2098_vm2, %v2071_v0  ;;  %v18686_v0 = vld [vmem:[#allocation60_spill] sm:$0xff]  ;;  %v18691_v28 = vld [vmem:[#allocation62_spill] sm:$0xff] }
 0x23d   :  { %18683 = vst [vmem:[#allocation257_spill] sm:$0xff] %v14115_v43  ;;  %v2417_v27 = vadd.f32 %v11415_v30, %v13943_v57  ;;  %v1622_v24 = vpop.permute.xlu1 %1621  ;;  %11540 = vmatprep.mubr.msk.bf16.mxu0 %vm2098_vm2, %v2972_v38  ;;  %v2007_v18 = vmax.f32 %v14115_v43, 0.0  ;;  %v12391_v19 = vld [vmem:[%s17779_s5 + $0x18] sm:$0xff]   ;;  %v2858_v43 = vmax.f32 %v2414_v48, 0.0 }
 0x23e   :  { %v2072_v49 = vpack.c.bf16 %v2006_v2, %v2005_v60  ;;  %v14125_v53 = vadd.f32 %v1622_v24, %v13702_v23  ;;  %v1624_v7 = vpop.permute.xlu0 %1623  ;;  %v2408_v26 = vpop.f32.mrf.mxu1  ;;  %11541 = vmatmul.mubr.msk.bf16.gmra.mxu0 %vm2098_vm2, %v2973_v37  ;;  %v18688_v2 = vld [vmem:[#allocation61_spill] sm:$0xff]  ;;  %v2856_v37 = vmax.f32 %v2406_v14, 0.0  ;;  %11784 = vmatprep.subr.bf16.mxu0 %v12391_v19 }
 0x23f   :  { %v2409_v45 = vadd.f32 %v13943_v57, %v2408_v26  ;;  %4026 = vrot.lane.b32.xlu1 %v18686_v0, %s12432_s2  ;;  %v2859_v30 = vmax.f32 %v2417_v27, 0.0  ;;  %v14134_v63 = vadd.f32 %v1624_v7, %v13699_v29  ;;  %11785 = vmatpush3.bf16.msra.mxu0 %v12391_v19 }
 0x240   :  { %18685 = vst [vmem:[#allocation258_spill] sm:$0xff] %v14125_v53  ;;  %v2008_v38 = vmax.f32 %v14125_v53, 0.0  ;;  %4028 = vrot.lane.b32.xlu0 %v18688_v2, %s12432_s2  ;;  %v11418_v60 = vpop.f32.mrf.mxu1  ;;  %11513 = vmatmul.mubr.msk.bf16.gmra.mxu1 %vm2098_vm2, %v2072_v49  ;;  %v18690_v2 = vld [vmem:[#allocation63_spill] sm:$0xff] }
 0x241   :  { %18687 = vst [vmem:[#allocation259_spill] sm:$0xff] %v14134_v63  ;;  %v2857_v24 = vmax.f32 %v2409_v45, 0.0  ;;  %v1626_v26 = vpop.permute.xlu1 %1625  ;;  %v2975_v14 = vpack.c.bf16 %v2859_v30, %v2858_v43  ;;  %v2009_v49 = vmax.f32 %v14134_v63, 0.0  ;;  %v2430_v43 = vadd.f32 %v11418_v60, %v13943_v57 }
 0x242   :  { %v2073_v27 = vpack.c.bf16 %v2008_v38, %v2007_v18  ;;  %v14143_v53 = vadd.f32 %v1626_v26, %v13718_v4  ;;  %v14145_v7 = vpop.permute.xlu0 %3916  ;;  %v2421_v13 = vpop.f32.mrf.mxu1 }
 0x243   :  { %v2974_v0 = vpack.c.bf16 %v2857_v24, %v2856_v37  ;;  %4030 = vrot.lane.b32.xlu1 %v18690_v2, %s12432_s2  ;;  %v2422_v18 = vadd.f32 %v13943_v57, %v2421_v13 }
 0x244   :  { %18689 = vst [vmem:[#allocation260_spill] sm:$0xff] %v14143_v53  ;;  %v2010_v45 = vmax.f32 %v14143_v53, 0.0  ;;  %4032 = vrot.lane.b32.xlu0 %v18691_v28, %s12432_s2  ;;  %v11419_v48 = vpop.f32.mrf.mxu1  ;;  %11516 = vmatprep.mubr.msk.bf16.mxu1 %vm2098_vm2, %v2073_v27  ;;  %v18692_v27 = vld [vmem:[#allocation66_spill] sm:$0xff] }
 0x245   :  { %v2433_v38 = vadd.f32 %v11419_v48, %v13943_v57  ;;  %v14156_v37 = vpop.permute.xlu1 %3918  ;;  %11544 = vmatprep.mubr.msk.bf16.mxu0 %vm2098_vm2, %v2974_v0  ;;  %v18693_v48 = vld [vmem:[#allocation68_spill] sm:$0xff]  ;;  %v2860_v19 = vmax.f32 %v2422_v18, 0.0 }
 0x246   :  { %v2074_v30 = vpack.c.bf16 %v2010_v45, %v2009_v49  ;;  %v14160_v24 = vpop.permute.xlu0 %3920  ;;  %v2424_v26 = vpop.f32.mrf.mxu1  ;;  %11545 = vmatmul.mubr.msk.bf16.gmra.mxu0 %vm2098_vm2, %v2975_v14  ;;  %v2862_v49 = vmax.f32 %v2430_v43, 0.0 }
 0x247   :  { %v2425_v53 = vadd.f32 %v13943_v57, %v2424_v26  ;;  %4034 = vrot.lane.b32.xlu1 %v18692_v27, %s12432_s2  ;;  %v2863_v13 = vmax.f32 %v2433_v38, 0.0  ;;  %v18695_v26 = vld [vmem:[#allocation71_spill] sm:$0xff]  ;;  %v18696_v38 = vld [vmem:[#allocation70_spill] sm:$0xff] }
 0x248   :  { %4036 = vrot.lane.b32.xlu0 %v18693_v48, %s12432_s2  ;;  %v11422_v63 = vpop.f32.mrf.mxu1  ;;  %11517 = vmatmul.mubr.msk.bf16.gmra.mxu1 %vm2098_vm2, %v2074_v30 }
 0x249   :  { %v2861_v0 = vmax.f32 %v2425_v53, 0.0  ;;  %v14169_v60 = vpop.permute.xlu1 %3922  ;;  %v2977_v27 = vpack.c.bf16 %v2863_v13, %v2862_v49  ;;  %v2446_v43 = vadd.f32 %v11422_v63, %v13943_v57 }
 0x24a   :  { %v14171_v45 = vpop.permute.xlu0 %3924  ;;  %v2437_v14 = vpop.f32.mrf.mxu1 }
 0x24b   :  { %18694 = vst [vmem:[#allocation261_spill] sm:$0xff] %v14171_v45  ;;  %v2976_v28 = vpack.c.bf16 %v2861_v0, %v2860_v19  ;;  %4038 = vrot.lane.b32.xlu1 %v18695_v26, %s12432_s2  ;;  %v2438_v2 = vadd.f32 %v13943_v57, %v2437_v14  ;;  %v18698_v0 = vld [vmem:[#allocation73_spill] sm:$0xff]  ;;  %v18699_v14 = vld [vmem:[#allocation74_spill] sm:$0xff]  ;;  %v2866_v63 = vmax.f32 %v2446_v43, 0.0 }
 0x24c   :  { %4040 = vrot.lane.b32.xlu0 %v18696_v38, %s12432_s2  ;;  %v11423_v48 = vpop.f32.mrf.mxu1 }
 0x24d   :  { %v2449_v18 = vadd.f32 %v11423_v48, %v13943_v57  ;;  %v14179_v53 = vpop.permute.xlu1 %3926  ;;  %11548 = vmatprep.mubr.msk.bf16.mxu0 %vm2098_vm2, %v2976_v28  ;;  %v2864_v38 = vmax.f32 %v2438_v2, 0.0 }
 0x24e   :  { %18697 = vst [vmem:[#allocation262_spill] sm:$0xff] %v14179_v53  ;;  %v14183_v30 = vpop.permute.xlu0 %3928  ;;  %v2440_v19 = vpop.f32.mrf.mxu1  ;;  %11549 = vmatmul.mubr.msk.bf16.gmra.mxu0 %vm2098_vm2, %v2977_v27  ;;  %v18700_v27 = vld [vmem:[#allocation78_spill] sm:$0xff] }
 0x24f   :  { %v2441_v13 = vadd.f32 %v13943_v57, %v2440_v19  ;;  %4042 = vrot.lane.b32.xlu1 %v18698_v0, %s12432_s2  ;;  %v2867_v49 = vmax.f32 %v2449_v18, 0.0 }
 0x250   :  { %4044 = vrot.lane.b32.xlu0 %v18699_v14, %s12432_s2  ;;  %v11426_v48 = vpop.f32.mrf.mxu1 }
 0x251   :  { %v2865_v26 = vmax.f32 %v2441_v13, 0.0  ;;  %v14191_v28 = vpop.permute.xlu1 %3930  ;;  %v2979_v19 = vpack.c.bf16 %v2867_v49, %v2866_v63  ;;  %v2462_v43 = vadd.f32 %v11426_v48, %v13943_v57 }
 0x252   :  { %v14193_v39 = vpop.permute.xlu0 %3932  ;;  %v2453_v53 = vpop.f32.mrf.mxu1 }
 0x253   :  { %v2978_v45 = vpack.c.bf16 %v2865_v26, %v2864_v38  ;;  %4046 = vrot.lane.b32.xlu1 %v18700_v27, %s12432_s2  ;;  %v2454_v14 = vadd.f32 %v13943_v57, %v2453_v53  ;;  %v2870_v48 = vmax.f32 %v2462_v43, 0.0 }
 0x254   :  { %4048 = vrot.lane.b32.xlu0 %v13121_v61, %s12432_s2  ;;  %v11427_v18 = vpop.f32.mrf.mxu1 }
 0x255   :  { %v2465_v2 = vadd.f32 %v11427_v18, %v13943_v57  ;;  %v14201_v13 = vpop.permute.xlu1 %3934  ;;  %11552 = vmatprep.mubr.msk.bf16.mxu0 %vm2098_vm2, %v2978_v45  ;;  %v2868_v63 = vmax.f32 %v2454_v14, 0.0 }
 0x256   :  { %18701 = vst [vmem:[#allocation263_spill] sm:$0xff] %v14201_v13  ;;  %v14205_v0 = vpop.permute.xlu0 %3936  ;;  %v2456_v26 = vpop.f32.mrf.mxu1  ;;  %11553 = vmatmul.mubr.msk.bf16.gmra.mxu0 %vm2098_vm2, %v2979_v19 }
 0x257   :  { %v2457_v38 = vadd.f32 %v13943_v57, %v2456_v26  ;;  %4050 = vrot.lane.b32.xlu1 %v13140_v20, %s12432_s2  ;;  %v2871_v49 = vmax.f32 %v2465_v2, 0.0 }
 0x258   :  { %4052 = vrot.lane.b32.xlu0 %v13143_v3, %s12432_s2  ;;  %v11430_v53 = vpop.f32.mrf.mxu1 }
 0x259   :  { %v2869_v18 = vmax.f32 %v2457_v38, 0.0  ;;  %v14213_v45 = vpop.permute.xlu1 %3938  ;;  %v2981_v19 = vpack.c.bf16 %v2871_v49, %v2870_v48  ;;  %v2478_v43 = vadd.f32 %v11430_v53, %v13943_v57 }
 0x25a   :  { %v14215_v61 = vpop.permute.xlu0 %3940  ;;  %v2469_v27 = vpop.f32.mrf.mxu1 }
 0x25b   :  { %v2980_v13 = vpack.c.bf16 %v2869_v18, %v2868_v63  ;;  %4054 = vrot.lane.b32.xlu1 %v13162_v59, %s12432_s2  ;;  %v2470_v26 = vadd.f32 %v13943_v57, %v2469_v27  ;;  %v2874_v53 = vmax.f32 %v2478_v43, 0.0 }
 0x25c   :  { %4056 = vrot.lane.b32.xlu0 %v13159_v58, %s12432_s2  ;;  %v11431_v2 = vpop.f32.mrf.mxu1 }
 0x25d   :  { %v2481_v14 = vadd.f32 %v11431_v2, %v13943_v57  ;;  %v14223_v38 = vpop.permute.xlu1 %3942  ;;  %11556 = vmatprep.mubr.msk.bf16.mxu0 %vm2098_vm2, %v2980_v13  ;;  %v2872_v48 = vmax.f32 %v2470_v26, 0.0 }
 0x25e   :  { %v14227_v3 = vpop.permute.xlu0 %3944  ;;  %v2472_v63 = vpop.f32.mrf.mxu1  ;;  %11557 = vmatmul.mubr.msk.bf16.gmra.mxu0 %vm2098_vm2, %v2981_v19 }
 0x25f   :  { %v2473_v49 = vadd.f32 %v13943_v57, %v2472_v63  ;;  %4058 = vrot.lane.b32.xlu1 %v13178_v6, %s12432_s2  ;;  %v2875_v18 = vmax.f32 %v2481_v14, 0.0 }
 0x260   :  { %4060 = vrot.lane.b32.xlu0 %v13181_v12, %s12432_s2  ;;  %v11434_v27 = vpop.f32.mrf.mxu1 }
 0x261   :  { %v2873_v2 = vmax.f32 %v2473_v49, 0.0  ;;  %v14235_v13 = vpop.permute.xlu1 %3946  ;;  %v2983_v19 = vpack.c.bf16 %v2875_v18, %v2874_v53  ;;  %v2494_v43 = vadd.f32 %v11434_v27, %v13943_v57 }
 0x262   :  { %v14237_v58 = vpop.permute.xlu0 %3948  ;;  %v2485_v59 = vpop.f32.mrf.mxu1 }
 0x263   :  { %v2982_v20 = vpack.c.bf16 %v2873_v2, %v2872_v48  ;;  %4062 = vrot.lane.b32.xlu1 %v13200_v40, %s12432_s2  ;;  %v2486_v63 = vadd.f32 %v13943_v57, %v2485_v59  ;;  %v2878_v27 = vmax.f32 %v2494_v43, 0.0 }
 0x264   :  { %4064 = vrot.lane.b32.xlu0 %v13197_v15, %s12432_s2  ;;  %v11435_v14 = vpop.f32.mrf.mxu1 }
 0x265   :  { %v2497_v26 = vadd.f32 %v11435_v14, %v13943_v57  ;;  %v14245_v49 = vpop.permute.xlu1 %3950  ;;  %11560 = vmatprep.mubr.msk.bf16.mxu0 %vm2098_vm2, %v2982_v20  ;;  %v2876_v53 = vmax.f32 %v2486_v63, 0.0 }
 0x266   :  { %v14249_v12 = vpop.permute.xlu0 %3952  ;;  %v2488_v48 = vpop.f32.mrf.mxu1  ;;  %11561 = vmatmul.mubr.msk.bf16.gmra.mxu0 %vm2098_vm2, %v2983_v19 }
 0x267   :  { %v2489_v18 = vadd.f32 %v13943_v57, %v2488_v48  ;;  %4066 = vrot.lane.b32.xlu1 %v13216_v22, %s12432_s2  ;;  %v2879_v2 = vmax.f32 %v2497_v26, 0.0 }
 0x268   :  { %4068 = vrot.lane.b32.xlu0 %v13219_v50, %s12432_s2  ;;  %v11438_v59 = vpop.f32.mrf.mxu1 }
 0x269   :  { %v2877_v14 = vmax.f32 %v2489_v18, 0.0  ;;  %v14257_v20 = vpop.permute.xlu1 %3954  ;;  %v2985_v19 = vpack.c.bf16 %v2879_v2, %v2878_v27  ;;  %v2510_v43 = vadd.f32 %v11438_v59, %v13943_v57 }
 0x26a   :  { %v14259_v15 = vpop.permute.xlu0 %3956  ;;  %v2501_v40 = vpop.f32.mrf.mxu1 }
 0x26b   :  { %v2984_v6 = vpack.c.bf16 %v2877_v14, %v2876_v53  ;;  %4070 = vrot.lane.b32.xlu1 %v13238_v25, %s12432_s2  ;;  %v2502_v48 = vadd.f32 %v13943_v57, %v2501_v40  ;;  %v2882_v59 = vmax.f32 %v2510_v43, 0.0 }
 0x26c   :  { %4072 = vrot.lane.b32.xlu0 %v13235_v11, %s12432_s2  ;;  %v11439_v26 = vpop.f32.mrf.mxu1 }
 0x26d   :  { %v2513_v63 = vadd.f32 %v11439_v26, %v13943_v57  ;;  %v14267_v18 = vpop.permute.xlu1 %3958  ;;  %11564 = vmatprep.mubr.msk.bf16.mxu0 %vm2098_vm2, %v2984_v6  ;;  %v2880_v27 = vmax.f32 %v2502_v48, 0.0 }
 0x26e   :  { %v14271_v50 = vpop.permute.xlu0 %3960  ;;  %v2504_v53 = vpop.f32.mrf.mxu1  ;;  %11565 = vmatmul.mubr.msk.bf16.gmra.mxu0 %vm2098_vm2, %v2985_v19 }
 0x26f   :  { %v2505_v2 = vadd.f32 %v13943_v57, %v2504_v53  ;;  %4074 = vrot.lane.b32.xlu1 %v13254_v16, %s12432_s2  ;;  %v2883_v14 = vmax.f32 %v2513_v63, 0.0 }
 0x270   :  { %4076 = vrot.lane.b32.xlu0 %v13257_v32, %s12432_s2  ;;  %v11442_v40 = vpop.f32.mrf.mxu1 }
 0x271   :  { %v2881_v26 = vmax.f32 %v2505_v2, 0.0  ;;  %v14279_v6 = vpop.permute.xlu1 %3962  ;;  %v2987_v19 = vpack.c.bf16 %v2883_v14, %v2882_v59  ;;  %v2526_v43 = vadd.f32 %v11442_v40, %v13943_v57 }
 0x272   :  { %v14281_v11 = vpop.permute.xlu0 %3964  ;;  %v2517_v25 = vpop.f32.mrf.mxu1 }
 0x273   :  { %v2986_v22 = vpack.c.bf16 %v2881_v26, %v2880_v27  ;;  %4078 = vrot.lane.b32.xlu1 %v13276_v35, %s12432_s2  ;;  %v2518_v53 = vadd.f32 %v13943_v57, %v2517_v25  ;;  %v2886_v40 = vmax.f32 %v2526_v43, 0.0 }
 0x274   :  { %4080 = vrot.lane.b32.xlu0 %v13273_v21, %s12432_s2  ;;  %v11443_v63 = vpop.f32.mrf.mxu1 }
 0x275   :  { %v2529_v48 = vadd.f32 %v11443_v63, %v13943_v57  ;;  %v14289_v2 = vpop.permute.xlu1 %3966  ;;  %11568 = vmatprep.mubr.msk.bf16.mxu0 %vm2098_vm2, %v2986_v22  ;;  %v2884_v59 = vmax.f32 %v2518_v53, 0.0 }
 0x276   :  { %v14293_v32 = vpop.permute.xlu0 %3968  ;;  %v2520_v27 = vpop.f32.mrf.mxu1  ;;  %11569 = vmatmul.mubr.msk.bf16.gmra.mxu0 %vm2098_vm2, %v2987_v19 }
 0x277   :  { %v2521_v14 = vadd.f32 %v13943_v57, %v2520_v27  ;;  %4082 = vrot.lane.b32.xlu1 %v13295_v17, %s12432_s2  ;;  %v2887_v26 = vmax.f32 %v2529_v48, 0.0 }
 0x278   :  { %4084 = vrot.lane.b32.xlu0 %v13298_v8, %s12432_s2  ;;  %v11446_v25 = vpop.f32.mrf.mxu1 }
 0x279   :  { %v2885_v63 = vmax.f32 %v2521_v14, 0.0  ;;  %v14301_v22 = vpop.permute.xlu1 %3970  ;;  %v2989_v19 = vpack.c.bf16 %v2887_v26, %v2886_v40  ;;  %v2542_v43 = vadd.f32 %v11446_v25, %v13943_v57 }
 0x27a   :  { %v14303_v21 = vpop.permute.xlu0 %3972  ;;  %v2533_v35 = vpop.f32.mrf.mxu1 }
 0x27b   :  { %v2988_v16 = vpack.c.bf16 %v2885_v63, %v2884_v59  ;;  %4086 = vrot.lane.b32.xlu1 %v13317_v31, %s12432_s2  ;;  %v2534_v27 = vadd.f32 %v13943_v57, %v2533_v35  ;;  %v2890_v25 = vmax.f32 %v2542_v43, 0.0 }
 0x27c   :  { %4088 = vrot.lane.b32.xlu0 %v13314_v41, %s12432_s2  ;;  %v11447_v48 = vpop.f32.mrf.mxu1 }
 0x27d   :  { %v2545_v53 = vadd.f32 %v11447_v48, %v13943_v57  ;;  %v14311_v14 = vpop.permute.xlu1 %3974  ;;  %11572 = vmatprep.mubr.msk.bf16.mxu0 %vm2098_vm2, %v2988_v16  ;;  %v2888_v40 = vmax.f32 %v2534_v27, 0.0 }
 0x27e   :  { %v14315_v8 = vpop.permute.xlu0 %3976  ;;  %v2536_v59 = vpop.f32.mrf.mxu1  ;;  %11573 = vmatmul.mubr.msk.bf16.gmra.mxu0 %vm2098_vm2, %v2989_v19 }
 0x27f   :  { %v2537_v26 = vadd.f32 %v13943_v57, %v2536_v59  ;;  %4090 = vrot.lane.b32.xlu1 %v13333_v36, %s12432_s2  ;;  %v2891_v63 = vmax.f32 %v2545_v53, 0.0 }
 0x280   :  { %4092 = vrot.lane.b32.xlu0 %v13336_v52, %s12432_s2  ;;  %v11450_v35 = vpop.f32.mrf.mxu1 }
 0x281   :  { %v2889_v48 = vmax.f32 %v2537_v26, 0.0  ;;  %v14323_v16 = vpop.permute.xlu1 %3978  ;;  %v2991_v19 = vpack.c.bf16 %v2891_v63, %v2890_v25  ;;  %v2558_v43 = vadd.f32 %v11450_v35, %v13943_v57 }
 0x282   :  { %v14325_v41 = vpop.permute.xlu0 %3980  ;;  %v2549_v31 = vpop.f32.mrf.mxu1 }
 0x283   :  { %v2990_v17 = vpack.c.bf16 %v2889_v48, %v2888_v40  ;;  %4094 = vrot.lane.b32.xlu1 %v13355_v55, %s12432_s2  ;;  %v2550_v59 = vadd.f32 %v13943_v57, %v2549_v31  ;;  %v2894_v35 = vmax.f32 %v2558_v43, 0.0 }
 0x284   :  { %4096 = vrot.lane.b32.xlu0 %v13352_v51, %s12432_s2  ;;  %v11451_v53 = vpop.f32.mrf.mxu1 }
 0x285   :  { %v2561_v27 = vadd.f32 %v11451_v53, %v13943_v57  ;;  %v14333_v26 = vpop.permute.xlu1 %3982  ;;  %11576 = vmatprep.mubr.msk.bf16.mxu0 %vm2098_vm2, %v2990_v17  ;;  %v2892_v25 = vmax.f32 %v2550_v59, 0.0 }
 0x286   :  { %v14337_v52 = vpop.permute.xlu0 %3984  ;;  %v2552_v40 = vpop.f32.mrf.mxu1  ;;  %11577 = vmatmul.mubr.msk.bf16.gmra.mxu0 %vm2098_vm2, %v2991_v19 }
 0x287   :  { %v2553_v63 = vadd.f32 %v13943_v57, %v2552_v40  ;;  %4098 = vrot.lane.b32.xlu1 %v13371_v1, %s12432_s2  ;;  %v2895_v48 = vmax.f32 %v2561_v27, 0.0 }
 0x288   :  { %4100 = vrot.lane.b32.xlu0 %v13374_v46, %s12432_s2  ;;  %v11454_v31 = vpop.f32.mrf.mxu1 }
 0x289   :  { %v2893_v53 = vmax.f32 %v2553_v63, 0.0  ;;  %v14345_v17 = vpop.permute.xlu1 %3986  ;;  %v2993_v19 = vpack.c.bf16 %v2895_v48, %v2894_v35  ;;  %v2574_v43 = vadd.f32 %v11454_v31, %v13943_v57 }
 0x28a   :  { %v14347_v51 = vpop.permute.xlu0 %3988  ;;  %v2565_v55 = vpop.f32.mrf.mxu1 }
 0x28b   :  { %v2992_v36 = vpack.c.bf16 %v2893_v53, %v2892_v25  ;;  %4102 = vrot.lane.b32.xlu1 %v13393_v34, %s12432_s2  ;;  %v2566_v40 = vadd.f32 %v13943_v57, %v2565_v55  ;;  %v18704_v55 = vld [vmem:[#allocation138_spill] sm:$0xff]  ;;  %v2898_v31 = vmax.f32 %v2574_v43, 0.0 }
 0x28c   :  { %4104 = vrot.lane.b32.xlu0 %v13390_v5, %s12432_s2  ;;  %v11455_v27 = vpop.f32.mrf.mxu1 }
 0x28d   :  { %v2577_v59 = vadd.f32 %v11455_v27, %v13943_v57  ;;  %v14355_v63 = vpop.permute.xlu1 %3990  ;;  %11580 = vmatprep.mubr.msk.bf16.mxu0 %vm2098_vm2, %v2992_v36  ;;  %v2896_v27 = vmax.f32 %v2566_v40, 0.0 }
 0x28e   :  { %18702 = vst [vmem:[#allocation264_spill] sm:$0xff] %v14355_v63  ;;  %v14359_v46 = vpop.permute.xlu0 %3992  ;;  %v2568_v25 = vpop.f32.mrf.mxu1  ;;  %11581 = vmatmul.mubr.msk.bf16.gmra.mxu0 %vm2098_vm2, %v2993_v19  ;;  %v18706_v19 = vld [vmem:[#allocation142_spill] sm:$0xff] }
 0x28f   :  { %18703 = vst [vmem:[#allocation265_spill] sm:$0xff] %v14359_v46  ;;  %v2569_v48 = vadd.f32 %v13943_v57, %v2568_v25  ;;  %4106 = vrot.lane.b32.xlu1 %v13409_v56, %s12432_s2  ;;  %v2899_v53 = vmax.f32 %v2577_v59, 0.0  ;;  %v18707_v56 = vld [vmem:[#allocation141_spill] sm:$0xff] }
 0x290   :  { %4108 = vrot.lane.b32.xlu0 %v18704_v55, %s12432_s2  ;;  %v11458_v35 = vpop.f32.mrf.mxu1 }
 0x291   :  { %v2897_v5 = vmax.f32 %v2569_v48, 0.0  ;;  %v14367_v36 = vpop.permute.xlu1 %3994  ;;  %v2995_v25 = vpack.c.bf16 %v2899_v53, %v2898_v31  ;;  %v2590_v43 = vadd.f32 %v11458_v35, %v13943_v57 }
 0x292   :  { %v14369_v34 = vpop.permute.xlu0 %3996  ;;  %v2581_v1 = vpop.f32.mrf.mxu1 }
 0x293   :  { %18705 = vst [vmem:[#allocation266_spill] sm:$0xff] %v14369_v34  ;;  %v2994_v63 = vpack.c.bf16 %v2897_v5, %v2896_v27  ;;  %4110 = vrot.lane.b32.xlu1 %v18706_v19, %s12432_s2  ;;  %v2582_v55 = vadd.f32 %v13943_v57, %v2581_v1  ;;  %v18710_v27 = vld [vmem:[#allocation145_spill] sm:$0xff]  ;;  %v18711_v1 = vld [vmem:[#allocation146_spill] sm:$0xff]  ;;  %v2902_v35 = vmax.f32 %v2590_v43, 0.0 }
 0x294   :  { %4112 = vrot.lane.b32.xlu0 %v18707_v56, %s12432_s2  ;;  %v11459_v59 = vpop.f32.mrf.mxu1 }
 0x295   :  { %v2593_v40 = vadd.f32 %v11459_v59, %v13943_v57  ;;  %v14377_v48 = vpop.permute.xlu1 %3998  ;;  %11584 = vmatprep.mubr.msk.bf16.mxu0 %vm2098_vm2, %v2994_v63  ;;  %v2900_v56 = vmax.f32 %v2582_v55, 0.0 }
 0x296   :  { %18708 = vst [vmem:[#allocation267_spill] sm:$0xff] %v14377_v48  ;;  %v14381_v34 = vpop.permute.xlu0 %4000  ;;  %v2584_v5 = vpop.f32.mrf.mxu1  ;;  %11585 = vmatmul.mubr.msk.bf16.gmra.mxu0 %vm2098_vm2, %v2995_v25  ;;  %v18714_v25 = vld [vmem:[#allocation150_spill] sm:$0xff] }
 0x297   :  { %18709 = vst [vmem:[#allocation268_spill] sm:$0xff] %v14381_v34  ;;  %v2585_v53 = vadd.f32 %v13943_v57, %v2584_v5  ;;  %4114 = vrot.lane.b32.xlu1 %v18710_v27, %s12432_s2  ;;  %v2903_v31 = vmax.f32 %v2593_v40, 0.0  ;;  %v18715_v27 = vld [vmem:[#allocation149_spill] sm:$0xff] }
 0x298   :  { %4116 = vrot.lane.b32.xlu0 %v18711_v1, %s12432_s2  ;;  %v11462_v59 = vpop.f32.mrf.mxu1 }
 0x299   :  { %v2901_v19 = vmax.f32 %v2585_v53, 0.0  ;;  %v14389_v63 = vpop.permute.xlu1 %4002  ;;  %v2997_v5 = vpack.c.bf16 %v2903_v31, %v2902_v35  ;;  %v2606_v43 = vadd.f32 %v11462_v59, %v13943_v57  ;;  %v18718_v31 = vld [vmem:[#allocation153_spill] sm:$0xff] }
 0x29a   :  { %18712 = vst [vmem:[#allocation269_spill] sm:$0xff] %v14389_v63  ;;  %v14391_v48 = vpop.permute.xlu0 %4004  ;;  %v2597_v34 = vpop.f32.mrf.mxu1 }
 0x29b   :  { %18713 = vst [vmem:[#allocation270_spill] sm:$0xff] %v14391_v48  ;;  %v2996_v46 = vpack.c.bf16 %v2901_v19, %v2900_v56  ;;  %4118 = vrot.lane.b32.xlu1 %v18714_v25, %s12432_s2  ;;  %v2598_v1 = vadd.f32 %v13943_v57, %v2597_v34  ;;  %v18719_v34 = vld [vmem:[#allocation154_spill] sm:$0xff]  ;;  %v2906_v59 = vmax.f32 %v2606_v43, 0.0 }
 0x29c   :  { %4120 = vrot.lane.b32.xlu0 %v18715_v27, %s12432_s2  ;;  %v11463_v40 = vpop.f32.mrf.mxu1 }
 0x29d   :  { %v2609_v55 = vadd.f32 %v11463_v40, %v13943_v57  ;;  %v14399_v53 = vpop.permute.xlu1 %4006  ;;  %11588 = vmatprep.mubr.msk.bf16.mxu0 %vm2098_vm2, %v2996_v46  ;;  %v2904_v27 = vmax.f32 %v2598_v1, 0.0  ;;  %v14422_v1 = vld [vmem:[%s17778_s4] ss:$0 sm:$0xff] }
 0x29e   :  { %18716 = vst [vmem:[#allocation271_spill] sm:$0xff] %v14399_v53  ;;  %v14403_v48 = vpop.permute.xlu0 %4008  ;;  %v2600_v56 = vpop.f32.mrf.mxu1  ;;  %11589 = vmatmul.mubr.msk.bf16.gmra.mxu0 %vm2098_vm2, %v2997_v5  ;;  %v18722_v5 = vld [vmem:[#allocation158_spill] sm:$0xff] }
 0x29f   :  { %18717 = vst [vmem:[#allocation272_spill] sm:$0xff] %v14403_v48  ;;  %v2601_v19 = vadd.f32 %v13943_v57, %v2600_v56  ;;  %4122 = vrot.lane.b32.xlu1 %v18718_v31, %s12432_s2  ;;  %v2907_v35 = vmax.f32 %v2609_v55, 0.0  ;;  %v18723_v56 = vld [vmem:[#allocation157_spill] sm:$0xff] }
 0x2a0   :  { %4124 = vrot.lane.b32.xlu0 %v18719_v34, %s12432_s2  ;;  %v11466_v40 = vpop.f32.mrf.mxu1 }
 0x2a1   :  { %v2905_v25 = vmax.f32 %v2601_v19, 0.0  ;;  %v14411_v46 = vpop.permute.xlu1 %4010  ;;  %v2999_v57 = vpack.c.bf16 %v2907_v35, %v2906_v59 }
 0x2a2   :  { %18720 = vst [vmem:[#allocation273_spill] sm:$0xff] %v14411_v46  ;;  %v14413_v53 = vpop.permute.xlu0 %4012  ;;  %v2613_v48 = vpop.f32.mrf.mxu1 }
 0x2a3   :  { %18721 = vst [vmem:[#allocation274_spill] sm:$0xff] %v14413_v53  ;;  %v2998_v63 = vpack.c.bf16 %v2905_v25, %v2904_v27  ;;  %4126 = vrot.lane.b32.xlu1 %v18722_v5, %s12432_s2  ;;  %v2614_v19 = vadd.f32 %v14422_v1, %v2613_v48  ;;  %v2622_v27 = vadd.f32 %v14422_v1, %v11466_v40  ;;  %v18727_v48 = vld [vmem:[#allocation162_spill] sm:$0xff] }
 0x2a4   :  { %4128 = vrot.lane.b32.xlu0 %v18723_v56, %s12432_s2  ;;  %v11467_v55 = vpop.f32.mrf.mxu1  ;;  %v18726_v56 = vld [vmem:[#allocation161_spill] sm:$0xff] }
 0x2a5   :  { %v2625_v43 = vadd.f32 %v14422_v1, %v11467_v55  ;;  %v14426_v34 = vpop.permute.xlu1 %4014  ;;  %11592 = vmatprep.mubr.msk.bf16.mxu0 %vm2098_vm2, %v2998_v63  ;;  %v2908_v31 = vmax.f32 %v2614_v19, 0.0  ;;  %v2910_v40 = vmax.f32 %v2622_v27, 0.0 }
 0x2a6   :  { %18724 = vst [vmem:[#allocation275_spill] sm:$0xff] %v14426_v34  ;;  %v14430_v25 = vpop.permute.xlu0 %4016  ;;  %v2616_v35 = vpop.f32.mrf.mxu1  ;;  %11593 = vmatmul.mubr.msk.bf16.gmra.mxu0 %vm2098_vm2, %v2999_v57  ;;  %v18729_v57 = vld [vmem:[#allocation166_spill] sm:$0xff] }
 0x2a7   :  { %18725 = vst [vmem:[#allocation276_spill] sm:$0xff] %v14430_v25  ;;  %v2617_v59 = vadd.f32 %v14422_v1, %v2616_v35  ;;  %4130 = vrot.lane.b32.xlu1 %v18726_v56, %s12432_s2  ;;  %v2911_v5 = vmax.f32 %v2625_v43, 0.0  ;;  %v18730_v56 = vld [vmem:[#allocation165_spill] sm:$0xff] }
 0x2a8   :  { %4132 = vrot.lane.b32.xlu0 %v18727_v48, %s12432_s2  ;;  %v11470_v55 = vpop.f32.mrf.mxu1 }
 0x2a9   :  { %v2909_v34 = vmax.f32 %v2617_v59, 0.0  ;;  %v14438_v63 = vpop.permute.xlu1 %4018  ;;  %v3001_v35 = vpack.c.bf16 %v2911_v5, %v2910_v40  ;;  %v2638_v27 = vadd.f32 %v14422_v1, %v11470_v55 }
 0x2aa   :  { %v14440_v53 = vpop.permute.xlu0 %4020  ;;  %v2629_v25 = vpop.f32.mrf.mxu1 }
 0x2ab   :  { %18728 = vst [vmem:[#allocation277_spill] sm:$0xff] %v14440_v53  ;;  %v3000_v46 = vpack.c.bf16 %v2909_v34, %v2908_v31  ;;  %4134 = vrot.lane.b32.xlu1 %v18729_v57, %s12432_s2  ;;  %v2630_v48 = vadd.f32 %v14422_v1, %v2629_v25  ;;  %v18733_v25 = vld [vmem:[#allocation170_spill] sm:$0xff]  ;;  %v2914_v55 = vmax.f32 %v2638_v27, 0.0 }
 0x2ac   :  { %4136 = vrot.lane.b32.xlu0 %v18730_v56, %s12432_s2  ;;  %v11471_v43 = vpop.f32.mrf.mxu1 }
 0x2ad   :  { %v2641_v19 = vadd.f32 %v14422_v1, %v11471_v43  ;;  %v14448_v59 = vpop.permute.xlu1 %4022  ;;  %11596 = vmatprep.mubr.msk.bf16.mxu0 %vm2098_vm2, %v3000_v46  ;;  %v2912_v43 = vmax.f32 %v2630_v48, 0.0 }
 0x2ae   :  { %18731 = vst [vmem:[#allocation278_spill] sm:$0xff] %v14448_v59  ;;  %v14452_v53 = vpop.permute.xlu0 %4024  ;;  %v2632_v31 = vpop.f32.mrf.mxu1  ;;  %11597 = vmatmul.mubr.msk.bf16.gmra.mxu0 %vm2098_vm2, %v3001_v35  ;;  %v18735_v35 = vld [vmem:[#allocation174_spill] sm:$0xff] }
 0x2af   :  { %18732 = vst [vmem:[#allocation279_spill] sm:$0xff] %v14452_v53  ;;  %v2633_v34 = vadd.f32 %v14422_v1, %v2632_v31  ;;  %4138 = vrot.lane.b32.xlu1 %v18650_v33, %s12432_s2  ;;  %v2915_v5 = vmax.f32 %v2641_v19, 0.0  ;;  %v18736_v33 = vld [vmem:[#allocation173_spill] sm:$0xff] }
 0x2b0   :  { %4140 = vrot.lane.b32.xlu0 %v18733_v25, %s12432_s2  ;;  %v11474_v40 = vpop.f32.mrf.mxu1 }
 0x2b1   :  { %v2913_v56 = vmax.f32 %v2633_v34, 0.0  ;;  %v14460_v46 = vpop.permute.xlu1 %4026  ;;  %v3003_v31 = vpack.c.bf16 %v2915_v5, %v2914_v55  ;;  %v2654_v27 = vadd.f32 %v14422_v1, %v11474_v40 }
 0x2b2   :  { %v14462_v57 = vpop.permute.xlu0 %4028  ;;  %v2645_v59 = vpop.f32.mrf.mxu1 }
 0x2b3   :  { %18734 = vst [vmem:[#allocation280_spill] sm:$0xff] %v14462_v57  ;;  %v3002_v53 = vpack.c.bf16 %v2913_v56, %v2912_v43  ;;  %4142 = vrot.lane.b32.xlu1 %v18735_v35, %s12432_s2  ;;  %v2646_v25 = vadd.f32 %v14422_v1, %v2645_v59  ;;  %v2918_v40 = vmax.f32 %v2654_v27, 0.0 }
 0x2b4   :  { %4144 = vrot.lane.b32.xlu0 %v18736_v33, %s12432_s2  ;;  %v11475_v19 = vpop.f32.mrf.mxu1 }
 0x2b5   :  { %v2657_v48 = vadd.f32 %v14422_v1, %v11475_v19  ;;  %v14470_v34 = vpop.permute.xlu1 %4030  ;;  %11600 = vmatprep.mubr.msk.bf16.mxu0 %vm2098_vm2, %v3002_v53  ;;  %v2916_v55 = vmax.f32 %v2646_v25, 0.0 }
 0x2b6   :  { %18737 = vst [vmem:[#allocation281_spill] sm:$0xff] %v14470_v34  ;;  %v14474_v57 = vpop.permute.xlu0 %4032  ;;  %v2648_v56 = vpop.f32.mrf.mxu1  ;;  %11601 = vmatmul.mubr.msk.bf16.gmra.mxu0 %vm2098_vm2, %v3003_v31 }
 0x2b7   :  { %v2649_v5 = vadd.f32 %v14422_v1, %v2648_v56  ;;  %4146 = vrot.lane.b32.xlu1 %v13604_v9, %s12432_s2  ;;  %v2919_v43 = vmax.f32 %v2657_v48, 0.0  ;;  %v18739_v56 = vld [vmem:[#allocation181_spill] sm:$0xff] }
 0x2b8   :  { %4148 = vrot.lane.b32.xlu0 %v18664_v42, %s12432_s2  ;;  %v11478_v59 = vpop.f32.mrf.mxu1 }
 0x2b9   :  { %v2917_v19 = vmax.f32 %v2649_v5, 0.0  ;;  %v14482_v53 = vpop.permute.xlu1 %4034  ;;  %v3005_v31 = vpack.c.bf16 %v2919_v43, %v2918_v40  ;;  %v2670_v27 = vadd.f32 %v14422_v1, %v11478_v59 }
 0x2ba   :  { %v14484_v33 = vpop.permute.xlu0 %4036  ;;  %v2661_v35 = vpop.f32.mrf.mxu1 }
 0x2bb   :  { %18738 = vst [vmem:[#allocation282_spill] sm:$0xff] %v14484_v33  ;;  %v3004_v34 = vpack.c.bf16 %v2917_v19, %v2916_v55  ;;  %4150 = vrot.lane.b32.xlu1 %v13626_v62, %s12432_s2  ;;  %v2662_v42 = vadd.f32 %v14422_v1, %v2661_v35  ;;  %v2922_v59 = vmax.f32 %v2670_v27, 0.0 }
 0x2bc   :  { %4152 = vrot.lane.b32.xlu0 %v18739_v56, %s12432_s2  ;;  %v11479_v48 = vpop.f32.mrf.mxu1 }
 0x2bd   :  { %v2673_v25 = vadd.f32 %v14422_v1, %v11479_v48  ;;  %v14492_v5 = vpop.permute.xlu1 %4038  ;;  %11604 = vmatprep.mubr.msk.bf16.mxu0 %vm2098_vm2, %v3004_v34  ;;  %v2920_v40 = vmax.f32 %v2662_v42, 0.0  ;;  %v12392_v42 = vld [vmem:[%s17779_s5 + $0x10] sm:$0xff]  }
 0x2be   :  { %18740 = vst [vmem:[#allocation283_spill] sm:$0xff] %v14492_v5  ;;  %v14496_v9 = vpop.permute.xlu0 %4040  ;;  %v2664_v55 = vpop.f32.mrf.mxu1  ;;  %11605 = vmatmul.mubr.msk.bf16.gmra.mxu0 %vm2098_vm2, %v3005_v31  ;;  %v18744_v31 = vld [vmem:[#allocation190_spill] sm:$0xff]  ;;  %11786 = vmatprep.subr.bf16.mxu0 %v12392_v42 }
 0x2bf   :  { %18741 = vst [vmem:[#allocation284_spill] sm:$0xff] %v14496_v9  ;;  %v2665_v43 = vadd.f32 %v14422_v1, %v2664_v55  ;;  %4154 = vrot.lane.b32.xlu1 %v13642_v54, %s12432_s2  ;;  %v2923_v19 = vmax.f32 %v2673_v25, 0.0  ;;  %v18745_v54 = vld [vmem:[#allocation189_spill] sm:$0xff]  ;;  %11787 = vmatpush3.bf16.msra.mxu0 %v12392_v42 }
 0x2c0   :  { %4156 = vrot.lane.b32.xlu0 %v18673_v10, %s12432_s2  ;;  %v11482_v35 = vpop.f32.mrf.mxu1 }
 0x2c1   :  { %v2921_v48 = vmax.f32 %v2665_v43, 0.0  ;;  %v14504_v34 = vpop.permute.xlu1 %4042  ;;  %v3007_v55 = vpack.c.bf16 %v2923_v19, %v2922_v59 }
 0x2c2   :  { %18742 = vst [vmem:[#allocation285_spill] sm:$0xff] %v14504_v34  ;;  %v14506_v56 = vpop.permute.xlu0 %4044  ;;  %v2677_v62 = vpop.f32.mrf.mxu1  ;;  %v18771_v34 = vld [vmem:[#allocation65_spill] sm:$0xff] }
 0x2c3   :  { %18743 = vst [vmem:[#allocation286_spill] sm:$0xff] %v14506_v56  ;;  %v3006_v5 = vpack.c.bf16 %v2921_v48, %v2920_v40  ;;  %4158 = vrot.lane.b32.xlu1 %v18744_v31, %s12432_s2  ;;  %v2678_v43 = vadd.f32 %v14422_v1, %v2677_v62  ;;  %v2686_v40 = vadd.f32 %v14422_v1, %v11482_v35 }
 0x2c4   :  { %4160 = vrot.lane.b32.xlu0 %v18745_v54, %s12432_s2  ;;  %v11483_v25 = vpop.f32.mrf.mxu1 }
 0x2c5   :  { %v2689_v27 = vadd.f32 %v14422_v1, %v11483_v25  ;;  %v14517_v10 = vpop.permute.xlu1 %4046  ;;  %11608 = vmatprep.mubr.msk.bf16.mxu0 %vm2098_vm2, %v3006_v5  ;;  %v2924_v5 = vmax.f32 %v2678_v43, 0.0  ;;  %v2926_v31 = vmax.f32 %v2686_v40, 0.0 }
 0x2c6   :  { %18746 = vst [vmem:[#allocation287_spill] sm:$0xff] %v14517_v10  ;;  %v14521_v48 = vpop.permute.xlu0 %4048  ;;  %v2680_v19 = vpop.f32.mrf.mxu1  ;;  %11609 = vmatmul.mubr.msk.bf16.gmra.mxu0 %vm2098_vm2, %v3007_v55 }
 0x2c7   :  { %18747 = vst [vmem:[#allocation288_spill] sm:$0xff] %v14521_v48  ;;  %v2681_v59 = vadd.f32 %v14422_v1, %v2680_v19  ;;  %4162 = vrot.lane.b32.xlu1 %v13680_v47, %s12432_s2  ;;  %v2927_v62 = vmax.f32 %v2689_v27, 0.0 }
 0x2c8   :  { %4164 = vrot.lane.b32.xlu0 %v13683_v44, %s12432_s2  ;;  %v11486_v25 = vpop.f32.mrf.mxu1 }
 0x2c9   :  { %v2925_v54 = vmax.f32 %v2681_v59, 0.0  ;;  %v14529_v35 = vpop.permute.xlu1 %4050  ;;  %v3009_v19 = vpack.c.bf16 %v2927_v62, %v2926_v31  ;;  %v2702_v40 = vadd.f32 %v14422_v1, %v11486_v25 }
 0x2ca   :  { %18748 = vst [vmem:[#allocation289_spill] sm:$0xff] %v14529_v35  ;;  %v14531_v10 = vpop.permute.xlu0 %4052  ;;  %v2693_v55 = vpop.f32.mrf.mxu1 }
 0x2cb   :  { %18749 = vst [vmem:[#allocation290_spill] sm:$0xff] %v14531_v10  ;;  %v3008_v48 = vpack.c.bf16 %v2925_v54, %v2924_v5  ;;  %4166 = vrot.lane.b32.xlu1 %v13702_v23, %s12432_s2  ;;  %v2694_v27 = vadd.f32 %v14422_v1, %v2693_v55  ;;  %v18752_v5 = vld [vmem:[#allocation6_spill] sm:$0xff]  ;;  %v2930_v25 = vmax.f32 %v2702_v40, 0.0 }
 0x2cc   :  { %4168 = vrot.lane.b32.xlu0 %v13699_v29, %s12432_s2  ;;  %v11487_v42 = vpop.f32.mrf.mxu1 }
 0x2cd   :  { %v2705_v43 = vadd.f32 %v14422_v1, %v11487_v42  ;;  %v14539_v59 = vpop.permute.xlu1 %4054  ;;  %11612 = vmatprep.mubr.msk.bf16.mxu0 %vm2098_vm2, %v3008_v48  ;;  %v2928_v42 = vmax.f32 %v2694_v27, 0.0 }
 0x2ce   :  { %18750 = vst [vmem:[#allocation291_spill] sm:$0xff] %v14539_v59  ;;  %v14543_v44 = vpop.permute.xlu0 %4056  ;;  %v2696_v54 = vpop.f32.mrf.mxu1  ;;  %11613 = vmatmul.mubr.msk.bf16.gmra.mxu0 %vm2098_vm2, %v3009_v19 }
 0x2cf   :  { %18751 = vst [vmem:[#allocation292_spill] sm:$0xff] %v14543_v44  ;;  %v2697_v31 = vadd.f32 %v14422_v1, %v2696_v54  ;;  %4170 = vrot.lane.b32.xlu1 %v13718_v4, %s12432_s2  ;;  %v2931_v62 = vmax.f32 %v2705_v43, 0.0  ;;  %v18755_v54 = vld [vmem:[#allocation8_spill] sm:$0xff]  ;;  %v18756_v43 = vld [vmem:[#allocation5_spill] sm:$0xff]  ;;  %s12409_s2 = scalar_lea.vmem %s10098_s22, 16384 }
 0x2d0   :  { %6464 = vrot.lane.b32.xlu0 %v18752_v5, %s12433_s11  ;;  %v11490_v55 = vpop.f32.mrf.mxu1  ;;  %p12410_p0 = scmp.ne.s32.totalorder %s10098_s22, %s12409_s2  ;;  %p12415_p2 = scmp.lt.s32.totalorder %s12409_s2, %s12409_s2 }
 0x2d1   :  { %v2929_v48 = vmax.f32 %v2697_v31, 0.0  ;;  %v14551_v29 = vpop.permute.xlu1 %4058  ;;  %v3011_v59 = vpack.c.bf16 %v2931_v62, %v2930_v25  ;;  %v2718_v40 = vadd.f32 %v14422_v1, %v11490_v55 }
 0x2d2   :  { %18753 = vst [vmem:[#allocation6_spill] sm:$0xff] %v14551_v29  ;;  %v14553_v23 = vpop.permute.xlu0 %4060  ;;  %v2709_v47 = vpop.f32.mrf.mxu1  ;;  %p12416_p3 = por %p12415_p2, %p12414_p1 }
 0x2d3   :  { %18754 = vst [vmem:[#allocation293_spill] sm:$0xff] %v14553_v23  ;;  %v3010_v19 = vpack.c.bf16 %v2929_v48, %v2928_v42  ;;  %6466 = vrot.lane.b32.xlu1 %v18755_v54, %s12433_s11  ;;  %v2710_v5 = vadd.f32 %v14422_v1, %v2709_v47  ;;  %v18759_v48 = vld [vmem:[#allocation7_spill] sm:$0xff]  ;;  %v18760_v47 = vld [vmem:[#allocation9_spill] sm:$0xff]  ;;  %v2934_v55 = vmax.f32 %v2718_v40, 0.0 }
 0x2d4   :  { %6468 = vrot.lane.b32.xlu0 %v18756_v43, %s12433_s11  ;;  %v11491_v4 = vpop.f32.mrf.mxu1  ;;  %p12417_p4 = pnand %p12416_p3, %p12410_p0 }
 0x2d5   :  { %v2721_v27 = vadd.f32 %v14422_v1, %v11491_v4  ;;  %v14561_v31 = vpop.permute.xlu1 %4062  ;;  %11616 = vmatprep.mubr.msk.bf16.mxu0 %vm2098_vm2, %v3010_v19  ;;  %v2932_v54 = vmax.f32 %v2710_v5, 0.0  ;;  %v18764_v5 = vld [vmem:[#allocation10_spill] sm:$0xff] }
 0x2d6   :  { %18757 = vst [vmem:[#allocation8_spill] sm:$0xff] %v14561_v31  ;;  %v14565_v23 = vpop.permute.xlu0 %4064  ;;  %v2712_v42 = vpop.f32.mrf.mxu1  ;;  %11617 = vmatmul.mubr.msk.bf16.gmra.mxu0 %vm2098_vm2, %v3011_v59  ;;  %v14578_v59 = vld [vmem:[%s17780_s6] ss:$0 sm:$0xff] }
 0x2d7   :  { %18758 = vst [vmem:[#allocation5_spill] sm:$0xff] %v14565_v23  ;;  %v2713_v62 = vadd.f32 %v14422_v1, %v2712_v42  ;;  %6470 = vrot.lane.b32.xlu1 %v18759_v48, %s12433_s11  ;;  %v2935_v25 = vmax.f32 %v2721_v27, 0.0  ;;  %v18762_v23 = vld [vmem:[#allocation11_spill] sm:$0xff] }
 0x2d8   :  { %6472 = vrot.lane.b32.xlu0 %v18760_v47, %s12433_s11  ;;  %v11494_v4 = vpop.f32.mrf.mxu1 }
 0x2d9   :  { %v2933_v43 = vmax.f32 %v2713_v62, 0.0  ;;  %v14573_v19 = vpop.permute.xlu1 %4066  ;;  %v3013_v48 = vpack.c.bf16 %v2935_v25, %v2934_v55 }
 0x2da   :  { %18761 = vst [vmem:[#allocation7_spill] sm:$0xff] %v14573_v19  ;;  %v2725_v31 = vpop.f32.mrf.mxu1  ;;  %v14582_v44 = vpop.permute.xlu0 %4068 }
 0x2db   :  { %v3012_v42 = vpack.c.bf16 %v2933_v43, %v2932_v54  ;;  %6474 = vrot.lane.b32.xlu1 %v18762_v23, %s12433_s11  ;;  %v11526_v27 = vpop.f32.mrf.mxu0  ;;  %18763 = vst [vmem:[#allocation9_spill] sm:$0xff] %v14582_v44  ;;  %v2726_v40 = vadd.f32 %v14422_v1, %v2725_v31  ;;  %v2734_v54 = vadd.f32 %v14422_v1, %v11494_v4  ;;  %v18766_v31 = vld [vmem:[#allocation12_spill] sm:$0xff]  ;;  %v18768_v4 = vld [vmem:[#allocation13_spill] sm:$0xff] }
 0x2dc   :  { %6476 = vrot.lane.b32.xlu0 %v18764_v5, %s12433_s11  ;;  %v11495_v62 = vpop.f32.mrf.mxu1  ;;  %v3286_v47 = vadd.f32 %v11526_v27, %v14578_v59 }
 0x2dd   :  { %v2737_v19 = vadd.f32 %v14422_v1, %v11495_v62  ;;  %v3277_v29 = vpop.f32.mrf.mxu0  ;;  %11620 = vmatprep.mubr.msk.bf16.mxu0 %vm2098_vm2, %v3012_v42  ;;  %v14591_v23 = vpop.permute.xlu1 %4070  ;;  %v18767_v62 = vld [vmem:[#allocation64_spill] sm:$0xff]  ;;  %v2936_v10 = vmax.f32 %v2726_v40, 0.0  ;;  %v2938_v9 = vmax.f32 %v2734_v54, 0.0  ;;  %v18775_v54 = vld [vmem:[#allocation69_spill] sm:$0xff] }
 0x2de   :  { %18765 = vst [vmem:[#allocation11_spill] sm:$0xff] %v14591_v23  ;;  %v3278_v25 = vadd.f32 %v14578_v59, %v3277_v29  ;;  %v2728_v43 = vpop.f32.mrf.mxu1  ;;  %11621 = vmatmul.mubr.msk.bf16.gmra.mxu0 %vm2098_vm2, %v3013_v48  ;;  %v18769_v29 = vld [vmem:[#allocation67_spill] sm:$0xff] }
 0x2df   :  { %v2729_v55 = vadd.f32 %v14422_v1, %v2728_v43  ;;  %6478 = vrot.lane.b32.xlu1 %v18766_v31, %s12433_s11  ;;  %v11527_v27 = vpop.f32.mrf.mxu0  ;;  %v2939_v5 = vmax.f32 %v2737_v19, 0.0  ;;  %v3790_v35 = vadd.f32 %v3286_v47, %v18769_v29  ;;  %v14603_v43 = vpop.permute.xlu0 %4072 }
 0x2e0   :  { %v3788_v44 = vadd.f32 %v3278_v25, %v18767_v62  ;;  %v3289_v42 = vadd.f32 %v11527_v27, %v14578_v59  ;;  %6480 = vrot.lane.b32.xlu0 %v18768_v4, %s12433_s11  ;;  %v11498_v23 = vpop.f32.mrf.mxu1  ;;  %18770 = vst [vmem:[#allocation10_spill] sm:$0xff] %v14603_v43  ;;  %v18772_v27 = vld [vmem:[#allocation15_spill] sm:$0xff] }
 0x2e1   :  { %v2937_v56 = vmax.f32 %v2729_v55, 0.0  ;;  %v3280_v48 = vpop.f32.mrf.mxu0  ;;  %v3015_v62 = vpack.c.bf16 %v2939_v5, %v2938_v9  ;;  %v14615_v47 = vpop.permute.xlu1 %4074 }
 0x2e2   :  { %v3791_v31 = vadd.f32 %v3289_v42, %v18771_v34  ;;  %v3281_v19 = vadd.f32 %v14578_v59, %v3280_v48  ;;  %v2741_v33 = vpop.f32.mrf.mxu1  ;;  %v14610_v4 = vadd.f32 %v14145_v7, %v3788_v44  ;;  %v18776_v34 = vld [vmem:[#allocation14_spill] sm:$0xff]  ;;  %v2750_v44 = vadd.f32 %v14422_v1, %v11498_v23 }
 0x2e3   :  { %v3014_v25 = vpack.c.bf16 %v2937_v56, %v2936_v10  ;;  %6482 = vrot.lane.b32.xlu1 %v18772_v27, %s12433_s11  ;;  %v14621_v10 = vadd.f32 %v14160_v24, %v3790_v35  ;;  %v2742_v56 = vadd.f32 %v14422_v1, %v2741_v33  ;;  %v18779_v35 = vld [vmem:[#allocation16_spill] sm:$0xff] }
 0x2e4   :  { %18773 = vst [vmem:[#allocation12_spill] sm:$0xff] %v14610_v4  ;;  %v14613_v40 = vadd.f32 %v14169_v60, %v3791_v31  ;;  %v3789_v55 = vadd.f32 %v3281_v19, %v18775_v54  ;;  %6484 = vrot.lane.b32.xlu0 %v18776_v34, %s12433_s11  ;;  %v11499_v42 = vpop.f32.mrf.mxu1  ;;  %v4428_v33 = vmax.f32 %v14610_v4, 0.0  ;;  %v14637_v31 = vpop.permute.xlu0 %4076  ;;  %v18781_v19 = vld [vmem:[#allocation17_spill] sm:$0xff]  ;;  %v2942_v34 = vmax.f32 %v2750_v44, 0.0  ;;  %v18783_v4 = vld [vmem:[#allocation76_spill] sm:$0xff]  ;;  %v18786_v44 = vld [vmem:[#allocation18_spill] sm:$0xff] }
 0x2e5   :  { %18777 = vst [vmem:[#allocation13_spill] sm:$0xff] %v14621_v10  ;;  %v2753_v9 = vadd.f32 %v14422_v1, %v11499_v42  ;;  %11624 = vmatprep.mubr.msk.bf16.mxu0 %vm2098_vm2, %v3014_v25  ;;  %18780 = vst [vmem:[#allocation65_spill] sm:$0xff] %v14637_v31  ;;  %v4430_v27 = vmax.f32 %v14621_v10, 0.0  ;;  %v14643_v42 = vpop.permute.xlu1 %4078  ;;  %v18785_v10 = vld [vmem:[#allocation72_spill] sm:$0xff] }
 0x2e6   :  { %18774 = vst [vmem:[#allocation64_spill] sm:$0xff] %v14613_v40  ;;  %v14628_v7 = vadd.f32 %v14156_v37, %v3789_v55  ;;  %v2744_v60 = vpop.f32.mrf.mxu1  ;;  %11625 = vmatmul.mubr.msk.bf16.gmra.mxu0 %vm2098_vm2, %v3015_v62  ;;  %v4431_v5 = vmax.f32 %v14613_v40, 0.0  ;;  %v11530_v24 = vpop.f32.mrf.mxu0  ;;  %v2940_v62 = vmax.f32 %v2742_v56, 0.0  ;;  %18782 = vst [vmem:[#allocation15_spill] sm:$0xff] %v14643_v42 }
 0x2e7   :  { %v2745_v29 = vadd.f32 %v14422_v1, %v2744_v60  ;;  %6486 = vrot.lane.b32.xlu1 %v18779_v35, %s12433_s11  ;;  %v2943_v23 = vmax.f32 %v2753_v9, 0.0  ;;  %v3302_v37 = vadd.f32 %v11530_v24, %v14578_v59 }
 0x2e8   :  { %18778 = vst [vmem:[#allocation67_spill] sm:$0xff] %v14628_v7  ;;  %v4429_v48 = vmax.f32 %v14628_v7, 0.0  ;;  %6488 = vrot.lane.b32.xlu0 %v18781_v19, %s12433_s11  ;;  %v11502_v25 = vpop.f32.mrf.mxu1  ;;  %v3293_v55 = vpop.f32.mrf.mxu0  ;;  %v4557_v40 = vpack.c.bf16 %v4431_v5, %v4430_v27  ;;  %v18784_v19 = vld [vmem:[#allocation19_spill] sm:$0xff] }
 0x2e9   :  { %v2941_v54 = vmax.f32 %v2745_v29, 0.0  ;;  %v3294_v60 = vadd.f32 %v14578_v59, %v3293_v55  ;;  %v3794_v24 = vadd.f32 %v3302_v37, %v18783_v4  ;;  %v3017_v43 = vpack.c.bf16 %v2943_v23, %v2942_v34  ;;  %v18791_v34 = vld [vmem:[#allocation20_spill] sm:$0xff] }
 0x2ea   :  { %v2757_v35 = vpop.f32.mrf.mxu1  ;;  %v4556_v7 = vpack.c.bf16 %v4429_v48, %v4428_v33  ;;  %v11531_v31 = vpop.f32.mrf.mxu0 }
 0x2eb   :  { %v3016_v9 = vpack.c.bf16 %v2941_v54, %v2940_v62  ;;  %6490 = vrot.lane.b32.xlu1 %v18784_v19, %s12433_s11  ;;  %v3792_v56 = vadd.f32 %v3294_v60, %v18785_v10  ;;  %v3305_v29 = vadd.f32 %v11531_v31, %v14578_v59  ;;  %v2758_v5 = vadd.f32 %v14422_v1, %v2757_v35  ;;  %v14658_v48 = vpop.permute.xlu0 %4080  ;;  %v18787_v31 = vld [vmem:[#allocation79_spill] sm:$0xff]  ;;  %v18789_v62 = vld [vmem:[#allocation261_spill] sm:$0xff] }
 0x2ec   :  { %6492 = vrot.lane.b32.xlu0 %v18786_v44, %s12433_s11  ;;  %v11503_v42 = vpop.f32.mrf.mxu1  ;;  %11656 = vmatprep.mubr.msk.bf16.mxu1 %vm2098_vm2, %v4556_v7  ;;  %v3296_v4 = vpop.f32.mrf.mxu0  ;;  %v2766_v10 = vadd.f32 %v14422_v1, %v11502_v25  ;;  %v14665_v7 = vadd.f32 %v14183_v30, %v3794_v24  ;;  %v18793_v35 = vld [vmem:[#allocation75_spill] sm:$0xff] }
 0x2ed   :  { %v2769_v33 = vadd.f32 %v14422_v1, %v11503_v42  ;;  %11628 = vmatprep.mubr.msk.bf16.mxu0 %vm2098_vm2, %v3016_v9  ;;  %11657 = vmatmul.mubr.msk.bf16.vlgmr.msra.gmra.mxu1 %vm2098_vm2, %v4557_v40  ;;  %v3795_v23 = vadd.f32 %v3305_v29, %v18787_v31  ;;  %v3297_v37 = vadd.f32 %v14578_v59, %v3296_v4  ;;  %v14673_v25 = vpop.permute.xlu1 %4082  ;;  %v18794_v9 = vld [vmem:[#allocation21_spill] sm:$0xff]  ;;  %v2944_v19 = vmax.f32 %v2758_v5, 0.0  ;;  %v18795_v4 = vld [vmem:[#allocation262_spill] sm:$0xff] }
 0x2ee   :  { %v2760_v27 = vpop.f32.mrf.mxu1  ;;  %11629 = vmatmul.mubr.msk.bf16.gmra.mxu0 %vm2098_vm2, %v3017_v43  ;;  %18788 = vst [vmem:[#allocation69_spill] sm:$0xff] %v14665_v7  ;;  %v14668_v54 = vadd.f32 %v18789_v62, %v3792_v56  ;;  %v11534_v40 = vpop.f32.mrf.mxu0  ;;  %v2946_v44 = vmax.f32 %v2766_v10, 0.0 }
 0x2ef   :  { %v2761_v55 = vadd.f32 %v14422_v1, %v2760_v27  ;;  %6494 = vrot.lane.b32.xlu1 %v18791_v34, %s12433_s11  ;;  %v14676_v42 = vadd.f32 %v14191_v28, %v3795_v23  ;;  %v2947_v60 = vmax.f32 %v2769_v33, 0.0  ;;  %v3793_v43 = vadd.f32 %v3297_v37, %v18793_v35  ;;  %v18798_v35 = vld [vmem:[#allocation84_spill] sm:$0xff] }
 0x2f0   :  { %18790 = vst [vmem:[#allocation14_spill] sm:$0xff] %v14668_v54  ;;  %v3318_v30 = vadd.f32 %v11534_v40, %v14578_v59  ;;  %6496 = vrot.lane.b32.xlu0 %v18794_v9, %s12433_s11  ;;  %v11506_v24 = vpop.f32.mrf.mxu1  ;;  %v3309_v29 = vpop.f32.mrf.mxu0  ;;  %v4434_v33 = vmax.f32 %v14665_v7, 0.0  ;;  %v18797_v40 = vld [vmem:[#allocation23_spill] sm:$0xff]  ;;  %v4432_v5 = vmax.f32 %v14668_v54, 0.0  ;;  %v18799_v9 = vld [vmem:[#allocation22_spill] sm:$0xff] }
 0x2f1   :  { %18792 = vst [vmem:[#allocation16_spill] sm:$0xff] %v14676_v42  ;;  %v2945_v56 = vmax.f32 %v2761_v55, 0.0  ;;  %v14683_v31 = vadd.f32 %v18795_v4, %v3793_v43  ;;  %v3310_v27 = vadd.f32 %v14578_v59, %v3309_v29  ;;  %v4435_v23 = vmax.f32 %v14676_v42, 0.0  ;;  %v14691_v55 = vpop.permute.xlu0 %4084  ;;  %v18800_v4 = vld [vmem:[#allocation80_spill] sm:$0xff] }
 0x2f2   :  { %v2773_v28 = vpop.f32.mrf.mxu1  ;;  %v11535_v62 = vpop.f32.mrf.mxu0  ;;  %v3019_v10 = vpack.c.bf16 %v2947_v60, %v2946_v44  ;;  %v3798_v43 = vadd.f32 %v3318_v30, %v18798_v35  ;;  %v2782_v44 = vadd.f32 %v14422_v1, %v11506_v24  ;;  %v18805_v24 = vld [vmem:[#allocation83_spill] sm:$0xff] }
 0x2f3   :  { %18796 = vst [vmem:[#allocation17_spill] sm:$0xff] %v14683_v31  ;;  %v3018_v37 = vpack.c.bf16 %v2945_v56, %v2944_v19  ;;  %6498 = vrot.lane.b32.xlu1 %v18797_v40, %s12433_s11  ;;  %v4433_v34 = vmax.f32 %v14683_v31, 0.0  ;;  %v3796_v42 = vadd.f32 %v3310_v27, %v18800_v4  ;;  %v2774_v19 = vadd.f32 %v14422_v1, %v2773_v28  ;;  %v14702_v60 = vpop.permute.xlu1 %4086  ;;  %v18802_v4 = vld [vmem:[#allocation87_spill] sm:$0xff] }
 0x2f4   :  { %6500 = vrot.lane.b32.xlu0 %v18799_v9, %s12433_s11  ;;  %v11507_v29 = vpop.f32.mrf.mxu1  ;;  %v3321_v56 = vadd.f32 %v11535_v62, %v14578_v59  ;;  %v3312_v54 = vpop.f32.mrf.mxu0  ;;  %18801 = vst [vmem:[#allocation76_spill] sm:$0xff] %v14702_v60  ;;  %v4559_v27 = vpack.c.bf16 %v4435_v23, %v4434_v33 }
 0x2f5   :  { %v2785_v40 = vadd.f32 %v14422_v1, %v11507_v29  ;;  %11632 = vmatprep.mubr.msk.bf16.mxu0 %vm2098_vm2, %v3018_v37  ;;  %v3313_v30 = vadd.f32 %v14578_v59, %v3312_v54  ;;  %v4558_v9 = vpack.c.bf16 %v4433_v34, %v4432_v5  ;;  %v18803_v29 = vld [vmem:[#allocation24_spill] sm:$0xff]  ;;  %v14712_v37 = vadd.f32 %v14205_v0, %v3798_v43  ;;  %v18806_v54 = vld [vmem:[#allocation25_spill] sm:$0xff]  ;;  %v14725_v0 = vpop.permute.xlu0 %4088 }
 0x2f6   :  { %v2776_v35 = vpop.f32.mrf.mxu1  ;;  %11633 = vmatmul.mubr.msk.bf16.gmra.mxu0 %vm2098_vm2, %v3019_v10  ;;  %v3799_v28 = vadd.f32 %v3321_v56, %v18802_v4  ;;  %v11538_v31 = vpop.f32.mrf.mxu0  ;;  %v14719_v23 = vadd.f32 %v14193_v39, %v3796_v42  ;;  %v2948_v5 = vmax.f32 %v2774_v19, 0.0  ;;  %v2950_v43 = vmax.f32 %v2782_v44, 0.0  ;;  %v18811_v4 = vld [vmem:[#allocation27_spill] sm:$0xff] }
 0x2f7   :  { %v2777_v62 = vadd.f32 %v14422_v1, %v2776_v35  ;;  %6502 = vrot.lane.b32.xlu1 %v18803_v29, %s12433_s11  ;;  %18804 = vst [vmem:[#allocation19_spill] sm:$0xff] %v14712_v37  ;;  %v2951_v7 = vmax.f32 %v2785_v40, 0.0  ;;  %v3797_v60 = vadd.f32 %v3313_v30, %v18805_v24  ;;  %11660 = vmatprep.mubr.msk.bf16.mxu1 %vm2098_vm2, %v4558_v9  ;;  %v18809_v40 = vld [vmem:[#allocation263_spill] sm:$0xff] }
 0x2f8   :  { %6504 = vrot.lane.b32.xlu0 %v18806_v54, %s12433_s11  ;;  %v11510_v33 = vpop.f32.mrf.mxu1  ;;  %18807 = vst [vmem:[#allocation72_spill] sm:$0xff] %v14719_v23  ;;  %v14722_v10 = vadd.f32 %v14213_v45, %v3799_v28  ;;  %v3325_v56 = vpop.f32.mrf.mxu0  ;;  %11661 = vmatmul.mubr.msk.bf16.gmra.mxu1 %vm2098_vm2, %v4559_v27  ;;  %v3334_v35 = vadd.f32 %v11538_v31, %v14578_v59  ;;  %v18813_v31 = vld [vmem:[#allocation26_spill] sm:$0xff]  ;;  %v4438_v54 = vmax.f32 %v14712_v37, 0.0  ;;  %v18996_v37 = vld [vmem:[#allocation97_spill] sm:$0xff] }
 0x2f9   :  { %v2949_v34 = vmax.f32 %v2777_v62, 0.0  ;;  %v14728_v30 = vadd.f32 %v18809_v40, %v3797_v60  ;;  %v3326_v9 = vadd.f32 %v14578_v59, %v3325_v56  ;;  %v14735_v28 = vpop.permute.xlu1 %4090  ;;  %v3021_v27 = vpack.c.bf16 %v2951_v7, %v2950_v43  ;;  %v18812_v62 = vld [vmem:[#allocation88_spill] sm:$0xff] }
 0x2fa   :  { %18808 = vst [vmem:[#allocation18_spill] sm:$0xff] %v14722_v10  ;;  %v2789_v39 = vpop.f32.mrf.mxu1  ;;  %v4439_v42 = vmax.f32 %v14722_v10, 0.0  ;;  %v11539_v45 = vpop.f32.mrf.mxu0  ;;  %v18814_v7 = vld [vmem:[#allocation92_spill] sm:$0xff] }
 0x2fb   :  { %18810 = vst [vmem:[#allocation79_spill] sm:$0xff] %v14728_v30  ;;  %v3020_v19 = vpack.c.bf16 %v2949_v34, %v2948_v5  ;;  %6506 = vrot.lane.b32.xlu1 %v18811_v4, %s12433_s11  ;;  %v4437_v44 = vmax.f32 %v14728_v30, 0.0  ;;  %v3800_v60 = vadd.f32 %v3326_v9, %v18812_v62  ;;  %v3337_v29 = vadd.f32 %v11539_v45, %v14578_v59  ;;  %v18815_v45 = vld [vmem:[#allocation95_spill] sm:$0xff] }
 0x2fc   :  { %6508 = vrot.lane.b32.xlu0 %v18813_v31, %s12433_s11  ;;  %v11511_v24 = vpop.f32.mrf.mxu1  ;;  %v4436_v5 = vmax.f32 %v14719_v23, 0.0  ;;  %v2790_v34 = vadd.f32 %v14422_v1, %v2789_v39  ;;  %v3328_v40 = vpop.f32.mrf.mxu0  ;;  %v3802_v43 = vadd.f32 %v3334_v35, %v18814_v7  ;;  %v2798_v9 = vadd.f32 %v14422_v1, %v11510_v33 }
 0x2fd   :  { %v2801_v56 = vadd.f32 %v14422_v1, %v11511_v24  ;;  %11636 = vmatprep.mubr.msk.bf16.mxu0 %vm2098_vm2, %v3020_v19  ;;  %v3803_v4 = vadd.f32 %v3337_v29, %v18815_v45  ;;  %v3329_v62 = vadd.f32 %v14578_v59, %v3328_v40  ;;  %v4561_v30 = vpack.c.bf16 %v4439_v42, %v4438_v54  ;;  %v18817_v19 = vld [vmem:[#allocation28_spill] sm:$0xff]  ;;  %v14758_v7 = vpop.permute.xlu0 %4092  ;;  %v18819_v40 = vld [vmem:[#allocation91_spill] sm:$0xff] }
 0x2fe   :  { %v2792_v31 = vpop.f32.mrf.mxu1  ;;  %11637 = vmatmul.mubr.msk.bf16.gmra.mxu0 %vm2098_vm2, %v3021_v27  ;;  %v14753_v10 = vadd.f32 %v14215_v61, %v3800_v60  ;;  %v11542_v24 = vpop.f32.mrf.mxu0  ;;  %v4560_v35 = vpack.c.bf16 %v4437_v44, %v4436_v5  ;;  %v18820_v61 = vld [vmem:[#allocation29_spill] sm:$0xff]  ;;  %v2952_v60 = vmax.f32 %v2790_v34, 0.0  ;;  %v14771_v5 = vadd.f32 %v14227_v3, %v3802_v43  ;;  %v18823_v34 = vld [vmem:[#allocation100_spill] sm:$0xff] }
 0x2ff   :  { %v2793_v39 = vadd.f32 %v14422_v1, %v2792_v31  ;;  %6510 = vrot.lane.b32.xlu1 %v18817_v19, %s12433_s11  ;;  %v14761_v33 = vadd.f32 %v14235_v13, %v3803_v4  ;;  %v2955_v29 = vmax.f32 %v2801_v56, 0.0  ;;  %v3801_v45 = vadd.f32 %v3329_v62, %v18819_v40  ;;  %v14768_v44 = vpop.permute.xlu1 %4094 }
 0x300   :  { %18816 = vst [vmem:[#allocation261_spill] sm:$0xff] %v14753_v10  ;;  %v3350_v42 = vadd.f32 %v11542_v24, %v14578_v59  ;;  %6512 = vrot.lane.b32.xlu0 %v18820_v61, %s12433_s11  ;;  %v11514_v27 = vpop.f32.mrf.mxu1  ;;  %11664 = vmatprep.mubr.msk.bf16.mxu1 %vm2098_vm2, %v4560_v35  ;;  %v3341_v31 = vpop.f32.mrf.mxu0  ;;  %18821 = vst [vmem:[#allocation75_spill] sm:$0xff] %v14771_v5  ;;  %v2954_v13 = vmax.f32 %v2798_v9, 0.0  ;;  %v18824_v35 = vld [vmem:[#allocation31_spill] sm:$0xff]  ;;  %v4440_v40 = vmax.f32 %v14753_v10, 0.0  ;;  %v18825_v9 = vld [vmem:[#allocation30_spill] sm:$0xff] }
 0x301   :  { %18818 = vst [vmem:[#allocation20_spill] sm:$0xff] %v14761_v33  ;;  %v2953_v54 = vmax.f32 %v2793_v39, 0.0  ;;  %v14774_v56 = vadd.f32 %v14223_v38, %v3801_v45  ;;  %v3342_v4 = vadd.f32 %v14578_v59, %v3341_v31  ;;  %11665 = vmatmul.mubr.msk.bf16.gmra.mxu1 %vm2098_vm2, %v4561_v30  ;;  %v4443_v3 = vmax.f32 %v14761_v33, 0.0  ;;  %v18826_v30 = vld [vmem:[#allocation96_spill] sm:$0xff] }
 0x302   :  { %v2805_v62 = vpop.f32.mrf.mxu1  ;;  %v3806_v39 = vadd.f32 %v3350_v42, %v18823_v34  ;;  %v11543_v19 = vpop.f32.mrf.mxu0  ;;  %v3023_v43 = vpack.c.bf16 %v2955_v29, %v2954_v13  ;;  %v4442_v29 = vmax.f32 %v14771_v5, 0.0  ;;  %v2814_v13 = vadd.f32 %v14422_v1, %v11514_v27 }
 0x303   :  { %18822 = vst [vmem:[#allocation21_spill] sm:$0xff] %v14774_v56  ;;  %v3022_v24 = vpack.c.bf16 %v2953_v54, %v2952_v60  ;;  %6514 = vrot.lane.b32.xlu1 %v18824_v35, %s12433_s11  ;;  %v4441_v38 = vmax.f32 %v14774_v56, 0.0  ;;  %v3804_v61 = vadd.f32 %v3342_v4, %v18826_v30  ;;  %v2806_v60 = vadd.f32 %v14422_v1, %v2805_v62  ;;  %v14791_v34 = vpop.permute.xlu0 %4096  ;;  %v18829_v56 = vld [vmem:[#allocation32_spill] sm:$0xff]  ;;  %v14804_v33 = vpop.permute.xlu1 %4098 }
 0x304   :  { %6516 = vrot.lane.b32.xlu0 %v18825_v9, %s12433_s11  ;;  %v11515_v45 = vpop.f32.mrf.mxu1  ;;  %v3353_v42 = vadd.f32 %v11543_v19, %v14578_v59  ;;  %v3344_v31 = vpop.f32.mrf.mxu0  ;;  %v14798_v62 = vadd.f32 %v14249_v12, %v3806_v39  ;;  %v18828_v19 = vld [vmem:[#allocation103_spill] sm:$0xff]  ;;  %v4563_v27 = vpack.c.bf16 %v4443_v3, %v4442_v29 }
 0x305   :  { %v2817_v54 = vadd.f32 %v14422_v1, %v11515_v45  ;;  %11640 = vmatprep.mubr.msk.bf16.mxu0 %vm2098_vm2, %v3022_v24  ;;  %v3345_v35 = vadd.f32 %v14578_v59, %v3344_v31  ;;  %v4562_v4 = vpack.c.bf16 %v4441_v38, %v4440_v40  ;;  %v18830_v31 = vld [vmem:[#allocation99_spill] sm:$0xff]  ;;  %v18831_v40 = vld [vmem:[#allocation33_spill] sm:$0xff]  ;;  %v14811_v39 = vadd.f32 %v14237_v58, %v3804_v61 }
 0x306   :  { %v2808_v9 = vpop.f32.mrf.mxu1  ;;  %11641 = vmatmul.mubr.msk.bf16.gmra.mxu0 %vm2098_vm2, %v3023_v43  ;;  %18827 = vst [vmem:[#allocation262_spill] sm:$0xff] %v14798_v62  ;;  %v3807_v45 = vadd.f32 %v3353_v42, %v18828_v19  ;;  %v11546_v24 = vpop.f32.mrf.mxu0  ;;  %v2956_v43 = vmax.f32 %v2806_v60, 0.0  ;;  %v4446_v58 = vmax.f32 %v14798_v62, 0.0  ;;  %v18836_v19 = vld [vmem:[#allocation104_spill] sm:$0xff] }
 0x307   :  { %v2809_v30 = vadd.f32 %v14422_v1, %v2808_v9  ;;  %6518 = vrot.lane.b32.xlu1 %v18829_v56, %s12433_s11  ;;  %v2959_v10 = vmax.f32 %v2817_v54, 0.0  ;;  %v3805_v5 = vadd.f32 %v3345_v35, %v18830_v31  ;;  %11668 = vmatprep.mubr.msk.bf16.mxu1 %vm2098_vm2, %v4562_v4  ;;  %18832 = vst [vmem:[#allocation23_spill] sm:$0xff] %v14811_v39  ;;  %v2958_v9 = vmax.f32 %v2814_v13, 0.0  ;;  %v18835_v4 = vld [vmem:[#allocation35_spill] sm:$0xff]  ;;  %v14826_v13 = vpop.permute.xlu0 %4100 }
 0x308   :  { %6520 = vrot.lane.b32.xlu0 %v18831_v40, %s12433_s11  ;;  %v11518_v12 = vpop.f32.mrf.mxu1  ;;  %v14814_v38 = vadd.f32 %v14257_v20, %v3807_v45  ;;  %v3357_v42 = vpop.f32.mrf.mxu0  ;;  %v3366_v54 = vadd.f32 %v11546_v24, %v14578_v59  ;;  %v18837_v24 = vld [vmem:[#allocation34_spill] sm:$0xff]  ;;  %v4444_v31 = vmax.f32 %v14811_v39, 0.0 }
 0x309   :  { %v2957_v56 = vmax.f32 %v2809_v30, 0.0  ;;  %v14817_v3 = vadd.f32 %v14245_v49, %v3805_v5  ;;  %v3358_v29 = vadd.f32 %v14578_v59, %v3357_v42  ;;  %11669 = vmatmul.mubr.msk.bf16.gmra.mxu1 %vm2098_vm2, %v4563_v27  ;;  %v3025_v49 = vpack.c.bf16 %v2959_v10, %v2958_v9  ;;  %v14838_v10 = vpop.permute.xlu1 %4102  ;;  %v18838_v9 = vld [vmem:[#allocation108_spill] sm:$0xff] }
 0x30a   :  { %18833 = vst [vmem:[#allocation84_spill] sm:$0xff] %v14814_v38  ;;  %v2821_v35 = vpop.f32.mrf.mxu1  ;;  %v4447_v61 = vmax.f32 %v14814_v38, 0.0  ;;  %v11547_v20 = vpop.f32.mrf.mxu0  ;;  %v2830_v40 = vadd.f32 %v14422_v1, %v11518_v12 }
 0x30b   :  { %18834 = vst [vmem:[#allocation22_spill] sm:$0xff] %v14817_v3  ;;  %v3024_v60 = vpack.c.bf16 %v2957_v56, %v2956_v43  ;;  %6522 = vrot.lane.b32.xlu1 %v18835_v4, %s12433_s11  ;;  %v4445_v5 = vmax.f32 %v14817_v3, 0.0  ;;  %v3808_v45 = vadd.f32 %v3358_v29, %v18836_v19  ;;  %v3369_v30 = vadd.f32 %v11547_v20, %v14578_v59  ;;  %v18839_v20 = vld [vmem:[#allocation111_spill] sm:$0xff] }
 0x30c   :  { %6524 = vrot.lane.b32.xlu0 %v18837_v24, %s12433_s11  ;;  %v11519_v27 = vpop.f32.mrf.mxu1  ;;  %v2822_v43 = vadd.f32 %v14422_v1, %v2821_v35  ;;  %v3360_v42 = vpop.f32.mrf.mxu0  ;;  %v3810_v29 = vadd.f32 %v3366_v54, %v18838_v9  ;;  %v4565_v3 = vpack.c.bf16 %v4447_v61, %v4446_v58  ;;  %v18843_v9 = vld [vmem:[#allocation107_spill] sm:$0xff]  ;;  %v2962_v58 = vmax.f32 %v2830_v40, 0.0 }
 0x30d   :  { %v2833_v56 = vadd.f32 %v14422_v1, %v11519_v27  ;;  %11644 = vmatprep.mubr.msk.bf16.mxu0 %vm2098_vm2, %v3024_v60  ;;  %v3811_v4 = vadd.f32 %v3369_v30, %v18839_v20  ;;  %v3361_v19 = vadd.f32 %v14578_v59, %v3360_v42  ;;  %v18840_v27 = vld [vmem:[#allocation36_spill] sm:$0xff]  ;;  %v4564_v38 = vpack.c.bf16 %v4445_v5, %v4444_v31  ;;  %v18844_v20 = vld [vmem:[#allocation37_spill] sm:$0xff] }
 0x30e   :  { %v2824_v24 = vpop.f32.mrf.mxu1  ;;  %11645 = vmatmul.mubr.msk.bf16.gmra.mxu0 %vm2098_vm2, %v3025_v49  ;;  %v11550_v35 = vpop.f32.mrf.mxu0  ;;  %v14848_v60 = vadd.f32 %v14259_v15, %v3808_v45  ;;  %v2960_v61 = vmax.f32 %v2822_v43, 0.0  ;;  %v14860_v15 = vadd.f32 %v14271_v50, %v3810_v29  ;;  %v18847_v43 = vld [vmem:[#allocation39_spill] sm:$0xff] }
 0x30f   :  { %v2825_v12 = vadd.f32 %v14422_v1, %v2824_v24  ;;  %6526 = vrot.lane.b32.xlu1 %v18840_v27, %s12433_s11  ;;  %v14851_v54 = vadd.f32 %v14279_v6, %v3811_v4  ;;  %v2963_v30 = vmax.f32 %v2833_v56, 0.0  ;;  %v3809_v42 = vadd.f32 %v3361_v19, %v18843_v9  ;;  %11672 = vmatprep.mubr.msk.bf16.mxu1 %vm2098_vm2, %v4564_v38  ;;  %v14857_v24 = vpop.permute.xlu0 %4104  ;;  %v14870_v38 = vpop.permute.xlu1 %4106  ;;  %v18848_v4 = vld [vmem:[#allocation38_spill] sm:$0xff]  ;;  %v18849_v19 = vld [vmem:[#allocation112_spill] sm:$0xff] }
 0x310   :  { %18841 = vst [vmem:[#allocation80_spill] sm:$0xff] %v14848_v60  ;;  %6528 = vrot.lane.b32.xlu0 %v18844_v20, %s12433_s11  ;;  %v3373_v49 = vpop.f32.mrf.mxu0  ;;  %18845 = vst [vmem:[#allocation24_spill] sm:$0xff] %v14860_v15  ;;  %v3382_v5 = vadd.f32 %v11550_v35, %v14578_v59  ;;  %v4448_v56 = vmax.f32 %v14848_v60, 0.0  ;;  %v4450_v27 = vmax.f32 %v14860_v15, 0.0  ;;  %v18850_v9 = vld [vmem:[#allocation116_spill] sm:$0xff]  ;;  %v18964_v15 = vld [vmem:[#allocation81_spill] sm:$0xff] }
 0x311   :  { %18842 = vst [vmem:[#allocation87_spill] sm:$0xff] %v14851_v54  ;;  %v2961_v1 = vmax.f32 %v2825_v12, 0.0  ;;  %v14863_v6 = vadd.f32 %v14267_v18, %v3809_v42  ;;  %v3374_v45 = vadd.f32 %v14578_v59, %v3373_v49  ;;  %11673 = vmatmul.mubr.msk.bf16.gmra.mxu1 %vm2098_vm2, %v4565_v3  ;;  %v4451_v50 = vmax.f32 %v14851_v54, 0.0 }
 0x312   :  { %v11551_v40 = vpop.f32.mrf.mxu0  ;;  %v3027_v29 = vpack.c.bf16 %v2963_v30, %v2962_v58  ;;  %v3814_v42 = vadd.f32 %v3382_v5, %v18850_v9  ;;  %v12393_v58 = vld [vmem:[%s17777_s3 + $0x28] sm:$0xff]  }
 0x313   :  { %18846 = vst [vmem:[#allocation83_spill] sm:$0xff] %v14863_v6  ;;  %v3026_v31 = vpack.c.bf16 %v2961_v1, %v2960_v61  ;;  %6530 = vrot.lane.b32.xlu1 %v18847_v43, %s12433_s11  ;;  %v4449_v18 = vmax.f32 %v14863_v6, 0.0  ;;  %v3812_v12 = vadd.f32 %v3374_v45, %v18849_v19  ;;  %v3385_v3 = vadd.f32 %v11551_v40, %v14578_v59  ;;  %v18851_v61 = vld [vmem:[#allocation119_spill] sm:$0xff]  ;;  %v18852_v45 = vld [vmem:[#allocation40_spill] sm:$0xff]  ;;  %v14902_v19 = vpop.permute.xlu1 %4110 }
 0x314   :  { %6532 = vrot.lane.b32.xlu0 %v18848_v4, %s12433_s11  ;;  %v3376_v35 = vpop.f32.mrf.mxu0  ;;  %v4567_v40 = vpack.c.bf16 %v4451_v50, %v4450_v27  ;;  %v18853_v43 = vld [vmem:[#allocation115_spill] sm:$0xff]  ;;  %11916 = vmatprep.subr.bf16.mxu1 %v12393_v58 }
 0x315   :  { %11648 = vmatprep.mubr.msk.bf16.mxu0 %vm2098_vm2, %v3026_v31  ;;  %v3377_v20 = vadd.f32 %v14578_v59, %v3376_v35  ;;  %v4566_v30 = vpack.c.bf16 %v4449_v18, %v4448_v56  ;;  %v3815_v1 = vadd.f32 %v3385_v3, %v18851_v61  ;;  %v14890_v31 = vpop.permute.xlu0 %4108  ;;  %v14897_v56 = vadd.f32 %v14281_v11, %v3812_v12 }
 0x316   :  { %11649 = vmatmul.mubr.msk.bf16.gmra.mxu0 %vm2098_vm2, %v3027_v29  ;;  %v11554_v49 = vpop.f32.mrf.mxu0  ;;  %v18854_v29 = vld [vmem:[#allocation41_spill] sm:$0xff]  ;;  %v14905_v3 = vadd.f32 %v14293_v32, %v3814_v42  ;;  %11917 = vmatpush3.bf16.msra.mxu1 %v12393_v58  ;;  %v18860_v32 = vld [vmem:[#allocation120_spill] sm:$0xff] }
 0x317   :  { %6534 = vrot.lane.b32.xlu1 %v18852_v45, %s12433_s11  ;;  %v3813_v5 = vadd.f32 %v3377_v20, %v18853_v43  ;;  %11676 = vmatprep.mubr.msk.bf16.mxu1 %vm2098_vm2, %v4566_v30  ;;  %18855 = vst [vmem:[#allocation25_spill] sm:$0xff] %v14897_v56  ;;  %v14900_v18 = vadd.f32 %v14301_v22, %v3815_v1  ;;  %v18859_v22 = vld [vmem:[#allocation43_spill] sm:$0xff]  ;;  %v18861_v20 = vld [vmem:[#allocation42_spill] sm:$0xff]  ;;  %v4452_v30 = vmax.f32 %v14897_v56, 0.0  ;;  %v18862_v45 = vld [vmem:[#allocation124_spill] sm:$0xff] }
 0x318   :  { %6536 = vrot.lane.b32.xlu0 %v18854_v29, %s12433_s11  ;;  %v3389_v4 = vpop.f32.mrf.mxu0  ;;  %18857 = vst [vmem:[#allocation27_spill] sm:$0xff] %v14905_v3  ;;  %v3398_v35 = vadd.f32 %v11554_v49, %v14578_v59  ;;  %v4454_v49 = vmax.f32 %v14905_v3, 0.0  ;;  %v18923_v56 = vld [vmem:[#allocation155_spill] sm:$0xff] }
 0x319   :  { %18856 = vst [vmem:[#allocation263_spill] sm:$0xff] %v14900_v18  ;;  %v14908_v50 = vadd.f32 %v14289_v2, %v3813_v5  ;;  %v3390_v27 = vadd.f32 %v14578_v59, %v3389_v4  ;;  %11677 = vmatmul.mubr.msk.bf16.gmra.mxu1 %vm2098_vm2, %v4567_v40  ;;  %v4455_v12 = vmax.f32 %v14900_v18, 0.0  ;;  %v14922_v1 = vpop.permute.xlu0 %4112  ;;  %v18863_v40 = vld [vmem:[#allocation127_spill] sm:$0xff]  ;;  %v18864_v4 = vld [vmem:[#allocation44_spill] sm:$0xff] }
 0x31a   :  { %v11555_v11 = vpop.f32.mrf.mxu0  ;;  %v3818_v58 = vadd.f32 %v3398_v35, %v18862_v45 }
 0x31b   :  { %18858 = vst [vmem:[#allocation88_spill] sm:$0xff] %v14908_v50  ;;  %6538 = vrot.lane.b32.xlu1 %v18859_v22, %s12433_s11  ;;  %v4453_v9 = vmax.f32 %v14908_v50, 0.0  ;;  %v3816_v42 = vadd.f32 %v3390_v27, %v18860_v32  ;;  %v3401_v2 = vadd.f32 %v11555_v11, %v14578_v59  ;;  %v14930_v11 = vpop.permute.xlu1 %4114  ;;  %v4569_v22 = vpack.c.bf16 %v4455_v12, %v4454_v49  ;;  %v18867_v50 = vld [vmem:[#allocation123_spill] sm:$0xff] }
 0x31c   :  { %6540 = vrot.lane.b32.xlu0 %v18861_v20, %s12433_s11  ;;  %v3392_v61 = vpop.f32.mrf.mxu0  ;;  %v14943_v45 = vadd.f32 %v14315_v8, %v3818_v58  ;;  %v18873_v58 = vld [vmem:[#allocation128_spill] sm:$0xff] }
 0x31d   :  { %v3819_v43 = vadd.f32 %v3401_v2, %v18863_v40  ;;  %v3393_v5 = vadd.f32 %v14578_v59, %v3392_v61  ;;  %v4568_v27 = vpack.c.bf16 %v4453_v9, %v4452_v30  ;;  %v14933_v32 = vadd.f32 %v14303_v21, %v3816_v42  ;;  %v18868_v2 = vld [vmem:[#allocation45_spill] sm:$0xff]  ;;  %v14953_v42 = vpop.permute.xlu0 %4116 }
 0x31e   :  { %v11558_v29 = vpop.f32.mrf.mxu0  ;;  %18869 = vst [vmem:[#allocation95_spill] sm:$0xff] %v14943_v45 }
 0x31f   :  { %6542 = vrot.lane.b32.xlu1 %v18864_v4, %s12433_s11  ;;  %18865 = vst [vmem:[#allocation26_spill] sm:$0xff] %v14933_v32  ;;  %v14936_v20 = vadd.f32 %v14323_v16, %v3819_v43  ;;  %v3817_v35 = vadd.f32 %v3393_v5, %v18867_v50  ;;  %11680 = vmatprep.mubr.msk.bf16.mxu1 %vm2098_vm2, %v4568_v27  ;;  %v18871_v50 = vld [vmem:[#allocation47_spill] sm:$0xff]  ;;  %v4456_v30 = vmax.f32 %v14933_v32, 0.0  ;;  %v4458_v4 = vmax.f32 %v14943_v45, 0.0  ;;  %v18874_v27 = vld [vmem:[#allocation132_spill] sm:$0xff] }
 0x320   :  { %6544 = vrot.lane.b32.xlu0 %v18868_v2, %s12433_s11  ;;  %v3405_v61 = vpop.f32.mrf.mxu0  ;;  %v3414_v21 = vadd.f32 %v11558_v29, %v14578_v59  ;;  %v14962_v29 = vpop.permute.xlu1 %4118 }
 0x321   :  { %18866 = vst [vmem:[#allocation92_spill] sm:$0xff] %v14936_v20  ;;  %v14946_v9 = vadd.f32 %v14311_v14, %v3817_v35  ;;  %v3406_v12 = vadd.f32 %v14578_v59, %v3405_v61  ;;  %11681 = vmatmul.mubr.msk.bf16.gmra.mxu1 %vm2098_vm2, %v4569_v22  ;;  %v4459_v8 = vmax.f32 %v14936_v20, 0.0  ;;  %v18872_v14 = vld [vmem:[#allocation46_spill] sm:$0xff]  ;;  %v18875_v61 = vld [vmem:[#allocation135_spill] sm:$0xff]  ;;  %v18876_v20 = vld [vmem:[#allocation48_spill] sm:$0xff] }
 0x322   :  { %v11559_v16 = vpop.f32.mrf.mxu0  ;;  %v3822_v22 = vadd.f32 %v3414_v21, %v18874_v27  ;;  %v18884_v27 = vld [vmem:[#allocation136_spill] sm:$0xff] }
 0x323   :  { %18870 = vst [vmem:[#allocation28_spill] sm:$0xff] %v14946_v9  ;;  %6546 = vrot.lane.b32.xlu1 %v18871_v50, %s12433_s11  ;;  %v4457_v49 = vmax.f32 %v14946_v9, 0.0  ;;  %v3820_v40 = vadd.f32 %v3406_v12, %v18873_v58  ;;  %v3417_v43 = vadd.f32 %v11559_v16, %v14578_v59  ;;  %v18877_v12 = vld [vmem:[#allocation131_spill] sm:$0xff]  ;;  %v18878_v16 = vld [vmem:[#allocation49_spill] sm:$0xff] }
 0x324   :  { %6548 = vrot.lane.b32.xlu0 %v18872_v14, %s12433_s11  ;;  %v3408_v5 = vpop.f32.mrf.mxu0  ;;  %v4571_v14 = vpack.c.bf16 %v4459_v8, %v4458_v4 }
 0x325   :  { %v3409_v35 = vadd.f32 %v14578_v59, %v3408_v5  ;;  %v4570_v2 = vpack.c.bf16 %v4457_v49, %v4456_v30  ;;  %v3823_v50 = vadd.f32 %v3417_v43, %v18875_v61  ;;  %v14975_v45 = vadd.f32 %v14325_v41, %v3820_v40  ;;  %v14980_v49 = vpop.permute.xlu0 %4120  ;;  %v18883_v40 = vld [vmem:[#allocation51_spill] sm:$0xff] }
 0x326   :  { %v11562_v9 = vpop.f32.mrf.mxu0  ;;  %v14983_v43 = vadd.f32 %v14337_v52, %v3822_v22 }
 0x327   :  { %6550 = vrot.lane.b32.xlu1 %v18876_v20, %s12433_s11  ;;  %v3821_v58 = vadd.f32 %v3409_v35, %v18877_v12  ;;  %11684 = vmatprep.mubr.msk.bf16.mxu1 %vm2098_vm2, %v4570_v2  ;;  %18879 = vst [vmem:[#allocation91_spill] sm:$0xff] %v14975_v45  ;;  %v14978_v21 = vadd.f32 %v14345_v17, %v3823_v50  ;;  %v14993_v17 = vpop.permute.xlu1 %4122  ;;  %v4460_v35 = vmax.f32 %v14975_v45, 0.0  ;;  %v18886_v50 = vld [vmem:[#allocation140_spill] sm:$0xff]  ;;  %v18887_v12 = vld [vmem:[#allocation143_spill] sm:$0xff] }
 0x328   :  { %6552 = vrot.lane.b32.xlu0 %v18878_v16, %s12433_s11  ;;  %v3421_v30 = vpop.f32.mrf.mxu0  ;;  %18881 = vst [vmem:[#allocation100_spill] sm:$0xff] %v14983_v43  ;;  %v3430_v8 = vadd.f32 %v11562_v9, %v14578_v59  ;;  %v18885_v9 = vld [vmem:[#allocation50_spill] sm:$0xff]  ;;  %v4462_v61 = vmax.f32 %v14983_v43, 0.0  ;;  %v18902_v43 = vld [vmem:[#allocation56_spill] sm:$0xff] }
 0x329   :  { %18880 = vst [vmem:[#allocation29_spill] sm:$0xff] %v14978_v21  ;;  %v14986_v20 = vadd.f32 %v14333_v26, %v3821_v58  ;;  %v3422_v5 = vadd.f32 %v14578_v59, %v3421_v30  ;;  %11685 = vmatmul.mubr.msk.bf16.gmra.mxu1 %vm2098_vm2, %v4571_v14  ;;  %v4463_v4 = vmax.f32 %v14978_v21, 0.0  ;;  %v18891_v21 = vld [vmem:[#allocation139_spill] sm:$0xff] }
 0x32a   :  { %v11563_v41 = vpop.f32.mrf.mxu0  ;;  %v3826_v14 = vadd.f32 %v3430_v8, %v18886_v50 }
 0x32b   :  { %18882 = vst [vmem:[#allocation31_spill] sm:$0xff] %v14986_v20  ;;  %6554 = vrot.lane.b32.xlu1 %v18883_v40, %s12433_s11  ;;  %v4461_v52 = vmax.f32 %v14986_v20, 0.0  ;;  %v3824_v22 = vadd.f32 %v3422_v5, %v18884_v27  ;;  %v3433_v26 = vadd.f32 %v11563_v41, %v14578_v59  ;;  %v18888_v40 = vld [vmem:[#allocation52_spill] sm:$0xff]  ;;  %v15008_v41 = vpop.permute.xlu0 %4124  ;;  %v4573_v27 = vpack.c.bf16 %v4463_v4, %v4462_v61  ;;  %v15020_v50 = vpop.permute.xlu1 %4126 }
 0x32c   :  { %6556 = vrot.lane.b32.xlu0 %v18885_v9, %s12433_s11  ;;  %v3424_v2 = vpop.f32.mrf.mxu0  ;;  %v18895_v4 = vld [vmem:[#allocation264_spill] sm:$0xff] }
 0x32d   :  { %v3827_v58 = vadd.f32 %v3433_v26, %v18887_v12  ;;  %v3425_v16 = vadd.f32 %v14578_v59, %v3424_v2  ;;  %v4572_v5 = vpack.c.bf16 %v4461_v52, %v4460_v35  ;;  %v15011_v9 = vadd.f32 %v14347_v51, %v3824_v22  ;;  %v18892_v26 = vld [vmem:[#allocation53_spill] sm:$0xff]  ;;  %v18897_v22 = vld [vmem:[#allocation55_spill] sm:$0xff] }
 0x32e   :  { %v11566_v30 = vpop.f32.mrf.mxu0  ;;  %v18893_v52 = vld [vmem:[#allocation265_spill] sm:$0xff] }
 0x32f   :  { %6558 = vrot.lane.b32.xlu1 %v18888_v40, %s12433_s11  ;;  %18889 = vst [vmem:[#allocation30_spill] sm:$0xff] %v15011_v9  ;;  %v15014_v20 = vadd.f32 %v14367_v36, %v3827_v58  ;;  %v3825_v8 = vadd.f32 %v3425_v16, %v18891_v21  ;;  %11688 = vmatprep.mubr.msk.bf16.mxu1 %vm2098_vm2, %v4572_v5  ;;  %v4464_v12 = vmax.f32 %v15011_v9, 0.0  ;;  %v18898_v16 = vld [vmem:[#allocation54_spill] sm:$0xff]  ;;  %v18899_v40 = vld [vmem:[#allocation144_spill] sm:$0xff] }
 0x330   :  { %6560 = vrot.lane.b32.xlu0 %v18892_v26, %s12433_s11  ;;  %v3437_v2 = vpop.f32.mrf.mxu0  ;;  %v15023_v35 = vadd.f32 %v18893_v52, %v3826_v14  ;;  %v3446_v51 = vadd.f32 %v11566_v30, %v14578_v59  ;;  %v15040_v26 = vpop.permute.xlu0 %4128 }
 0x331   :  { %18890 = vst [vmem:[#allocation96_spill] sm:$0xff] %v15014_v20  ;;  %v15026_v61 = vadd.f32 %v18895_v4, %v3825_v8  ;;  %v3438_v36 = vadd.f32 %v14578_v59, %v3437_v2  ;;  %11689 = vmatmul.mubr.msk.bf16.gmra.mxu1 %vm2098_vm2, %v4573_v27  ;;  %v4467_v58 = vmax.f32 %v15014_v20, 0.0  ;;  %v18900_v2 = vld [vmem:[#allocation148_spill] sm:$0xff]  ;;  %v18901_v20 = vld [vmem:[#allocation151_spill] sm:$0xff] }
 0x332   :  { %18894 = vst [vmem:[#allocation103_spill] sm:$0xff] %v15023_v35  ;;  %v11567_v21 = vpop.f32.mrf.mxu0  ;;  %v4466_v27 = vmax.f32 %v15023_v35, 0.0  ;;  %v3830_v52 = vadd.f32 %v3446_v51, %v18900_v2  ;;  %v18904_v35 = vld [vmem:[#allocation57_spill] sm:$0xff]  ;;  %v18905_v51 = vld [vmem:[#allocation266_spill] sm:$0xff] }
 0x333   :  { %18896 = vst [vmem:[#allocation32_spill] sm:$0xff] %v15026_v61  ;;  %6562 = vrot.lane.b32.xlu1 %v18897_v22, %s12433_s11  ;;  %v4465_v14 = vmax.f32 %v15026_v61, 0.0  ;;  %v3828_v5 = vadd.f32 %v3438_v36, %v18899_v40  ;;  %v3449_v30 = vadd.f32 %v11567_v21, %v14578_v59  ;;  %v18903_v21 = vld [vmem:[#allocation147_spill] sm:$0xff] }
 0x334   :  { %6564 = vrot.lane.b32.xlu0 %v18898_v16, %s12433_s11  ;;  %v3440_v8 = vpop.f32.mrf.mxu0  ;;  %v15048_v16 = vpop.permute.xlu1 %4130  ;;  %v4575_v36 = vpack.c.bf16 %v4467_v58, %v4466_v27 }
 0x335   :  { %v3441_v4 = vadd.f32 %v14578_v59, %v3440_v8  ;;  %v4574_v22 = vpack.c.bf16 %v4465_v14, %v4464_v12  ;;  %v3831_v9 = vadd.f32 %v3449_v30, %v18901_v20  ;;  %v15055_v2 = vadd.f32 %v18905_v51, %v3828_v5  ;;  %v18907_v12 = vld [vmem:[#allocation269_spill] sm:$0xff]  ;;  %v18909_v30 = vld [vmem:[#allocation268_spill] sm:$0xff]  ;;  %v18913_v5 = vld [vmem:[#allocation59_spill] sm:$0xff] }
 0x336   :  { %v11570_v61 = vpop.f32.mrf.mxu0  ;;  %v15061_v8 = vadd.f32 %v18909_v30, %v3830_v52  ;;  %v18916_v30 = vld [vmem:[#allocation156_spill] sm:$0xff] }
 0x337   :  { %6566 = vrot.lane.b32.xlu1 %v18902_v43, %s12433_s11  ;;  %v3829_v40 = vadd.f32 %v3441_v4, %v18903_v21  ;;  %11692 = vmatprep.mubr.msk.bf16.mxu1 %vm2098_vm2, %v4574_v22  ;;  %18906 = vst [vmem:[#allocation99_spill] sm:$0xff] %v15055_v2  ;;  %v15058_v14 = vadd.f32 %v18907_v12, %v3831_v9  ;;  %v18911_v43 = vld [vmem:[#allocation267_spill] sm:$0xff]  ;;  %v15071_v4 = vpop.permute.xlu0 %4132  ;;  %v18914_v22 = vld [vmem:[#allocation152_spill] sm:$0xff]  ;;  %v4468_v51 = vmax.f32 %v15055_v2, 0.0  ;;  %v18921_v2 = vld [vmem:[#allocation273_spill] sm:$0xff] }
 0x338   :  { %6568 = vrot.lane.b32.xlu0 %v18904_v35, %s12433_s11  ;;  %v3453_v20 = vpop.f32.mrf.mxu0  ;;  %18910 = vst [vmem:[#allocation35_spill] sm:$0xff] %v15061_v8  ;;  %v3462_v58 = vadd.f32 %v11570_v61, %v14578_v59  ;;  %v18915_v61 = vld [vmem:[#allocation58_spill] sm:$0xff]  ;;  %v15080_v12 = vpop.permute.xlu1 %4134 }
 0x339   :  { %18908 = vst [vmem:[#allocation33_spill] sm:$0xff] %v15058_v14  ;;  %v15064_v45 = vadd.f32 %v18911_v43, %v3829_v40  ;;  %v3454_v27 = vadd.f32 %v14578_v59, %v3453_v20  ;;  %11693 = vmatmul.mubr.msk.bf16.gmra.mxu1 %vm2098_vm2, %v4575_v36  ;;  %v4471_v9 = vmax.f32 %v15058_v14, 0.0  ;;  %v4470_v20 = vmax.f32 %v15061_v8, 0.0 }
 0x33a   :  { %v11571_v35 = vpop.f32.mrf.mxu0  ;;  %v3834_v43 = vadd.f32 %v3462_v58, %v18916_v30  ;;  %v18924_v58 = vld [vmem:[#allocation61_spill] sm:$0xff]  ;;  %v18925_v30 = vld [vmem:[#allocation272_spill] sm:$0xff] }
 0x33b   :  { %18912 = vst [vmem:[#allocation104_spill] sm:$0xff] %v15064_v45  ;;  %6570 = vrot.lane.b32.xlu1 %v18913_v5, %s12433_s11  ;;  %v4469_v52 = vmax.f32 %v15064_v45, 0.0  ;;  %v3832_v21 = vadd.f32 %v3454_v27, %v18914_v22  ;;  %v3465_v40 = vadd.f32 %v11571_v35, %v14578_v59  ;;  %v18917_v5 = vld [vmem:[#allocation159_spill] sm:$0xff]  ;;  %v18918_v27 = vld [vmem:[#allocation60_spill] sm:$0xff]  ;;  %v4577_v22 = vpack.c.bf16 %v4471_v9, %v4470_v20 }
 0x33c   :  { %6572 = vrot.lane.b32.xlu0 %v18915_v61, %s12433_s11  ;;  %v3456_v36 = vpop.f32.mrf.mxu0  ;;  %v18919_v61 = vld [vmem:[#allocation270_spill] sm:$0xff]  ;;  %v18927_v9 = vld [vmem:[#allocation271_spill] sm:$0xff] }
 0x33d   :  { %v3835_v14 = vadd.f32 %v3465_v40, %v18917_v5  ;;  %v3457_v45 = vadd.f32 %v14578_v59, %v3456_v36  ;;  %v4576_v35 = vpack.c.bf16 %v4469_v52, %v4468_v51  ;;  %v15089_v18 = vadd.f32 %v18919_v61, %v3832_v21  ;;  %v15098_v36 = vpop.permute.xlu0 %4136 }
 0x33e   :  { %v11574_v32 = vpop.f32.mrf.mxu0  ;;  %v15101_v5 = vadd.f32 %v18925_v30, %v3834_v43 }
 0x33f   :  { %6574 = vrot.lane.b32.xlu1 %v18918_v27, %s12433_s11  ;;  %18920 = vst [vmem:[#allocation34_spill] sm:$0xff] %v15089_v18  ;;  %v15092_v3 = vadd.f32 %v18921_v2, %v3835_v14  ;;  %v3833_v8 = vadd.f32 %v3457_v45, %v18923_v56  ;;  %11696 = vmatprep.mubr.msk.bf16.mxu1 %vm2098_vm2, %v4576_v35  ;;  %v18929_v45 = vld [vmem:[#allocation63_spill] sm:$0xff]  ;;  %v15111_v14 = vpop.permute.xlu1 %4138  ;;  %v4472_v51 = vmax.f32 %v15089_v18, 0.0 }
 0x340   :  { %6576 = vrot.lane.b32.xlu0 %v18924_v58, %s12433_s11  ;;  %v3469_v40 = vpop.f32.mrf.mxu0  ;;  %18926 = vst [vmem:[#allocation111_spill] sm:$0xff] %v15101_v5  ;;  %v3478_v21 = vadd.f32 %v11574_v32, %v14578_v59  ;;  %v18931_v32 = vld [vmem:[#allocation160_spill] sm:$0xff]  ;;  %v4474_v61 = vmax.f32 %v15101_v5, 0.0 }
 0x341   :  { %18922 = vst [vmem:[#allocation108_spill] sm:$0xff] %v15092_v3  ;;  %v15104_v52 = vadd.f32 %v18927_v9, %v3833_v8  ;;  %v3470_v2 = vadd.f32 %v14578_v59, %v3469_v40  ;;  %11697 = vmatmul.mubr.msk.bf16.gmra.mxu1 %vm2098_vm2, %v4577_v22  ;;  %v4475_v20 = vmax.f32 %v15092_v3, 0.0  ;;  %v18930_v8 = vld [vmem:[#allocation62_spill] sm:$0xff]  ;;  %v18932_v58 = vld [vmem:[#allocation164_spill] sm:$0xff]  ;;  %v15126_v6 = vpop.permute.xlu0 %4140 }
 0x342   :  { %v11575_v56 = vpop.f32.mrf.mxu0  ;;  %v3838_v40 = vadd.f32 %v3478_v21, %v18932_v58  ;;  %v18937_v21 = vld [vmem:[#allocation274_spill] sm:$0xff] }
 0x343   :  { %18928 = vst [vmem:[#allocation36_spill] sm:$0xff] %v15104_v52  ;;  %6578 = vrot.lane.b32.xlu1 %v18929_v45, %s12433_s11  ;;  %v4473_v43 = vmax.f32 %v15104_v52, 0.0  ;;  %v3836_v27 = vadd.f32 %v3470_v2, %v18931_v32  ;;  %v3481_v35 = vadd.f32 %v11575_v56, %v14578_v59  ;;  %v18933_v45 = vld [vmem:[#allocation167_spill] sm:$0xff]  ;;  %v18934_v52 = vld [vmem:[#allocation66_spill] sm:$0xff]  ;;  %v18936_v56 = vld [vmem:[#allocation68_spill] sm:$0xff] }
 0x344   :  { %6580 = vrot.lane.b32.xlu0 %v18930_v8, %s12433_s11  ;;  %v3472_v22 = vpop.f32.mrf.mxu0  ;;  %v4579_v8 = vpack.c.bf16 %v4475_v20, %v4474_v61  ;;  %v18935_v2 = vld [vmem:[#allocation163_spill] sm:$0xff]  ;;  %v15149_v61 = vld [vmem:[%s17780_s6] ss:$0 sm:$0xff] }
 0x345   :  { %v3473_v30 = vadd.f32 %v14578_v59, %v3472_v22  ;;  %v4578_v9 = vpack.c.bf16 %v4473_v43, %v4472_v51  ;;  %v3839_v18 = vadd.f32 %v3481_v35, %v18933_v45  ;;  %v15133_v58 = vadd.f32 %v18937_v21, %v3836_v27  ;;  %v15138_v43 = vpop.permute.xlu1 %4142  ;;  %v18942_v20 = vld [vmem:[#allocation275_spill] sm:$0xff]  ;;  %v18945_v45 = vld [vmem:[#allocation168_spill] sm:$0xff] }
 0x346   :  { %v11578_v3 = vpop.f32.mrf.mxu0 }
 0x347   :  { %6582 = vrot.lane.b32.xlu1 %v18934_v52, %s12433_s11  ;;  %v3837_v32 = vadd.f32 %v3473_v30, %v18935_v2  ;;  %11700 = vmatprep.mubr.msk.bf16.mxu1 %vm2098_vm2, %v4578_v9  ;;  %18938 = vst [vmem:[#allocation107_spill] sm:$0xff] %v15133_v58  ;;  %v15136_v59 = vadd.f32 %v14438_v63, %v3839_v18  ;;  %v18940_v52 = vld [vmem:[#allocation276_spill] sm:$0xff]  ;;  %v18944_v18 = vld [vmem:[#allocation71_spill] sm:$0xff] }
 0x348   :  { %6584 = vrot.lane.b32.xlu0 %v18936_v56, %s12433_s11  ;;  %v3485_v51 = vpop.f32.mrf.mxu0  ;;  %v15141_v35 = vadd.f32 %v18940_v52, %v3838_v40  ;;  %v3494_v27 = vadd.f32 %v15149_v61, %v11578_v3  ;;  %v18946_v56 = vld [vmem:[#allocation70_spill] sm:$0xff]  ;;  %v4476_v3 = vmax.f32 %v15133_v58, 0.0  ;;  %v18947_v52 = vld [vmem:[#allocation172_spill] sm:$0xff]  ;;  %v18950_v58 = vld [vmem:[#allocation277_spill] sm:$0xff] }
 0x349   :  { %18939 = vst [vmem:[#allocation37_spill] sm:$0xff] %v15136_v59  ;;  %v15144_v22 = vadd.f32 %v18942_v20, %v3837_v32  ;;  %v3486_v30 = vadd.f32 %v15149_v61, %v3485_v51  ;;  %11701 = vmatmul.mubr.msk.bf16.gmra.mxu1 %vm2098_vm2, %v4579_v8  ;;  %v4479_v40 = vmax.f32 %v15136_v59, 0.0  ;;  %v15163_v51 = vpop.permute.xlu0 %4144 }
 0x34a   :  { %18941 = vst [vmem:[#allocation39_spill] sm:$0xff] %v15141_v35  ;;  %v11579_v63 = vpop.f32.mrf.mxu0  ;;  %v4478_v8 = vmax.f32 %v15141_v35, 0.0  ;;  %v3842_v20 = vadd.f32 %v3494_v27, %v18947_v52  ;;  %v18953_v35 = vld [vmem:[#allocation171_spill] sm:$0xff] }
 0x34b   :  { %18943 = vst [vmem:[#allocation38_spill] sm:$0xff] %v15144_v22  ;;  %6586 = vrot.lane.b32.xlu1 %v18944_v18, %s12433_s11  ;;  %v4477_v9 = vmax.f32 %v15144_v22, 0.0  ;;  %v3840_v2 = vadd.f32 %v3486_v30, %v18945_v45  ;;  %v3497_v32 = vadd.f32 %v15149_v61, %v11579_v63  ;;  %v18948_v18 = vld [vmem:[#allocation175_spill] sm:$0xff]  ;;  %v18949_v30 = vld [vmem:[#allocation73_spill] sm:$0xff]  ;;  %v15171_v45 = vpop.permute.xlu1 %4146 }
 0x34c   :  { %6588 = vrot.lane.b32.xlu0 %v18946_v56, %s12433_s11  ;;  %v3488_v21 = vpop.f32.mrf.mxu0  ;;  %v4581_v56 = vpack.c.bf16 %v4479_v40, %v4478_v8  ;;  %v18955_v52 = vld [vmem:[#allocation279_spill] sm:$0xff] }
 0x34d   :  { %v3843_v59 = vadd.f32 %v3497_v32, %v18948_v18  ;;  %v3489_v22 = vadd.f32 %v15149_v61, %v3488_v21  ;;  %v4580_v63 = vpack.c.bf16 %v4477_v9, %v4476_v3  ;;  %v15174_v54 = vadd.f32 %v18950_v58, %v3840_v2  ;;  %v18954_v32 = vld [vmem:[#allocation74_spill] sm:$0xff] }
 0x34e   :  { %v11582_v5 = vpop.f32.mrf.mxu0  ;;  %v15184_v18 = vadd.f32 %v18955_v52, %v3842_v20  ;;  %v18957_v9 = vld [vmem:[#allocation278_spill] sm:$0xff]  ;;  %v18960_v20 = vld [vmem:[#allocation77_spill] sm:$0xff] }
 0x34f   :  { %6590 = vrot.lane.b32.xlu1 %v18949_v30, %s12433_s11  ;;  %18951 = vst [vmem:[#allocation112_spill] sm:$0xff] %v15174_v54  ;;  %v15177_v60 = vadd.f32 %v14460_v46, %v3843_v59  ;;  %v3841_v27 = vadd.f32 %v3489_v22, %v18953_v35  ;;  %11704 = vmatprep.mubr.msk.bf16.mxu1 %vm2098_vm2, %v4580_v63  ;;  %v18959_v59 = vld [vmem:[#allocation78_spill] sm:$0xff]  ;;  %v15194_v35 = vpop.permute.xlu0 %4148  ;;  %v4480_v22 = vmax.f32 %v15174_v54, 0.0 }
 0x350   :  { %6592 = vrot.lane.b32.xlu0 %v18954_v32, %s12433_s11  ;;  %v3501_v21 = vpop.f32.mrf.mxu0  ;;  %18956 = vst [vmem:[#allocation119_spill] sm:$0xff] %v15184_v18  ;;  %v3510_v58 = vadd.f32 %v15149_v61, %v11582_v5  ;;  %v18961_v5 = vld [vmem:[#allocation176_spill] sm:$0xff]  ;;  %v4482_v32 = vmax.f32 %v15184_v18, 0.0 }
 0x351   :  { %18952 = vst [vmem:[#allocation116_spill] sm:$0xff] %v15177_v60  ;;  %v15187_v3 = vadd.f32 %v18957_v9, %v3841_v27  ;;  %v3502_v40 = vadd.f32 %v15149_v61, %v3501_v21  ;;  %11705 = vmatmul.mubr.msk.bf16.gmra.mxu1 %vm2098_vm2, %v4581_v56  ;;  %v4483_v2 = vmax.f32 %v15177_v60, 0.0  ;;  %v15203_v27 = vpop.permute.xlu1 %4150  ;;  %v18962_v21 = vld [vmem:[#allocation180_spill] sm:$0xff]  ;;  %v18963_v60 = vld [vmem:[#allocation183_spill] sm:$0xff] }
 0x352   :  { %v11583_v46 = vpop.f32.mrf.mxu0  ;;  %v3846_v52 = vadd.f32 %v3510_v58, %v18962_v21  ;;  %v18967_v18 = vld [vmem:[#allocation280_spill] sm:$0xff] }
 0x353   :  { %18958 = vst [vmem:[#allocation40_spill] sm:$0xff] %v15187_v3  ;;  %6594 = vrot.lane.b32.xlu1 %v18959_v59, %s12433_s11  ;;  %v4481_v8 = vmax.f32 %v15187_v3, 0.0  ;;  %v3844_v30 = vadd.f32 %v3502_v40, %v18961_v5  ;;  %v3513_v63 = vadd.f32 %v15149_v61, %v11583_v46  ;;  %v18965_v40 = vld [vmem:[#allocation179_spill] sm:$0xff]  ;;  %v18966_v46 = vld [vmem:[#allocation82_spill] sm:$0xff] }
 0x354   :  { %6596 = vrot.lane.b32.xlu0 %v18960_v20, %s12433_s11  ;;  %v3504_v56 = vpop.f32.mrf.mxu0  ;;  %v4583_v20 = vpack.c.bf16 %v4483_v2, %v4482_v32  ;;  %v18974_v32 = vld [vmem:[#allocation184_spill] sm:$0xff] }
 0x355   :  { %v3505_v9 = vadd.f32 %v15149_v61, %v3504_v56  ;;  %v4582_v59 = vpack.c.bf16 %v4481_v8, %v4480_v22  ;;  %v3847_v54 = vadd.f32 %v3513_v63, %v18963_v60  ;;  %v15216_v62 = vadd.f32 %v18967_v18, %v3844_v30  ;;  %v15221_v60 = vpop.permute.xlu0 %4152  ;;  %v18973_v30 = vld [vmem:[#allocation86_spill] sm:$0xff] }
 0x356   :  { %v11586_v3 = vpop.f32.mrf.mxu0  ;;  %v15224_v8 = vadd.f32 %v14474_v57, %v3846_v52 }
 0x357   :  { %6598 = vrot.lane.b32.xlu1 %v18964_v15, %s12433_s11  ;;  %v3845_v5 = vadd.f32 %v3505_v9, %v18965_v40  ;;  %11708 = vmatprep.mubr.msk.bf16.mxu1 %vm2098_vm2, %v4582_v59  ;;  %18968 = vst [vmem:[#allocation115_spill] sm:$0xff] %v15216_v62  ;;  %v15219_v58 = vadd.f32 %v14482_v53, %v3847_v54  ;;  %v18971_v15 = vld [vmem:[#allocation281_spill] sm:$0xff]  ;;  %v15234_v53 = vpop.permute.xlu1 %4154  ;;  %v4484_v9 = vmax.f32 %v15216_v62, 0.0  ;;  %v18976_v40 = vld [vmem:[#allocation188_spill] sm:$0xff] }
 0x358   :  { %6600 = vrot.lane.b32.xlu0 %v18966_v46, %s12433_s11  ;;  %v3517_v22 = vpop.f32.mrf.mxu0  ;;  %18970 = vst [vmem:[#allocation43_spill] sm:$0xff] %v15224_v8  ;;  %v3526_v63 = vadd.f32 %v15149_v61, %v11586_v3  ;;  %v18975_v3 = vld [vmem:[#allocation85_spill] sm:$0xff]  ;;  %v18977_v46 = vld [vmem:[#allocation191_spill] sm:$0xff] }
 0x359   :  { %18969 = vst [vmem:[#allocation41_spill] sm:$0xff] %v15219_v58  ;;  %v15227_v2 = vadd.f32 %v18971_v15, %v3845_v5  ;;  %v3518_v56 = vadd.f32 %v15149_v61, %v3517_v22  ;;  %11709 = vmatmul.mubr.msk.bf16.gmra.mxu1 %vm2098_vm2, %v4583_v20  ;;  %v4487_v54 = vmax.f32 %v15219_v58, 0.0  ;;  %v4486_v20 = vmax.f32 %v15224_v8, 0.0  ;;  %v18981_v62 = vld [vmem:[#allocation285_spill] sm:$0xff]  ;;  %v18983_v8 = vld [vmem:[#allocation187_spill] sm:$0xff] }
 0x35a   :  { %v11587_v18 = vpop.f32.mrf.mxu0  ;;  %v3850_v5 = vadd.f32 %v3526_v63, %v18976_v40 }
 0x35b   :  { %18972 = vst [vmem:[#allocation120_spill] sm:$0xff] %v15227_v2  ;;  %6602 = vrot.lane.b32.xlu1 %v18973_v30, %s12433_s11  ;;  %v4485_v57 = vmax.f32 %v15227_v2, 0.0  ;;  %v3848_v21 = vadd.f32 %v3518_v56, %v18974_v32  ;;  %v3529_v52 = vadd.f32 %v15149_v61, %v11587_v18  ;;  %v18978_v2 = vld [vmem:[#allocation89_spill] sm:$0xff]  ;;  %v15249_v18 = vpop.permute.xlu0 %4156  ;;  %v4585_v32 = vpack.c.bf16 %v4487_v54, %v4486_v20  ;;  %v15261_v40 = vpop.permute.xlu1 %4158  ;;  %v18988_v54 = vld [vmem:[#allocation283_spill] sm:$0xff]  ;;  %v18990_v20 = vld [vmem:[#allocation94_spill] sm:$0xff] }
 0x35c   :  { %6604 = vrot.lane.b32.xlu0 %v18975_v3, %s12433_s11  ;;  %v3520_v59 = vpop.f32.mrf.mxu0  ;;  %v18979_v3 = vld [vmem:[#allocation282_spill] sm:$0xff]  ;;  %18985 = vst [vmem:[#allocation127_spill] sm:$0xff] %v15261_v40 }
 0x35d   :  { %v3851_v22 = vadd.f32 %v3529_v52, %v18977_v46  ;;  %v3521_v15 = vadd.f32 %v15149_v61, %v3520_v59  ;;  %v4584_v56 = vpack.c.bf16 %v4485_v57, %v4484_v9  ;;  %v15252_v58 = vadd.f32 %v18979_v3, %v3848_v21  ;;  %v18984_v52 = vld [vmem:[#allocation90_spill] sm:$0xff] }
 0x35e   :  { %v11590_v30 = vpop.f32.mrf.mxu0 }
 0x35f   :  { %6606 = vrot.lane.b32.xlu1 %v18978_v2, %s12433_s11  ;;  %18980 = vst [vmem:[#allocation42_spill] sm:$0xff] %v15252_v58  ;;  %v15255_v39 = vadd.f32 %v18981_v62, %v3851_v22  ;;  %v3849_v63 = vadd.f32 %v3521_v15, %v18983_v8  ;;  %11712 = vmatprep.mubr.msk.bf16.mxu1 %vm2098_vm2, %v4584_v56  ;;  %v18986_v2 = vld [vmem:[#allocation284_spill] sm:$0xff]  ;;  %v4488_v46 = vmax.f32 %v15252_v58, 0.0  ;;  %v18991_v15 = vld [vmem:[#allocation93_spill] sm:$0xff] }
 0x360   :  { %6608 = vrot.lane.b32.xlu0 %v18984_v52, %s12433_s11  ;;  %v3533_v59 = vpop.f32.mrf.mxu0  ;;  %v15264_v57 = vadd.f32 %v18986_v2, %v3850_v5  ;;  %v3542_v21 = vadd.f32 %v15149_v61, %v11590_v30  ;;  %v18992_v56 = vld [vmem:[#allocation192_spill] sm:$0xff]  ;;  %v15281_v52 = vpop.permute.xlu0 %4160 }
 0x361   :  { %18982 = vst [vmem:[#allocation124_spill] sm:$0xff] %v15255_v39  ;;  %v15267_v9 = vadd.f32 %v18988_v54, %v3849_v63  ;;  %v3534_v62 = vadd.f32 %v15149_v61, %v3533_v59  ;;  %11713 = vmatmul.mubr.msk.bf16.gmra.mxu1 %vm2098_vm2, %v4585_v32  ;;  %v4491_v22 = vmax.f32 %v15255_v39, 0.0  ;;  %18993 = vst [vmem:[#allocation45_spill] sm:$0xff] %v15281_v52  ;;  %v18994_v59 = vld [vmem:[#allocation196_spill] sm:$0xff]  ;;  %v18995_v39 = vld [vmem:[#allocation199_spill] sm:$0xff] }
 0x362   :  { %18987 = vst [vmem:[#allocation44_spill] sm:$0xff] %v15264_v57  ;;  %v11591_v8 = vpop.f32.mrf.mxu0  ;;  %v4490_v32 = vmax.f32 %v15264_v57, 0.0  ;;  %v3854_v2 = vadd.f32 %v3542_v21, %v18994_v59  ;;  %v18998_v57 = vld [vmem:[#allocation98_spill] sm:$0xff] }
 0x363   :  { %18989 = vst [vmem:[#allocation123_spill] sm:$0xff] %v15267_v9  ;;  %6610 = vrot.lane.b32.xlu1 %v18990_v20, %s12433_s11  ;;  %v4489_v5 = vmax.f32 %v15267_v9, 0.0  ;;  %v3852_v3 = vadd.f32 %v3534_v62, %v18992_v56  ;;  %v3545_v30 = vadd.f32 %v15149_v61, %v11591_v8  ;;  %v18997_v8 = vld [vmem:[#allocation195_spill] sm:$0xff]  ;;  %v18999_v21 = vld [vmem:[#allocation286_spill] sm:$0xff] }
 0x364   :  { %6612 = vrot.lane.b32.xlu0 %v18991_v15, %s12433_s11  ;;  %v3536_v63 = vpop.f32.mrf.mxu0  ;;  %v15289_v15 = vpop.permute.xlu1 %4162  ;;  %v4587_v62 = vpack.c.bf16 %v4491_v22, %v4490_v32 }
 0x365   :  { %v3537_v54 = vadd.f32 %v15149_v61, %v3536_v63  ;;  %v4586_v20 = vpack.c.bf16 %v4489_v5, %v4488_v46  ;;  %v3855_v58 = vadd.f32 %v3545_v30, %v18995_v39  ;;  %v15296_v59 = vadd.f32 %v18999_v21, %v3852_v3  ;;  %v19001_v46 = vld [vmem:[#allocation289_spill] sm:$0xff]  ;;  %v19003_v30 = vld [vmem:[#allocation288_spill] sm:$0xff]  ;;  %v19007_v3 = vld [vmem:[#allocation102_spill] sm:$0xff] }
 0x366   :  { %v11594_v9 = vpop.f32.mrf.mxu0  ;;  %v15302_v63 = vadd.f32 %v19003_v30, %v3854_v2  ;;  %v19012_v30 = vld [vmem:[#allocation203_spill] sm:$0xff] }
 0x367   :  { %6614 = vrot.lane.b32.xlu1 %v18996_v37, %s12433_s11  ;;  %v3853_v56 = vadd.f32 %v3537_v54, %v18997_v8  ;;  %11716 = vmatprep.mubr.msk.bf16.mxu1 %vm2098_vm2, %v4586_v20  ;;  %19000 = vst [vmem:[#allocation47_spill] sm:$0xff] %v15296_v59  ;;  %v15299_v5 = vadd.f32 %v19001_v46, %v3855_v58  ;;  %v19005_v37 = vld [vmem:[#allocation287_spill] sm:$0xff]  ;;  %v15312_v54 = vpop.permute.xlu0 %4164  ;;  %v19009_v20 = vld [vmem:[#allocation200_spill] sm:$0xff]  ;;  %v4492_v21 = vmax.f32 %v15296_v59, 0.0  ;;  %v19017_v59 = vld [vmem:[#allocation6_spill] sm:$0xff] }
 0x368   :  { %6616 = vrot.lane.b32.xlu0 %v18998_v57, %s12433_s11  ;;  %v3549_v39 = vpop.f32.mrf.mxu0  ;;  %19004 = vst [vmem:[#allocation128_spill] sm:$0xff] %v15302_v63  ;;  %v3558_v22 = vadd.f32 %v15149_v61, %v11594_v9  ;;  %19008 = vst [vmem:[#allocation135_spill] sm:$0xff] %v15312_v54  ;;  %v19010_v9 = vld [vmem:[#allocation101_spill] sm:$0xff]  ;;  %v15321_v46 = vpop.permute.xlu1 %4166 }
 0x369   :  { %19002 = vst [vmem:[#allocation46_spill] sm:$0xff] %v15299_v5  ;;  %v15305_v23 = vadd.f32 %v19005_v37, %v3853_v56  ;;  %v3550_v32 = vadd.f32 %v15149_v61, %v3549_v39  ;;  %11717 = vmatmul.mubr.msk.bf16.gmra.mxu1 %vm2098_vm2, %v4587_v62  ;;  %v4495_v58 = vmax.f32 %v15299_v5, 0.0  ;;  %19011 = vst [vmem:[#allocation48_spill] sm:$0xff] %v15321_v46  ;;  %v4494_v39 = vmax.f32 %v15302_v63, 0.0  ;;  %v19019_v46 = vld [vmem:[#allocation202_spill] sm:$0xff] }
 0x36a   :  { %v11595_v57 = vpop.f32.mrf.mxu0  ;;  %v3858_v37 = vadd.f32 %v3558_v22, %v19012_v30  ;;  %v19020_v22 = vld [vmem:[#allocation106_spill] sm:$0xff]  ;;  %v19022_v30 = vld [vmem:[#allocation292_spill] sm:$0xff] }
 0x36b   :  { %19006 = vst [vmem:[#allocation132_spill] sm:$0xff] %v15305_v23  ;;  %6618 = vrot.lane.b32.xlu1 %v19007_v3, %s12433_s11  ;;  %v4493_v2 = vmax.f32 %v15305_v23, 0.0  ;;  %v3856_v8 = vadd.f32 %v3550_v32, %v19009_v20  ;;  %v3561_v56 = vadd.f32 %v15149_v61, %v11595_v57  ;;  %v19013_v3 = vld [vmem:[#allocation204_spill] sm:$0xff]  ;;  %v19014_v32 = vld [vmem:[#allocation105_spill] sm:$0xff]  ;;  %v4589_v20 = vpack.c.bf16 %v4495_v58, %v4494_v39  ;;  %v19024_v58 = vld [vmem:[#allocation291_spill] sm:$0xff] }
 0x36c   :  { %6620 = vrot.lane.b32.xlu0 %v19010_v9, %s12433_s11  ;;  %v3552_v62 = vpop.f32.mrf.mxu0  ;;  %v19015_v9 = vld [vmem:[#allocation290_spill] sm:$0xff] }
 0x36d   :  { %v3859_v5 = vadd.f32 %v3561_v56, %v19013_v3  ;;  %v3553_v23 = vadd.f32 %v15149_v61, %v3552_v62  ;;  %v4588_v57 = vpack.c.bf16 %v4493_v2, %v4492_v21  ;;  %v15330_v40 = vadd.f32 %v19015_v9, %v3856_v8  ;;  %v15339_v62 = vpop.permute.xlu0 %4168  ;;  %v15352_v21 = vpop.permute.xlu1 %4170 }
 0x36e   :  { %v11598_v54 = vpop.f32.mrf.mxu0  ;;  %19021 = vst [vmem:[#allocation51_spill] sm:$0xff] %v15339_v62  ;;  %v15342_v3 = vadd.f32 %v19022_v30, %v3858_v37 }
 0x36f   :  { %6622 = vrot.lane.b32.xlu1 %v19014_v32, %s12433_s11  ;;  %19016 = vst [vmem:[#allocation131_spill] sm:$0xff] %v15330_v40  ;;  %v15333_v52 = vadd.f32 %v19017_v59, %v3859_v5  ;;  %v3857_v63 = vadd.f32 %v3553_v23, %v19019_v46  ;;  %11720 = vmatprep.mubr.msk.bf16.mxu1 %vm2098_vm2, %v4588_v57  ;;  %v19026_v5 = vld [vmem:[#allocation110_spill] sm:$0xff]  ;;  %v4496_v46 = vmax.f32 %v15330_v40, 0.0 }
 0x370   :  { %6624 = vrot.lane.b32.xlu0 %v19020_v22, %s12433_s11  ;;  %v3565_v56 = vpop.f32.mrf.mxu0  ;;  %19023 = vst [vmem:[#allocation136_spill] sm:$0xff] %v15342_v3  ;;  %v3574_v8 = vadd.f32 %v15149_v61, %v11598_v54  ;;  %v19028_v54 = vld [vmem:[#allocation205_spill] sm:$0xff]  ;;  %v4498_v9 = vmax.f32 %v15342_v3, 0.0  ;;  %v19029_v22 = vld [vmem:[#allocation207_spill] sm:$0xff]  ;;  %v19049_v3 = vld [vmem:[#allocation212_spill] sm:$0xff] }
 0x371   :  { %19018 = vst [vmem:[#allocation49_spill] sm:$0xff] %v15333_v52  ;;  %v15345_v2 = vadd.f32 %v19024_v58, %v3857_v63  ;;  %v3566_v59 = vadd.f32 %v15149_v61, %v3565_v56  ;;  %11721 = vmatmul.mubr.msk.bf16.gmra.mxu1 %vm2098_vm2, %v4589_v20  ;;  %v4499_v39 = vmax.f32 %v15333_v52, 0.0  ;;  %v19027_v63 = vld [vmem:[#allocation109_spill] sm:$0xff]  ;;  %v15367_v62 = vpop.permute.xlu0 %6464 }
 0x372   :  { %v11599_v23 = vpop.f32.mrf.mxu0  ;;  %v3862_v56 = vadd.f32 %v3574_v8, %v19029_v22  ;;  %19032 = vst [vmem:[#allocation140_spill] sm:$0xff] %v15367_v62  ;;  %v19035_v8 = vld [vmem:[#allocation293_spill] sm:$0xff] }
 0x373   :  { %19025 = vst [vmem:[#allocation50_spill] sm:$0xff] %v15345_v2  ;;  %6626 = vrot.lane.b32.xlu1 %v19026_v5, %s12433_s11  ;;  %v4497_v37 = vmax.f32 %v15345_v2, 0.0  ;;  %v3860_v32 = vadd.f32 %v3566_v59, %v19028_v54  ;;  %v3577_v57 = vadd.f32 %v15149_v61, %v11599_v23  ;;  %v19030_v5 = vld [vmem:[#allocation208_spill] sm:$0xff]  ;;  %v19031_v2 = vld [vmem:[#allocation113_spill] sm:$0xff]  ;;  %v19033_v59 = vld [vmem:[#allocation206_spill] sm:$0xff] }
 0x374   :  { %6628 = vrot.lane.b32.xlu0 %v19027_v63, %s12433_s11  ;;  %v3568_v20 = vpop.f32.mrf.mxu0  ;;  %v4591_v63 = vpack.c.bf16 %v4499_v39, %v4498_v9  ;;  %v19034_v23 = vld [vmem:[#allocation114_spill] sm:$0xff]  ;;  %v19042_v39 = vld [vmem:[#allocation8_spill] sm:$0xff] }
 0x375   :  { %v3569_v30 = vadd.f32 %v15149_v61, %v3568_v20  ;;  %v4590_v58 = vpack.c.bf16 %v4497_v37, %v4496_v46  ;;  %v3863_v40 = vadd.f32 %v3577_v57, %v19030_v5  ;;  %v15374_v22 = vadd.f32 %v19035_v8, %v3860_v32  ;;  %v19037_v46 = vld [vmem:[#allocation7_spill] sm:$0xff]  ;;  %v15379_v20 = vpop.permute.xlu1 %6466  ;;  %v19045_v8 = vld [vmem:[#allocation209_spill] sm:$0xff] }
 0x376   :  { %v11602_v52 = vpop.f32.mrf.mxu0  ;;  %19039 = vst [vmem:[#allocation139_spill] sm:$0xff] %v15379_v20 }
 0x377   :  { %6630 = vrot.lane.b32.xlu1 %v19031_v2, %s12433_s11  ;;  %v3861_v54 = vadd.f32 %v3569_v30, %v19033_v59  ;;  %11724 = vmatprep.mubr.msk.bf16.mxu1 %vm2098_vm2, %v4590_v58  ;;  %19036 = vst [vmem:[#allocation143_spill] sm:$0xff] %v15374_v22  ;;  %v15377_v37 = vadd.f32 %v19037_v46, %v3863_v40  ;;  %v19040_v2 = vld [vmem:[#allocation5_spill] sm:$0xff]  ;;  %v19044_v59 = vld [vmem:[#allocation118_spill] sm:$0xff] }
 0x378   :  { %6632 = vrot.lane.b32.xlu0 %v19034_v23, %s12433_s11  ;;  %v3581_v57 = vpop.f32.mrf.mxu0  ;;  %v15382_v5 = vadd.f32 %v19040_v2, %v3862_v56  ;;  %v3590_v30 = vadd.f32 %v15149_v61, %v11602_v52  ;;  %v4500_v52 = vmax.f32 %v15374_v22, 0.0  ;;  %v15399_v2 = vpop.permute.xlu0 %6468  ;;  %v19051_v22 = vld [vmem:[#allocation9_spill] sm:$0xff] }
 0x379   :  { %19038 = vst [vmem:[#allocation52_spill] sm:$0xff] %v15377_v37  ;;  %v15385_v9 = vadd.f32 %v19042_v39, %v3861_v54  ;;  %v3582_v58 = vadd.f32 %v15149_v61, %v3581_v57  ;;  %11725 = vmatmul.mubr.msk.bf16.gmra.mxu1 %vm2098_vm2, %v4591_v63  ;;  %v4503_v40 = vmax.f32 %v15377_v37, 0.0  ;;  %v19046_v54 = vld [vmem:[#allocation117_spill] sm:$0xff]  ;;  %19047 = vst [vmem:[#allocation264_spill] sm:$0xff] %v15399_v2  ;;  %v19048_v39 = vld [vmem:[#allocation211_spill] sm:$0xff] }
 0x37a   :  { %19041 = vst [vmem:[#allocation53_spill] sm:$0xff] %v15382_v5  ;;  %v11603_v32 = vpop.f32.mrf.mxu0  ;;  %v4502_v63 = vmax.f32 %v15382_v5, 0.0  ;;  %v19054_v5 = vld [vmem:[#allocation210_spill] sm:$0xff] }
 0x37b   :  { %19043 = vst [vmem:[#allocation265_spill] sm:$0xff] %v15385_v9  ;;  %6634 = vrot.lane.b32.xlu1 %v19044_v59, %s12433_s11  ;;  %v4501_v23 = vmax.f32 %v15385_v9, 0.0  ;;  %v3864_v56 = vadd.f32 %v3582_v58, %v19045_v8  ;;  %v3593_v46 = vadd.f32 %v15149_v61, %v11603_v32  ;;  %v3866_v59 = vadd.f32 %v3590_v30, %v19048_v39  ;;  %v19050_v58 = vld [vmem:[#allocation121_spill] sm:$0xff]  ;;  %v15407_v8 = vpop.permute.xlu1 %6470 }
 0x37c   :  { %6636 = vrot.lane.b32.xlu0 %v19046_v54, %s12433_s11  ;;  %v3584_v57 = vpop.f32.mrf.mxu0  ;;  %v4593_v54 = vpack.c.bf16 %v4503_v40, %v4502_v63 }
 0x37d   :  { %v3867_v37 = vadd.f32 %v3593_v46, %v19049_v3  ;;  %v3585_v9 = vadd.f32 %v15149_v61, %v3584_v57  ;;  %v4592_v32 = vpack.c.bf16 %v4501_v23, %v4500_v52  ;;  %v15410_v62 = vadd.f32 %v19051_v22, %v3864_v56  ;;  %v19055_v3 = vld [vmem:[#allocation122_spill] sm:$0xff]  ;;  %v19058_v23 = vld [vmem:[#allocation11_spill] sm:$0xff] }
 0x37e   :  { %v11606_v20 = vpop.f32.mrf.mxu0  ;;  %v19056_v57 = vld [vmem:[#allocation10_spill] sm:$0xff] }
 0x37f   :  { %6638 = vrot.lane.b32.xlu1 %v19050_v58, %s12433_s11  ;;  %19052 = vst [vmem:[#allocation55_spill] sm:$0xff] %v15410_v62  ;;  %v15413_v2 = vadd.f32 %v14615_v47, %v3867_v37  ;;  %v3865_v30 = vadd.f32 %v3585_v9, %v19054_v5  ;;  %11728 = vmatprep.mubr.msk.bf16.mxu1 %vm2098_vm2, %v4592_v32  ;;  %v19060_v37 = vld [vmem:[#allocation126_spill] sm:$0xff]  ;;  %v15430_v5 = vpop.permute.xlu0 %6472  ;;  %v4504_v9 = vmax.f32 %v15410_v62, 0.0 }
 0x380   :  { %6640 = vrot.lane.b32.xlu0 %v19055_v3, %s12433_s11  ;;  %v3597_v46 = vpop.f32.mrf.mxu0  ;;  %v15420_v39 = vadd.f32 %v19056_v57, %v3866_v59  ;;  %v3606_v22 = vadd.f32 %v15149_v61, %v11606_v20  ;;  %19061 = vst [vmem:[#allocation151_spill] sm:$0xff] %v15430_v5  ;;  %v19062_v59 = vld [vmem:[#allocation125_spill] sm:$0xff] }
 0x381   :  { %19053 = vst [vmem:[#allocation54_spill] sm:$0xff] %v15413_v2  ;;  %v15423_v52 = vadd.f32 %v19058_v23, %v3865_v30  ;;  %v3598_v40 = vadd.f32 %v15149_v61, %v3597_v46  ;;  %11729 = vmatmul.mubr.msk.bf16.gmra.mxu1 %vm2098_vm2, %v4593_v54  ;;  %v4507_v56 = vmax.f32 %v15413_v2, 0.0  ;;  %v19063_v20 = vld [vmem:[#allocation213_spill] sm:$0xff]  ;;  %v15439_v30 = vpop.permute.xlu1 %6474  ;;  %v19065_v46 = vld [vmem:[#allocation215_spill] sm:$0xff]  ;;  %v19066_v2 = vld [vmem:[#allocation216_spill] sm:$0xff] }
 0x382   :  { %19057 = vst [vmem:[#allocation144_spill] sm:$0xff] %v15420_v39  ;;  %v11607_v47 = vpop.f32.mrf.mxu0  ;;  %19064 = vst [vmem:[#allocation56_spill] sm:$0xff] %v15439_v30  ;;  %v4506_v3 = vmax.f32 %v15420_v39, 0.0  ;;  %v3870_v57 = vadd.f32 %v3606_v22, %v19065_v46  ;;  %v19067_v5 = vld [vmem:[#allocation129_spill] sm:$0xff] }
 0x383   :  { %19059 = vst [vmem:[#allocation148_spill] sm:$0xff] %v15423_v52  ;;  %6642 = vrot.lane.b32.xlu1 %v19060_v37, %s12433_s11  ;;  %v4505_v63 = vmax.f32 %v15423_v52, 0.0  ;;  %v3868_v58 = vadd.f32 %v3598_v40, %v19063_v20  ;;  %v3609_v32 = vadd.f32 %v15149_v61, %v11607_v47  ;;  %v19068_v40 = vld [vmem:[#allocation214_spill] sm:$0xff]  ;;  %v19070_v39 = vld [vmem:[#allocation65_spill] sm:$0xff] }
 0x384   :  { %6644 = vrot.lane.b32.xlu0 %v19062_v59, %s12433_s11  ;;  %v3600_v54 = vpop.f32.mrf.mxu0  ;;  %v4595_v59 = vpack.c.bf16 %v4507_v56, %v4506_v3  ;;  %v19069_v47 = vld [vmem:[#allocation130_spill] sm:$0xff]  ;;  %v19077_v3 = vld [vmem:[#allocation217_spill] sm:$0xff] }
 0x385   :  { %v3601_v23 = vadd.f32 %v15149_v61, %v3600_v54  ;;  %v4594_v37 = vpack.c.bf16 %v4505_v63, %v4504_v9  ;;  %v3871_v62 = vadd.f32 %v3609_v32, %v19066_v2  ;;  %v15452_v30 = vadd.f32 %v19070_v39, %v3868_v58  ;;  %v15457_v2 = vpop.permute.xlu0 %6476  ;;  %v19076_v58 = vld [vmem:[#allocation134_spill] sm:$0xff] }
 0x386   :  { %v11610_v52 = vpop.f32.mrf.mxu0  ;;  %v15460_v63 = vadd.f32 %v14658_v48, %v3870_v57 }
 0x387   :  { %6646 = vrot.lane.b32.xlu1 %v19067_v5, %s12433_s11  ;;  %v3869_v20 = vadd.f32 %v3601_v23, %v19068_v40  ;;  %11732 = vmatprep.mubr.msk.bf16.mxu1 %vm2098_vm2, %v4594_v37  ;;  %19071 = vst [vmem:[#allocation147_spill] sm:$0xff] %v15452_v30  ;;  %v15455_v22 = vadd.f32 %v14673_v25, %v3871_v62  ;;  %v19074_v5 = vld [vmem:[#allocation15_spill] sm:$0xff]  ;;  %v15470_v25 = vpop.permute.xlu1 %6478  ;;  %v4508_v23 = vmax.f32 %v15452_v30, 0.0 }
 0x388   :  { %6648 = vrot.lane.b32.xlu0 %v19069_v47, %s12433_s11  ;;  %v3613_v9 = vpop.f32.mrf.mxu0  ;;  %19073 = vst [vmem:[#allocation266_spill] sm:$0xff] %v15460_v63  ;;  %v3622_v32 = vadd.f32 %v15149_v61, %v11610_v52  ;;  %v19078_v52 = vld [vmem:[#allocation133_spill] sm:$0xff]  ;;  %v19079_v40 = vld [vmem:[#allocation219_spill] sm:$0xff]  ;;  %v19080_v47 = vld [vmem:[#allocation220_spill] sm:$0xff] }
 0x389   :  { %19072 = vst [vmem:[#allocation57_spill] sm:$0xff] %v15455_v22  ;;  %v15463_v56 = vadd.f32 %v19074_v5, %v3869_v20  ;;  %v3614_v54 = vadd.f32 %v15149_v61, %v3613_v9  ;;  %11733 = vmatmul.mubr.msk.bf16.gmra.mxu1 %vm2098_vm2, %v4595_v59  ;;  %v4511_v62 = vmax.f32 %v15455_v22, 0.0  ;;  %v4510_v59 = vmax.f32 %v15460_v63, 0.0  ;;  %v19084_v63 = vld [vmem:[#allocation218_spill] sm:$0xff] }
 0x38a   :  { %v11611_v39 = vpop.f32.mrf.mxu0  ;;  %v3874_v20 = vadd.f32 %v3622_v32, %v19079_v40 }
 0x38b   :  { %19075 = vst [vmem:[#allocation269_spill] sm:$0xff] %v15463_v56  ;;  %6650 = vrot.lane.b32.xlu1 %v19076_v58, %s12433_s11  ;;  %v4509_v48 = vmax.f32 %v15463_v56, 0.0  ;;  %v3872_v46 = vadd.f32 %v3614_v54, %v19077_v3  ;;  %v3625_v57 = vadd.f32 %v15149_v61, %v11611_v39  ;;  %v19081_v56 = vld [vmem:[#allocation137_spill] sm:$0xff]  ;;  %v15485_v39 = vpop.permute.xlu0 %6480  ;;  %v4597_v3 = vpack.c.bf16 %v4511_v62, %v4510_v59  ;;  %v15497_v40 = vpop.permute.xlu1 %6482  ;;  %v19087_v62 = vld [vmem:[#allocation76_spill] sm:$0xff] }
 0x38c   :  { %6652 = vrot.lane.b32.xlu0 %v19078_v52, %s12433_s11  ;;  %v3616_v37 = vpop.f32.mrf.mxu0 }
 0x38d   :  { %v3875_v9 = vadd.f32 %v3625_v57, %v19080_v47  ;;  %v3617_v5 = vadd.f32 %v15149_v61, %v3616_v37  ;;  %v4596_v54 = vpack.c.bf16 %v4509_v48, %v4508_v23  ;;  %v15488_v52 = vadd.f32 %v14691_v55, %v3872_v46  ;;  %v19085_v57 = vld [vmem:[#allocation138_spill] sm:$0xff]  ;;  %v19091_v47 = vld [vmem:[#allocation221_spill] sm:$0xff] }
 0x38e   :  { %v11614_v58 = vpop.f32.mrf.mxu0  ;;  %v19089_v46 = vld [vmem:[#allocation142_spill] sm:$0xff] }
 0x38f   :  { %6654 = vrot.lane.b32.xlu1 %v19081_v56, %s12433_s11  ;;  %19082 = vst [vmem:[#allocation268_spill] sm:$0xff] %v15488_v52  ;;  %v15491_v22 = vadd.f32 %v14735_v28, %v3875_v9  ;;  %v3873_v32 = vadd.f32 %v3617_v5, %v19084_v63  ;;  %11736 = vmatprep.mubr.msk.bf16.mxu1 %vm2098_vm2, %v4596_v54  ;;  %v4512_v23 = vmax.f32 %v15488_v52, 0.0  ;;  %v12394_v54 = vld [vmem:[%s17777_s3 + $0x20] sm:$0xff]   ;;  %v19095_v52 = vld [vmem:[#allocation222_spill] sm:$0xff] }
 0x390   :  { %6656 = vrot.lane.b32.xlu0 %v19085_v57, %s12433_s11  ;;  %v3629_v37 = vpop.f32.mrf.mxu0  ;;  %v15500_v56 = vadd.f32 %v14725_v0, %v3874_v20  ;;  %v3638_v55 = vadd.f32 %v15149_v61, %v11614_v58  ;;  %v19090_v20 = vld [vmem:[#allocation141_spill] sm:$0xff]  ;;  %v19092_v57 = vld [vmem:[#allocation223_spill] sm:$0xff]  ;;  %11918 = vmatprep.subr.bf16.mxu1 %v12394_v54 }
 0x391   :  { %19083 = vst [vmem:[#allocation267_spill] sm:$0xff] %v15491_v22  ;;  %v15503_v48 = vadd.f32 %v19087_v62, %v3873_v32  ;;  %v3630_v28 = vadd.f32 %v15149_v61, %v3629_v37  ;;  %11737 = vmatmul.mubr.msk.bf16.gmra.mxu1 %vm2098_vm2, %v4597_v3  ;;  %v4515_v59 = vmax.f32 %v15491_v22, 0.0  ;;  %v15520_v3 = vpop.permute.xlu0 %6484 }
 0x392   :  { %19086 = vst [vmem:[#allocation59_spill] sm:$0xff] %v15500_v56  ;;  %v11615_v63 = vpop.f32.mrf.mxu0  ;;  %v4514_v32 = vmax.f32 %v15500_v56, 0.0  ;;  %v3878_v37 = vadd.f32 %v3638_v55, %v19092_v57  ;;  %v19096_v56 = vld [vmem:[#allocation146_spill] sm:$0xff]  ;;  %11919 = vmatpush3.bf16.msra.mxu1 %v12394_v54 }
 0x393   :  { %19088 = vst [vmem:[#allocation152_spill] sm:$0xff] %v15503_v48  ;;  %6658 = vrot.lane.b32.xlu1 %v19089_v46, %s12433_s11  ;;  %v4513_v0 = vmax.f32 %v15503_v48, 0.0  ;;  %v3876_v9 = vadd.f32 %v3630_v28, %v19091_v47  ;;  %v3641_v5 = vadd.f32 %v15149_v61, %v11615_v63  ;;  %v19093_v48 = vld [vmem:[#allocation224_spill] sm:$0xff]  ;;  %v19094_v28 = vld [vmem:[#allocation145_spill] sm:$0xff]  ;;  %v15528_v63 = vpop.permute.xlu1 %6486 }
 0x394   :  { %6660 = vrot.lane.b32.xlu0 %v19090_v20, %s12433_s11  ;;  %v3632_v58 = vpop.f32.mrf.mxu0  ;;  %v4599_v47 = vpack.c.bf16 %v4515_v59, %v4514_v32 }
 0x395   :  { %v3633_v62 = vadd.f32 %v15149_v61, %v3632_v58  ;;  %v4598_v46 = vpack.c.bf16 %v4513_v0, %v4512_v23  ;;  %v3879_v20 = vadd.f32 %v3641_v5, %v19093_v48  ;;  %v15535_v55 = vadd.f32 %v14758_v7, %v3876_v9  ;;  %v19101_v7 = vld [vmem:[#allocation150_spill] sm:$0xff]  ;;  %v19102_v58 = vld [vmem:[#allocation225_spill] sm:$0xff] }
 0x396   :  { %v11618_v22 = vpop.f32.mrf.mxu0  ;;  %v15541_v0 = vadd.f32 %v14791_v34, %v3878_v37 }
 0x397   :  { %6662 = vrot.lane.b32.xlu1 %v19094_v28, %s12433_s11  ;;  %v3877_v30 = vadd.f32 %v3633_v62, %v19095_v52  ;;  %11740 = vmatprep.mubr.msk.bf16.mxu1 %vm2098_vm2, %v4598_v46  ;;  %19097 = vst [vmem:[#allocation58_spill] sm:$0xff] %v15535_v55  ;;  %v15538_v48 = vadd.f32 %v14804_v33, %v3879_v20  ;;  %v15551_v33 = vpop.permute.xlu0 %6488  ;;  %v15560_v57 = vpop.permute.xlu1 %6490  ;;  %v19104_v62 = vld [vmem:[#allocation227_spill] sm:$0xff]  ;;  %v19105_v20 = vld [vmem:[#allocation228_spill] sm:$0xff] }
 0x398   :  { %6664 = vrot.lane.b32.xlu0 %v19096_v56, %s12433_s11  ;;  %v3645_v23 = vpop.f32.mrf.mxu0  ;;  %19099 = vst [vmem:[#allocation159_spill] sm:$0xff] %v15541_v0  ;;  %v3654_v52 = vadd.f32 %v15149_v61, %v11618_v22  ;;  %v4516_v22 = vmax.f32 %v15535_v55, 0.0  ;;  %v4518_v37 = vmax.f32 %v15541_v0, 0.0  ;;  %v19143_v0 = vld [vmem:[#allocation240_spill] sm:$0xff] }
 0x399   :  { %19098 = vst [vmem:[#allocation156_spill] sm:$0xff] %v15538_v48  ;;  %v15544_v59 = vadd.f32 %v14768_v44, %v3877_v30  ;;  %v3646_v5 = vadd.f32 %v15149_v61, %v3645_v23  ;;  %11741 = vmatmul.mubr.msk.bf16.gmra.mxu1 %vm2098_vm2, %v4599_v47  ;;  %v4519_v9 = vmax.f32 %v15538_v48, 0.0  ;;  %v19103_v30 = vld [vmem:[#allocation149_spill] sm:$0xff] }
 0x39a   :  { %v11619_v56 = vpop.f32.mrf.mxu0  ;;  %v3882_v46 = vadd.f32 %v3654_v52, %v19104_v62  ;;  %v19110_v52 = vld [vmem:[#allocation154_spill] sm:$0xff] }
 0x39b   :  { %19100 = vst [vmem:[#allocation60_spill] sm:$0xff] %v15544_v59  ;;  %6666 = vrot.lane.b32.xlu1 %v19101_v7, %s12433_s11  ;;  %v4517_v34 = vmax.f32 %v15544_v59, 0.0  ;;  %v3880_v54 = vadd.f32 %v3646_v5, %v19102_v58  ;;  %v3657_v44 = vadd.f32 %v15149_v61, %v11619_v56  ;;  %v19106_v5 = vld [vmem:[#allocation153_spill] sm:$0xff]  ;;  %v4601_v7 = vpack.c.bf16 %v4519_v9, %v4518_v37  ;;  %v19109_v59 = vld [vmem:[#allocation226_spill] sm:$0xff] }
 0x39c   :  { %6668 = vrot.lane.b32.xlu0 %v19103_v30, %s12433_s11  ;;  %v3648_v32 = vpop.f32.mrf.mxu0  ;;  %v15581_v62 = vadd.f32 %v14857_v24, %v3882_v46 }
 0x39d   :  { %v3883_v28 = vadd.f32 %v3657_v44, %v19105_v20  ;;  %v3649_v47 = vadd.f32 %v15149_v61, %v3648_v32  ;;  %v4600_v56 = vpack.c.bf16 %v4517_v34, %v4516_v22  ;;  %v15569_v58 = vadd.f32 %v14826_v13, %v3880_v54  ;;  %v15578_v32 = vpop.permute.xlu0 %6492  ;;  %v19113_v34 = vld [vmem:[#allocation158_spill] sm:$0xff]  ;;  %v15591_v54 = vpop.permute.xlu1 %6494 }
 0x39e   :  { %v11622_v23 = vpop.f32.mrf.mxu0  ;;  %19111 = vst [vmem:[#allocation155_spill] sm:$0xff] %v15581_v62 }
 0x39f   :  { %6670 = vrot.lane.b32.xlu1 %v19106_v5, %s12433_s11  ;;  %19107 = vst [vmem:[#allocation270_spill] sm:$0xff] %v15569_v58  ;;  %v15572_v30 = vadd.f32 %v14870_v38, %v3883_v28  ;;  %v3881_v48 = vadd.f32 %v3649_v47, %v19109_v59  ;;  %11744 = vmatprep.mubr.msk.bf16.mxu1 %vm2098_vm2, %v4600_v56  ;;  %v4520_v22 = vmax.f32 %v15569_v58, 0.0  ;;  %v4522_v47 = vmax.f32 %v15581_v62, 0.0 }
 0x3a0   :  { %6672 = vrot.lane.b32.xlu0 %v19110_v52, %s12433_s11  ;;  %v3661_v44 = vpop.f32.mrf.mxu0  ;;  %v3670_v13 = vadd.f32 %v15149_v61, %v11622_v23  ;;  %v19116_v23 = vld [vmem:[#allocation231_spill] sm:$0xff]  ;;  %v19117_v52 = vld [vmem:[#allocation232_spill] sm:$0xff] }
 0x3a1   :  { %19108 = vst [vmem:[#allocation273_spill] sm:$0xff] %v15572_v30  ;;  %v15584_v9 = vadd.f32 %v14838_v10, %v3881_v48  ;;  %v3662_v38 = vadd.f32 %v15149_v61, %v3661_v44  ;;  %11745 = vmatmul.mubr.msk.bf16.gmra.mxu1 %vm2098_vm2, %v4601_v7  ;;  %v4523_v24 = vmax.f32 %v15572_v30, 0.0  ;;  %v19114_v10 = vld [vmem:[#allocation157_spill] sm:$0xff]  ;;  %v15606_v30 = vpop.permute.xlu0 %6496 }
 0x3a2   :  { %v11623_v59 = vpop.f32.mrf.mxu0  ;;  %v19115_v48 = vld [vmem:[#allocation229_spill] sm:$0xff]  ;;  %v3886_v5 = vadd.f32 %v3670_v13, %v19116_v23 }
 0x3a3   :  { %19112 = vst [vmem:[#allocation61_spill] sm:$0xff] %v15584_v9  ;;  %6674 = vrot.lane.b32.xlu1 %v19113_v34, %s12433_s11  ;;  %v4521_v37 = vmax.f32 %v15584_v9, 0.0  ;;  %v3884_v46 = vadd.f32 %v3662_v38, %v19115_v48  ;;  %v3673_v20 = vadd.f32 %v15149_v61, %v11623_v59  ;;  %v19118_v9 = vld [vmem:[#allocation161_spill] sm:$0xff]  ;;  %v19119_v38 = vld [vmem:[#allocation230_spill] sm:$0xff] }
 0x3a4   :  { %6676 = vrot.lane.b32.xlu0 %v19114_v10, %s12433_s11  ;;  %v3664_v28 = vpop.f32.mrf.mxu0  ;;  %v4603_v10 = vpack.c.bf16 %v4523_v24, %v4522_v47  ;;  %v19120_v59 = vld [vmem:[#allocation162_spill] sm:$0xff]  ;;  %v15622_v24 = vadd.f32 %v14922_v1, %v3886_v5  ;;  %v19127_v5 = vld [vmem:[#allocation165_spill] sm:$0xff] }
 0x3a5   :  { %v3665_v56 = vadd.f32 %v15149_v61, %v3664_v28  ;;  %v4602_v7 = vpack.c.bf16 %v4521_v37, %v4520_v22  ;;  %v3887_v44 = vadd.f32 %v3673_v20, %v19117_v52  ;;  %v15613_v13 = vadd.f32 %v14890_v31, %v3884_v46  ;;  %v19125_v46 = vld [vmem:[#allocation166_spill] sm:$0xff]  ;;  %v19128_v52 = vld [vmem:[#allocation235_spill] sm:$0xff] }
 0x3a6   :  { %v11626_v34 = vpop.f32.mrf.mxu0  ;;  %19123 = vst [vmem:[#allocation63_spill] sm:$0xff] %v15622_v24 }
 0x3a7   :  { %6678 = vrot.lane.b32.xlu1 %v19118_v9, %s12433_s11  ;;  %v3885_v48 = vadd.f32 %v3665_v56, %v19119_v38  ;;  %11748 = vmatprep.mubr.msk.bf16.mxu1 %vm2098_vm2, %v4602_v7  ;;  %19121 = vst [vmem:[#allocation272_spill] sm:$0xff] %v15613_v13  ;;  %v15616_v22 = vadd.f32 %v14930_v11, %v3887_v44  ;;  %v15619_v9 = vpop.permute.xlu1 %6498  ;;  %v19126_v56 = vld [vmem:[#allocation233_spill] sm:$0xff]  ;;  %v4526_v38 = vmax.f32 %v15622_v24, 0.0 }
 0x3a8   :  { %6680 = vrot.lane.b32.xlu0 %v19120_v59, %s12433_s11  ;;  %v3686_v37 = vadd.f32 %v15149_v61, %v11626_v34  ;;  %v3677_v20 = vpop.f32.mrf.mxu0 }
 0x3a9   :  { %19122 = vst [vmem:[#allocation271_spill] sm:$0xff] %v15616_v22  ;;  %v15625_v28 = vadd.f32 %v14902_v19, %v3885_v48  ;;  %v3678_v47 = vadd.f32 %v15149_v61, %v3677_v20  ;;  %11749 = vmatmul.mubr.msk.bf16.gmra.mxu1 %vm2098_vm2, %v4603_v10  ;;  %v4527_v11 = vmax.f32 %v15616_v22, 0.0  ;;  %v4524_v19 = vmax.f32 %v15613_v13, 0.0  ;;  %v15639_v10 = vpop.permute.xlu0 %6500  ;;  %v19129_v48 = vld [vmem:[#allocation236_spill] sm:$0xff]  ;;  %v19133_v22 = vld [vmem:[#allocation234_spill] sm:$0xff] }
 0x3aa   :  { %v11627_v31 = vpop.f32.mrf.mxu0  ;;  %v3890_v44 = vadd.f32 %v3686_v37, %v19128_v52 }
 0x3ab   :  { %19124 = vst [vmem:[#allocation62_spill] sm:$0xff] %v15625_v28  ;;  %6682 = vrot.lane.b32.xlu1 %v19125_v46, %s12433_s11  ;;  %v4525_v23 = vmax.f32 %v15625_v28, 0.0  ;;  %v3888_v7 = vadd.f32 %v3678_v47, %v19126_v56  ;;  %v3689_v1 = vadd.f32 %v15149_v61, %v11627_v31  ;;  %v19130_v31 = vld [vmem:[#allocation169_spill] sm:$0xff]  ;;  %v4605_v28 = vpack.c.bf16 %v4527_v11, %v4526_v38  ;;  %v19137_v38 = vld [vmem:[#allocation174_spill] sm:$0xff] }
 0x3ac   :  { %6684 = vrot.lane.b32.xlu0 %v19127_v5, %s12433_s11  ;;  %v3680_v34 = vpop.f32.mrf.mxu0  ;;  %v15646_v5 = vpop.permute.xlu1 %6502 }
 0x3ad   :  { %v3891_v59 = vadd.f32 %v3689_v1, %v19129_v48  ;;  %v3681_v20 = vadd.f32 %v15149_v61, %v3680_v34  ;;  %v11658_v46 = vpop.f32.mrf.mxu1  ;;  %v4604_v56 = vpack.c.bf16 %v4525_v23, %v4524_v19  ;;  %v15649_v37 = vadd.f32 %v14953_v42, %v3888_v7  ;;  %v19134_v34 = vld [vmem:[#allocation170_spill] sm:$0xff]  ;;  %v15663_v23 = vld [vmem:[%s17778_s4 + $0x1] ss:$0 sm:$0xff] }
 0x3ae   :  { %v11630_v47 = vpop.f32.mrf.mxu0  ;;  %v15658_v48 = vadd.f32 %v14980_v49, %v3890_v44 }
 0x3af   :  { %6686 = vrot.lane.b32.xlu1 %v19130_v31, %s12433_s11  ;;  %19131 = vst [vmem:[#allocation160_spill] sm:$0xff] %v15649_v37  ;;  %v15652_v52 = vadd.f32 %v14993_v17, %v3891_v59  ;;  %v3889_v24 = vadd.f32 %v3681_v20, %v19133_v22  ;;  %v4871_v1 = vpop.f32.mrf.mxu1  ;;  %11752 = vmatprep.mubr.msk.bf16.mxu1 %vm2098_vm2, %v4604_v56  ;;  %v15676_v59 = vpop.permute.xlu0 %6504  ;;  %v19139_v31 = vld [vmem:[#allocation173_spill] sm:$0xff] }
 0x3b0   :  { %6688 = vrot.lane.b32.xlu0 %v19134_v34, %s12433_s11  ;;  %19135 = vst [vmem:[#allocation167_spill] sm:$0xff] %v15658_v48  ;;  %v3693_v42 = vpop.f32.mrf.mxu0  ;;  %v3702_v22 = vadd.f32 %v15149_v61, %v11630_v47  ;;  %v4872_v49 = vadd.f32 %v15663_v23, %v4871_v1  ;;  %19138 = vst [vmem:[#allocation163_spill] sm:$0xff] %v15676_v59  ;;  %v4880_v47 = vadd.f32 %v11658_v46, %v15663_v23  ;;  %v19140_v1 = vld [vmem:[#allocation237_spill] sm:$0xff] }
 0x3b1   :  { %19132 = vst [vmem:[#allocation164_spill] sm:$0xff] %v15652_v52  ;;  %v15667_v17 = vadd.f32 %v14962_v29, %v3889_v24  ;;  %v3694_v11 = vadd.f32 %v15149_v61, %v3693_v42  ;;  %11753 = vmatmul.mubr.msk.bf16.gmra.mxu1 %vm2098_vm2, %v4605_v28  ;;  %v11659_v7 = vpop.f32.mrf.mxu1  ;;  %v4528_v29 = vmax.f32 %v15649_v37, 0.0  ;;  %v4531_v24 = vmax.f32 %v15652_v52, 0.0  ;;  %v15688_v37 = vpop.permute.xlu1 %6506  ;;  %v19142_v52 = vld [vmem:[#allocation239_spill] sm:$0xff] }
 0x3b2   :  { %v4883_v19 = vadd.f32 %v11659_v7, %v15663_v23  ;;  %v11631_v44 = vpop.f32.mrf.mxu0  ;;  %v4530_v56 = vmax.f32 %v15658_v48, 0.0  ;;  %19141 = vst [vmem:[#allocation68_spill] sm:$0xff] %v15688_v37  ;;  %v3894_v13 = vadd.f32 %v3702_v22, %v19142_v52  ;;  %v5382_v58 = vmax.f32 %v4872_v49, 0.0  ;;  %v19146_v52 = vld [vmem:[#allocation178_spill] sm:$0xff] }
 0x3b3   :  { %19136 = vst [vmem:[#allocation66_spill] sm:$0xff] %v15667_v17  ;;  %6690 = vrot.lane.b32.xlu1 %v19137_v38, %s12433_s11  ;;  %v4529_v20 = vmax.f32 %v15667_v17, 0.0  ;;  %v4874_v28 = vpop.f32.mrf.mxu1  ;;  %v3892_v34 = vadd.f32 %v3694_v11, %v19140_v1  ;;  %v3705_v42 = vadd.f32 %v15149_v61, %v11631_v44  ;;  %v19144_v11 = vld [vmem:[#allocation177_spill] sm:$0xff]  ;;  %v5384_v1 = vmax.f32 %v4880_v47, 0.0 }
 0x3b4   :  { %6692 = vrot.lane.b32.xlu0 %v19139_v31, %s12433_s11  ;;  %v4875_v7 = vadd.f32 %v15663_v23, %v4874_v28  ;;  %v3696_v38 = vpop.f32.mrf.mxu0  ;;  %v5385_v17 = vmax.f32 %v4883_v19, 0.0  ;;  %v4607_v44 = vpack.c.bf16 %v4531_v24, %v4530_v56  ;;  %v19145_v28 = vld [vmem:[#allocation238_spill] sm:$0xff]  ;;  %v15706_v24 = vpop.permute.xlu0 %6508 }
 0x3b5   :  { %v3697_v46 = vadd.f32 %v15149_v61, %v3696_v38  ;;  %v4606_v62 = vpack.c.bf16 %v4529_v20, %v4528_v29  ;;  %v3895_v31 = vadd.f32 %v3705_v42, %v19143_v0  ;;  %v15701_v22 = vadd.f32 %v15008_v41, %v3892_v34  ;;  %v19154_v34 = vld [vmem:[#allocation241_spill] sm:$0xff] }
 0x3b6   :  { %v5383_v55 = vmax.f32 %v4875_v7, 0.0  ;;  %v11634_v48 = vpop.f32.mrf.mxu0  ;;  %v15709_v20 = vadd.f32 %v15040_v26, %v3894_v13  ;;  %v19152_v13 = vld [vmem:[#allocation243_spill] sm:$0xff] }
 0x3b7   :  { %6694 = vrot.lane.b32.xlu1 %v19144_v11, %s12433_s11  ;;  %v3893_v59 = vadd.f32 %v3697_v46, %v19145_v28  ;;  %v3718_v37 = vadd.f32 %v15149_v61, %v11634_v48  ;;  %11756 = vmatprep.mubr.msk.bf16.mxu1 %vm2098_vm2, %v4606_v62  ;;  %19147 = vst [vmem:[#allocation274_spill] sm:$0xff] %v15701_v22 }
 0x3b8   :  { %6696 = vrot.lane.b32.xlu0 %v19146_v52, %s12433_s11  ;;  %v15704_v0 = vadd.f32 %v15048_v16, %v3895_v31  ;;  %v5510_v49 = vpack.c.bf16 %v5383_v55, %v5382_v58  ;;  %v3709_v19 = vpop.f32.mrf.mxu0  ;;  %v11662_v29 = vpop.f32.mrf.mxu1  ;;  %19149 = vst [vmem:[#allocation275_spill] sm:$0xff] %v15709_v20  ;;  %v5511_v48 = vpack.c.bf16 %v5385_v17, %v5384_v1  ;;  %v19151_v16 = vld [vmem:[#allocation182_spill] sm:$0xff]  ;;  %v19153_v17 = vld [vmem:[#allocation181_spill] sm:$0xff]  ;;  %v4534_v31 = vmax.f32 %v15709_v20, 0.0  ;;  %v19155_v1 = vld [vmem:[#allocation244_spill] sm:$0xff] }
 0x3b9   :  { %v15712_v62 = vadd.f32 %v15020_v50, %v3893_v59  ;;  %v3710_v47 = vadd.f32 %v15149_v61, %v3709_v19  ;;  %11757 = vmatmul.mubr.msk.bf16.gmra.mxu1 %vm2098_vm2, %v4607_v44  ;;  %v15719_v55 = vpop.permute.xlu1 %6510  ;;  %v3898_v50 = vadd.f32 %v3718_v37, %v19152_v13  ;;  %v4532_v59 = vmax.f32 %v15701_v22, 0.0 }
 0x3ba   :  { %19148 = vst [vmem:[#allocation276_spill] sm:$0xff] %v15704_v0  ;;  %v11635_v41 = vpop.f32.mrf.mxu0  ;;  %v4887_v56 = vpop.f32.mrf.mxu1  ;;  %11788 = vmatprep.mubr.msk.bf16.mxu0 %vm2098_vm2, %v5510_v49  ;;  %v4535_v26 = vmax.f32 %v15704_v0, 0.0  ;;  %v4896_v37 = vadd.f32 %v11662_v29, %v15663_v23 }
 0x3bb   :  { %19150 = vst [vmem:[#allocation71_spill] sm:$0xff] %v15712_v62  ;;  %6698 = vrot.lane.b32.xlu1 %v19151_v16, %s12433_s11  ;;  %v4533_v58 = vmax.f32 %v15712_v62, 0.0  ;;  %11789 = vmatmul.mubr.msk.bf16.vlgmr.msra.gmra.mxu0 %vm2098_vm2, %v5511_v48  ;;  %v3896_v42 = vadd.f32 %v3710_v47, %v19154_v34  ;;  %v3721_v7 = vadd.f32 %v15149_v61, %v11635_v41  ;;  %v19156_v48 = vld [vmem:[#allocation185_spill] sm:$0xff]  ;;  %v15738_v41 = vpop.permute.xlu0 %6512 }
 0x3bc   :  { %6700 = vrot.lane.b32.xlu0 %v19153_v17, %s12433_s11  ;;  %v3712_v38 = vpop.f32.mrf.mxu0  ;;  %v11663_v46 = vpop.f32.mrf.mxu1  ;;  %v4888_v52 = vadd.f32 %v15663_v23, %v4887_v56  ;;  %v4609_v16 = vpack.c.bf16 %v4535_v26, %v4534_v31  ;;  %v15741_v13 = vadd.f32 %v15098_v36, %v3898_v50  ;;  %v19158_v17 = vld [vmem:[#allocation242_spill] sm:$0xff]  ;;  %v19163_v50 = vld [vmem:[#allocation247_spill] sm:$0xff] }
 0x3bd   :  { %v3713_v11 = vadd.f32 %v15149_v61, %v3712_v38  ;;  %v4899_v44 = vadd.f32 %v11663_v46, %v15663_v23  ;;  %v3899_v28 = vadd.f32 %v3721_v7, %v19155_v1  ;;  %v4608_v47 = vpack.c.bf16 %v4533_v58, %v4532_v59  ;;  %v19159_v7 = vld [vmem:[#allocation186_spill] sm:$0xff] }
 0x3be   :  { %v11638_v49 = vpop.f32.mrf.mxu0  ;;  %v4890_v19 = vpop.f32.mrf.mxu1  ;;  %19157 = vst [vmem:[#allocation168_spill] sm:$0xff] %v15741_v13  ;;  %v15748_v56 = vadd.f32 %v15071_v4, %v3896_v42 }
 0x3bf   :  { %6702 = vrot.lane.b32.xlu1 %v19156_v48, %s12433_s11  ;;  %v3897_v34 = vadd.f32 %v3713_v11, %v19158_v17  ;;  %v3734_v29 = vadd.f32 %v15149_v61, %v11638_v49  ;;  %v15751_v38 = vadd.f32 %v15111_v14, %v3899_v28  ;;  %v5389_v58 = vmax.f32 %v4899_v44, 0.0  ;;  %11760 = vmatprep.mubr.msk.bf16.mxu1 %vm2098_vm2, %v4608_v47  ;;  %v15761_v4 = vpop.permute.xlu1 %6514  ;;  %v19164_v49 = vld [vmem:[#allocation190_spill] sm:$0xff]  ;;  %v19165_v48 = vld [vmem:[#allocation245_spill] sm:$0xff] }
 0x3c0   :  { %6704 = vrot.lane.b32.xlu0 %v19159_v7, %s12433_s11  ;;  %19160 = vst [vmem:[#allocation70_spill] sm:$0xff] %v15748_v56  ;;  %v4891_v59 = vadd.f32 %v15663_v23, %v4890_v19  ;;  %v3725_v36 = vpop.f32.mrf.mxu0  ;;  %v5388_v14 = vmax.f32 %v4896_v37, 0.0  ;;  %v5386_v44 = vmax.f32 %v4888_v52, 0.0  ;;  %v4536_v37 = vmax.f32 %v15748_v56, 0.0 }
 0x3c1   :  { %19161 = vst [vmem:[#allocation172_spill] sm:$0xff] %v15751_v38  ;;  %v15756_v26 = vadd.f32 %v15080_v12, %v3897_v34  ;;  %v3902_v46 = vadd.f32 %v3734_v29, %v19163_v50  ;;  %v3726_v31 = vadd.f32 %v15149_v61, %v3725_v36  ;;  %v11666_v11 = vpop.f32.mrf.mxu1  ;;  %11761 = vmatmul.mubr.msk.bf16.gmra.mxu1 %vm2098_vm2, %v4609_v16  ;;  %v4539_v42 = vmax.f32 %v15751_v38, 0.0  ;;  %v19166_v34 = vld [vmem:[#allocation189_spill] sm:$0xff]  ;;  %v15774_v36 = vpop.permute.xlu0 %6516 }
 0x3c2   :  { %v5387_v1 = vmax.f32 %v4891_v59, 0.0  ;;  %v11639_v28 = vpop.f32.mrf.mxu0  ;;  %v4538_v12 = vmax.f32 %v15741_v13, 0.0  ;;  %v5513_v52 = vpack.c.bf16 %v5389_v58, %v5388_v14  ;;  %v4912_v7 = vadd.f32 %v11666_v11, %v15663_v23  ;;  %v19179_v13 = vld [vmem:[#allocation252_spill] sm:$0xff] }
 0x3c3   :  { %19162 = vst [vmem:[#allocation175_spill] sm:$0xff] %v15756_v26  ;;  %6706 = vrot.lane.b32.xlu1 %v19164_v49, %s12433_s11  ;;  %v4537_v19 = vmax.f32 %v15756_v26, 0.0  ;;  %v3900_v47 = vadd.f32 %v3726_v31, %v19165_v48  ;;  %v3737_v17 = vadd.f32 %v15149_v61, %v11639_v28  ;;  %v4903_v16 = vpop.f32.mrf.mxu1  ;;  %v15777_v49 = vadd.f32 %v15163_v51, %v3902_v46  ;;  %v19168_v31 = vld [vmem:[#allocation248_spill] sm:$0xff]  ;;  %v15783_v61 = vld [vmem:[%s17780_s6] ss:$0 sm:$0xff] }
 0x3c4   :  { %6708 = vrot.lane.b32.xlu0 %v19166_v34, %s12433_s11  ;;  %v5512_v29 = vpack.c.bf16 %v5387_v1, %v5386_v44  ;;  %v3728_v59 = vpop.f32.mrf.mxu0  ;;  %v4611_v50 = vpack.c.bf16 %v4539_v42, %v4538_v12  ;;  %v4904_v14 = vadd.f32 %v15663_v23, %v4903_v16  ;;  %v19169_v51 = vld [vmem:[#allocation193_spill] sm:$0xff]  ;;  %v19172_v12 = vld [vmem:[#allocation246_spill] sm:$0xff] }
 0x3c5   :  { %19167 = vst [vmem:[#allocation73_spill] sm:$0xff] %v15777_v49  ;;  %v3903_v48 = vadd.f32 %v3737_v17, %v19168_v31  ;;  %v3729_v28 = vadd.f32 %v15783_v61, %v3728_v59  ;;  %v11667_v58 = vpop.f32.mrf.mxu1  ;;  %v4610_v46 = vpack.c.bf16 %v4537_v19, %v4536_v37  ;;  %v15792_v44 = vadd.f32 %v15126_v6, %v3900_v47  ;;  %v19173_v16 = vld [vmem:[#allocation194_spill] sm:$0xff] }
 0x3c6   :  { %v4915_v11 = vadd.f32 %v11667_v58, %v15663_v23  ;;  %11792 = vmatprep.mubr.msk.bf16.mxu0 %vm2098_vm2, %v5512_v29  ;;  %v11642_v42 = vpop.f32.mrf.mxu0  ;;  %v15801_v29 = vpop.permute.xlu1 %6518 }
 0x3c7   :  { %6710 = vrot.lane.b32.xlu1 %v19169_v51, %s12433_s11  ;;  %19170 = vst [vmem:[#allocation277_spill] sm:$0xff] %v15792_v44  ;;  %v15795_v1 = vadd.f32 %v15171_v45, %v3903_v48  ;;  %v3901_v17 = vadd.f32 %v3729_v28, %v19172_v12  ;;  %v4906_v34 = vpop.f32.mrf.mxu1  ;;  %11793 = vmatmul.mubr.msk.bf16.gmra.mxu0 %vm2098_vm2, %v5513_v52  ;;  %v5392_v52 = vmax.f32 %v4912_v7, 0.0  ;;  %v5390_v48 = vmax.f32 %v4904_v14, 0.0  ;;  %v15813_v51 = vpop.permute.xlu0 %6520  ;;  %v19177_v7 = vld [vmem:[#allocation251_spill] sm:$0xff] }
 0x3c8   :  { %6712 = vrot.lane.b32.xlu0 %v19173_v16, %s12433_s11  ;;  %v3750_v59 = vadd.f32 %v15783_v61, %v11642_v42  ;;  %v4907_v19 = vadd.f32 %v15663_v23, %v4906_v34  ;;  %11764 = vmatprep.mubr.msk.bf16.mxu1 %vm2098_vm2, %v4610_v46  ;;  %v3741_v6 = vpop.f32.mrf.mxu0  ;;  %v5393_v47 = vmax.f32 %v4915_v11, 0.0  ;;  %v19175_v42 = vld [vmem:[#allocation198_spill] sm:$0xff]  ;;  %v4542_v46 = vmax.f32 %v15777_v49, 0.0  ;;  %v19178_v16 = vld [vmem:[#allocation249_spill] sm:$0xff] }
 0x3c9   :  { %19171 = vst [vmem:[#allocation171_spill] sm:$0xff] %v15795_v1  ;;  %v15807_v45 = vadd.f32 %v15138_v43, %v3901_v17  ;;  %v3742_v37 = vadd.f32 %v15783_v61, %v3741_v6  ;;  %v11670_v31 = vpop.f32.mrf.mxu1  ;;  %11765 = vmatmul.mubr.msk.bf16.gmra.mxu1 %vm2098_vm2, %v4611_v50  ;;  %v4540_v43 = vmax.f32 %v15792_v44, 0.0  ;;  %v4543_v11 = vmax.f32 %v15795_v1, 0.0  ;;  %v19176_v50 = vld [vmem:[#allocation197_spill] sm:$0xff] }
 0x3ca   :  { %v5391_v28 = vmax.f32 %v4907_v19, 0.0  ;;  %v11643_v58 = vpop.f32.mrf.mxu0  ;;  %v3906_v14 = vadd.f32 %v3750_v59, %v19177_v7  ;;  %v5515_v26 = vpack.c.bf16 %v5393_v47, %v5392_v52  ;;  %v4928_v49 = vadd.f32 %v11670_v31, %v15663_v23  ;;  %v19181_v31 = vld [vmem:[#allocation250_spill] sm:$0xff] }
 0x3cb   :  { %19174 = vst [vmem:[#allocation74_spill] sm:$0xff] %v15807_v45  ;;  %6714 = vrot.lane.b32.xlu1 %v19175_v42, %s12433_s11  ;;  %v4541_v12 = vmax.f32 %v15807_v45, 0.0  ;;  %v4919_v17 = vpop.f32.mrf.mxu1  ;;  %v3904_v19 = vadd.f32 %v3742_v37, %v19178_v16  ;;  %v3753_v6 = vadd.f32 %v15783_v61, %v11643_v58  ;;  %v15826_v45 = vpop.permute.xlu1 %6522  ;;  %v4613_v47 = vpack.c.bf16 %v4543_v11, %v4542_v46  ;;  %v19186_v16 = vld [vmem:[#allocation253_spill] sm:$0xff] }
 0x3cc   :  { %6716 = vrot.lane.b32.xlu0 %v19176_v50, %s12433_s11  ;;  %v5514_v34 = vpack.c.bf16 %v5391_v28, %v5390_v48  ;;  %v3744_v42 = vpop.f32.mrf.mxu0  ;;  %v4920_v50 = vadd.f32 %v15663_v23, %v4919_v17  ;;  %v19180_v48 = vld [vmem:[#allocation201_spill] sm:$0xff]  ;;  %v15846_v46 = vadd.f32 %v15221_v60, %v3906_v14 }
 0x3cd   :  { %v3745_v44 = vadd.f32 %v15783_v61, %v3744_v42  ;;  %v11671_v1 = vpop.f32.mrf.mxu1  ;;  %v4612_v38 = vpack.c.bf16 %v4541_v12, %v4540_v43  ;;  %v3907_v56 = vadd.f32 %v3753_v6, %v19179_v13  ;;  %v15838_v13 = vadd.f32 %v15194_v35, %v3904_v19  ;;  %v19187_v6 = vld [vmem:[#allocation255_spill] sm:$0xff] }
 0x3ce   :  { %v4931_v59 = vadd.f32 %v11671_v1, %v15663_v23  ;;  %11796 = vmatprep.mubr.msk.bf16.mxu0 %vm2098_vm2, %v5514_v34  ;;  %v11646_v37 = vpop.f32.mrf.mxu0  ;;  %19184 = vst [vmem:[#allocation78_spill] sm:$0xff] %v15846_v46  ;;  %v5396_v35 = vmax.f32 %v4928_v49, 0.0  ;;  %v4546_v49 = vmax.f32 %v15846_v46, 0.0  ;;  %v19210_v46 = vld [vmem:[#allocation64_spill] sm:$0xff] }
 0x3cf   :  { %6718 = vrot.lane.b32.xlu1 %v19180_v48, %s12433_s11  ;;  %v3905_v52 = vadd.f32 %v3745_v44, %v19181_v31  ;;  %v4922_v28 = vpop.f32.mrf.mxu1  ;;  %11797 = vmatmul.mubr.msk.bf16.gmra.mxu0 %vm2098_vm2, %v5515_v26  ;;  %19182 = vst [vmem:[#allocation279_spill] sm:$0xff] %v15838_v13  ;;  %v15841_v58 = vadd.f32 %v15234_v53, %v3907_v56  ;;  %v5394_v53 = vmax.f32 %v4920_v50, 0.0  ;;  %v4544_v19 = vmax.f32 %v15838_v13, 0.0  ;;  %v19188_v48 = vld [vmem:[#allocation256_spill] sm:$0xff] }
 0x3d0   :  { %11768 = vmatprep.mubr.msk.bf16.mxu1 %vm2098_vm2, %v4612_v38  ;;  %v3766_v1 = vadd.f32 %v15783_v61, %v11646_v37  ;;  %v4923_v43 = vadd.f32 %v15663_v23, %v4922_v28  ;;  %v3757_v12 = vpop.f32.mrf.mxu0  ;;  %v5397_v26 = vmax.f32 %v4931_v59, 0.0 }
 0x3d1   :  { %19183 = vst [vmem:[#allocation278_spill] sm:$0xff] %v15841_v58  ;;  %v15849_v44 = vadd.f32 %v15203_v27, %v3905_v52  ;;  %v3758_v38 = vadd.f32 %v15783_v61, %v3757_v12  ;;  %v11674_v11 = vpop.f32.mrf.mxu1  ;;  %11769 = vmatmul.mubr.msk.bf16.gmra.mxu1 %vm2098_vm2, %v4613_v47  ;;  %v4547_v7 = vmax.f32 %v15841_v58, 0.0 }
 0x3d2   :  { %v5395_v56 = vmax.f32 %v4923_v43, 0.0  ;;  %v11647_v17 = vpop.f32.mrf.mxu0  ;;  %v3910_v42 = vadd.f32 %v3766_v1, %v19187_v6  ;;  %v5517_v50 = vpack.c.bf16 %v5397_v26, %v5396_v35  ;;  %v4944_v28 = vadd.f32 %v11674_v11, %v15663_v23  ;;  %v19191_v35 = vld [vmem:[#allocation254_spill] sm:$0xff]  ;;  %v19192_v11 = vld [vmem:[#allocation45_spill] sm:$0xff] }
 0x3d3   :  { %19185 = vst [vmem:[#allocation77_spill] sm:$0xff] %v15849_v44  ;;  %v4545_v34 = vmax.f32 %v15849_v44, 0.0  ;;  %v3908_v60 = vadd.f32 %v3758_v38, %v19186_v16  ;;  %v3769_v14 = vadd.f32 %v15783_v61, %v11647_v17  ;;  %v4935_v27 = vpop.f32.mrf.mxu1  ;;  %v19209_v44 = vld [vmem:[#allocation13_spill] sm:$0xff] }
 0x3d4   :  { %v5516_v59 = vpack.c.bf16 %v5395_v56, %v5394_v53  ;;  %v3760_v37 = vpop.f32.mrf.mxu0  ;;  %v4936_v43 = vadd.f32 %v15663_v23, %v4935_v27  ;;  %v4615_v53 = vpack.c.bf16 %v4547_v7, %v4546_v49  ;;  %v19194_v7 = vld [vmem:[#allocation127_spill] sm:$0xff] }
 0x3d5   :  { %v3911_v47 = vadd.f32 %v3769_v14, %v19188_v48  ;;  %v3761_v31 = vadd.f32 %v15783_v61, %v3760_v37  ;;  %v11675_v52 = vpop.f32.mrf.mxu1  ;;  %v4614_v1 = vpack.c.bf16 %v4545_v34, %v4544_v19  ;;  %v15867_v56 = vadd.f32 %v15249_v18, %v3908_v60 }
 0x3d6   :  { %v4947_v12 = vadd.f32 %v11675_v52, %v15663_v23  ;;  %11800 = vmatprep.mubr.msk.bf16.mxu0 %vm2098_vm2, %v5516_v59  ;;  %v11650_v38 = vpop.f32.mrf.mxu0  ;;  %v15875_v14 = vadd.f32 %v19192_v11, %v3910_v42  ;;  %v5400_v59 = vmax.f32 %v4944_v28, 0.0  ;;  %v5398_v37 = vmax.f32 %v4936_v43, 0.0  ;;  %v19197_v28 = vld [vmem:[#allocation259_spill] sm:$0xff] }
 0x3d7   :  { %19189 = vst [vmem:[#allocation176_spill] sm:$0xff] %v15867_v56  ;;  %v15870_v26 = vadd.f32 %v15289_v15, %v3911_v47  ;;  %v3909_v17 = vadd.f32 %v3761_v31, %v19191_v35  ;;  %v4938_v16 = vpop.f32.mrf.mxu1  ;;  %11801 = vmatmul.mubr.msk.bf16.gmra.mxu0 %vm2098_vm2, %v5517_v50  ;;  %11772 = vmatprep.mubr.msk.bf16.mxu1 %vm2098_vm2, %v4614_v1  ;;  %v4548_v50 = vmax.f32 %v15867_v56, 0.0  ;;  %v19196_v31 = vld [vmem:[#allocation257_spill] sm:$0xff] }
 0x3d8   :  { %19193 = vst [vmem:[#allocation183_spill] sm:$0xff] %v15875_v14  ;;  %v4939_v27 = vadd.f32 %v15663_v23, %v4938_v16  ;;  %v3773_v34 = vpop.f32.mrf.mxu0  ;;  %v5401_v18 = vmax.f32 %v4947_v12, 0.0  ;;  %v3782_v15 = vadd.f32 %v15783_v61, %v11650_v38  ;;  %v4550_v38 = vmax.f32 %v15875_v14, 0.0 }
 0x3d9   :  { %19190 = vst [vmem:[#allocation180_spill] sm:$0xff] %v15870_v26  ;;  %v15880_v19 = vadd.f32 %v19194_v7, %v3909_v17  ;;  %v3774_v60 = vadd.f32 %v15783_v61, %v3773_v34  ;;  %v11678_v6 = vpop.f32.mrf.mxu1  ;;  %11773 = vmatmul.mubr.msk.bf16.gmra.mxu1 %vm2098_vm2, %v4615_v53  ;;  %v4551_v48 = vmax.f32 %v15870_v26, 0.0  ;;  %v19198_v7 = vld [vmem:[#allocation260_spill] sm:$0xff] }
 0x3da   :  { %v5399_v42 = vmax.f32 %v4939_v27, 0.0  ;;  %v11651_v49 = vpop.f32.mrf.mxu0  ;;  %v5519_v53 = vpack.c.bf16 %v5401_v18, %v5400_v59  ;;  %v3914_v43 = vadd.f32 %v3782_v15, %v19197_v28  ;;  %v4960_v34 = vadd.f32 %v11678_v6, %v15663_v23  ;;  %v19201_v18 = vld [vmem:[#allocation258_spill] sm:$0xff]  ;;  %v19208_v26 = vld [vmem:[#allocation12_spill] sm:$0xff] }
 0x3db   :  { %19195 = vst [vmem:[#allocation81_spill] sm:$0xff] %v15880_v19  ;;  %v4549_v47 = vmax.f32 %v15880_v19, 0.0  ;;  %v3912_v52 = vadd.f32 %v3774_v60, %v19196_v31  ;;  %v4951_v12 = vpop.f32.mrf.mxu1  ;;  %v3785_v35 = vadd.f32 %v15783_v61, %v11651_v49 }
 0x3dc   :  { %v5518_v1 = vpack.c.bf16 %v5399_v42, %v5398_v37  ;;  %v3776_v17 = vpop.f32.mrf.mxu0  ;;  %v4952_v60 = vadd.f32 %v15663_v23, %v4951_v12  ;;  %v4617_v37 = vpack.c.bf16 %v4551_v48, %v4550_v38  ;;  %v19199_v42 = vld [vmem:[#allocation135_spill] sm:$0xff]  ;;  %v19205_v12 = vld [vmem:[#allocation48_spill] sm:$0xff] }
 0x3dd   :  { %v3777_v16 = vadd.f32 %v15783_v61, %v3776_v17  ;;  %v11679_v11 = vpop.f32.mrf.mxu1  ;;  %v4616_v27 = vpack.c.bf16 %v4549_v47, %v4548_v50  ;;  %v3915_v19 = vadd.f32 %v3785_v35, %v19198_v7  ;;  %v15899_v49 = vadd.f32 %v19199_v42, %v3912_v52  ;;  %v19203_v50 = vld [vmem:[#allocation51_spill] sm:$0xff]  ;;  %v12395_v17 = vld [vmem:[%s17779_s5 + $0x28] sm:$0xff]  }
 0x3de   :  { %v4963_v31 = vadd.f32 %v11679_v11, %v15663_v23  ;;  %11804 = vmatprep.mubr.msk.bf16.mxu0 %vm2098_vm2, %v5518_v1  ;;  %v15909_v47 = vadd.f32 %v19203_v50, %v3914_v43  ;;  %v5402_v1 = vmax.f32 %v4952_v60, 0.0  ;;  %12048 = vmatprep.subr.bf16.mxu0 %v12395_v17 }
 0x3df   :  { %19200 = vst [vmem:[#allocation179_spill] sm:$0xff] %v15899_v49  ;;  %v3913_v15 = vadd.f32 %v3777_v16, %v19201_v18  ;;  %v4954_v59 = vpop.f32.mrf.mxu1  ;;  %11805 = vmatmul.mubr.msk.bf16.gmra.mxu0 %vm2098_vm2, %v5519_v53  ;;  %11776 = vmatprep.mubr.msk.bf16.mxu1 %vm2098_vm2, %v4616_v27  ;;  %v15905_v61 = vadd.f32 %v15352_v21, %v3915_v19  ;;  %v4552_v21 = vmax.f32 %v15899_v49, 0.0  ;;  %v5404_v19 = vmax.f32 %v4960_v34, 0.0 }
 0x3e0   :  { %v4955_v6 = vadd.f32 %v15663_v23, %v4954_v59  ;;  %19204 = vst [vmem:[#allocation280_spill] sm:$0xff] %v15909_v47  ;;  %v5405_v52 = vmax.f32 %v4963_v31, 0.0  ;;  %v4554_v11 = vmax.f32 %v15909_v47, 0.0  ;;  %12049 = vmatpush3.bf16.msra.mxu0 %v12395_v17 }
 0x3e1   :  { %19202 = vst [vmem:[#allocation82_spill] sm:$0xff] %v15905_v61  ;;  %v15912_v48 = vadd.f32 %v19205_v12, %v3913_v15  ;;  %v11682_v38 = vpop.f32.mrf.mxu1  ;;  %11777 = vmatmul.mubr.msk.bf16.gmra.mxu1 %vm2098_vm2, %v4617_v37  ;;  %v4555_v53 = vmax.f32 %v15905_v61, 0.0 }
 0x3e2   :  { %v5403_v35 = vmax.f32 %v4955_v6, 0.0  ;;  %v5521_v27 = vpack.c.bf16 %v5405_v52, %v5404_v19  ;;  %v4976_v42 = vadd.f32 %v11682_v38, %v15663_v23 }
 0x3e3   :  { %19206 = vst [vmem:[#allocation281_spill] sm:$0xff] %v15912_v48  ;;  %v4553_v28 = vmax.f32 %v15912_v48, 0.0  ;;  %v4967_v43 = vpop.f32.mrf.mxu1  ;;  %v4619_v34 = vpack.c.bf16 %v4555_v53, %v4554_v11 }
 0x3e4   :  { %v5520_v16 = vpack.c.bf16 %v5403_v35, %v5402_v1  ;;  %v4968_v31 = vadd.f32 %v15663_v23, %v4967_v43  ;;  %v5408_v52 = vmax.f32 %v4976_v42, 0.0 }
 0x3e5   :  { %v11683_v7 = vpop.f32.mrf.mxu1  ;;  %v4618_v60 = vpack.c.bf16 %v4553_v28, %v4552_v21 }
 0x3e6   :  { %v4979_v37 = vadd.f32 %v11683_v7, %v15663_v23  ;;  %11808 = vmatprep.mubr.msk.bf16.mxu0 %vm2098_vm2, %v5520_v16  ;;  %v5406_v50 = vmax.f32 %v4968_v31, 0.0 }
 0x3e7   :  { %v4970_v18 = vpop.f32.mrf.mxu1  ;;  %11809 = vmatmul.mubr.msk.bf16.gmra.mxu0 %vm2098_vm2, %v5521_v27  ;;  %11780 = vmatprep.mubr.msk.bf16.mxu1 %vm2098_vm2, %v4618_v60 }
 0x3e8   :  { %v4971_v15 = vadd.f32 %v15663_v23, %v4970_v18  ;;  %v5409_v59 = vmax.f32 %v4979_v37, 0.0 }
 0x3e9   :  { %v11686_v6 = vpop.f32.mrf.mxu1  ;;  %11781 = vmatmul.mubr.msk.bf16.gmra.mxu1 %vm2098_vm2, %v4619_v34 }
 0x3ea   :  { %v5407_v12 = vmax.f32 %v4971_v15, 0.0  ;;  %v5523_v17 = vpack.c.bf16 %v5409_v59, %v5408_v52  ;;  %v4992_v53 = vadd.f32 %v11686_v6, %v15663_v23 }
 0x3eb   :  { %v4983_v1 = vpop.f32.mrf.mxu1 }
 0x3ec   :  { %v5522_v35 = vpack.c.bf16 %v5407_v12, %v5406_v50  ;;  %v4984_v38 = vadd.f32 %v15663_v23, %v4983_v1  ;;  %v5412_v60 = vmax.f32 %v4992_v53, 0.0 }
 0x3ed   :  { %v11687_v21 = vpop.f32.mrf.mxu1 }
 0x3ee   :  { %v4995_v19 = vadd.f32 %v11687_v21, %v15663_v23  ;;  %11812 = vmatprep.mubr.msk.bf16.mxu0 %vm2098_vm2, %v5522_v35  ;;  %v5410_v27 = vmax.f32 %v4984_v38, 0.0 }
 0x3ef   :  { %v4986_v28 = vpop.f32.mrf.mxu1  ;;  %11813 = vmatmul.mubr.msk.bf16.gmra.mxu0 %vm2098_vm2, %v5523_v17 }
 0x3f0   :  { %v4987_v43 = vadd.f32 %v15663_v23, %v4986_v28  ;;  %v5413_v16 = vmax.f32 %v4995_v19, 0.0 }
 0x3f1   :  { %v11690_v11 = vpop.f32.mrf.mxu1 }
 0x3f2   :  { %v5411_v7 = vmax.f32 %v4987_v43, 0.0  ;;  %v5525_v34 = vpack.c.bf16 %v5413_v16, %v5412_v60  ;;  %v5008_v59 = vadd.f32 %v11690_v11, %v15663_v23 }
 0x3f3   :  { %v4999_v31 = vpop.f32.mrf.mxu1 }
 0x3f4   :  { %v5524_v37 = vpack.c.bf16 %v5411_v7, %v5410_v27  ;;  %v5000_v18 = vadd.f32 %v15663_v23, %v4999_v31  ;;  %v5416_v17 = vmax.f32 %v5008_v59, 0.0 }
 0x3f5   :  { %v11691_v42 = vpop.f32.mrf.mxu1 }
 0x3f6   :  { %v5011_v15 = vadd.f32 %v11691_v42, %v15663_v23  ;;  %11816 = vmatprep.mubr.msk.bf16.mxu0 %vm2098_vm2, %v5524_v37  ;;  %v5414_v1 = vmax.f32 %v5000_v18, 0.0 }
 0x3f7   :  { %v5002_v6 = vpop.f32.mrf.mxu1  ;;  %11817 = vmatmul.mubr.msk.bf16.gmra.mxu0 %vm2098_vm2, %v5525_v34 }
 0x3f8   :  { %v5003_v50 = vadd.f32 %v15663_v23, %v5002_v6  ;;  %v5417_v12 = vmax.f32 %v5011_v15, 0.0 }
 0x3f9   :  { %v11694_v52 = vpop.f32.mrf.mxu1 }
 0x3fa   :  { %v5415_v35 = vmax.f32 %v5003_v50, 0.0  ;;  %v5527_v19 = vpack.c.bf16 %v5417_v12, %v5416_v17  ;;  %v5024_v16 = vadd.f32 %v11694_v52, %v15663_v23 }
 0x3fb   :  { %v5015_v21 = vpop.f32.mrf.mxu1 }
 0x3fc   :  { %v5526_v38 = vpack.c.bf16 %v5415_v35, %v5414_v1  ;;  %v5016_v28 = vadd.f32 %v15663_v23, %v5015_v21  ;;  %v5420_v34 = vmax.f32 %v5024_v16, 0.0 }
 0x3fd   :  { %v11695_v53 = vpop.f32.mrf.mxu1 }
 0x3fe   :  { %v5027_v43 = vadd.f32 %v11695_v53, %v15663_v23  ;;  %11820 = vmatprep.mubr.msk.bf16.mxu0 %vm2098_vm2, %v5526_v38  ;;  %v5418_v31 = vmax.f32 %v5016_v28, 0.0 }
 0x3ff   :  { %v5018_v11 = vpop.f32.mrf.mxu1  ;;  %11821 = vmatmul.mubr.msk.bf16.gmra.mxu0 %vm2098_vm2, %v5527_v19 }
 0x400   :  { %v5019_v27 = vadd.f32 %v15663_v23, %v5018_v11  ;;  %v5421_v7 = vmax.f32 %v5027_v43, 0.0 }
 0x401   :  { %v11698_v60 = vpop.f32.mrf.mxu1 }
 0x402   :  { %v5419_v37 = vmax.f32 %v5019_v27, 0.0  ;;  %v5529_v15 = vpack.c.bf16 %v5421_v7, %v5420_v34  ;;  %v5040_v12 = vadd.f32 %v11698_v60, %v15663_v23 }
 0x403   :  { %v5031_v42 = vpop.f32.mrf.mxu1 }
 0x404   :  { %v5528_v18 = vpack.c.bf16 %v5419_v37, %v5418_v31  ;;  %v5032_v6 = vadd.f32 %v15663_v23, %v5031_v42  ;;  %v5424_v19 = vmax.f32 %v5040_v12, 0.0 }
 0x405   :  { %v11699_v59 = vpop.f32.mrf.mxu1 }
 0x406   :  { %v5043_v50 = vadd.f32 %v11699_v59, %v15663_v23  ;;  %11824 = vmatprep.mubr.msk.bf16.mxu0 %vm2098_vm2, %v5528_v18  ;;  %v5422_v21 = vmax.f32 %v5032_v6, 0.0 }
 0x407   :  { %v5034_v52 = vpop.f32.mrf.mxu1  ;;  %11825 = vmatmul.mubr.msk.bf16.gmra.mxu0 %vm2098_vm2, %v5529_v15 }
 0x408   :  { %v5035_v1 = vadd.f32 %v15663_v23, %v5034_v52  ;;  %v5425_v35 = vmax.f32 %v5043_v50, 0.0 }
 0x409   :  { %v11702_v17 = vpop.f32.mrf.mxu1 }
 0x40a   :  { %v5423_v38 = vmax.f32 %v5035_v1, 0.0  ;;  %v5531_v43 = vpack.c.bf16 %v5425_v35, %v5424_v19  ;;  %v5056_v7 = vadd.f32 %v11702_v17, %v15663_v23 }
 0x40b   :  { %v5047_v53 = vpop.f32.mrf.mxu1 }
 0x40c   :  { %v5530_v28 = vpack.c.bf16 %v5423_v38, %v5422_v21  ;;  %v5048_v11 = vadd.f32 %v15663_v23, %v5047_v53  ;;  %v5428_v15 = vmax.f32 %v5056_v7, 0.0 }
 0x40d   :  { %v11703_v16 = vpop.f32.mrf.mxu1 }
 0x40e   :  { %v5059_v27 = vadd.f32 %v11703_v16, %v15663_v23  ;;  %11828 = vmatprep.mubr.msk.bf16.mxu0 %vm2098_vm2, %v5530_v28  ;;  %v5426_v42 = vmax.f32 %v5048_v11, 0.0 }
 0x40f   :  { %v5050_v60 = vpop.f32.mrf.mxu1  ;;  %11829 = vmatmul.mubr.msk.bf16.gmra.mxu0 %vm2098_vm2, %v5531_v43 }
 0x410   :  { %v5051_v31 = vadd.f32 %v15663_v23, %v5050_v60  ;;  %v5429_v37 = vmax.f32 %v5059_v27, 0.0 }
 0x411   :  { %v11706_v34 = vpop.f32.mrf.mxu1 }
 0x412   :  { %v5427_v18 = vmax.f32 %v5051_v31, 0.0  ;;  %v5533_v50 = vpack.c.bf16 %v5429_v37, %v5428_v15  ;;  %v5072_v35 = vadd.f32 %v11706_v34, %v15663_v23 }
 0x413   :  { %v5063_v59 = vpop.f32.mrf.mxu1 }
 0x414   :  { %v5532_v6 = vpack.c.bf16 %v5427_v18, %v5426_v42  ;;  %v5064_v52 = vadd.f32 %v15663_v23, %v5063_v59  ;;  %v5432_v43 = vmax.f32 %v5072_v35, 0.0 }
 0x415   :  { %v11707_v12 = vpop.f32.mrf.mxu1 }
 0x416   :  { %v5075_v1 = vadd.f32 %v11707_v12, %v15663_v23  ;;  %11832 = vmatprep.mubr.msk.bf16.mxu0 %vm2098_vm2, %v5532_v6  ;;  %v5430_v53 = vmax.f32 %v5064_v52, 0.0 }
 0x417   :  { %v5066_v17 = vpop.f32.mrf.mxu1  ;;  %11833 = vmatmul.mubr.msk.bf16.gmra.mxu0 %vm2098_vm2, %v5533_v50 }
 0x418   :  { %v5067_v21 = vadd.f32 %v15663_v23, %v5066_v17  ;;  %v5433_v38 = vmax.f32 %v5075_v1, 0.0 }
 0x419   :  { %v11710_v19 = vpop.f32.mrf.mxu1 }
 0x41a   :  { %v5431_v28 = vmax.f32 %v5067_v21, 0.0  ;;  %v5535_v27 = vpack.c.bf16 %v5433_v38, %v5432_v43  ;;  %v5088_v37 = vadd.f32 %v11710_v19, %v15663_v23 }
 0x41b   :  { %v5079_v16 = vpop.f32.mrf.mxu1 }
 0x41c   :  { %v5534_v11 = vpack.c.bf16 %v5431_v28, %v5430_v53  ;;  %v5080_v60 = vadd.f32 %v15663_v23, %v5079_v16  ;;  %v5436_v50 = vmax.f32 %v5088_v37, 0.0 }
 0x41d   :  { %v11711_v7 = vpop.f32.mrf.mxu1 }
 0x41e   :  { %v5091_v31 = vadd.f32 %v11711_v7, %v15663_v23  ;;  %11836 = vmatprep.mubr.msk.bf16.mxu0 %vm2098_vm2, %v5534_v11  ;;  %v5434_v59 = vmax.f32 %v5080_v60, 0.0 }
 0x41f   :  { %v5082_v34 = vpop.f32.mrf.mxu1  ;;  %11837 = vmatmul.mubr.msk.bf16.gmra.mxu0 %vm2098_vm2, %v5535_v27 }
 0x420   :  { %v5083_v42 = vadd.f32 %v15663_v23, %v5082_v34  ;;  %v5437_v18 = vmax.f32 %v5091_v31, 0.0 }
 0x421   :  { %v11714_v15 = vpop.f32.mrf.mxu1 }
 0x422   :  { %v5435_v6 = vmax.f32 %v5083_v42, 0.0  ;;  %v5537_v1 = vpack.c.bf16 %v5437_v18, %v5436_v50  ;;  %v5104_v38 = vadd.f32 %v11714_v15, %v15663_v23 }
 0x423   :  { %v5095_v12 = vpop.f32.mrf.mxu1 }
 0x424   :  { %v5536_v52 = vpack.c.bf16 %v5435_v6, %v5434_v59  ;;  %v5096_v17 = vadd.f32 %v15663_v23, %v5095_v12  ;;  %v5440_v27 = vmax.f32 %v5104_v38, 0.0 }
 0x425   :  { %v11715_v35 = vpop.f32.mrf.mxu1 }
 0x426   :  { %v5107_v21 = vadd.f32 %v11715_v35, %v15663_v23  ;;  %11840 = vmatprep.mubr.msk.bf16.mxu0 %vm2098_vm2, %v5536_v52  ;;  %v5438_v16 = vmax.f32 %v5096_v17, 0.0 }
 0x427   :  { %v5098_v19 = vpop.f32.mrf.mxu1  ;;  %11841 = vmatmul.mubr.msk.bf16.gmra.mxu0 %vm2098_vm2, %v5537_v1 }
 0x428   :  { %v5099_v53 = vadd.f32 %v15663_v23, %v5098_v19  ;;  %v5441_v28 = vmax.f32 %v5107_v21, 0.0 }
 0x429   :  { %v11718_v43 = vpop.f32.mrf.mxu1 }
 0x42a   :  { %v5439_v11 = vmax.f32 %v5099_v53, 0.0  ;;  %v5539_v31 = vpack.c.bf16 %v5441_v28, %v5440_v27  ;;  %v5120_v18 = vadd.f32 %v11718_v43, %v15663_v23 }
 0x42b   :  { %v5111_v7 = vpop.f32.mrf.mxu1 }
 0x42c   :  { %v5538_v60 = vpack.c.bf16 %v5439_v11, %v5438_v16  ;;  %v5112_v34 = vadd.f32 %v15663_v23, %v5111_v7  ;;  %v5444_v1 = vmax.f32 %v5120_v18, 0.0 }
 0x42d   :  { %v11719_v37 = vpop.f32.mrf.mxu1 }
 0x42e   :  { %v5123_v42 = vadd.f32 %v11719_v37, %v15663_v23  ;;  %11844 = vmatprep.mubr.msk.bf16.mxu0 %vm2098_vm2, %v5538_v60  ;;  %v5442_v12 = vmax.f32 %v5112_v34, 0.0 }
 0x42f   :  { %v5114_v15 = vpop.f32.mrf.mxu1  ;;  %11845 = vmatmul.mubr.msk.bf16.gmra.mxu0 %vm2098_vm2, %v5539_v31 }
 0x430   :  { %v5115_v59 = vadd.f32 %v15663_v23, %v5114_v15  ;;  %v5445_v6 = vmax.f32 %v5123_v42, 0.0 }
 0x431   :  { %v11722_v50 = vpop.f32.mrf.mxu1 }
 0x432   :  { %v5443_v52 = vmax.f32 %v5115_v59, 0.0  ;;  %v5541_v21 = vpack.c.bf16 %v5445_v6, %v5444_v1  ;;  %v5136_v28 = vadd.f32 %v11722_v50, %v15663_v23 }
 0x433   :  { %v5127_v35 = vpop.f32.mrf.mxu1 }
 0x434   :  { %v5540_v17 = vpack.c.bf16 %v5443_v52, %v5442_v12  ;;  %v5128_v19 = vadd.f32 %v15663_v23, %v5127_v35  ;;  %v5448_v31 = vmax.f32 %v5136_v28, 0.0 }
 0x435   :  { %v11723_v38 = vpop.f32.mrf.mxu1 }
 0x436   :  { %v5139_v53 = vadd.f32 %v11723_v38, %v15663_v23  ;;  %11848 = vmatprep.mubr.msk.bf16.mxu0 %vm2098_vm2, %v5540_v17  ;;  %v5446_v7 = vmax.f32 %v5128_v19, 0.0 }
 0x437   :  { %v5130_v43 = vpop.f32.mrf.mxu1  ;;  %11849 = vmatmul.mubr.msk.bf16.gmra.mxu0 %vm2098_vm2, %v5541_v21 }
 0x438   :  { %v5131_v16 = vadd.f32 %v15663_v23, %v5130_v43  ;;  %v5449_v11 = vmax.f32 %v5139_v53, 0.0 }
 0x439   :  { %v11726_v27 = vpop.f32.mrf.mxu1 }
 0x43a   :  { %v5447_v60 = vmax.f32 %v5131_v16, 0.0  ;;  %v5543_v42 = vpack.c.bf16 %v5449_v11, %v5448_v31  ;;  %v5152_v6 = vadd.f32 %v11726_v27, %v15663_v23 }
 0x43b   :  { %v5143_v37 = vpop.f32.mrf.mxu1 }
 0x43c   :  { %v5542_v34 = vpack.c.bf16 %v5447_v60, %v5446_v7  ;;  %v5144_v15 = vadd.f32 %v15663_v23, %v5143_v37  ;;  %v5452_v21 = vmax.f32 %v5152_v6, 0.0 }
 0x43d   :  { %v11727_v18 = vpop.f32.mrf.mxu1 }
 0x43e   :  { %v5155_v59 = vadd.f32 %v11727_v18, %v15663_v23  ;;  %11852 = vmatprep.mubr.msk.bf16.mxu0 %vm2098_vm2, %v5542_v34  ;;  %v5450_v35 = vmax.f32 %v5144_v15, 0.0 }
 0x43f   :  { %v5146_v50 = vpop.f32.mrf.mxu1  ;;  %11853 = vmatmul.mubr.msk.bf16.gmra.mxu0 %vm2098_vm2, %v5543_v42 }
 0x440   :  { %v5147_v12 = vadd.f32 %v15663_v23, %v5146_v50  ;;  %v5453_v52 = vmax.f32 %v5155_v59, 0.0 }
 0x441   :  { %v11730_v1 = vpop.f32.mrf.mxu1 }
 0x442   :  { %v5451_v17 = vmax.f32 %v5147_v12, 0.0  ;;  %v5545_v53 = vpack.c.bf16 %v5453_v52, %v5452_v21  ;;  %v5168_v11 = vadd.f32 %v11730_v1, %v15663_v23 }
 0x443   :  { %v5159_v38 = vpop.f32.mrf.mxu1 }
 0x444   :  { %v5544_v19 = vpack.c.bf16 %v5451_v17, %v5450_v35  ;;  %v5160_v43 = vadd.f32 %v15663_v23, %v5159_v38  ;;  %v5456_v42 = vmax.f32 %v5168_v11, 0.0 }
 0x445   :  { %v11731_v28 = vpop.f32.mrf.mxu1 }
 0x446   :  { %v5171_v16 = vadd.f32 %v11731_v28, %v15663_v23  ;;  %11856 = vmatprep.mubr.msk.bf16.mxu0 %vm2098_vm2, %v5544_v19  ;;  %v5454_v37 = vmax.f32 %v5160_v43, 0.0 }
 0x447   :  { %v5162_v27 = vpop.f32.mrf.mxu1  ;;  %11857 = vmatmul.mubr.msk.bf16.gmra.mxu0 %vm2098_vm2, %v5545_v53 }
 0x448   :  { %v5163_v7 = vadd.f32 %v15663_v23, %v5162_v27  ;;  %v5457_v60 = vmax.f32 %v5171_v16, 0.0 }
 0x449   :  { %v11734_v31 = vpop.f32.mrf.mxu1 }
 0x44a   :  { %v5455_v34 = vmax.f32 %v5163_v7, 0.0  ;;  %v5547_v59 = vpack.c.bf16 %v5457_v60, %v5456_v42  ;;  %v5184_v52 = vadd.f32 %v11734_v31, %v15663_v23 }
 0x44b   :  { %v5175_v18 = vpop.f32.mrf.mxu1 }
 0x44c   :  { %v5546_v15 = vpack.c.bf16 %v5455_v34, %v5454_v37  ;;  %v5176_v50 = vadd.f32 %v15663_v23, %v5175_v18  ;;  %v5460_v53 = vmax.f32 %v5184_v52, 0.0 }
 0x44d   :  { %v11735_v6 = vpop.f32.mrf.mxu1 }
 0x44e   :  { %v5187_v12 = vadd.f32 %v11735_v6, %v15663_v23  ;;  %11860 = vmatprep.mubr.msk.bf16.mxu0 %vm2098_vm2, %v5546_v15  ;;  %v5458_v38 = vmax.f32 %v5176_v50, 0.0 }
 0x44f   :  { %v5178_v1 = vpop.f32.mrf.mxu1  ;;  %11861 = vmatmul.mubr.msk.bf16.gmra.mxu0 %vm2098_vm2, %v5547_v59 }
 0x450   :  { %v5179_v35 = vadd.f32 %v15663_v23, %v5178_v1  ;;  %v5461_v17 = vmax.f32 %v5187_v12, 0.0  ;;  %v16017_v1 = vld [vmem:[%s17778_s4 + $0x1] ss:$0 sm:$0xff] }
 0x451   :  { %v11738_v21 = vpop.f32.mrf.mxu1 }
 0x452   :  { %v5459_v19 = vmax.f32 %v5179_v35, 0.0  ;;  %v5549_v16 = vpack.c.bf16 %v5461_v17, %v5460_v53  ;;  %v5200_v60 = vadd.f32 %v11738_v21, %v15663_v23 }
 0x453   :  { %v5191_v28 = vpop.f32.mrf.mxu1 }
 0x454   :  { %v5548_v43 = vpack.c.bf16 %v5459_v19, %v5458_v38  ;;  %v5192_v27 = vadd.f32 %v15663_v23, %v5191_v28  ;;  %v5464_v59 = vmax.f32 %v5200_v60, 0.0  ;;  %v16024_v38 = vpop.permute.xlu0 %6524  ;;  %v16026_v19 = vpop.permute.xlu1 %6526 }
 0x455   :  { %v11739_v11 = vpop.f32.mrf.mxu1 }
 0x456   :  { %v5203_v7 = vadd.f32 %v11739_v11, %v15663_v23  ;;  %11864 = vmatprep.mubr.msk.bf16.mxu0 %vm2098_vm2, %v5548_v43  ;;  %v5462_v18 = vmax.f32 %v5192_v27, 0.0 }
 0x457   :  { %v5194_v31 = vpop.f32.mrf.mxu1  ;;  %11865 = vmatmul.mubr.msk.bf16.gmra.mxu0 %vm2098_vm2, %v5549_v16 }
 0x458   :  { %v5195_v37 = vadd.f32 %v15663_v23, %v5194_v31  ;;  %v5465_v34 = vmax.f32 %v5203_v7, 0.0 }
 0x459   :  { %v11742_v42 = vpop.f32.mrf.mxu1 }
 0x45a   :  { %v5463_v15 = vmax.f32 %v5195_v37, 0.0  ;;  %v5551_v12 = vpack.c.bf16 %v5465_v34, %v5464_v59  ;;  %v5216_v23 = vadd.f32 %v16017_v1, %v11742_v42  ;;  %v12396_v34 = vld [vmem:[%s17779_s5 + $0x20] sm:$0xff]   ;;  %v16032_v42 = vpop.permute.xlu0 %6528 }
 0x45b   :  { %v5207_v6 = vpop.f32.mrf.mxu1  ;;  %12050 = vmatprep.subr.bf16.mxu0 %v12396_v34 }
 0x45c   :  { %v5550_v50 = vpack.c.bf16 %v5463_v15, %v5462_v18  ;;  %v5208_v35 = vadd.f32 %v16017_v1, %v5207_v6  ;;  %v5468_v27 = vmax.f32 %v5216_v23, 0.0  ;;  %v16034_v18 = vpop.permute.xlu1 %6530  ;;  %12051 = vmatpush3.bf16.msra.mxu0 %v12396_v34 }
 0x45d   :  { %v11743_v52 = vpop.f32.mrf.mxu1 }
 0x45e   :  { %v5219_v17 = vadd.f32 %v16017_v1, %v11743_v52  ;;  %11868 = vmatprep.mubr.msk.bf16.mxu0 %vm2098_vm2, %v5550_v50  ;;  %v5466_v16 = vmax.f32 %v5208_v35, 0.0 }
 0x45f   :  { %v5210_v21 = vpop.f32.mrf.mxu1  ;;  %11869 = vmatmul.mubr.msk.bf16.gmra.mxu0 %vm2098_vm2, %v5551_v12 }
 0x460   :  { %v5211_v53 = vadd.f32 %v16017_v1, %v5210_v21  ;;  %v5469_v28 = vmax.f32 %v5219_v17, 0.0 }
 0x461   :  { %v11746_v43 = vpop.f32.mrf.mxu1 }
 0x462   :  { %v5467_v11 = vmax.f32 %v5211_v53, 0.0  ;;  %v5553_v31 = vpack.c.bf16 %v5469_v28, %v5468_v27  ;;  %v5232_v6 = vadd.f32 %v16017_v1, %v11746_v43  ;;  %v16042_v28 = vpop.permute.xlu0 %6532 }
 0x463   :  { %v5223_v7 = vpop.f32.mrf.mxu1 }
 0x464   :  { %v5552_v60 = vpack.c.bf16 %v5467_v11, %v5466_v16  ;;  %v5224_v15 = vadd.f32 %v16017_v1, %v5223_v7  ;;  %v5472_v21 = vmax.f32 %v5232_v6, 0.0  ;;  %v16044_v16 = vpop.permute.xlu1 %6534 }
 0x465   :  { %v11747_v37 = vpop.f32.mrf.mxu1 }
 0x466   :  { %v5235_v59 = vadd.f32 %v16017_v1, %v11747_v37  ;;  %11872 = vmatprep.mubr.msk.bf16.mxu0 %vm2098_vm2, %v5552_v60  ;;  %v5470_v17 = vmax.f32 %v5224_v15, 0.0  ;;  %v16052_v6 = vpop.permute.xlu0 %6536 }
 0x467   :  { %v5226_v50 = vpop.f32.mrf.mxu1  ;;  %11873 = vmatmul.mubr.msk.bf16.gmra.mxu0 %vm2098_vm2, %v5553_v31 }
 0x468   :  { %v5227_v12 = vadd.f32 %v16017_v1, %v5226_v50  ;;  %v5473_v52 = vmax.f32 %v5235_v59, 0.0  ;;  %v16054_v50 = vpop.permute.xlu1 %6538 }
 0x469   :  { %v11750_v35 = vpop.f32.mrf.mxu1 }
 0x46a   :  { %v5471_v23 = vmax.f32 %v5227_v12, 0.0  ;;  %v5555_v27 = vpack.c.bf16 %v5473_v52, %v5472_v21  ;;  %v5248_v31 = vadd.f32 %v16017_v1, %v11750_v35 }
 0x46b   :  { %v5239_v53 = vpop.f32.mrf.mxu1 }
 0x46c   :  { %v5554_v11 = vpack.c.bf16 %v5471_v23, %v5470_v17  ;;  %v5240_v7 = vadd.f32 %v16017_v1, %v5239_v53  ;;  %v5476_v17 = vmax.f32 %v5248_v31, 0.0 }
 0x46d   :  { %v11751_v43 = vpop.f32.mrf.mxu1 }
 0x46e   :  { %v5251_v60 = vadd.f32 %v16017_v1, %v11751_v43  ;;  %11876 = vmatprep.mubr.msk.bf16.mxu0 %vm2098_vm2, %v5554_v11  ;;  %v5474_v12 = vmax.f32 %v5240_v7, 0.0  ;;  %v16063_v7 = vpop.permute.xlu1 %6542 }
 0x46f   :  { %v5242_v37 = vpop.f32.mrf.mxu1  ;;  %11877 = vmatmul.mubr.msk.bf16.gmra.mxu0 %vm2098_vm2, %v5555_v27 }
 0x470   :  { %v5243_v34 = vadd.f32 %v16017_v1, %v5242_v37  ;;  %v5477_v15 = vmax.f32 %v5251_v60, 0.0  ;;  %v16061_v37 = vpop.permute.xlu0 %6540 }
 0x471   :  { %v11754_v59 = vpop.f32.mrf.mxu1 }
 0x472   :  { %v5475_v52 = vmax.f32 %v5243_v34, 0.0  ;;  %v5557_v53 = vpack.c.bf16 %v5477_v15, %v5476_v17  ;;  %v5264_v27 = vadd.f32 %v16017_v1, %v11754_v59  ;;  %v16069_v59 = vld [vmem:[%s17780_s6 + $0x1] ss:$0 sm:$0xff]  ;;  %v16073_v49 = vpop.permute.xlu1 %6546 }
 0x473   :  { %v5255_v23 = vpop.f32.mrf.mxu1  ;;  %19207 = vst [vmem:[#allocation86_spill] sm:$0xff] %v16073_v49  ;;  %v19223_v49 = vld [vmem:[#allocation14_spill] sm:$0xff] }
 0x474   :  { %v5556_v21 = vpack.c.bf16 %v5475_v52, %v5474_v12  ;;  %v5256_v35 = vadd.f32 %v16017_v1, %v5255_v23  ;;  %v5480_v17 = vmax.f32 %v5264_v27, 0.0  ;;  %v16071_v47 = vpop.permute.xlu0 %6544 }
 0x475   :  { %v11755_v11 = vpop.f32.mrf.mxu1 }
 0x476   :  { %v5267_v43 = vadd.f32 %v16017_v1, %v11755_v11  ;;  %11880 = vmatprep.mubr.msk.bf16.mxu0 %vm2098_vm2, %v5556_v21  ;;  %v5478_v12 = vmax.f32 %v5256_v35, 0.0 }
 0x477   :  { %v5258_v60 = vpop.f32.mrf.mxu1  ;;  %11881 = vmatmul.mubr.msk.bf16.gmra.mxu0 %vm2098_vm2, %v5557_v53 }
 0x478   :  { %v5259_v31 = vadd.f32 %v16017_v1, %v5258_v60  ;;  %v5481_v34 = vmax.f32 %v5267_v43, 0.0  ;;  %v16088_v62 = vpop.permute.xlu0 %6548 }
 0x479   :  { %v11758_v15 = vpop.f32.mrf.mxu1  ;;  %19211 = vst [vmem:[#allocation184_spill] sm:$0xff] %v16088_v62 }
 0x47a   :  { %v5479_v52 = vmax.f32 %v5259_v31, 0.0  ;;  %v5559_v53 = vpack.c.bf16 %v5481_v34, %v5480_v17  ;;  %v5280_v31 = vadd.f32 %v16017_v1, %v11758_v15 }
 0x47b   :  { %v5271_v23 = vpop.f32.mrf.mxu1  ;;  %v11790_v11 = vpop.f32.mrf.mxu0 }
 0x47c   :  { %v5558_v21 = vpack.c.bf16 %v5479_v52, %v5478_v12  ;;  %v5272_v43 = vadd.f32 %v16017_v1, %v5271_v23  ;;  %v5834_v35 = vadd.f32 %v11790_v11, %v16069_v59 }
 0x47d   :  { %v11759_v48 = vpop.f32.mrf.mxu1  ;;  %v5825_v61 = vpop.f32.mrf.mxu0 }
 0x47e   :  { %v5283_v27 = vadd.f32 %v16017_v1, %v11759_v48  ;;  %v5826_v60 = vadd.f32 %v16069_v59, %v5825_v61  ;;  %11884 = vmatprep.mubr.msk.bf16.mxu0 %vm2098_vm2, %v5558_v21  ;;  %v5482_v48 = vmax.f32 %v5272_v43, 0.0  ;;  %v6338_v61 = vadd.f32 %v5834_v35, %v19209_v44  ;;  %v19216_v44 = vld [vmem:[#allocation67_spill] sm:$0xff] }
 0x47f   :  { %v5274_v12 = vpop.f32.mrf.mxu1  ;;  %11885 = vmatmul.mubr.msk.bf16.gmra.mxu0 %vm2098_vm2, %v5559_v53  ;;  %v11791_v34 = vpop.f32.mrf.mxu0  ;;  %v5484_v21 = vmax.f32 %v5280_v31, 0.0 }
 0x480   :  { %v5275_v52 = vadd.f32 %v16017_v1, %v5274_v12  ;;  %v5485_v17 = vmax.f32 %v5283_v27, 0.0  ;;  %v6336_v14 = vadd.f32 %v5826_v60, %v19208_v26  ;;  %v5837_v23 = vadd.f32 %v11791_v34, %v16069_v59  ;;  %v16090_v12 = vpop.permute.xlu1 %6550  ;;  %v19213_v60 = vld [vmem:[#allocation140_spill] sm:$0xff] }
 0x481   :  { %v11762_v11 = vpop.f32.mrf.mxu1  ;;  %v5828_v56 = vpop.f32.mrf.mxu0  ;;  %19212 = vst [vmem:[#allocation85_spill] sm:$0xff] %v16090_v12 }
 0x482   :  { %v5483_v58 = vmax.f32 %v5275_v52, 0.0  ;;  %v6339_v15 = vadd.f32 %v5837_v23, %v19210_v46  ;;  %v5829_v13 = vadd.f32 %v16069_v59, %v5828_v56  ;;  %v5561_v26 = vpack.c.bf16 %v5485_v17, %v5484_v21  ;;  %v19217_v52 = vld [vmem:[#allocation264_spill] sm:$0xff]  ;;  %v19218_v17 = vld [vmem:[#allocation139_spill] sm:$0xff] }
 0x483   :  { %v5287_v53 = vpop.f32.mrf.mxu1  ;;  %v16093_v34 = vadd.f32 %v19213_v60, %v6336_v14  ;;  %v16100_v46 = vadd.f32 %v19217_v52, %v6338_v61 }
 0x484   :  { %v5560_v27 = vpack.c.bf16 %v5483_v58, %v5482_v48  ;;  %v16096_v43 = vadd.f32 %v15407_v8, %v6339_v15  ;;  %v6337_v35 = vadd.f32 %v5829_v13, %v19216_v44  ;;  %v5288_v56 = vadd.f32 %v16017_v1, %v5287_v53  ;;  %v16115_v44 = vpop.permute.xlu0 %6552 }
 0x485   :  { %19214 = vst [vmem:[#allocation188_spill] sm:$0xff] %v16093_v34  ;;  %v11763_v31 = vpop.f32.mrf.mxu1  ;;  %v5296_v58 = vadd.f32 %v16017_v1, %v11762_v11  ;;  %v6976_v15 = vmax.f32 %v16093_v34, 0.0  ;;  %19220 = vst [vmem:[#allocation282_spill] sm:$0xff] %v16115_v44 }
 0x486   :  { %19215 = vst [vmem:[#allocation191_spill] sm:$0xff] %v16096_v43  ;;  %v5299_v23 = vadd.f32 %v16017_v1, %v11763_v31  ;;  %11888 = vmatprep.mubr.msk.bf16.mxu0 %vm2098_vm2, %v5560_v27  ;;  %v16107_v14 = vadd.f32 %v19218_v17, %v6337_v35  ;;  %v6979_v13 = vmax.f32 %v16096_v43, 0.0  ;;  %v16117_v35 = vpop.permute.xlu1 %6554  ;;  %v6978_v31 = vmax.f32 %v16100_v46, 0.0 }
 0x487   :  { %v5290_v48 = vpop.f32.mrf.mxu1  ;;  %v11794_v8 = vpop.f32.mrf.mxu0  ;;  %11889 = vmatmul.mubr.msk.bf16.gmra.mxu0 %vm2098_vm2, %v5561_v26  ;;  %19221 = vst [vmem:[#allocation285_spill] sm:$0xff] %v16117_v35  ;;  %v5486_v26 = vmax.f32 %v5288_v56, 0.0  ;;  %v5488_v17 = vmax.f32 %v5296_v58, 0.0 }
 0x488   :  { %19219 = vst [vmem:[#allocation89_spill] sm:$0xff] %v16107_v14  ;;  %v5291_v61 = vadd.f32 %v16017_v1, %v5290_v48  ;;  %v5850_v21 = vadd.f32 %v11794_v8, %v16069_v59  ;;  %v6977_v53 = vmax.f32 %v16107_v14, 0.0  ;;  %v5489_v27 = vmax.f32 %v5299_v23, 0.0  ;;  %v19222_v14 = vld [vmem:[#allocation69_spill] sm:$0xff] }
 0x489   :  { %v11766_v60 = vpop.f32.mrf.mxu1  ;;  %v5841_v11 = vpop.f32.mrf.mxu0  ;;  %v7105_v34 = vpack.c.bf16 %v6979_v13, %v6978_v31  ;;  %v19224_v13 = vld [vmem:[#allocation16_spill] sm:$0xff] }
 0x48a   :  { %v5487_v52 = vmax.f32 %v5291_v61, 0.0  ;;  %v5842_v48 = vadd.f32 %v16069_v59, %v5841_v11  ;;  %v7104_v0 = vpack.c.bf16 %v6977_v53, %v6976_v15  ;;  %v6342_v23 = vadd.f32 %v5850_v21, %v19222_v14  ;;  %v16133_v53 = vpop.permute.xlu0 %6556 }
 0x48b   :  { %v5303_v43 = vpop.f32.mrf.mxu1  ;;  %v11795_v8 = vpop.f32.mrf.mxu0  ;;  %v5563_v22 = vpack.c.bf16 %v5489_v27, %v5488_v17  ;;  %v5312_v14 = vadd.f32 %v16017_v1, %v11766_v60 }
 0x48c   :  { %v5562_v20 = vpack.c.bf16 %v5487_v52, %v5486_v26  ;;  %v6340_v62 = vadd.f32 %v5842_v48, %v19223_v49  ;;  %v5853_v44 = vadd.f32 %v11795_v8, %v16069_v59  ;;  %11920 = vmatprep.mubr.msk.bf16.mxu1 %vm2098_vm2, %v7104_v0  ;;  %v5304_v56 = vadd.f32 %v16017_v1, %v5303_v43  ;;  %v16135_v0 = vpop.permute.xlu1 %6558  ;;  %v19230_v26 = vld [vmem:[#allocation56_spill] sm:$0xff] }
 0x48d   :  { %v11767_v35 = vpop.f32.mrf.mxu1  ;;  %v5844_v12 = vpop.f32.mrf.mxu0  ;;  %11921 = vmatmul.mubr.msk.bf16.vlgmr.msra.gmra.mxu1 %vm2098_vm2, %v7105_v34  ;;  %v16138_v43 = vadd.f32 %v15457_v2, %v6342_v23  ;;  %v19227_v34 = vld [vmem:[#allocation151_spill] sm:$0xff]  ;;  %v5492_v48 = vmax.f32 %v5312_v14, 0.0 }
 0x48e   :  { %v5315_v58 = vadd.f32 %v16017_v1, %v11767_v35  ;;  %v5845_v61 = vadd.f32 %v16069_v59, %v5844_v12  ;;  %11892 = vmatprep.mubr.msk.bf16.mxu0 %vm2098_vm2, %v5562_v20  ;;  %v6343_v49 = vadd.f32 %v5853_v44, %v19224_v13  ;;  %v19226_v12 = vld [vmem:[#allocation17_spill] sm:$0xff]  ;;  %v16143_v11 = vadd.f32 %v19227_v34, %v6340_v62 }
 0x48f   :  { %v5306_v21 = vpop.f32.mrf.mxu1  ;;  %v11798_v15 = vpop.f32.mrf.mxu0  ;;  %11893 = vmatmul.mubr.msk.bf16.gmra.mxu0 %vm2098_vm2, %v5563_v22  ;;  %19225 = vst [vmem:[#allocation187_spill] sm:$0xff] %v16138_v43  ;;  %v5490_v31 = vmax.f32 %v5304_v56, 0.0  ;;  %v6982_v62 = vmax.f32 %v16138_v43, 0.0 }
 0x490   :  { %v6341_v27 = vadd.f32 %v5845_v61, %v19226_v12  ;;  %v5307_v20 = vadd.f32 %v16017_v1, %v5306_v21  ;;  %19228 = vst [vmem:[#allocation90_spill] sm:$0xff] %v16143_v11  ;;  %v16146_v60 = vadd.f32 %v15470_v25, %v6343_v49  ;;  %v5493_v44 = vmax.f32 %v5315_v58, 0.0  ;;  %v19232_v21 = vld [vmem:[#allocation72_spill] sm:$0xff]  ;;  %v16161_v34 = vpop.permute.xlu1 %6562 }
 0x491   :  { %v11770_v35 = vpop.f32.mrf.mxu1  ;;  %v5857_v22 = vpop.f32.mrf.mxu0  ;;  %v5866_v2 = vadd.f32 %v11798_v15, %v16069_v59  ;;  %v6980_v56 = vmax.f32 %v16143_v11, 0.0  ;;  %v19235_v11 = vld [vmem:[#allocation79_spill] sm:$0xff] }
 0x492   :  { %19229 = vst [vmem:[#allocation284_spill] sm:$0xff] %v16146_v60  ;;  %v16149_v52 = vadd.f32 %v19230_v26, %v6341_v27  ;;  %v5491_v17 = vmax.f32 %v5307_v20, 0.0  ;;  %v5858_v8 = vadd.f32 %v16069_v59, %v5857_v22  ;;  %v6983_v25 = vmax.f32 %v16146_v60, 0.0  ;;  %v16159_v20 = vpop.permute.xlu0 %6560  ;;  %v19233_v22 = vld [vmem:[#allocation19_spill] sm:$0xff] }
 0x493   :  { %v5319_v23 = vpop.f32.mrf.mxu1  ;;  %v11799_v61 = vpop.f32.mrf.mxu0  ;;  %v5565_v49 = vpack.c.bf16 %v5493_v44, %v5492_v48  ;;  %v6346_v26 = vadd.f32 %v5866_v2, %v19233_v22  ;;  %v5328_v44 = vadd.f32 %v16017_v1, %v11770_v35 }
 0x494   :  { %19231 = vst [vmem:[#allocation283_spill] sm:$0xff] %v16149_v52  ;;  %v6981_v58 = vmax.f32 %v16149_v52, 0.0  ;;  %v5564_v13 = vpack.c.bf16 %v5491_v17, %v5490_v31  ;;  %v6344_v12 = vadd.f32 %v5858_v8, %v19232_v21  ;;  %v5869_v27 = vadd.f32 %v11799_v61, %v16069_v59  ;;  %v19234_v17 = vld [vmem:[#allocation18_spill] sm:$0xff] }
 0x495   :  { %v11771_v15 = vpop.f32.mrf.mxu1  ;;  %v5860_v14 = vpop.f32.mrf.mxu0  ;;  %v5320_v60 = vadd.f32 %v16017_v1, %v5319_v23  ;;  %v7107_v43 = vpack.c.bf16 %v6983_v25, %v6982_v62 }
 0x496   :  { %v5331_v52 = vadd.f32 %v16017_v1, %v11771_v15  ;;  %v5861_v31 = vadd.f32 %v16069_v59, %v5860_v14  ;;  %11896 = vmatprep.mubr.msk.bf16.mxu0 %vm2098_vm2, %v5564_v13  ;;  %v6347_v48 = vadd.f32 %v5869_v27, %v19234_v17  ;;  %v7106_v21 = vpack.c.bf16 %v6981_v58, %v6980_v56 }
 0x497   :  { %v5322_v8 = vpop.f32.mrf.mxu1  ;;  %v11802_v61 = vpop.f32.mrf.mxu0  ;;  %11897 = vmatmul.mubr.msk.bf16.gmra.mxu0 %vm2098_vm2, %v5565_v49  ;;  %v16175_v14 = vadd.f32 %v15485_v39, %v6344_v12  ;;  %v16182_v58 = vadd.f32 %v15520_v3, %v6346_v26  ;;  %v5494_v62 = vmax.f32 %v5320_v60, 0.0  ;;  %v5496_v39 = vmax.f32 %v5328_v44, 0.0  ;;  %v19237_v26 = vld [vmem:[#allocation75_spill] sm:$0xff] }
 0x498   :  { %v6345_v2 = vadd.f32 %v5861_v31, %v19235_v11  ;;  %v5323_v23 = vadd.f32 %v16017_v1, %v5322_v8  ;;  %v5882_v15 = vadd.f32 %v11802_v61, %v16069_v59  ;;  %v16178_v13 = vadd.f32 %v15528_v63, %v6347_v48  ;;  %11924 = vmatprep.mubr.msk.bf16.mxu1 %vm2098_vm2, %v7106_v21  ;;  %v16191_v12 = vpop.permute.xlu1 %6566 }
 0x499   :  { %v5497_v35 = vmax.f32 %v5331_v52, 0.0  ;;  %v11774_v27 = vpop.f32.mrf.mxu1  ;;  %v5873_v22 = vpop.f32.mrf.mxu0  ;;  %11925 = vmatmul.mubr.msk.bf16.gmra.mxu1 %vm2098_vm2, %v7107_v43  ;;  %v6984_v17 = vmax.f32 %v16175_v14, 0.0  ;;  %v19238_v43 = vld [vmem:[#allocation261_spill] sm:$0xff] }
 0x49a   :  { %v16185_v11 = vadd.f32 %v15497_v40, %v6345_v2  ;;  %v5495_v25 = vmax.f32 %v5323_v23, 0.0  ;;  %v5874_v56 = vadd.f32 %v16069_v59, %v5873_v22  ;;  %v16189_v52 = vpop.permute.xlu0 %6564  ;;  %v6987_v31 = vmax.f32 %v16178_v13, 0.0 }
 0x49b   :  { %v5335_v63 = vpop.f32.mrf.mxu1  ;;  %v11803_v49 = vpop.f32.mrf.mxu0  ;;  %v6350_v40 = vadd.f32 %v5882_v15, %v19237_v26  ;;  %v5567_v48 = vpack.c.bf16 %v5497_v35, %v5496_v39  ;;  %v6986_v2 = vmax.f32 %v16182_v58, 0.0  ;;  %v5344_v15 = vadd.f32 %v16017_v1, %v11774_v27 }
 0x49c   :  { %19236 = vst [vmem:[#allocation94_spill] sm:$0xff] %v16185_v11  ;;  %v6985_v3 = vmax.f32 %v16185_v11, 0.0  ;;  %v5566_v60 = vpack.c.bf16 %v5495_v25, %v5494_v62  ;;  %v6348_v44 = vadd.f32 %v5874_v56, %v19238_v43  ;;  %v5885_v8 = vadd.f32 %v11803_v49, %v16069_v59  ;;  %v19239_v62 = vld [vmem:[#allocation20_spill] sm:$0xff] }
 0x49d   :  { %v11775_v61 = vpop.f32.mrf.mxu1  ;;  %v5876_v21 = vpop.f32.mrf.mxu0  ;;  %v5336_v23 = vadd.f32 %v16017_v1, %v5335_v63  ;;  %v7109_v49 = vpack.c.bf16 %v6987_v31, %v6986_v2  ;;  %v16208_v26 = vadd.f32 %v15578_v32, %v6350_v40  ;;  %v19241_v63 = vld [vmem:[#allocation21_spill] sm:$0xff] }
 0x49e   :  { %v5347_v22 = vadd.f32 %v16017_v1, %v11775_v61  ;;  %v5877_v11 = vadd.f32 %v16069_v59, %v5876_v21  ;;  %11900 = vmatprep.mubr.msk.bf16.mxu0 %vm2098_vm2, %v5566_v60  ;;  %v6351_v35 = vadd.f32 %v5885_v8, %v19239_v62  ;;  %v7108_v56 = vpack.c.bf16 %v6985_v3, %v6984_v17  ;;  %v16219_v3 = vpop.permute.xlu0 %6568  ;;  %v16221_v31 = vpop.permute.xlu1 %6570 }
 0x49f   :  { %v5338_v25 = vpop.f32.mrf.mxu1  ;;  %v11806_v39 = vpop.f32.mrf.mxu0  ;;  %11901 = vmatmul.mubr.msk.bf16.gmra.mxu0 %vm2098_vm2, %v5567_v48  ;;  %19240 = vst [vmem:[#allocation93_spill] sm:$0xff] %v16208_v26  ;;  %v16213_v21 = vadd.f32 %v15551_v33, %v6348_v44  ;;  %v5498_v32 = vmax.f32 %v5336_v23, 0.0 }
 0x4a0   :  { %v6349_v43 = vadd.f32 %v5877_v11, %v19241_v63  ;;  %v5339_v61 = vadd.f32 %v16017_v1, %v5338_v25  ;;  %v16216_v27 = vadd.f32 %v15591_v54, %v6351_v35  ;;  %v5501_v60 = vmax.f32 %v5347_v22, 0.0  ;;  %11928 = vmatprep.mubr.msk.bf16.mxu1 %vm2098_vm2, %v7108_v56  ;;  %v19244_v56 = vld [vmem:[#allocation23_spill] sm:$0xff] }
 0x4a1   :  { %v11778_v8 = vpop.f32.mrf.mxu1  ;;  %v5889_v48 = vpop.f32.mrf.mxu0  ;;  %v5898_v33 = vadd.f32 %v11806_v39, %v16069_v59  ;;  %11929 = vmatmul.mubr.msk.bf16.gmra.mxu1 %vm2098_vm2, %v7109_v49  ;;  %v5500_v54 = vmax.f32 %v5344_v15, 0.0  ;;  %v6990_v22 = vmax.f32 %v16208_v26, 0.0 }
 0x4a2   :  { %19242 = vst [vmem:[#allocation192_spill] sm:$0xff] %v16216_v27  ;;  %v16224_v11 = vadd.f32 %v15560_v57, %v6349_v43  ;;  %v5499_v40 = vmax.f32 %v5339_v61, 0.0  ;;  %v5890_v17 = vadd.f32 %v16069_v59, %v5889_v48  ;;  %v6991_v62 = vmax.f32 %v16216_v27, 0.0  ;;  %v19245_v43 = vld [vmem:[#allocation262_spill] sm:$0xff] }
 0x4a3   :  { %v5351_v44 = vpop.f32.mrf.mxu1  ;;  %v11807_v2 = vpop.f32.mrf.mxu0  ;;  %v6988_v57 = vmax.f32 %v16213_v21, 0.0  ;;  %v5569_v25 = vpack.c.bf16 %v5501_v60, %v5500_v54  ;;  %v6354_v61 = vadd.f32 %v5898_v33, %v19245_v43 }
 0x4a4   :  { %19243 = vst [vmem:[#allocation196_spill] sm:$0xff] %v16224_v11  ;;  %v6989_v35 = vmax.f32 %v16224_v11, 0.0  ;;  %v5568_v23 = vpack.c.bf16 %v5499_v40, %v5498_v32  ;;  %v6352_v63 = vadd.f32 %v5890_v17, %v19244_v56  ;;  %v5901_v39 = vadd.f32 %v11807_v2, %v16069_v59  ;;  %v19246_v40 = vld [vmem:[#allocation84_spill] sm:$0xff]  ;;  %v16243_v56 = vpop.permute.xlu0 %6572  ;;  %v16245_v33 = vpop.permute.xlu1 %6574 }
 0x4a5   :  { %v11779_v49 = vpop.f32.mrf.mxu1  ;;  %v5892_v15 = vpop.f32.mrf.mxu0  ;;  %v5352_v48 = vadd.f32 %v16017_v1, %v5351_v44  ;;  %v5360_v32 = vadd.f32 %v16017_v1, %v11778_v8  ;;  %v7111_v44 = vpack.c.bf16 %v6991_v62, %v6990_v22 }
 0x4a6   :  { %v5363_v26 = vadd.f32 %v16017_v1, %v11779_v49  ;;  %v5893_v27 = vadd.f32 %v16069_v59, %v5892_v15  ;;  %11904 = vmatprep.mubr.msk.bf16.mxu0 %vm2098_vm2, %v5568_v23  ;;  %v6355_v60 = vadd.f32 %v5901_v39, %v19246_v40  ;;  %v7110_v2 = vpack.c.bf16 %v6989_v35, %v6988_v57  ;;  %v19248_v15 = vld [vmem:[#allocation22_spill] sm:$0xff] }
 0x4a7   :  { %v5354_v54 = vpop.f32.mrf.mxu1  ;;  %v11810_v17 = vpop.f32.mrf.mxu0  ;;  %11905 = vmatmul.mubr.msk.bf16.gmra.mxu0 %vm2098_vm2, %v5569_v25  ;;  %v16248_v49 = vadd.f32 %v15606_v30, %v6352_v63  ;;  %v16258_v25 = vadd.f32 %v15639_v10, %v6354_v61  ;;  %v5502_v22 = vmax.f32 %v5352_v48, 0.0  ;;  %v5504_v62 = vmax.f32 %v5360_v32, 0.0  ;;  %v19252_v48 = vld [vmem:[#allocation24_spill] sm:$0xff] }
 0x4a8   :  { %v6353_v43 = vadd.f32 %v5893_v27, %v19248_v15  ;;  %v5355_v23 = vadd.f32 %v16017_v1, %v5354_v54  ;;  %v16253_v8 = vadd.f32 %v15646_v5, %v6355_v60  ;;  %v5505_v39 = vmax.f32 %v5363_v26, 0.0  ;;  %11932 = vmatprep.mubr.msk.bf16.mxu1 %vm2098_vm2, %v7110_v2 }
 0x4a9   :  { %19247 = vst [vmem:[#allocation199_spill] sm:$0xff] %v16248_v49  ;;  %v5914_v40 = vadd.f32 %v11810_v17, %v16069_v59  ;;  %v11782_v35 = vpop.f32.mrf.mxu1  ;;  %v5905_v57 = vpop.f32.mrf.mxu0  ;;  %19250 = vst [vmem:[#allocation195_spill] sm:$0xff] %v16258_v25  ;;  %11933 = vmatmul.mubr.msk.bf16.gmra.mxu1 %vm2098_vm2, %v7111_v44  ;;  %v6992_v60 = vmax.f32 %v16248_v49, 0.0  ;;  %v6994_v49 = vmax.f32 %v16258_v25, 0.0 }
 0x4aa   :  { %19249 = vst [vmem:[#allocation97_spill] sm:$0xff] %v16253_v8  ;;  %v16261_v30 = vadd.f32 %v15619_v9, %v6353_v43  ;;  %v5503_v27 = vmax.f32 %v5355_v23, 0.0  ;;  %v5906_v5 = vadd.f32 %v16069_v59, %v5905_v57  ;;  %v6995_v54 = vmax.f32 %v16253_v8, 0.0  ;;  %v19253_v9 = vld [vmem:[#allocation80_spill] sm:$0xff]  ;;  %v16271_v23 = vpop.permute.xlu0 %6576  ;;  %v16273_v57 = vpop.permute.xlu1 %6578 }
 0x4ab   :  { %v5367_v26 = vpop.f32.mrf.mxu1  ;;  %v11811_v63 = vpop.f32.mrf.mxu0  ;;  %v5571_v61 = vpack.c.bf16 %v5505_v39, %v5504_v62  ;;  %v6358_v2 = vadd.f32 %v5914_v40, %v19252_v48  ;;  %v5376_v40 = vadd.f32 %v16017_v1, %v11782_v35 }
 0x4ac   :  { %19251 = vst [vmem:[#allocation98_spill] sm:$0xff] %v16261_v30  ;;  %v6993_v17 = vmax.f32 %v16261_v30, 0.0  ;;  %v5570_v10 = vpack.c.bf16 %v5503_v27, %v5502_v22  ;;  %v6356_v15 = vadd.f32 %v5906_v5, %v19253_v9  ;;  %v5917_v43 = vadd.f32 %v11811_v63, %v16069_v59  ;;  %v19254_v22 = vld [vmem:[#allocation87_spill] sm:$0xff] }
 0x4ad   :  { %v11783_v44 = vpop.f32.mrf.mxu1  ;;  %v5908_v32 = vpop.f32.mrf.mxu0  ;;  %v5368_v8 = vadd.f32 %v16017_v1, %v5367_v26  ;;  %v7113_v48 = vpack.c.bf16 %v6995_v54, %v6994_v49  ;;  %v19255_v9 = vld [vmem:[#allocation163_spill] sm:$0xff] }
 0x4ae   :  { %v5379_v30 = vadd.f32 %v16017_v1, %v11783_v44  ;;  %v5909_v39 = vadd.f32 %v16069_v59, %v5908_v32  ;;  %11908 = vmatprep.mubr.msk.bf16.mxu0 %vm2098_vm2, %v5570_v10  ;;  %v6359_v27 = vadd.f32 %v5917_v43, %v19254_v22  ;;  %v7112_v63 = vpack.c.bf16 %v6993_v17, %v6992_v60  ;;  %v19256_v26 = vld [vmem:[#allocation83_spill] sm:$0xff]  ;;  %v19257_v60 = vld [vmem:[#allocation68_spill] sm:$0xff]  ;;  %v16307_v22 = vpop.permute.xlu0 %6580 }
 0x4af   :  { %v5370_v62 = vpop.f32.mrf.mxu1  ;;  %v11814_v5 = vpop.f32.mrf.mxu0  ;;  %11909 = vmatmul.mubr.msk.bf16.gmra.mxu0 %vm2098_vm2, %v5571_v61  ;;  %v16284_v25 = vadd.f32 %v19255_v9, %v6356_v15  ;;  %v16289_v32 = vadd.f32 %v15706_v24, %v6358_v2  ;;  %v5506_v61 = vmax.f32 %v5368_v8, 0.0  ;;  %v19259_v9 = vld [vmem:[#allocation27_spill] sm:$0xff] }
 0x4b0   :  { %v6357_v11 = vadd.f32 %v5909_v39, %v19256_v26  ;;  %v5371_v44 = vadd.f32 %v16017_v1, %v5370_v62  ;;  %v16292_v35 = vadd.f32 %v15719_v55, %v6359_v27  ;;  %v5509_v10 = vmax.f32 %v5379_v30, 0.0  ;;  %11936 = vmatprep.mubr.msk.bf16.mxu1 %vm2098_vm2, %v7112_v63  ;;  %v16302_v15 = vpop.permute.xlu1 %6582 }
 0x4b1   :  { %v5921_v43 = vpop.f32.mrf.mxu0  ;;  %v5930_v17 = vadd.f32 %v11814_v5, %v16069_v59  ;;  %11937 = vmatmul.mubr.msk.bf16.gmra.mxu1 %vm2098_vm2, %v7113_v48  ;;  %v5508_v1 = vmax.f32 %v5376_v40, 0.0  ;;  %v6996_v30 = vmax.f32 %v16284_v25, 0.0  ;;  %v6998_v27 = vmax.f32 %v16289_v32, 0.0  ;;  %v19258_v40 = vld [vmem:[#allocation25_spill] sm:$0xff]  ;;  %v12397_v48 = vld [vmem:[%s17781_s7 + $0x8] sm:$0xff]  }
 0x4b2   :  { %v16296_v49 = vadd.f32 %v19257_v60, %v6357_v11  ;;  %v5507_v54 = vmax.f32 %v5371_v44, 0.0  ;;  %v6999_v24 = vmax.f32 %v16292_v35, 0.0  ;;  %v5922_v2 = vadd.f32 %v16069_v59, %v5921_v43  ;;  %v19260_v44 = vld [vmem:[#allocation263_spill] sm:$0xff]  ;;  %12180 = vmatprep.subr.bf16.mxu1 %v12397_v48 }
 0x4b3   :  { %v11815_v55 = vpop.f32.mrf.mxu0  ;;  %v5573_v62 = vpack.c.bf16 %v5509_v10, %v5508_v1  ;;  %v6362_v26 = vadd.f32 %v5930_v17, %v19259_v9  ;;  %12181 = vmatpush3.bf16.msra.mxu1 %v12397_v48 }
 0x4b4   :  { %v6997_v8 = vmax.f32 %v16296_v49, 0.0  ;;  %v5572_v39 = vpack.c.bf16 %v5507_v54, %v5506_v61  ;;  %v5933_v11 = vadd.f32 %v11815_v55, %v16069_v59  ;;  %v6360_v5 = vadd.f32 %v5922_v2, %v19258_v40  ;;  %v19261_v2 = vld [vmem:[#allocation88_spill] sm:$0xff]  ;;  %v16327_v40 = vpop.permute.xlu1 %6586 }
 0x4b5   :  { %v5924_v63 = vpop.f32.mrf.mxu0  ;;  %v7115_v54 = vpack.c.bf16 %v6999_v24, %v6998_v27  ;;  %v16330_v24 = vadd.f32 %v15774_v36, %v6362_v26  ;;  %v19263_v36 = vld [vmem:[#allocation26_spill] sm:$0xff]  ;;  %v19264_v26 = vld [vmem:[#allocation95_spill] sm:$0xff] }
 0x4b6   :  { %v6363_v43 = vadd.f32 %v5933_v11, %v19260_v44  ;;  %v5925_v61 = vadd.f32 %v16069_v59, %v5924_v63  ;;  %11912 = vmatprep.mubr.msk.bf16.mxu0 %vm2098_vm2, %v5572_v39  ;;  %v7114_v60 = vpack.c.bf16 %v6997_v8, %v6996_v30  ;;  %v16320_v10 = vadd.f32 %v15738_v41, %v6360_v5 }
 0x4b7   :  { %v11818_v55 = vpop.f32.mrf.mxu0  ;;  %11913 = vmatmul.mubr.msk.bf16.gmra.mxu0 %vm2098_vm2, %v5573_v62  ;;  %v7002_v9 = vmax.f32 %v16330_v24, 0.0 }
 0x4b8   :  { %v16323_v1 = vadd.f32 %v15801_v29, %v6363_v43  ;;  %v6361_v17 = vadd.f32 %v5925_v61, %v19261_v2  ;;  %11940 = vmatprep.mubr.msk.bf16.mxu1 %vm2098_vm2, %v7114_v60  ;;  %v5946_v41 = vadd.f32 %v11818_v55, %v16069_v59  ;;  %v16338_v29 = vpop.permute.xlu0 %6584  ;;  %v7000_v27 = vmax.f32 %v16320_v10, 0.0  ;;  %v19265_v60 = vld [vmem:[#allocation92_spill] sm:$0xff]  ;;  %v16349_v2 = vpop.permute.xlu1 %6590 }
 0x4b9   :  { %v5937_v11 = vpop.f32.mrf.mxu0  ;;  %11941 = vmatmul.mubr.msk.bf16.gmra.mxu1 %vm2098_vm2, %v7115_v54 }
 0x4ba   :  { %v16333_v30 = vadd.f32 %v15761_v4, %v6361_v17  ;;  %v5938_v8 = vadd.f32 %v16069_v59, %v5937_v11  ;;  %v7003_v62 = vmax.f32 %v16323_v1, 0.0  ;;  %v6366_v44 = vadd.f32 %v5946_v41, %v19264_v26  ;;  %v19266_v11 = vld [vmem:[#allocation28_spill] sm:$0xff] }
 0x4bb   :  { %v11819_v39 = vpop.f32.mrf.mxu0 }
 0x4bc   :  { %19262 = vst [vmem:[#allocation286_spill] sm:$0xff] %v16333_v30  ;;  %v7001_v5 = vmax.f32 %v16333_v30, 0.0  ;;  %v6364_v63 = vadd.f32 %v5938_v8, %v19263_v36  ;;  %v5949_v4 = vadd.f32 %v11819_v39, %v16069_v59  ;;  %v7117_v17 = vpack.c.bf16 %v7003_v62, %v7002_v9  ;;  %v16353_v8 = vpop.permute.xlu0 %6588 }
 0x4bd   :  { %v5940_v48 = vpop.f32.mrf.mxu0 }
 0x4be   :  { %v5941_v43 = vadd.f32 %v16069_v59, %v5940_v48  ;;  %v7116_v61 = vpack.c.bf16 %v7001_v5, %v7000_v27  ;;  %v6367_v54 = vadd.f32 %v5949_v4, %v19265_v60  ;;  %v16356_v39 = vadd.f32 %v15813_v51, %v6364_v63  ;;  %v19272_v60 = vld [vmem:[#allocation29_spill] sm:$0xff] }
 0x4bf   :  { %v11822_v55 = vpop.f32.mrf.mxu0  ;;  %v16362_v27 = vadd.f32 %v16024_v38, %v6366_v44 }
 0x4c0   :  { %v6365_v30 = vadd.f32 %v5941_v43, %v19266_v11  ;;  %11944 = vmatprep.mubr.msk.bf16.mxu1 %vm2098_vm2, %v7116_v61  ;;  %v16359_v41 = vadd.f32 %v16026_v19, %v6367_v54  ;;  %v5962_v62 = vadd.f32 %v11822_v55, %v16069_v59  ;;  %v19270_v19 = vld [vmem:[#allocation91_spill] sm:$0xff]  ;;  %v7004_v38 = vmax.f32 %v16356_v39, 0.0  ;;  %v19271_v43 = vld [vmem:[#allocation100_spill] sm:$0xff] }
 0x4c1   :  { %v5953_v36 = vpop.f32.mrf.mxu0  ;;  %19268 = vst [vmem:[#allocation288_spill] sm:$0xff] %v16362_v27  ;;  %11945 = vmatmul.mubr.msk.bf16.gmra.mxu1 %vm2098_vm2, %v7117_v17  ;;  %v16381_v17 = vpop.permute.xlu0 %6592 }
 0x4c2   :  { %19267 = vst [vmem:[#allocation289_spill] sm:$0xff] %v16359_v41  ;;  %v16365_v5 = vadd.f32 %v15826_v45, %v6365_v30  ;;  %v5954_v4 = vadd.f32 %v16069_v59, %v5953_v36  ;;  %v7007_v51 = vmax.f32 %v16359_v41, 0.0  ;;  %v16375_v45 = vpop.permute.xlu1 %6594  ;;  %v7006_v30 = vmax.f32 %v16362_v27, 0.0 }
 0x4c3   :  { %v11823_v48 = vpop.f32.mrf.mxu0  ;;  %v6370_v61 = vadd.f32 %v5962_v62, %v19271_v43 }
 0x4c4   :  { %19269 = vst [vmem:[#allocation287_spill] sm:$0xff] %v16365_v5  ;;  %v7005_v63 = vmax.f32 %v16365_v5, 0.0  ;;  %v6368_v9 = vadd.f32 %v5954_v4, %v19270_v19  ;;  %v5965_v26 = vadd.f32 %v11823_v48, %v16069_v59  ;;  %v7119_v4 = vpack.c.bf16 %v7007_v51, %v7006_v30  ;;  %v19275_v5 = vld [vmem:[#allocation31_spill] sm:$0xff]  ;;  %v19278_v30 = vld [vmem:[#allocation30_spill] sm:$0xff] }
 0x4c5   :  { %v5956_v44 = vpop.f32.mrf.mxu0 }
 0x4c6   :  { %v6371_v54 = vadd.f32 %v5965_v26, %v19272_v60  ;;  %v5957_v55 = vadd.f32 %v16069_v59, %v5956_v44  ;;  %v7118_v36 = vpack.c.bf16 %v7005_v63, %v7004_v38  ;;  %v16384_v48 = vadd.f32 %v16032_v42, %v6368_v9  ;;  %v19279_v60 = vld [vmem:[#allocation103_spill] sm:$0xff] }
 0x4c7   :  { %v11826_v11 = vpop.f32.mrf.mxu0  ;;  %v16392_v26 = vadd.f32 %v16042_v28, %v6370_v61  ;;  %v16405_v28 = vpop.permute.xlu0 %6596 }
 0x4c8   :  { %19273 = vst [vmem:[#allocation102_spill] sm:$0xff] %v16384_v48  ;;  %v16387_v19 = vadd.f32 %v16044_v16, %v6371_v54  ;;  %v6369_v41 = vadd.f32 %v5957_v55, %v19275_v5  ;;  %11948 = vmatprep.mubr.msk.bf16.mxu1 %vm2098_vm2, %v7118_v36  ;;  %v5978_v63 = vadd.f32 %v11826_v11, %v16069_v59  ;;  %v16400_v16 = vpop.permute.xlu1 %6598  ;;  %v7008_v5 = vmax.f32 %v16384_v48, 0.0  ;;  %v19280_v36 = vld [vmem:[#allocation96_spill] sm:$0xff] }
 0x4c9   :  { %v5969_v62 = vpop.f32.mrf.mxu0  ;;  %19276 = vst [vmem:[#allocation101_spill] sm:$0xff] %v16392_v26  ;;  %11949 = vmatmul.mubr.msk.bf16.gmra.mxu1 %vm2098_vm2, %v7119_v4  ;;  %v7010_v61 = vmax.f32 %v16392_v26, 0.0  ;;  %v19281_v48 = vld [vmem:[#allocation32_spill] sm:$0xff] }
 0x4ca   :  { %19274 = vst [vmem:[#allocation200_spill] sm:$0xff] %v16387_v19  ;;  %v16395_v44 = vadd.f32 %v16034_v18, %v6369_v41  ;;  %v5970_v51 = vadd.f32 %v16069_v59, %v5969_v62  ;;  %v7011_v9 = vmax.f32 %v16387_v19, 0.0  ;;  %v6374_v54 = vadd.f32 %v5978_v63, %v19279_v60  ;;  %v19287_v60 = vld [vmem:[#allocation35_spill] sm:$0xff] }
 0x4cb   :  { %v11827_v42 = vpop.f32.mrf.mxu0 }
 0x4cc   :  { %19277 = vst [vmem:[#allocation203_spill] sm:$0xff] %v16395_v44  ;;  %v7009_v38 = vmax.f32 %v16395_v44, 0.0  ;;  %v6372_v18 = vadd.f32 %v5970_v51, %v19278_v30  ;;  %v5981_v41 = vadd.f32 %v11827_v42, %v16069_v59  ;;  %v7121_v19 = vpack.c.bf16 %v7011_v9, %v7010_v61  ;;  %v16421_v26 = vpop.permute.xlu1 %6602 }
 0x4cd   :  { %v5972_v43 = vpop.f32.mrf.mxu0  ;;  %v16424_v63 = vadd.f32 %v16061_v37, %v6374_v54 }
 0x4ce   :  { %v5973_v55 = vadd.f32 %v16069_v59, %v5972_v43  ;;  %v7120_v11 = vpack.c.bf16 %v7009_v38, %v7008_v5  ;;  %v6375_v4 = vadd.f32 %v5981_v41, %v19280_v36  ;;  %v16416_v51 = vadd.f32 %v16052_v6, %v6372_v18  ;;  %v16432_v6 = vpop.permute.xlu0 %6600  ;;  %v19286_v41 = vld [vmem:[#allocation99_spill] sm:$0xff] }
 0x4cf   :  { %v11830_v62 = vpop.f32.mrf.mxu0  ;;  %19284 = vst [vmem:[#allocation290_spill] sm:$0xff] %v16424_v63  ;;  %v7014_v61 = vmax.f32 %v16424_v63, 0.0 }
 0x4d0   :  { %v6373_v44 = vadd.f32 %v5973_v55, %v19281_v48  ;;  %11952 = vmatprep.mubr.msk.bf16.mxu1 %vm2098_vm2, %v7120_v11  ;;  %19282 = vst [vmem:[#allocation204_spill] sm:$0xff] %v16416_v51  ;;  %v16419_v42 = vadd.f32 %v16063_v7, %v6375_v4  ;;  %v5994_v9 = vadd.f32 %v11830_v62, %v16069_v59  ;;  %v19288_v55 = vld [vmem:[#allocation33_spill] sm:$0xff]  ;;  %v16443_v62 = vpop.permute.xlu1 %6606 }
 0x4d1   :  { %v5985_v30 = vpop.f32.mrf.mxu0  ;;  %11953 = vmatmul.mubr.msk.bf16.gmra.mxu1 %vm2098_vm2, %v7121_v19 }
 0x4d2   :  { %19283 = vst [vmem:[#allocation105_spill] sm:$0xff] %v16419_v42  ;;  %v16427_v5 = vadd.f32 %v16054_v50, %v6373_v44  ;;  %v5986_v48 = vadd.f32 %v16069_v59, %v5985_v30  ;;  %v7015_v7 = vmax.f32 %v16419_v42, 0.0  ;;  %v7012_v50 = vmax.f32 %v16416_v51, 0.0  ;;  %v16452_v63 = vpop.permute.xlu0 %6604  ;;  %v19300_v51 = vld [vmem:[#allocation36_spill] sm:$0xff] }
 0x4d3   :  { %v11831_v38 = vpop.f32.mrf.mxu0  ;;  %v6378_v54 = vadd.f32 %v5994_v9, %v19287_v60 }
 0x4d4   :  { %19285 = vst [vmem:[#allocation6_spill] sm:$0xff] %v16427_v5  ;;  %v7013_v18 = vmax.f32 %v16427_v5, 0.0  ;;  %v6376_v43 = vadd.f32 %v5986_v48, %v19286_v41  ;;  %v5997_v37 = vadd.f32 %v11831_v38, %v16069_v59  ;;  %v7123_v30 = vpack.c.bf16 %v7015_v7, %v7014_v61  ;;  %v19290_v38 = vld [vmem:[#allocation85_spill] sm:$0xff]  ;;  %v19292_v5 = vld [vmem:[#allocation104_spill] sm:$0xff] }
 0x4d5   :  { %v5988_v44 = vpop.f32.mrf.mxu0 }
 0x4d6   :  { %v6379_v19 = vadd.f32 %v5997_v37, %v19288_v55  ;;  %v5989_v11 = vadd.f32 %v16069_v59, %v5988_v44  ;;  %v7122_v4 = vpack.c.bf16 %v7013_v18, %v7012_v50  ;;  %v16446_v48 = vadd.f32 %v16071_v47, %v6376_v43  ;;  %v19293_v37 = vld [vmem:[#allocation184_spill] sm:$0xff]  ;;  %v19295_v18 = vld [vmem:[#allocation86_spill] sm:$0xff] }
 0x4d7   :  { %v11834_v36 = vpop.f32.mrf.mxu0  ;;  %v16456_v44 = vadd.f32 %v19293_v37, %v6378_v54  ;;  %v19297_v55 = vld [vmem:[#allocation34_spill] sm:$0xff]  ;;  %v16474_v37 = vpop.permute.xlu0 %6608 }
 0x4d8   :  { %19289 = vst [vmem:[#allocation202_spill] sm:$0xff] %v16446_v48  ;;  %v16449_v41 = vadd.f32 %v19290_v38, %v6379_v19  ;;  %v6377_v42 = vadd.f32 %v5989_v11, %v19292_v5  ;;  %11956 = vmatprep.mubr.msk.bf16.mxu1 %vm2098_vm2, %v7122_v4  ;;  %v6010_v7 = vadd.f32 %v11834_v36, %v16069_v59  ;;  %v7016_v5 = vmax.f32 %v16446_v48, 0.0  ;;  %v19298_v4 = vld [vmem:[#allocation111_spill] sm:$0xff] }
 0x4d9   :  { %v6001_v9 = vpop.f32.mrf.mxu0  ;;  %19294 = vst [vmem:[#allocation292_spill] sm:$0xff] %v16456_v44  ;;  %11957 = vmatmul.mubr.msk.bf16.gmra.mxu1 %vm2098_vm2, %v7123_v30  ;;  %v7018_v36 = vmax.f32 %v16456_v44, 0.0 }
 0x4da   :  { %19291 = vst [vmem:[#allocation106_spill] sm:$0xff] %v16449_v41  ;;  %v16459_v50 = vadd.f32 %v19295_v18, %v6377_v42  ;;  %v6002_v47 = vadd.f32 %v16069_v59, %v6001_v9  ;;  %v7019_v61 = vmax.f32 %v16449_v41, 0.0  ;;  %v16469_v42 = vpop.permute.xlu1 %6610  ;;  %v6382_v38 = vadd.f32 %v6010_v7, %v19298_v4  ;;  %v19299_v18 = vld [vmem:[#allocation108_spill] sm:$0xff] }
 0x4db   :  { %v11835_v43 = vpop.f32.mrf.mxu0 }
 0x4dc   :  { %19296 = vst [vmem:[#allocation291_spill] sm:$0xff] %v16459_v50  ;;  %v7017_v60 = vmax.f32 %v16459_v50, 0.0  ;;  %v6380_v19 = vadd.f32 %v6002_v47, %v19297_v55  ;;  %v6013_v54 = vadd.f32 %v11835_v43, %v16069_v59  ;;  %v7125_v50 = vpack.c.bf16 %v7019_v61, %v7018_v36  ;;  %v19301_v43 = vld [vmem:[#allocation282_spill] sm:$0xff] }
 0x4dd   :  { %v6004_v11 = vpop.f32.mrf.mxu0 }
 0x4de   :  { %v6005_v30 = vadd.f32 %v16069_v59, %v6004_v11  ;;  %v7124_v9 = vpack.c.bf16 %v7017_v60, %v7016_v5  ;;  %v6383_v41 = vadd.f32 %v6013_v54, %v19299_v18  ;;  %v16480_v55 = vadd.f32 %v19301_v43, %v6380_v19  ;;  %v19305_v5 = vld [vmem:[#allocation285_spill] sm:$0xff]  ;;  %v16494_v36 = vpop.permute.xlu1 %6614  ;;  %v19308_v18 = vld [vmem:[#allocation39_spill] sm:$0xff] }
 0x4df   :  { %v11838_v48 = vpop.f32.mrf.mxu0  ;;  %v16486_v11 = vadd.f32 %v16133_v53, %v6382_v38  ;;  %v16500_v38 = vpop.permute.xlu0 %6612 }
 0x4e0   :  { %v6381_v47 = vadd.f32 %v6005_v30, %v19300_v51  ;;  %11960 = vmatprep.mubr.msk.bf16.mxu1 %vm2098_vm2, %v7124_v9  ;;  %19302 = vst [vmem:[#allocation110_spill] sm:$0xff] %v16480_v55  ;;  %v16483_v44 = vadd.f32 %v16135_v0, %v6383_v41  ;;  %v6026_v54 = vadd.f32 %v11838_v48, %v16069_v59  ;;  %v19307_v41 = vld [vmem:[#allocation107_spill] sm:$0xff]  ;;  %v7020_v30 = vmax.f32 %v16480_v55, 0.0 }
 0x4e1   :  { %v6017_v7 = vpop.f32.mrf.mxu0  ;;  %19304 = vst [vmem:[#allocation205_spill] sm:$0xff] %v16486_v11  ;;  %11961 = vmatmul.mubr.msk.bf16.gmra.mxu1 %vm2098_vm2, %v7125_v50  ;;  %v7022_v9 = vmax.f32 %v16486_v11, 0.0 }
 0x4e2   :  { %19303 = vst [vmem:[#allocation109_spill] sm:$0xff] %v16483_v44  ;;  %v16489_v60 = vadd.f32 %v19305_v5, %v6381_v47  ;;  %v6018_v61 = vadd.f32 %v16069_v59, %v6017_v7  ;;  %v7023_v19 = vmax.f32 %v16483_v44, 0.0  ;;  %v6386_v50 = vadd.f32 %v6026_v54, %v19308_v18  ;;  %v19309_v47 = vld [vmem:[#allocation37_spill] sm:$0xff]  ;;  %v16515_v27 = vpop.permute.xlu1 %6618  ;;  %v19314_v18 = vld [vmem:[#allocation119_spill] sm:$0xff] }
 0x4e3   :  { %v11839_v51 = vpop.f32.mrf.mxu0 }
 0x4e4   :  { %19306 = vst [vmem:[#allocation207_spill] sm:$0xff] %v16489_v60  ;;  %v7021_v0 = vmax.f32 %v16489_v60, 0.0  ;;  %v6384_v4 = vadd.f32 %v6018_v61, %v19307_v41  ;;  %v6029_v53 = vadd.f32 %v11839_v51, %v16069_v59  ;;  %v7127_v60 = vpack.c.bf16 %v7023_v19, %v7022_v9  ;;  %v19311_v41 = vld [vmem:[#allocation38_spill] sm:$0xff] }
 0x4e5   :  { %v6020_v48 = vpop.f32.mrf.mxu0  ;;  %v16518_v54 = vadd.f32 %v16189_v52, %v6386_v50  ;;  %v19313_v52 = vld [vmem:[#allocation112_spill] sm:$0xff] }
 0x4e6   :  { %v6387_v43 = vadd.f32 %v6029_v53, %v19309_v47  ;;  %v6021_v7 = vadd.f32 %v16069_v59, %v6020_v48  ;;  %v7126_v44 = vpack.c.bf16 %v7021_v0, %v7020_v30  ;;  %v16508_v61 = vadd.f32 %v16159_v20, %v6384_v4  ;;  %v19315_v47 = vld [vmem:[#allocation116_spill] sm:$0xff] }
 0x4e7   :  { %v11842_v5 = vpop.f32.mrf.mxu0  ;;  %v7026_v9 = vmax.f32 %v16518_v54, 0.0 }
 0x4e8   :  { %v16511_v51 = vadd.f32 %v16191_v12, %v6387_v43  ;;  %v6385_v55 = vadd.f32 %v6021_v7, %v19311_v41  ;;  %11964 = vmatprep.mubr.msk.bf16.mxu1 %vm2098_vm2, %v7126_v44  ;;  %v6042_v19 = vadd.f32 %v11842_v5, %v16069_v59  ;;  %v16526_v12 = vpop.permute.xlu0 %6616  ;;  %v7024_v44 = vmax.f32 %v16508_v61, 0.0  ;;  %v16537_v5 = vpop.permute.xlu1 %6622 }
 0x4e9   :  { %v6033_v11 = vpop.f32.mrf.mxu0  ;;  %11965 = vmatmul.mubr.msk.bf16.gmra.mxu1 %vm2098_vm2, %v7127_v60 }
 0x4ea   :  { %19310 = vst [vmem:[#allocation208_spill] sm:$0xff] %v16511_v51  ;;  %v16521_v53 = vadd.f32 %v16161_v34, %v6385_v55  ;;  %v6034_v20 = vadd.f32 %v16069_v59, %v6033_v11  ;;  %v7027_v4 = vmax.f32 %v16511_v51, 0.0  ;;  %v6390_v11 = vadd.f32 %v6042_v19, %v19314_v18  ;;  %v19316_v51 = vld [vmem:[#allocation40_spill] sm:$0xff] }
 0x4eb   :  { %v11843_v0 = vpop.f32.mrf.mxu0 }
 0x4ec   :  { %19312 = vst [vmem:[#allocation113_spill] sm:$0xff] %v16521_v53  ;;  %v7025_v30 = vmax.f32 %v16521_v53, 0.0  ;;  %v6388_v48 = vadd.f32 %v6034_v20, %v19313_v52  ;;  %v6045_v34 = vadd.f32 %v11843_v0, %v16069_v59  ;;  %v7129_v41 = vpack.c.bf16 %v7027_v4, %v7026_v9  ;;  %v16541_v20 = vpop.permute.xlu0 %6620 }
 0x4ed   :  { %v6036_v55 = vpop.f32.mrf.mxu0 }
 0x4ee   :  { %v6037_v60 = vadd.f32 %v16069_v59, %v6036_v55  ;;  %v7128_v50 = vpack.c.bf16 %v7025_v30, %v7024_v44  ;;  %v6391_v43 = vadd.f32 %v6045_v34, %v19315_v47  ;;  %v16544_v0 = vadd.f32 %v16219_v3, %v6388_v48 }
 0x4ef   :  { %v11846_v7 = vpop.f32.mrf.mxu0  ;;  %v16550_v44 = vadd.f32 %v16243_v56, %v6390_v11  ;;  %v19320_v11 = vld [vmem:[#allocation43_spill] sm:$0xff] }
 0x4f0   :  { %v6389_v53 = vadd.f32 %v6037_v60, %v19316_v51  ;;  %11968 = vmatprep.mubr.msk.bf16.mxu1 %vm2098_vm2, %v7128_v50  ;;  %v16547_v19 = vadd.f32 %v16245_v33, %v6391_v43  ;;  %v6058_v4 = vadd.f32 %v11846_v7, %v16069_v59  ;;  %v19319_v33 = vld [vmem:[#allocation115_spill] sm:$0xff]  ;;  %v7028_v56 = vmax.f32 %v16544_v0, 0.0  ;;  %v19321_v50 = vld [vmem:[#allocation41_spill] sm:$0xff]  ;;  %v16569_v7 = vpop.permute.xlu0 %6624 }
 0x4f1   :  { %v6049_v52 = vpop.f32.mrf.mxu0  ;;  %11969 = vmatmul.mubr.msk.bf16.gmra.mxu1 %vm2098_vm2, %v7129_v41 }
 0x4f2   :  { %19317 = vst [vmem:[#allocation206_spill] sm:$0xff] %v16547_v19  ;;  %v16553_v30 = vadd.f32 %v16221_v31, %v6389_v53  ;;  %v6050_v51 = vadd.f32 %v16069_v59, %v6049_v52  ;;  %v7031_v3 = vmax.f32 %v16547_v19, 0.0  ;;  %v16563_v31 = vpop.permute.xlu1 %6626  ;;  %v7030_v53 = vmax.f32 %v16550_v44, 0.0 }
 0x4f3   :  { %v11847_v34 = vpop.f32.mrf.mxu0  ;;  %v6394_v60 = vadd.f32 %v6058_v4, %v19320_v11 }
 0x4f4   :  { %19318 = vst [vmem:[#allocation114_spill] sm:$0xff] %v16553_v30  ;;  %v7029_v48 = vmax.f32 %v16553_v30, 0.0  ;;  %v6392_v55 = vadd.f32 %v6050_v51, %v19319_v33  ;;  %v6061_v9 = vadd.f32 %v11847_v34, %v16069_v59  ;;  %v7131_v51 = vpack.c.bf16 %v7031_v3, %v7030_v53  ;;  %v19324_v30 = vld [vmem:[#allocation120_spill] sm:$0xff]  ;;  %v16588_v3 = vld [vmem:[%s17780_s6 + $0x1] ss:$0 sm:$0xff] }
 0x4f5   :  { %v6052_v18 = vpop.f32.mrf.mxu0 }
 0x4f6   :  { %v6395_v47 = vadd.f32 %v6061_v9, %v19321_v50  ;;  %v6053_v43 = vadd.f32 %v16069_v59, %v6052_v18  ;;  %v7130_v52 = vpack.c.bf16 %v7029_v48, %v7028_v56  ;;  %v16572_v34 = vadd.f32 %v16271_v23, %v6392_v55  ;;  %v16593_v48 = vpop.permute.xlu1 %6630  ;;  %v19327_v56 = vld [vmem:[#allocation42_spill] sm:$0xff]  ;;  %v19328_v50 = vld [vmem:[#allocation44_spill] sm:$0xff] }
 0x4f7   :  { %v11850_v41 = vpop.f32.mrf.mxu0  ;;  %v16580_v9 = vadd.f32 %v16307_v22, %v6394_v60 }
 0x4f8   :  { %19322 = vst [vmem:[#allocation293_spill] sm:$0xff] %v16572_v34  ;;  %v16575_v33 = vadd.f32 %v16302_v15, %v6395_v47  ;;  %v6393_v19 = vadd.f32 %v6053_v43, %v19324_v30  ;;  %11972 = vmatprep.mubr.msk.bf16.mxu1 %vm2098_vm2, %v7130_v52  ;;  %v6074_v23 = vadd.f32 %v16588_v3, %v11850_v41  ;;  %v7032_v22 = vmax.f32 %v16572_v34, 0.0  ;;  %v19329_v52 = vld [vmem:[#allocation124_spill] sm:$0xff]  ;;  %v19330_v34 = vld [vmem:[#allocation123_spill] sm:$0xff] }
 0x4f9   :  { %v6065_v4 = vpop.f32.mrf.mxu0  ;;  %19325 = vst [vmem:[#allocation5_spill] sm:$0xff] %v16580_v9  ;;  %11973 = vmatmul.mubr.msk.bf16.gmra.mxu1 %vm2098_vm2, %v7131_v51  ;;  %v7034_v60 = vmax.f32 %v16580_v9, 0.0 }
 0x4fa   :  { %19323 = vst [vmem:[#allocation7_spill] sm:$0xff] %v16575_v33  ;;  %v16583_v59 = vadd.f32 %v16273_v57, %v6393_v19  ;;  %v6066_v15 = vadd.f32 %v16588_v3, %v6065_v4  ;;  %v7035_v55 = vmax.f32 %v16575_v33, 0.0  ;;  %v16598_v19 = vpop.permute.xlu0 %6628  ;;  %v6398_v47 = vadd.f32 %v6074_v23, %v19328_v50  ;;  %v16614_v9 = vpop.permute.xlu1 %6634  ;;  %v19334_v50 = vld [vmem:[#allocation128_spill] sm:$0xff] }
 0x4fb   :  { %v11851_v30 = vpop.f32.mrf.mxu0 }
 0x4fc   :  { %19326 = vst [vmem:[#allocation8_spill] sm:$0xff] %v16583_v59  ;;  %v7033_v57 = vmax.f32 %v16583_v59, 0.0  ;;  %v6396_v18 = vadd.f32 %v6066_v15, %v19327_v56  ;;  %v6077_v53 = vadd.f32 %v16588_v3, %v11851_v30  ;;  %v7133_v33 = vpack.c.bf16 %v7035_v55, %v7034_v60 }
 0x4fd   :  { %v6068_v11 = vpop.f32.mrf.mxu0  ;;  %v16617_v23 = vadd.f32 %v16353_v8, %v6398_v47 }
 0x4fe   :  { %v6069_v43 = vadd.f32 %v16588_v3, %v6068_v11  ;;  %v7132_v41 = vpack.c.bf16 %v7033_v57, %v7032_v22  ;;  %v6399_v51 = vadd.f32 %v6077_v53, %v19329_v52  ;;  %v16609_v15 = vadd.f32 %v16338_v29, %v6396_v18  ;;  %v16625_v29 = vpop.permute.xlu0 %6632  ;;  %v19333_v53 = vld [vmem:[#allocation47_spill] sm:$0xff] }
 0x4ff   :  { %v11854_v4 = vpop.f32.mrf.mxu0  ;;  %19331 = vst [vmem:[#allocation118_spill] sm:$0xff] %v16617_v23  ;;  %v7038_v60 = vmax.f32 %v16617_v23, 0.0 }
 0x500   :  { %v6397_v59 = vadd.f32 %v6069_v43, %v19330_v34  ;;  %11976 = vmatprep.mubr.msk.bf16.mxu1 %vm2098_vm2, %v7132_v41  ;;  %v16612_v30 = vadd.f32 %v16349_v2, %v6399_v51  ;;  %v6090_v55 = vadd.f32 %v16588_v3, %v11854_v4  ;;  %v19335_v43 = vld [vmem:[#allocation46_spill] sm:$0xff]  ;;  %v16636_v4 = vpop.permute.xlu1 %6638 }
 0x501   :  { %v6081_v56 = vpop.f32.mrf.mxu0  ;;  %11977 = vmatmul.mubr.msk.bf16.gmra.mxu1 %vm2098_vm2, %v7133_v33 }
 0x502   :  { %v16620_v22 = vadd.f32 %v16327_v40, %v6397_v59  ;;  %v6082_v34 = vadd.f32 %v16588_v3, %v6081_v56  ;;  %v7039_v2 = vmax.f32 %v16612_v30, 0.0  ;;  %v7036_v40 = vmax.f32 %v16609_v15, 0.0  ;;  %v16645_v23 = vpop.permute.xlu0 %6636 }
 0x503   :  { %v11855_v57 = vpop.f32.mrf.mxu0  ;;  %v6402_v47 = vadd.f32 %v6090_v55, %v19334_v50 }
 0x504   :  { %19332 = vst [vmem:[#allocation209_spill] sm:$0xff] %v16620_v22  ;;  %v7037_v18 = vmax.f32 %v16620_v22, 0.0  ;;  %v6400_v11 = vadd.f32 %v6082_v34, %v19333_v53  ;;  %v6093_v8 = vadd.f32 %v16588_v3, %v11855_v57  ;;  %v7135_v56 = vpack.c.bf16 %v7039_v2, %v7038_v60  ;;  %v19337_v53 = vld [vmem:[#allocation132_spill] sm:$0xff]  ;;  %v19339_v60 = vld [vmem:[#allocation131_spill] sm:$0xff] }
 0x505   :  { %v6084_v59 = vpop.f32.mrf.mxu0 }
 0x506   :  { %v6403_v33 = vadd.f32 %v6093_v8, %v19335_v43  ;;  %v6085_v41 = vadd.f32 %v16588_v3, %v6084_v59  ;;  %v7134_v51 = vpack.c.bf16 %v7037_v18, %v7036_v40  ;;  %v16639_v34 = vadd.f32 %v16381_v17, %v6400_v11  ;;  %v19340_v43 = vld [vmem:[#allocation136_spill] sm:$0xff] }
 0x507   :  { %v11858_v52 = vpop.f32.mrf.mxu0  ;;  %v16649_v8 = vadd.f32 %v16405_v28, %v6402_v47 }
 0x508   :  { %v16642_v57 = vadd.f32 %v16400_v16, %v6403_v33  ;;  %v6401_v22 = vadd.f32 %v6085_v41, %v19337_v53  ;;  %11980 = vmatprep.mubr.msk.bf16.mxu1 %vm2098_vm2, %v7134_v51  ;;  %v6106_v2 = vadd.f32 %v16588_v3, %v11858_v52  ;;  %v7040_v11 = vmax.f32 %v16639_v34, 0.0  ;;  %v16667_v51 = vpop.permute.xlu0 %6640 }
 0x509   :  { %v6097_v55 = vpop.f32.mrf.mxu0  ;;  %11981 = vmatmul.mubr.msk.bf16.gmra.mxu1 %vm2098_vm2, %v7135_v56  ;;  %v19341_v56 = vld [vmem:[#allocation49_spill] sm:$0xff] }
 0x50a   :  { %19336 = vst [vmem:[#allocation117_spill] sm:$0xff] %v16642_v57  ;;  %v16652_v18 = vadd.f32 %v16375_v45, %v6401_v22  ;;  %v6098_v17 = vadd.f32 %v16588_v3, %v6097_v55  ;;  %v7043_v40 = vmax.f32 %v16642_v57, 0.0  ;;  %v16662_v45 = vpop.permute.xlu1 %6642  ;;  %v7042_v22 = vmax.f32 %v16649_v8, 0.0  ;;  %v19342_v57 = vld [vmem:[#allocation50_spill] sm:$0xff] }
 0x50b   :  { %v11859_v16 = vpop.f32.mrf.mxu0  ;;  %v6406_v33 = vadd.f32 %v6106_v2, %v19340_v43 }
 0x50c   :  { %19338 = vst [vmem:[#allocation211_spill] sm:$0xff] %v16652_v18  ;;  %v7041_v59 = vmax.f32 %v16652_v18, 0.0  ;;  %v6404_v50 = vadd.f32 %v6098_v17, %v19339_v60  ;;  %v6109_v28 = vadd.f32 %v16588_v3, %v11859_v16  ;;  %v7137_v18 = vpack.c.bf16 %v7043_v40, %v7042_v22  ;;  %v16693_v43 = vpop.permute.xlu0 %6644 }
 0x50d   :  { %v6100_v47 = vpop.f32.mrf.mxu0 }
 0x50e   :  { %v6101_v41 = vadd.f32 %v16588_v3, %v6100_v47  ;;  %v7136_v52 = vpack.c.bf16 %v7041_v59, %v7040_v11  ;;  %v6407_v53 = vadd.f32 %v6109_v28, %v19341_v56  ;;  %v16673_v16 = vadd.f32 %v16432_v6, %v6404_v50  ;;  %v16687_v28 = vpop.permute.xlu1 %6646  ;;  %v19347_v50 = vld [vmem:[#allocation143_spill] sm:$0xff]  ;;  %v19349_v56 = vld [vmem:[#allocation52_spill] sm:$0xff] }
 0x50f   :  { %v11862_v55 = vpop.f32.mrf.mxu0  ;;  %v16679_v47 = vadd.f32 %v16452_v63, %v6406_v33 }
 0x510   :  { %v6405_v17 = vadd.f32 %v6101_v41, %v19342_v57  ;;  %11984 = vmatprep.mubr.msk.bf16.mxu1 %vm2098_vm2, %v7136_v52  ;;  %19343 = vst [vmem:[#allocation212_spill] sm:$0xff] %v16673_v16  ;;  %v16676_v60 = vadd.f32 %v16443_v62, %v6407_v53  ;;  %v6122_v59 = vadd.f32 %v16588_v3, %v11862_v55  ;;  %v19348_v52 = vld [vmem:[#allocation53_spill] sm:$0xff] }
 0x511   :  { %v6113_v2 = vpop.f32.mrf.mxu0  ;;  %19345 = vst [vmem:[#allocation9_spill] sm:$0xff] %v16679_v47  ;;  %11985 = vmatmul.mubr.msk.bf16.gmra.mxu1 %vm2098_vm2, %v7137_v18  ;;  %v7046_v41 = vmax.f32 %v16679_v47, 0.0 }
 0x512   :  { %19344 = vst [vmem:[#allocation121_spill] sm:$0xff] %v16676_v60  ;;  %v16682_v11 = vadd.f32 %v16421_v26, %v6405_v17  ;;  %v6114_v40 = vadd.f32 %v16588_v3, %v6113_v2  ;;  %v7047_v6 = vmax.f32 %v16676_v60, 0.0  ;;  %v7044_v26 = vmax.f32 %v16673_v16, 0.0  ;;  %v16708_v16 = vpop.permute.xlu1 %6650 }
 0x513   :  { %v11863_v57 = vpop.f32.mrf.mxu0  ;;  %v6410_v18 = vadd.f32 %v6122_v59, %v19348_v52 }
 0x514   :  { %19346 = vst [vmem:[#allocation210_spill] sm:$0xff] %v16682_v11  ;;  %v7045_v62 = vmax.f32 %v16682_v11, 0.0  ;;  %v6408_v22 = vadd.f32 %v6114_v40, %v19347_v50  ;;  %v6125_v63 = vadd.f32 %v16588_v3, %v11863_v57  ;;  %v7139_v11 = vpack.c.bf16 %v7047_v6, %v7046_v41  ;;  %v19351_v50 = vld [vmem:[#allocation265_spill] sm:$0xff] }
 0x515   :  { %v6116_v33 = vpop.f32.mrf.mxu0  ;;  %v16711_v59 = vadd.f32 %v16500_v38, %v6410_v18  ;;  %v19353_v38 = vld [vmem:[#allocation55_spill] sm:$0xff]  ;;  %v19354_v18 = vld [vmem:[#allocation144_spill] sm:$0xff] }
 0x516   :  { %v6411_v53 = vadd.f32 %v6125_v63, %v19349_v56  ;;  %v6117_v55 = vadd.f32 %v16588_v3, %v6116_v33  ;;  %v7138_v2 = vpack.c.bf16 %v7045_v62, %v7044_v26  ;;  %v16701_v40 = vadd.f32 %v16474_v37, %v6408_v22 }
 0x517   :  { %v11866_v17 = vpop.f32.mrf.mxu0  ;;  %v7050_v52 = vmax.f32 %v16711_v59, 0.0 }
 0x518   :  { %v16704_v57 = vadd.f32 %v16494_v36, %v6411_v53  ;;  %v6409_v60 = vadd.f32 %v6117_v55, %v19351_v50  ;;  %11988 = vmatprep.mubr.msk.bf16.mxu1 %vm2098_vm2, %v7138_v2  ;;  %v6138_v6 = vadd.f32 %v16588_v3, %v11866_v17  ;;  %v16719_v36 = vpop.permute.xlu0 %6648  ;;  %v7048_v22 = vmax.f32 %v16701_v40, 0.0  ;;  %v19355_v53 = vld [vmem:[#allocation54_spill] sm:$0xff]  ;;  %v16730_v2 = vpop.permute.xlu1 %6654 }
 0x519   :  { %v6129_v47 = vpop.f32.mrf.mxu0  ;;  %11989 = vmatmul.mubr.msk.bf16.gmra.mxu1 %vm2098_vm2, %v7139_v11 }
 0x51a   :  { %19350 = vst [vmem:[#allocation122_spill] sm:$0xff] %v16704_v57  ;;  %v16714_v63 = vadd.f32 %v16469_v42, %v6409_v60  ;;  %v6130_v37 = vadd.f32 %v16588_v3, %v6129_v47  ;;  %v7051_v26 = vmax.f32 %v16704_v57, 0.0  ;;  %v6414_v47 = vadd.f32 %v6138_v6, %v19354_v18  ;;  %v19356_v57 = vld [vmem:[#allocation148_spill] sm:$0xff] }
 0x51b   :  { %v11867_v62 = vpop.f32.mrf.mxu0 }
 0x51c   :  { %19352 = vst [vmem:[#allocation10_spill] sm:$0xff] %v16714_v63  ;;  %v7049_v33 = vmax.f32 %v16714_v63, 0.0  ;;  %v6412_v41 = vadd.f32 %v6130_v37, %v19353_v38  ;;  %v6141_v42 = vadd.f32 %v16588_v3, %v11867_v62  ;;  %v7141_v50 = vpack.c.bf16 %v7051_v26, %v7050_v52  ;;  %v16734_v37 = vpop.permute.xlu0 %6652 }
 0x51d   :  { %v6132_v60 = vpop.f32.mrf.mxu0 }
 0x51e   :  { %v6133_v11 = vadd.f32 %v16588_v3, %v6132_v60  ;;  %v7140_v56 = vpack.c.bf16 %v7049_v33, %v7048_v22  ;;  %v6415_v55 = vadd.f32 %v6141_v42, %v19355_v53  ;;  %v16737_v62 = vadd.f32 %v16526_v12, %v6412_v41 }
 0x51f   :  { %v11870_v17 = vpop.f32.mrf.mxu0  ;;  %v16743_v22 = vadd.f32 %v16541_v20, %v6414_v47  ;;  %v19360_v47 = vld [vmem:[#allocation266_spill] sm:$0xff] }
 0x520   :  { %v6413_v63 = vadd.f32 %v6133_v11, %v19356_v57  ;;  %11992 = vmatprep.mubr.msk.bf16.mxu1 %vm2098_vm2, %v7140_v56  ;;  %v16740_v6 = vadd.f32 %v16537_v5, %v6415_v55  ;;  %v6154_v26 = vadd.f32 %v16588_v3, %v11870_v17  ;;  %v19359_v5 = vld [vmem:[#allocation147_spill] sm:$0xff]  ;;  %v7052_v20 = vmax.f32 %v16737_v62, 0.0  ;;  %v19361_v56 = vld [vmem:[#allocation57_spill] sm:$0xff]  ;;  %v16762_v17 = vpop.permute.xlu0 %6656 }
 0x521   :  { %v6145_v38 = vpop.f32.mrf.mxu0  ;;  %11993 = vmatmul.mubr.msk.bf16.gmra.mxu1 %vm2098_vm2, %v7141_v50 }
 0x522   :  { %19357 = vst [vmem:[#allocation11_spill] sm:$0xff] %v16740_v6  ;;  %v16746_v33 = vadd.f32 %v16515_v27, %v6413_v63  ;;  %v6146_v57 = vadd.f32 %v16588_v3, %v6145_v38  ;;  %v7055_v12 = vmax.f32 %v16740_v6, 0.0  ;;  %v16756_v27 = vpop.permute.xlu1 %6658  ;;  %v7054_v63 = vmax.f32 %v16743_v22, 0.0 }
 0x523   :  { %v11871_v42 = vpop.f32.mrf.mxu0  ;;  %v6418_v11 = vadd.f32 %v6154_v26, %v19360_v47 }
 0x524   :  { %19358 = vst [vmem:[#allocation126_spill] sm:$0xff] %v16746_v33  ;;  %v7053_v41 = vmax.f32 %v16746_v33, 0.0  ;;  %v6416_v60 = vadd.f32 %v6146_v57, %v19359_v5  ;;  %v6157_v52 = vadd.f32 %v16588_v3, %v11871_v42  ;;  %v7143_v57 = vpack.c.bf16 %v7055_v12, %v7054_v63  ;;  %v19364_v33 = vld [vmem:[#allocation269_spill] sm:$0xff]  ;;  %v19367_v63 = vld [vmem:[#allocation268_spill] sm:$0xff] }
 0x525   :  { %v6148_v18 = vpop.f32.mrf.mxu0 }
 0x526   :  { %v6419_v53 = vadd.f32 %v6157_v52, %v19361_v56  ;;  %v6149_v55 = vadd.f32 %v16588_v3, %v6148_v18  ;;  %v7142_v38 = vpack.c.bf16 %v7053_v41, %v7052_v20  ;;  %v16765_v42 = vadd.f32 %v16569_v7, %v6416_v60  ;;  %v19368_v56 = vld [vmem:[#allocation59_spill] sm:$0xff] }
 0x527   :  { %v11874_v50 = vpop.f32.mrf.mxu0  ;;  %v16773_v52 = vadd.f32 %v16598_v19, %v6418_v11  ;;  %v16786_v19 = vpop.permute.xlu0 %6660 }
 0x528   :  { %19362 = vst [vmem:[#allocation125_spill] sm:$0xff] %v16765_v42  ;;  %v16768_v5 = vadd.f32 %v16593_v48, %v6419_v53  ;;  %v6417_v6 = vadd.f32 %v6149_v55, %v19364_v33  ;;  %11996 = vmatprep.mubr.msk.bf16.mxu1 %vm2098_vm2, %v7142_v38  ;;  %v6170_v41 = vadd.f32 %v16588_v3, %v11874_v50  ;;  %v16781_v48 = vpop.permute.xlu1 %6662  ;;  %v7056_v33 = vmax.f32 %v16765_v42, 0.0  ;;  %v19369_v38 = vld [vmem:[#allocation267_spill] sm:$0xff]  ;;  %v19370_v42 = vld [vmem:[#allocation152_spill] sm:$0xff] }
 0x529   :  { %v6161_v26 = vpop.f32.mrf.mxu0  ;;  %19365 = vst [vmem:[#allocation215_spill] sm:$0xff] %v16773_v52  ;;  %11997 = vmatmul.mubr.msk.bf16.gmra.mxu1 %vm2098_vm2, %v7143_v57  ;;  %v7058_v11 = vmax.f32 %v16773_v52, 0.0 }
 0x52a   :  { %19363 = vst [vmem:[#allocation213_spill] sm:$0xff] %v16768_v5  ;;  %v16776_v18 = vadd.f32 %v16563_v31, %v6417_v6  ;;  %v6162_v12 = vadd.f32 %v16588_v3, %v6161_v26  ;;  %v7059_v60 = vmax.f32 %v16768_v5, 0.0  ;;  %v6422_v53 = vadd.f32 %v6170_v41, %v19368_v56  ;;  %v19375_v56 = vld [vmem:[#allocation159_spill] sm:$0xff] }
 0x52b   :  { %v11875_v7 = vpop.f32.mrf.mxu0 }
 0x52c   :  { %19366 = vst [vmem:[#allocation216_spill] sm:$0xff] %v16776_v18  ;;  %v7057_v20 = vmax.f32 %v16776_v18, 0.0  ;;  %v6420_v31 = vadd.f32 %v6162_v12, %v19367_v63  ;;  %v6173_v6 = vadd.f32 %v16588_v3, %v11875_v7  ;;  %v7145_v5 = vpack.c.bf16 %v7059_v60, %v7058_v11  ;;  %v16802_v52 = vpop.permute.xlu1 %6666 }
 0x52d   :  { %v6164_v47 = vpop.f32.mrf.mxu0  ;;  %v16805_v41 = vadd.f32 %v16645_v23, %v6422_v53 }
 0x52e   :  { %v6165_v55 = vadd.f32 %v16588_v3, %v6164_v47  ;;  %v7144_v50 = vpack.c.bf16 %v7057_v20, %v7056_v33  ;;  %v6423_v57 = vadd.f32 %v6173_v6, %v19369_v38  ;;  %v16797_v12 = vadd.f32 %v16625_v29, %v6420_v31  ;;  %v16813_v29 = vpop.permute.xlu0 %6664  ;;  %v19374_v6 = vld [vmem:[#allocation58_spill] sm:$0xff] }
 0x52f   :  { %v11878_v26 = vpop.f32.mrf.mxu0  ;;  %19372 = vst [vmem:[#allocation214_spill] sm:$0xff] %v16805_v41 }
 0x530   :  { %v6421_v18 = vadd.f32 %v6165_v55, %v19370_v42  ;;  %12000 = vmatprep.mubr.msk.bf16.mxu1 %vm2098_vm2, %v7144_v50  ;;  %v16800_v7 = vadd.f32 %v16636_v4, %v6423_v57  ;;  %v6186_v60 = vadd.f32 %v16588_v3, %v11878_v26  ;;  %v12398_v4 = vld [vmem:[%s17781_s7] sm:$0xff]   ;;  %v7060_v47 = vmax.f32 %v16797_v12, 0.0  ;;  %v19376_v55 = vld [vmem:[#allocation156_spill] sm:$0xff] }
 0x531   :  { %v6177_v63 = vpop.f32.mrf.mxu0  ;;  %12001 = vmatmul.mubr.msk.bf16.gmra.mxu1 %vm2098_vm2, %v7145_v5  ;;  %12182 = vmatprep.subr.bf16.mxu1 %v12398_v4  ;;  %v7062_v5 = vmax.f32 %v16805_v41, 0.0 }
 0x532   :  { %19371 = vst [vmem:[#allocation129_spill] sm:$0xff] %v16800_v7  ;;  %v16808_v33 = vadd.f32 %v16614_v9, %v6421_v18  ;;  %v6178_v42 = vadd.f32 %v16588_v3, %v6177_v63  ;;  %v7063_v31 = vmax.f32 %v16800_v7, 0.0  ;;  %v6426_v53 = vadd.f32 %v6186_v60, %v19375_v56  ;;  %12183 = vmatpush3.bf16.msra.mxu1 %v12398_v4  ;;  %v16827_v63 = vpop.permute.xlu1 %6670  ;;  %v16836_v7 = vpop.permute.xlu0 %6668  ;;  %v19382_v56 = vld [vmem:[#allocation155_spill] sm:$0xff] }
 0x533   :  { %v11879_v20 = vpop.f32.mrf.mxu0 }
 0x534   :  { %19373 = vst [vmem:[#allocation130_spill] sm:$0xff] %v16808_v33  ;;  %v7061_v23 = vmax.f32 %v16808_v33, 0.0  ;;  %v6424_v9 = vadd.f32 %v6178_v42, %v19374_v6  ;;  %v6189_v18 = vadd.f32 %v16588_v3, %v11879_v20  ;;  %v7147_v42 = vpack.c.bf16 %v7063_v31, %v7062_v5  ;;  %v19378_v33 = vld [vmem:[#allocation60_spill] sm:$0xff] }
 0x535   :  { %v6180_v11 = vpop.f32.mrf.mxu0  ;;  %v16840_v4 = vadd.f32 %v16693_v43, %v6426_v53 }
 0x536   :  { %v6427_v50 = vadd.f32 %v6189_v18, %v19376_v55  ;;  %v6181_v38 = vadd.f32 %v16588_v3, %v6180_v11  ;;  %v7146_v26 = vpack.c.bf16 %v7061_v23, %v7060_v47  ;;  %v16830_v20 = vadd.f32 %v16667_v51, %v6424_v9  ;;  %v19381_v47 = vld [vmem:[#allocation270_spill] sm:$0xff] }
 0x537   :  { %v11882_v57 = vpop.f32.mrf.mxu0  ;;  %19379 = vst [vmem:[#allocation15_spill] sm:$0xff] %v16840_v4 }
 0x538   :  { %v16833_v6 = vadd.f32 %v16687_v28, %v6427_v50  ;;  %v6425_v41 = vadd.f32 %v6181_v38, %v19378_v33  ;;  %12004 = vmatprep.mubr.msk.bf16.mxu1 %vm2098_vm2, %v7146_v26  ;;  %v6202_v31 = vadd.f32 %v16588_v3, %v11882_v57  ;;  %v7064_v33 = vmax.f32 %v16830_v20, 0.0  ;;  %v16858_v38 = vpop.permute.xlu0 %6672  ;;  %v19383_v57 = vld [vmem:[#allocation273_spill] sm:$0xff] }
 0x539   :  { %v6193_v60 = vpop.f32.mrf.mxu0  ;;  %12005 = vmatmul.mubr.msk.bf16.gmra.mxu1 %vm2098_vm2, %v7147_v42 }
 0x53a   :  { %19377 = vst [vmem:[#allocation65_spill] sm:$0xff] %v16833_v6  ;;  %v16843_v23 = vadd.f32 %v16662_v45, %v6425_v41  ;;  %v6194_v51 = vadd.f32 %v16588_v3, %v6193_v60  ;;  %v7067_v9 = vmax.f32 %v16833_v6, 0.0  ;;  %v16853_v45 = vpop.permute.xlu1 %6674  ;;  %v7066_v41 = vmax.f32 %v16840_v4, 0.0 }
 0x53b   :  { %v11883_v28 = vpop.f32.mrf.mxu0  ;;  %v6430_v53 = vadd.f32 %v6202_v31, %v19382_v56 }
 0x53c   :  { %19380 = vst [vmem:[#allocation134_spill] sm:$0xff] %v16843_v23  ;;  %v7065_v18 = vmax.f32 %v16843_v23, 0.0  ;;  %v6428_v11 = vadd.f32 %v6194_v51, %v19381_v47  ;;  %v6205_v43 = vadd.f32 %v16588_v3, %v11883_v28  ;;  %v7149_v60 = vpack.c.bf16 %v7067_v9, %v7066_v41  ;;  %v19384_v23 = vld [vmem:[#allocation61_spill] sm:$0xff]  ;;  %v16884_v56 = vpop.permute.xlu0 %6676 }
 0x53d   :  { %v6196_v5 = vpop.f32.mrf.mxu0 }
 0x53e   :  { %v6197_v55 = vadd.f32 %v16588_v3, %v6196_v5  ;;  %v7148_v50 = vpack.c.bf16 %v7065_v18, %v7064_v33  ;;  %v6431_v26 = vadd.f32 %v6205_v43, %v19383_v57  ;;  %v16864_v28 = vadd.f32 %v16719_v36, %v6428_v11  ;;  %v16878_v43 = vpop.permute.xlu1 %6678  ;;  %v19389_v11 = vld [vmem:[#allocation272_spill] sm:$0xff] }
 0x53f   :  { %v11886_v42 = vpop.f32.mrf.mxu0  ;;  %v16870_v5 = vadd.f32 %v16734_v37, %v6430_v53 }
 0x540   :  { %v6429_v51 = vadd.f32 %v6197_v55, %v19384_v23  ;;  %12008 = vmatprep.mubr.msk.bf16.mxu1 %vm2098_vm2, %v7148_v50  ;;  %19385 = vst [vmem:[#allocation217_spill] sm:$0xff] %v16864_v28  ;;  %v16867_v47 = vadd.f32 %v16730_v2, %v6431_v26  ;;  %v6218_v18 = vadd.f32 %v16588_v3, %v11886_v42  ;;  %v19390_v50 = vld [vmem:[#allocation63_spill] sm:$0xff] }
 0x541   :  { %v6209_v31 = vpop.f32.mrf.mxu0  ;;  %19387 = vst [vmem:[#allocation219_spill] sm:$0xff] %v16870_v5  ;;  %12009 = vmatmul.mubr.msk.bf16.gmra.mxu1 %vm2098_vm2, %v7149_v60  ;;  %v7070_v55 = vmax.f32 %v16870_v5, 0.0  ;;  %v19391_v26 = vld [vmem:[#allocation271_spill] sm:$0xff] }
 0x542   :  { %19386 = vst [vmem:[#allocation133_spill] sm:$0xff] %v16867_v47  ;;  %v16873_v33 = vadd.f32 %v16708_v16, %v6429_v51  ;;  %v6210_v9 = vadd.f32 %v16588_v3, %v6209_v31  ;;  %v7071_v36 = vmax.f32 %v16867_v47, 0.0  ;;  %v7068_v16 = vmax.f32 %v16864_v28, 0.0  ;;  %v16899_v28 = vpop.permute.xlu1 %6682 }
 0x543   :  { %v11887_v23 = vpop.f32.mrf.mxu0  ;;  %v6434_v57 = vadd.f32 %v6218_v18, %v19390_v50 }
 0x544   :  { %19388 = vst [vmem:[#allocation220_spill] sm:$0xff] %v16873_v33  ;;  %v7069_v2 = vmax.f32 %v16873_v33, 0.0  ;;  %v6432_v41 = vadd.f32 %v6210_v9, %v19389_v11  ;;  %v6221_v37 = vadd.f32 %v16588_v3, %v11887_v23  ;;  %v7151_v33 = vpack.c.bf16 %v7071_v36, %v7070_v55  ;;  %v19394_v11 = vld [vmem:[#allocation62_spill] sm:$0xff] }
 0x545   :  { %v6212_v53 = vpop.f32.mrf.mxu0  ;;  %v16902_v18 = vadd.f32 %v16786_v19, %v6434_v57  ;;  %v19397_v19 = vld [vmem:[#allocation160_spill] sm:$0xff]  ;;  %v19398_v57 = vld [vmem:[#allocation167_spill] sm:$0xff] }
 0x546   :  { %v6435_v42 = vadd.f32 %v6221_v37, %v19391_v26  ;;  %v6213_v60 = vadd.f32 %v16588_v3, %v6212_v53  ;;  %v7150_v31 = vpack.c.bf16 %v7069_v2, %v7068_v16  ;;  %v16892_v9 = vadd.f32 %v16762_v17, %v6432_v41 }
 0x547   :  { %v11890_v51 = vpop.f32.mrf.mxu0  ;;  %19395 = vst [vmem:[#allocation138_spill] sm:$0xff] %v16902_v18  ;;  %v7074_v50 = vmax.f32 %v16902_v18, 0.0 }
 0x548   :  { %19392 = vst [vmem:[#allocation137_spill] sm:$0xff] %v16892_v9  ;;  %v16895_v23 = vadd.f32 %v16781_v48, %v6435_v42  ;;  %v6433_v47 = vadd.f32 %v6213_v60, %v19394_v11  ;;  %12012 = vmatprep.mubr.msk.bf16.mxu1 %vm2098_vm2, %v7150_v31  ;;  %v6234_v36 = vadd.f32 %v16588_v3, %v11890_v51  ;;  %v16910_v48 = vpop.permute.xlu0 %6680  ;;  %v7072_v41 = vmax.f32 %v16892_v9, 0.0  ;;  %v19399_v60 = vld [vmem:[#allocation164_spill] sm:$0xff]  ;;  %v16921_v11 = vpop.permute.xlu1 %6686 }
 0x549   :  { %v6225_v5 = vpop.f32.mrf.mxu0  ;;  %12013 = vmatmul.mubr.msk.bf16.gmra.mxu1 %vm2098_vm2, %v7151_v33 }
 0x54a   :  { %19393 = vst [vmem:[#allocation218_spill] sm:$0xff] %v16895_v23  ;;  %v16905_v37 = vadd.f32 %v16756_v27, %v6433_v47  ;;  %v6226_v17 = vadd.f32 %v16588_v3, %v6225_v5  ;;  %v7075_v16 = vmax.f32 %v16895_v23, 0.0  ;;  %v6438_v5 = vadd.f32 %v6234_v36, %v19398_v57 }
 0x54b   :  { %v11891_v2 = vpop.f32.mrf.mxu0 }
 0x54c   :  { %19396 = vst [vmem:[#allocation76_spill] sm:$0xff] %v16905_v37  ;;  %v7073_v53 = vmax.f32 %v16905_v37, 0.0  ;;  %v6436_v55 = vadd.f32 %v6226_v17, %v19397_v19  ;;  %v6237_v27 = vadd.f32 %v16588_v3, %v11891_v2  ;;  %v7153_v23 = vpack.c.bf16 %v7075_v16, %v7074_v50  ;;  %v19400_v37 = vld [vmem:[#allocation66_spill] sm:$0xff]  ;;  %v16927_v17 = vld [vmem:[%s17778_s4 + $0x2] ss:$0 sm:$0xff]  ;;  %v16930_v36 = vpop.permute.xlu0 %6684 }
 0x54d   :  { %v6228_v47 = vpop.f32.mrf.mxu0  ;;  %v11922_v26 = vpop.f32.mrf.mxu1 }
 0x54e   :  { %v6229_v33 = vadd.f32 %v16588_v3, %v6228_v47  ;;  %v7152_v42 = vpack.c.bf16 %v7073_v53, %v7072_v41  ;;  %v6439_v51 = vadd.f32 %v6237_v27, %v19399_v60  ;;  %v16933_v41 = vadd.f32 %v16813_v29, %v6436_v55 }
 0x54f   :  { %v11894_v31 = vpop.f32.mrf.mxu0  ;;  %v7419_v2 = vpop.f32.mrf.mxu1  ;;  %v7428_v29 = vadd.f32 %v11922_v26, %v16927_v17 }
 0x550   :  { %v6437_v9 = vadd.f32 %v6229_v33, %v19400_v37  ;;  %12016 = vmatprep.mubr.msk.bf16.mxu1 %vm2098_vm2, %v7152_v42  ;;  %19401 = vst [vmem:[#allocation142_spill] sm:$0xff] %v16933_v41  ;;  %v16936_v53 = vadd.f32 %v16827_v63, %v6439_v51  ;;  %v6250_v16 = vadd.f32 %v16588_v3, %v11894_v31  ;;  %v7076_v60 = vmax.f32 %v16933_v41, 0.0 }
 0x551   :  { %v6241_v19 = vpop.f32.mrf.mxu0  ;;  %v16940_v37 = vadd.f32 %v16836_v7, %v6438_v5  ;;  %12017 = vmatmul.mubr.msk.bf16.gmra.mxu1 %vm2098_vm2, %v7153_v23  ;;  %v11923_v50 = vpop.f32.mrf.mxu1  ;;  %v7420_v55 = vadd.f32 %v16927_v17, %v7419_v2  ;;  %v19405_v5 = vld [vmem:[#allocation274_spill] sm:$0xff]  ;;  %v19406_v23 = vld [vmem:[#allocation275_spill] sm:$0xff] }
 0x552   :  { %19402 = vst [vmem:[#allocation141_spill] sm:$0xff] %v16936_v53  ;;  %v16943_v27 = vadd.f32 %v16802_v52, %v6437_v9  ;;  %v6242_v47 = vadd.f32 %v16588_v3, %v6241_v19  ;;  %v7431_v63 = vadd.f32 %v11923_v50, %v16927_v17  ;;  %v7079_v33 = vmax.f32 %v16936_v53, 0.0  ;;  %v16957_v2 = vpop.permute.xlu1 %6690  ;;  %v19407_v53 = vld [vmem:[#allocation276_spill] sm:$0xff] }
 0x553   :  { %19403 = vst [vmem:[#allocation221_spill] sm:$0xff] %v16940_v37  ;;  %v11895_v57 = vpop.f32.mrf.mxu0  ;;  %v7422_v9 = vpop.f32.mrf.mxu1  ;;  %v6442_v51 = vadd.f32 %v6250_v16, %v19406_v23  ;;  %v7078_v19 = vmax.f32 %v16940_v37, 0.0  ;;  %v19409_v37 = vld [vmem:[#allocation71_spill] sm:$0xff] }
 0x554   :  { %19404 = vst [vmem:[#allocation223_spill] sm:$0xff] %v16943_v27  ;;  %v7077_v7 = vmax.f32 %v16943_v27, 0.0  ;;  %v6440_v42 = vadd.f32 %v6242_v47, %v19405_v5  ;;  %v6253_v52 = vadd.f32 %v16588_v3, %v11895_v57  ;;  %v7423_v26 = vadd.f32 %v16927_v17, %v7422_v9  ;;  %v16962_v47 = vpop.permute.xlu0 %6688 }
 0x555   :  { %v6244_v31 = vpop.f32.mrf.mxu0  ;;  %v7933_v50 = vmax.f32 %v7431_v63, 0.0  ;;  %v7932_v57 = vmax.f32 %v7428_v29, 0.0  ;;  %v7930_v5 = vmax.f32 %v7420_v55, 0.0  ;;  %v7155_v16 = vpack.c.bf16 %v7079_v33, %v7078_v19 }
 0x556   :  { %v6443_v18 = vadd.f32 %v6253_v52, %v19407_v53  ;;  %v6245_v27 = vadd.f32 %v16588_v3, %v6244_v31  ;;  %v7931_v4 = vmax.f32 %v7423_v26, 0.0  ;;  %v7154_v6 = vpack.c.bf16 %v7077_v7, %v7076_v60  ;;  %v19413_v31 = vld [vmem:[#allocation168_spill] sm:$0xff] }
 0x557   :  { %v11898_v41 = vpop.f32.mrf.mxu0  ;;  %v16965_v9 = vadd.f32 %v16858_v38, %v6440_v42  ;;  %v16972_v53 = vadd.f32 %v16884_v56, %v6442_v51  ;;  %v8059_v55 = vpack.c.bf16 %v7933_v50, %v7932_v57  ;;  %v16982_v56 = vpop.permute.xlu1 %6694 }
 0x558   :  { %v16968_v23 = vadd.f32 %v16878_v43, %v6443_v18  ;;  %v6441_v63 = vadd.f32 %v6245_v27, %v19409_v37  ;;  %v8058_v52 = vpack.c.bf16 %v7931_v4, %v7930_v5  ;;  %12020 = vmatprep.mubr.msk.bf16.mxu1 %vm2098_vm2, %v7154_v6  ;;  %v6266_v33 = vadd.f32 %v16588_v3, %v11898_v41  ;;  %v16988_v41 = vpop.permute.xlu0 %6692  ;;  %v19412_v37 = vld [vmem:[#allocation70_spill] sm:$0xff] }
 0x559   :  { %19410 = vst [vmem:[#allocation145_spill] sm:$0xff] %v16972_v53  ;;  %v6257_v29 = vpop.f32.mrf.mxu0  ;;  %v11926_v7 = vpop.f32.mrf.mxu1  ;;  %12021 = vmatmul.mubr.msk.bf16.gmra.mxu1 %vm2098_vm2, %v7155_v16  ;;  %v7080_v4 = vmax.f32 %v16965_v9, 0.0  ;;  %v7082_v51 = vmax.f32 %v16972_v53, 0.0 }
 0x55a   :  { %19408 = vst [vmem:[#allocation224_spill] sm:$0xff] %v16968_v23  ;;  %v16976_v26 = vadd.f32 %v16853_v45, %v6441_v63  ;;  %v6258_v38 = vadd.f32 %v16588_v3, %v6257_v29  ;;  %12052 = vmatprep.mubr.msk.bf16.mxu0 %vm2098_vm2, %v8058_v52  ;;  %v7083_v6 = vmax.f32 %v16968_v23, 0.0  ;;  %v6446_v19 = vadd.f32 %v6266_v33, %v19413_v31  ;;  %v19414_v63 = vld [vmem:[#allocation172_spill] sm:$0xff] }
 0x55b   :  { %v11899_v43 = vpop.f32.mrf.mxu0  ;;  %v7435_v45 = vpop.f32.mrf.mxu1  ;;  %12053 = vmatmul.mubr.msk.bf16.vlgmr.msra.gmra.mxu0 %vm2098_vm2, %v8059_v55  ;;  %v7444_v16 = vadd.f32 %v11926_v7, %v16927_v17 }
 0x55c   :  { %19411 = vst [vmem:[#allocation222_spill] sm:$0xff] %v16976_v26  ;;  %v7081_v18 = vmax.f32 %v16976_v26, 0.0  ;;  %v6444_v27 = vadd.f32 %v6258_v38, %v19412_v37  ;;  %v6269_v42 = vadd.f32 %v16588_v3, %v11899_v43  ;;  %v7436_v29 = vadd.f32 %v16927_v17, %v7435_v45  ;;  %v19415_v43 = vld [vmem:[#allocation175_spill] sm:$0xff] }
 0x55d   :  { %v6260_v60 = vpop.f32.mrf.mxu0  ;;  %v11927_v57 = vpop.f32.mrf.mxu1  ;;  %v7157_v37 = vpack.c.bf16 %v7083_v6, %v7082_v51  ;;  %v17012_v6 = vadd.f32 %v16930_v36, %v6446_v19  ;;  %v7936_v31 = vmax.f32 %v7444_v16, 0.0  ;;  %v19419_v19 = vld [vmem:[#allocation277_spill] sm:$0xff] }
 0x55e   :  { %v6261_v50 = vadd.f32 %v16588_v3, %v6260_v60  ;;  %v7156_v5 = vpack.c.bf16 %v7081_v18, %v7080_v4  ;;  %v6447_v52 = vadd.f32 %v6269_v42, %v19414_v63  ;;  %v7447_v55 = vadd.f32 %v11927_v57, %v16927_v17  ;;  %v17009_v42 = vpop.permute.xlu1 %6698 }
 0x55f   :  { %v11902_v38 = vpop.f32.mrf.mxu0  ;;  %v7438_v23 = vpop.f32.mrf.mxu1  ;;  %v17002_v33 = vadd.f32 %v16910_v48, %v6444_v27  ;;  %19417 = vst [vmem:[#allocation150_spill] sm:$0xff] %v17012_v6  ;;  %v7086_v16 = vmax.f32 %v17012_v6, 0.0  ;;  %v19429_v6 = vld [vmem:[#allocation278_spill] sm:$0xff] }
 0x560   :  { %v6445_v26 = vadd.f32 %v6261_v50, %v19415_v43  ;;  %12024 = vmatprep.mubr.msk.bf16.mxu1 %vm2098_vm2, %v7156_v5  ;;  %v17005_v4 = vadd.f32 %v16921_v11, %v6447_v52  ;;  %v6282_v7 = vadd.f32 %v16588_v3, %v11902_v38  ;;  %v7439_v18 = vadd.f32 %v16927_v17, %v7438_v23  ;;  %v17019_v11 = vpop.permute.xlu0 %6696 }
 0x561   :  { %v6273_v45 = vpop.f32.mrf.mxu0  ;;  %v7937_v51 = vmax.f32 %v7447_v55, 0.0  ;;  %v11930_v27 = vpop.f32.mrf.mxu1  ;;  %12025 = vmatmul.mubr.msk.bf16.gmra.mxu1 %vm2098_vm2, %v7157_v37  ;;  %v7934_v50 = vmax.f32 %v7436_v29, 0.0  ;;  %v7084_v52 = vmax.f32 %v17002_v33, 0.0  ;;  %v19420_v55 = vld [vmem:[#allocation73_spill] sm:$0xff] }
 0x562   :  { %19416 = vst [vmem:[#allocation146_spill] sm:$0xff] %v17005_v4  ;;  %v17015_v60 = vadd.f32 %v16899_v28, %v6445_v26  ;;  %v6274_v48 = vadd.f32 %v16588_v3, %v6273_v45  ;;  %v7935_v23 = vmax.f32 %v7439_v18, 0.0  ;;  %v7087_v5 = vmax.f32 %v17005_v4, 0.0  ;;  %v19421_v18 = vld [vmem:[#allocation171_spill] sm:$0xff] }
 0x563   :  { %v11903_v57 = vpop.f32.mrf.mxu0  ;;  %v7451_v26 = vpop.f32.mrf.mxu1  ;;  %v6450_v38 = vadd.f32 %v6282_v7, %v19420_v55  ;;  %v8061_v29 = vpack.c.bf16 %v7937_v51, %v7936_v31  ;;  %v19424_v31 = vld [vmem:[#allocation74_spill] sm:$0xff] }
 0x564   :  { %19418 = vst [vmem:[#allocation225_spill] sm:$0xff] %v17015_v60  ;;  %v7085_v36 = vmax.f32 %v17015_v60, 0.0  ;;  %v6448_v63 = vadd.f32 %v6274_v48, %v19419_v19  ;;  %v6285_v28 = vadd.f32 %v16588_v3, %v11903_v57  ;;  %v8060_v37 = vpack.c.bf16 %v7935_v23, %v7934_v50  ;;  %v6703_v50 = vpop.permute.xlu1 %6702 }
 0x565   :  { %v6276_v43 = vpop.f32.mrf.mxu0  ;;  %v11931_v53 = vpop.f32.mrf.mxu1  ;;  %v7460_v60 = vadd.f32 %v11930_v27, %v16927_v17  ;;  %v7452_v48 = vadd.f32 %v16927_v17, %v7451_v26  ;;  %v7159_v23 = vpack.c.bf16 %v7087_v5, %v7086_v16 }
 0x566   :  { %v6451_v45 = vadd.f32 %v6285_v28, %v19421_v18  ;;  %v6277_v4 = vadd.f32 %v16588_v3, %v6276_v43  ;;  %v7463_v57 = vadd.f32 %v11931_v53, %v16927_v17  ;;  %12056 = vmatprep.mubr.msk.bf16.mxu0 %vm2098_vm2, %v8060_v37  ;;  %v7158_v7 = vpack.c.bf16 %v7085_v36, %v7084_v52  ;;  %v6701_v27 = vpop.permute.xlu0 %6700 }
 0x567   :  { %v11906_v19 = vpop.f32.mrf.mxu0  ;;  %v17035_v55 = vadd.f32 %v16962_v47, %v6448_v63  ;;  %v7454_v43 = vpop.f32.mrf.mxu1  ;;  %12057 = vmatmul.mubr.msk.bf16.gmra.mxu0 %vm2098_vm2, %v8061_v29  ;;  %v17043_v53 = vadd.f32 %v16988_v41, %v6450_v38  ;;  %v7938_v52 = vmax.f32 %v7452_v48, 0.0  ;;  %v7940_v16 = vmax.f32 %v7460_v60, 0.0 }
 0x568   :  { %v17038_v51 = vadd.f32 %v16982_v56, %v6451_v45  ;;  %v6449_v28 = vadd.f32 %v6277_v4, %v19424_v31  ;;  %v7455_v26 = vadd.f32 %v16927_v17, %v7454_v43  ;;  %12028 = vmatprep.mubr.msk.bf16.mxu1 %vm2098_vm2, %v7158_v7  ;;  %v7941_v36 = vmax.f32 %v7463_v57, 0.0  ;;  %v19428_v43 = vld [vmem:[#allocation78_spill] sm:$0xff] }
 0x569   :  { %19422 = vst [vmem:[#allocation149_spill] sm:$0xff] %v17035_v55  ;;  %19425 = vst [vmem:[#allocation228_spill] sm:$0xff] %v17043_v53  ;;  %v6289_v5 = vpop.f32.mrf.mxu0  ;;  %v6298_v56 = vadd.f32 %v16588_v3, %v11906_v19  ;;  %v11934_v63 = vpop.f32.mrf.mxu1  ;;  %12029 = vmatmul.mubr.msk.bf16.gmra.mxu1 %vm2098_vm2, %v7159_v23  ;;  %v7088_v38 = vmax.f32 %v17035_v55, 0.0  ;;  %v7090_v45 = vmax.f32 %v17043_v53, 0.0  ;;  %v19427_v19 = vld [vmem:[#allocation279_spill] sm:$0xff] }
 0x56a   :  { %19423 = vst [vmem:[#allocation227_spill] sm:$0xff] %v17038_v51  ;;  %v17048_v47 = vadd.f32 %v16957_v2, %v6449_v28  ;;  %v6290_v4 = vadd.f32 %v16588_v3, %v6289_v5  ;;  %v7939_v37 = vmax.f32 %v7455_v26, 0.0  ;;  %v7091_v29 = vmax.f32 %v17038_v51, 0.0  ;;  %v17059_v23 = vpop.permute.xlu1 %6706  ;;  %v6705_v55 = vpop.permute.xlu0 %6704 }
 0x56b   :  { %v11907_v41 = vpop.f32.mrf.mxu0  ;;  %v7467_v2 = vpop.f32.mrf.mxu1  ;;  %v8063_v48 = vpack.c.bf16 %v7941_v36, %v7940_v16  ;;  %v6454_v26 = vadd.f32 %v6298_v56, %v19428_v43  ;;  %v19430_v36 = vld [vmem:[#allocation77_spill] sm:$0xff] }
 0x56c   :  { %19426 = vst [vmem:[#allocation153_spill] sm:$0xff] %v17048_v47  ;;  %v7089_v18 = vmax.f32 %v17048_v47, 0.0  ;;  %v8062_v57 = vpack.c.bf16 %v7939_v37, %v7938_v52  ;;  %v6452_v7 = vadd.f32 %v6290_v4, %v19427_v19  ;;  %v6301_v31 = vadd.f32 %v16588_v3, %v11907_v41 }
 0x56d   :  { %v6292_v28 = vpop.f32.mrf.mxu0  ;;  %v11935_v5 = vpop.f32.mrf.mxu1  ;;  %v7476_v47 = vadd.f32 %v11934_v63, %v16927_v17  ;;  %v7468_v52 = vadd.f32 %v16927_v17, %v7467_v2  ;;  %v7161_v41 = vpack.c.bf16 %v7091_v29, %v7090_v45 }
 0x56e   :  { %v6293_v60 = vadd.f32 %v16588_v3, %v6292_v28  ;;  %v7160_v51 = vpack.c.bf16 %v7089_v18, %v7088_v38  ;;  %v6455_v53 = vadd.f32 %v6301_v31, %v19429_v6  ;;  %v7479_v4 = vadd.f32 %v11935_v5, %v16927_v17  ;;  %12060 = vmatprep.mubr.msk.bf16.mxu0 %vm2098_vm2, %v8062_v57 }
 0x56f   :  { %v11910_v37 = vpop.f32.mrf.mxu0  ;;  %v7470_v56 = vpop.f32.mrf.mxu1  ;;  %12061 = vmatmul.mubr.msk.bf16.gmra.mxu0 %vm2098_vm2, %v8063_v48  ;;  %v17072_v38 = vadd.f32 %v17019_v11, %v6452_v7  ;;  %v17078_v57 = vadd.f32 %v6701_v27, %v6454_v26  ;;  %v7944_v11 = vmax.f32 %v7476_v47, 0.0  ;;  %v19432_v27 = vld [vmem:[#allocation176_spill] sm:$0xff] }
 0x570   :  { %v6453_v16 = vadd.f32 %v6293_v60, %v19430_v36  ;;  %12032 = vmatprep.mubr.msk.bf16.mxu1 %vm2098_vm2, %v7160_v51  ;;  %v17074_v63 = vadd.f32 %v6703_v50, %v6455_v53  ;;  %v6314_v6 = vadd.f32 %v16588_v3, %v11910_v37  ;;  %v7471_v18 = vadd.f32 %v16927_v17, %v7470_v56  ;;  %v6711_v7 = vpop.permute.xlu1 %6710  ;;  %v6709_v60 = vpop.permute.xlu0 %6708 }
 0x571   :  { %v6305_v2 = vpop.f32.mrf.mxu0  ;;  %v7945_v45 = vmax.f32 %v7479_v4, 0.0  ;;  %v11938_v31 = vpop.f32.mrf.mxu1  ;;  %12033 = vmatmul.mubr.msk.bf16.gmra.mxu1 %vm2098_vm2, %v7161_v41  ;;  %v7942_v51 = vmax.f32 %v7468_v52, 0.0  ;;  %v7092_v5 = vmax.f32 %v17072_v38, 0.0  ;;  %v19433_v4 = vld [vmem:[#allocation183_spill] sm:$0xff]  ;;  %v7094_v52 = vmax.f32 %v17078_v57, 0.0 }
 0x572   :  { %v17081_v29 = vadd.f32 %v17009_v42, %v6453_v16  ;;  %v6306_v19 = vadd.f32 %v16588_v3, %v6305_v2  ;;  %v7943_v50 = vmax.f32 %v7471_v18, 0.0  ;;  %v7095_v28 = vmax.f32 %v17074_v63, 0.0  ;;  %v19434_v16 = vld [vmem:[#allocation180_spill] sm:$0xff] }
 0x573   :  { %v11911_v53 = vpop.f32.mrf.mxu0  ;;  %v7483_v26 = vpop.f32.mrf.mxu1  ;;  %v6458_v37 = vadd.f32 %v6314_v6, %v19433_v4  ;;  %v8065_v36 = vpack.c.bf16 %v7945_v45, %v7944_v11  ;;  %v19436_v45 = vld [vmem:[#allocation81_spill] sm:$0xff] }
 0x574   :  { %19431 = vst [vmem:[#allocation226_spill] sm:$0xff] %v17081_v29  ;;  %v7093_v48 = vmax.f32 %v17081_v29, 0.0  ;;  %v6456_v43 = vadd.f32 %v6306_v19, %v19432_v27  ;;  %v6317_v42 = vadd.f32 %v16588_v3, %v11911_v53  ;;  %v8064_v41 = vpack.c.bf16 %v7943_v50, %v7942_v51 }
 0x575   :  { %v6308_v47 = vpop.f32.mrf.mxu0  ;;  %v11939_v2 = vpop.f32.mrf.mxu1  ;;  %v7492_v19 = vadd.f32 %v11938_v31, %v16927_v17  ;;  %v7484_v53 = vadd.f32 %v16927_v17, %v7483_v26  ;;  %v7163_v51 = vpack.c.bf16 %v7095_v28, %v7094_v52 }
 0x576   :  { %v6459_v56 = vadd.f32 %v6317_v42, %v19434_v16  ;;  %v6309_v18 = vadd.f32 %v16588_v3, %v6308_v47  ;;  %v7495_v27 = vadd.f32 %v11939_v2, %v16927_v17  ;;  %12064 = vmatprep.mubr.msk.bf16.mxu0 %vm2098_vm2, %v8064_v41  ;;  %v7162_v6 = vpack.c.bf16 %v7093_v48, %v7092_v5  ;;  %v6715_v41 = vpop.permute.xlu1 %6714  ;;  %v6713_v5 = vpop.permute.xlu0 %6712 }
 0x577   :  { %v11914_v29 = vpop.f32.mrf.mxu0  ;;  %v17098_v50 = vadd.f32 %v6705_v55, %v6456_v43  ;;  %v7486_v42 = vpop.f32.mrf.mxu1  ;;  %12065 = vmatmul.mubr.msk.bf16.gmra.mxu0 %vm2098_vm2, %v8065_v36  ;;  %v17104_v47 = vadd.f32 %v6709_v60, %v6458_v37  ;;  %v7948_v60 = vmax.f32 %v7492_v19, 0.0  ;;  %v7946_v37 = vmax.f32 %v7484_v53, 0.0 }
 0x578   :  { %v17100_v4 = vadd.f32 %v6711_v7, %v6459_v56  ;;  %v6457_v11 = vadd.f32 %v6309_v18, %v19436_v45  ;;  %v7487_v31 = vadd.f32 %v16927_v17, %v7486_v42  ;;  %12036 = vmatprep.mubr.msk.bf16.mxu1 %vm2098_vm2, %v7162_v6  ;;  %v7949_v55 = vmax.f32 %v7495_v27, 0.0  ;;  %v19439_v18 = vld [vmem:[#allocation179_spill] sm:$0xff]  ;;  %v12405_v6 = vld [vmem:[%s17780_s6 + $0x1] ss:$0 sm:$0xff]  ;;  %v19440_v45 = vld [vmem:[#allocation280_spill] sm:$0xff] }
 0x579   :  { %19437 = vst [vmem:[#allocation158_spill] sm:$0xff] %v17104_v47  ;;  %v6321_v26 = vpop.f32.mrf.mxu0  ;;  %v6330_v7 = vadd.f32 %v16588_v3, %v11914_v29  ;;  %v11942_v43 = vpop.f32.mrf.mxu1  ;;  %12037 = vmatmul.mubr.msk.bf16.gmra.mxu1 %vm2098_vm2, %v7163_v51  ;;  %v7096_v16 = vmax.f32 %v17098_v50, 0.0  ;;  %v7098_v29 = vmax.f32 %v17104_v47, 0.0 }
 0x57a   :  { %19435 = vst [vmem:[#allocation154_spill] sm:$0xff] %v17100_v4  ;;  %v17109_v48 = vadd.f32 %v17059_v23, %v6457_v11  ;;  %v6322_v28 = vadd.f32 %v16588_v3, %v6321_v26  ;;  %v7947_v52 = vmax.f32 %v7487_v31, 0.0  ;;  %v7099_v56 = vmax.f32 %v17100_v4, 0.0  ;;  %v19441_v4 = vld [vmem:[#allocation82_spill] sm:$0xff] }
 0x57b   :  { %v11915_v36 = vpop.f32.mrf.mxu0  ;;  %v7499_v27 = vpop.f32.mrf.mxu1  ;;  %v8067_v51 = vpack.c.bf16 %v7949_v55, %v7948_v60  ;;  %v6462_v11 = vadd.f32 %v6330_v7, %v19440_v45  ;;  %v19442_v55 = vld [vmem:[#allocation281_spill] sm:$0xff] }
 0x57c   :  { %19438 = vst [vmem:[#allocation157_spill] sm:$0xff] %v17109_v48  ;;  %v7097_v23 = vmax.f32 %v17109_v48, 0.0  ;;  %v6460_v2 = vadd.f32 %v6322_v28, %v19439_v18  ;;  %v8066_v3 = vpack.c.bf16 %v7947_v52, %v7946_v37  ;;  %v6333_v19 = vadd.f32 %v12405_v6, %v11915_v36  ;;  %v6719_v52 = vpop.permute.xlu1 %6718 }
 0x57d   :  { %v6324_v53 = vpop.f32.mrf.mxu0  ;;  %v11943_v31 = vpop.f32.mrf.mxu1  ;;  %v7508_v48 = vadd.f32 %v11942_v43, %v16927_v17  ;;  %v7500_v18 = vadd.f32 %v16927_v17, %v7499_v27  ;;  %v7165_v47 = vpack.c.bf16 %v7099_v56, %v7098_v29 }
 0x57e   :  { %v6325_v42 = vadd.f32 %v12405_v6, %v6324_v53  ;;  %v7164_v26 = vpack.c.bf16 %v7097_v23, %v7096_v16  ;;  %v6463_v28 = vadd.f32 %v6333_v19, %v19441_v4  ;;  %v7511_v37 = vadd.f32 %v11943_v31, %v16927_v17  ;;  %12068 = vmatprep.mubr.msk.bf16.mxu0 %vm2098_vm2, %v8066_v3  ;;  %v6717_v43 = vpop.permute.xlu0 %6716 }
 0x57f   :  { %v17128_v36 = vadd.f32 %v6713_v5, %v6460_v2  ;;  %v7502_v7 = vpop.f32.mrf.mxu1  ;;  %12069 = vmatmul.mubr.msk.bf16.gmra.mxu0 %vm2098_vm2, %v8067_v51  ;;  %v17136_v23 = vadd.f32 %v6717_v43, %v6462_v11  ;;  %v7950_v5 = vmax.f32 %v7500_v18, 0.0  ;;  %v7952_v6 = vmax.f32 %v7508_v48, 0.0 }
 0x580   :  { %v6461_v60 = vadd.f32 %v6325_v42, %v19442_v55  ;;  %12040 = vmatprep.mubr.msk.bf16.mxu1 %vm2098_vm2, %v7164_v26  ;;  %v17133_v16 = vadd.f32 %v6719_v52, %v6463_v28  ;;  %v7503_v4 = vadd.f32 %v16927_v17, %v7502_v7  ;;  %v7953_v3 = vmax.f32 %v7511_v37, 0.0 }
 0x581   :  { %v11946_v56 = vpop.f32.mrf.mxu1  ;;  %12041 = vmatmul.mubr.msk.bf16.gmra.mxu1 %vm2098_vm2, %v7165_v47  ;;  %v7100_v29 = vmax.f32 %v17128_v36, 0.0  ;;  %v7102_v11 = vmax.f32 %v17136_v23, 0.0 }
 0x582   :  { %v17138_v27 = vadd.f32 %v6715_v41, %v6461_v60  ;;  %v7951_v2 = vmax.f32 %v7503_v4, 0.0  ;;  %v7103_v19 = vmax.f32 %v17133_v16, 0.0  ;;  %v8069_v42 = vpack.c.bf16 %v7953_v3, %v7952_v6 }
 0x583   :  { %v7515_v51 = vpop.f32.mrf.mxu1  ;;  %v7524_v48 = vadd.f32 %v11946_v56, %v16927_v17 }
 0x584   :  { %19443 = vst [vmem:[#allocation229_spill] sm:$0xff] %v17138_v27  ;;  %v7101_v53 = vmax.f32 %v17138_v27, 0.0  ;;  %v8068_v45 = vpack.c.bf16 %v7951_v2, %v7950_v5  ;;  %v7516_v26 = vadd.f32 %v16927_v17, %v7515_v51  ;;  %v7167_v28 = vpack.c.bf16 %v7103_v19, %v7102_v11 }
 0x585   :  { %v11947_v41 = vpop.f32.mrf.mxu1  ;;  %v7956_v43 = vmax.f32 %v7524_v48, 0.0 }
 0x586   :  { %v7166_v31 = vpack.c.bf16 %v7101_v53, %v7100_v29  ;;  %v7527_v47 = vadd.f32 %v11947_v41, %v16927_v17  ;;  %12072 = vmatprep.mubr.msk.bf16.mxu0 %vm2098_vm2, %v8068_v45  ;;  %v7954_v60 = vmax.f32 %v7516_v26, 0.0 }
 0x587   :  { %v7518_v18 = vpop.f32.mrf.mxu1  ;;  %12073 = vmatmul.mubr.msk.bf16.gmra.mxu0 %vm2098_vm2, %v8069_v42 }
 0x588   :  { %12044 = vmatprep.mubr.msk.bf16.mxu1 %vm2098_vm2, %v7166_v31  ;;  %v7519_v37 = vadd.f32 %v16927_v17, %v7518_v18  ;;  %v7957_v52 = vmax.f32 %v7527_v47, 0.0 }
 0x589   :  { %v11950_v55 = vpop.f32.mrf.mxu1  ;;  %12045 = vmatmul.mubr.msk.bf16.gmra.mxu1 %vm2098_vm2, %v7167_v28 }
 0x58a   :  { %v7955_v7 = vmax.f32 %v7519_v37, 0.0  ;;  %v8071_v5 = vpack.c.bf16 %v7957_v52, %v7956_v43  ;;  %v7540_v6 = vadd.f32 %v11950_v55, %v16927_v17 }
 0x58b   :  { %v7531_v4 = vpop.f32.mrf.mxu1 }
 0x58c   :  { %v8070_v3 = vpack.c.bf16 %v7955_v7, %v7954_v60  ;;  %v7532_v56 = vadd.f32 %v16927_v17, %v7531_v4  ;;  %v7960_v41 = vmax.f32 %v7540_v6, 0.0 }
 0x58d   :  { %v11951_v2 = vpop.f32.mrf.mxu1 }
 0x58e   :  { %v7543_v29 = vadd.f32 %v11951_v2, %v16927_v17  ;;  %12076 = vmatprep.mubr.msk.bf16.mxu0 %vm2098_vm2, %v8070_v3  ;;  %v7958_v11 = vmax.f32 %v7532_v56, 0.0 }
 0x58f   :  { %v7534_v19 = vpop.f32.mrf.mxu1  ;;  %12077 = vmatmul.mubr.msk.bf16.gmra.mxu0 %vm2098_vm2, %v8071_v5 }
 0x590   :  { %v7535_v53 = vadd.f32 %v16927_v17, %v7534_v19  ;;  %v7961_v51 = vmax.f32 %v7543_v29, 0.0 }
 0x591   :  { %v11954_v45 = vpop.f32.mrf.mxu1 }
 0x592   :  { %v7959_v42 = vmax.f32 %v7535_v53, 0.0  ;;  %v8073_v47 = vpack.c.bf16 %v7961_v51, %v7960_v41  ;;  %v7556_v37 = vadd.f32 %v11954_v45, %v16927_v17 }
 0x593   :  { %v7547_v31 = vpop.f32.mrf.mxu1 }
 0x594   :  { %v8072_v26 = vpack.c.bf16 %v7959_v42, %v7958_v11  ;;  %v7548_v48 = vadd.f32 %v16927_v17, %v7547_v31  ;;  %v7964_v3 = vmax.f32 %v7556_v37, 0.0 }
 0x595   :  { %v11955_v28 = vpop.f32.mrf.mxu1 }
 0x596   :  { %v7559_v18 = vadd.f32 %v11955_v28, %v16927_v17  ;;  %12080 = vmatprep.mubr.msk.bf16.mxu0 %vm2098_vm2, %v8072_v26  ;;  %v7962_v43 = vmax.f32 %v7548_v48, 0.0 }
 0x597   :  { %v7550_v52 = vpop.f32.mrf.mxu1  ;;  %12081 = vmatmul.mubr.msk.bf16.gmra.mxu0 %vm2098_vm2, %v8073_v47 }
 0x598   :  { %v7551_v55 = vadd.f32 %v16927_v17, %v7550_v52  ;;  %v7965_v60 = vmax.f32 %v7559_v18, 0.0 }
 0x599   :  { %v11958_v7 = vpop.f32.mrf.mxu1 }
 0x59a   :  { %v7963_v4 = vmax.f32 %v7551_v55, 0.0  ;;  %v8075_v56 = vpack.c.bf16 %v7965_v60, %v7964_v3  ;;  %v7572_v53 = vadd.f32 %v11958_v7, %v16927_v17 }
 0x59b   :  { %v7563_v5 = vpop.f32.mrf.mxu1 }
 0x59c   :  { %v8074_v2 = vpack.c.bf16 %v7963_v4, %v7962_v43  ;;  %v7564_v6 = vadd.f32 %v16927_v17, %v7563_v5  ;;  %v7968_v26 = vmax.f32 %v7572_v53, 0.0 }
 0x59d   :  { %v11959_v29 = vpop.f32.mrf.mxu1 }
 0x59e   :  { %v7575_v19 = vadd.f32 %v11959_v29, %v16927_v17  ;;  %12084 = vmatprep.mubr.msk.bf16.mxu0 %vm2098_vm2, %v8074_v2  ;;  %v7966_v41 = vmax.f32 %v7564_v6, 0.0 }
 0x59f   :  { %v7566_v51 = vpop.f32.mrf.mxu1  ;;  %12085 = vmatmul.mubr.msk.bf16.gmra.mxu0 %vm2098_vm2, %v8075_v56 }
 0x5a0   :  { %v7567_v45 = vadd.f32 %v16927_v17, %v7566_v51  ;;  %v7969_v11 = vmax.f32 %v7575_v19, 0.0 }
 0x5a1   :  { %v11962_v42 = vpop.f32.mrf.mxu1 }
 0x5a2   :  { %v7967_v31 = vmax.f32 %v7567_v45, 0.0  ;;  %v8077_v48 = vpack.c.bf16 %v7969_v11, %v7968_v26  ;;  %v7588_v55 = vadd.f32 %v11962_v42, %v16927_v17 }
 0x5a3   :  { %v7579_v47 = vpop.f32.mrf.mxu1 }
 0x5a4   :  { %v8076_v28 = vpack.c.bf16 %v7967_v31, %v7966_v41  ;;  %v7580_v37 = vadd.f32 %v16927_v17, %v7579_v47  ;;  %v7972_v2 = vmax.f32 %v7588_v55, 0.0 }
 0x5a5   :  { %v11963_v18 = vpop.f32.mrf.mxu1 }
 0x5a6   :  { %v7591_v52 = vadd.f32 %v11963_v18, %v16927_v17  ;;  %12088 = vmatprep.mubr.msk.bf16.mxu0 %vm2098_vm2, %v8076_v28  ;;  %v7970_v3 = vmax.f32 %v7580_v37, 0.0 }
 0x5a7   :  { %v7582_v60 = vpop.f32.mrf.mxu1  ;;  %12089 = vmatmul.mubr.msk.bf16.gmra.mxu0 %vm2098_vm2, %v8077_v48 }
 0x5a8   :  { %v7583_v7 = vadd.f32 %v16927_v17, %v7582_v60  ;;  %v7973_v43 = vmax.f32 %v7591_v52, 0.0 }
 0x5a9   :  { %v11966_v4 = vpop.f32.mrf.mxu1 }
 0x5aa   :  { %v7971_v5 = vmax.f32 %v7583_v7, 0.0  ;;  %v8079_v6 = vpack.c.bf16 %v7973_v43, %v7972_v2  ;;  %v7604_v45 = vadd.f32 %v11966_v4, %v16927_v17 }
 0x5ab   :  { %v7595_v56 = vpop.f32.mrf.mxu1 }
 0x5ac   :  { %v8078_v29 = vpack.c.bf16 %v7971_v5, %v7970_v3  ;;  %v7596_v53 = vadd.f32 %v16927_v17, %v7595_v56  ;;  %v7976_v28 = vmax.f32 %v7604_v45, 0.0 }
 0x5ad   :  { %v11967_v19 = vpop.f32.mrf.mxu1 }
 0x5ae   :  { %v7607_v51 = vadd.f32 %v11967_v19, %v16927_v17  ;;  %12092 = vmatprep.mubr.msk.bf16.mxu0 %vm2098_vm2, %v8078_v29  ;;  %v7974_v26 = vmax.f32 %v7596_v53, 0.0 }
 0x5af   :  { %v7598_v11 = vpop.f32.mrf.mxu1  ;;  %12093 = vmatmul.mubr.msk.bf16.gmra.mxu0 %vm2098_vm2, %v8079_v6 }
 0x5b0   :  { %v7599_v42 = vadd.f32 %v16927_v17, %v7598_v11  ;;  %v7977_v41 = vmax.f32 %v7607_v51, 0.0 }
 0x5b1   :  { %v11970_v31 = vpop.f32.mrf.mxu1 }
 0x5b2   :  { %v7975_v47 = vmax.f32 %v7599_v42, 0.0  ;;  %v8081_v37 = vpack.c.bf16 %v7977_v41, %v7976_v28  ;;  %v7620_v7 = vadd.f32 %v11970_v31, %v16927_v17 }
 0x5b3   :  { %v7611_v48 = vpop.f32.mrf.mxu1 }
 0x5b4   :  { %v8080_v18 = vpack.c.bf16 %v7975_v47, %v7974_v26  ;;  %v7612_v55 = vadd.f32 %v16927_v17, %v7611_v48  ;;  %v7980_v29 = vmax.f32 %v7620_v7, 0.0 }
 0x5b5   :  { %v11971_v52 = vpop.f32.mrf.mxu1 }
 0x5b6   :  { %v7623_v60 = vadd.f32 %v11971_v52, %v16927_v17  ;;  %12096 = vmatprep.mubr.msk.bf16.mxu0 %vm2098_vm2, %v8080_v18  ;;  %v7978_v2 = vmax.f32 %v7612_v55, 0.0 }
 0x5b7   :  { %v7614_v43 = vpop.f32.mrf.mxu1  ;;  %12097 = vmatmul.mubr.msk.bf16.gmra.mxu0 %vm2098_vm2, %v8081_v37 }
 0x5b8   :  { %v7615_v4 = vadd.f32 %v16927_v17, %v7614_v43  ;;  %v7981_v3 = vmax.f32 %v7623_v60, 0.0 }
 0x5b9   :  { %v11974_v5 = vpop.f32.mrf.mxu1 }
 0x5ba   :  { %v7979_v56 = vmax.f32 %v7615_v4, 0.0  ;;  %v8083_v53 = vpack.c.bf16 %v7981_v3, %v7980_v29  ;;  %v7636_v42 = vadd.f32 %v11974_v5, %v16927_v17 }
 0x5bb   :  { %v7627_v6 = vpop.f32.mrf.mxu1 }
 0x5bc   :  { %v8082_v19 = vpack.c.bf16 %v7979_v56, %v7978_v2  ;;  %v7628_v45 = vadd.f32 %v16927_v17, %v7627_v6  ;;  %v7984_v18 = vmax.f32 %v7636_v42, 0.0 }
 0x5bd   :  { %v11975_v51 = vpop.f32.mrf.mxu1 }
 0x5be   :  { %v7639_v11 = vadd.f32 %v11975_v51, %v16927_v17  ;;  %12100 = vmatprep.mubr.msk.bf16.mxu0 %vm2098_vm2, %v8082_v19  ;;  %v7982_v28 = vmax.f32 %v7628_v45, 0.0 }
 0x5bf   :  { %v7630_v41 = vpop.f32.mrf.mxu1  ;;  %12101 = vmatmul.mubr.msk.bf16.gmra.mxu0 %vm2098_vm2, %v8083_v53 }
 0x5c0   :  { %v7631_v31 = vadd.f32 %v16927_v17, %v7630_v41  ;;  %v7985_v26 = vmax.f32 %v7639_v11, 0.0 }
 0x5c1   :  { %v11978_v47 = vpop.f32.mrf.mxu1 }
 0x5c2   :  { %v7983_v48 = vmax.f32 %v7631_v31, 0.0  ;;  %v8085_v55 = vpack.c.bf16 %v7985_v26, %v7984_v18  ;;  %v7652_v4 = vadd.f32 %v11978_v47, %v16927_v17 }
 0x5c3   :  { %v7643_v37 = vpop.f32.mrf.mxu1 }
 0x5c4   :  { %v8084_v52 = vpack.c.bf16 %v7983_v48, %v7982_v28  ;;  %v7644_v7 = vadd.f32 %v16927_v17, %v7643_v37  ;;  %v7988_v19 = vmax.f32 %v7652_v4, 0.0 }
 0x5c5   :  { %v11979_v60 = vpop.f32.mrf.mxu1 }
 0x5c6   :  { %v7655_v43 = vadd.f32 %v11979_v60, %v16927_v17  ;;  %12104 = vmatprep.mubr.msk.bf16.mxu0 %vm2098_vm2, %v8084_v52  ;;  %v7986_v29 = vmax.f32 %v7644_v7, 0.0 }
 0x5c7   :  { %v7646_v3 = vpop.f32.mrf.mxu1  ;;  %12105 = vmatmul.mubr.msk.bf16.gmra.mxu0 %vm2098_vm2, %v8085_v55 }
 0x5c8   :  { %v7647_v5 = vadd.f32 %v16927_v17, %v7646_v3  ;;  %v7989_v2 = vmax.f32 %v7655_v43, 0.0 }
 0x5c9   :  { %v11982_v56 = vpop.f32.mrf.mxu1 }
 0x5ca   :  { %v7987_v6 = vmax.f32 %v7647_v5, 0.0  ;;  %v8087_v45 = vpack.c.bf16 %v7989_v2, %v7988_v19  ;;  %v7668_v31 = vadd.f32 %v11982_v56, %v16927_v17 }
 0x5cb   :  { %v7659_v53 = vpop.f32.mrf.mxu1 }
 0x5cc   :  { %v8086_v51 = vpack.c.bf16 %v7987_v6, %v7986_v29  ;;  %v7660_v42 = vadd.f32 %v16927_v17, %v7659_v53  ;;  %v7992_v52 = vmax.f32 %v7668_v31, 0.0 }
 0x5cd   :  { %v11983_v11 = vpop.f32.mrf.mxu1 }
 0x5ce   :  { %v7671_v41 = vadd.f32 %v11983_v11, %v16927_v17  ;;  %12108 = vmatprep.mubr.msk.bf16.mxu0 %vm2098_vm2, %v8086_v51  ;;  %v7990_v18 = vmax.f32 %v7660_v42, 0.0 }
 0x5cf   :  { %v7662_v26 = vpop.f32.mrf.mxu1  ;;  %12109 = vmatmul.mubr.msk.bf16.gmra.mxu0 %vm2098_vm2, %v8087_v45 }
 0x5d0   :  { %v7663_v47 = vadd.f32 %v16927_v17, %v7662_v26  ;;  %v7993_v28 = vmax.f32 %v7671_v41, 0.0 }
 0x5d1   :  { %v11986_v48 = vpop.f32.mrf.mxu1 }
 0x5d2   :  { %v7991_v37 = vmax.f32 %v7663_v47, 0.0  ;;  %v8089_v7 = vpack.c.bf16 %v7993_v28, %v7992_v52  ;;  %v7684_v5 = vadd.f32 %v11986_v48, %v16927_v17 }
 0x5d3   :  { %v7675_v55 = vpop.f32.mrf.mxu1 }
 0x5d4   :  { %v8088_v60 = vpack.c.bf16 %v7991_v37, %v7990_v18  ;;  %v7676_v4 = vadd.f32 %v16927_v17, %v7675_v55  ;;  %v7996_v51 = vmax.f32 %v7684_v5, 0.0 }
 0x5d5   :  { %v11987_v43 = vpop.f32.mrf.mxu1 }
 0x5d6   :  { %v7687_v3 = vadd.f32 %v11987_v43, %v16927_v17  ;;  %12112 = vmatprep.mubr.msk.bf16.mxu0 %vm2098_vm2, %v8088_v60  ;;  %v7994_v19 = vmax.f32 %v7676_v4, 0.0 }
 0x5d7   :  { %v7678_v2 = vpop.f32.mrf.mxu1  ;;  %12113 = vmatmul.mubr.msk.bf16.gmra.mxu0 %vm2098_vm2, %v8089_v7 }
 0x5d8   :  { %v7679_v56 = vadd.f32 %v16927_v17, %v7678_v2  ;;  %v7997_v29 = vmax.f32 %v7687_v3, 0.0 }
 0x5d9   :  { %v11990_v6 = vpop.f32.mrf.mxu1 }
 0x5da   :  { %v7995_v53 = vmax.f32 %v7679_v56, 0.0  ;;  %v8091_v42 = vpack.c.bf16 %v7997_v29, %v7996_v51  ;;  %v7700_v47 = vadd.f32 %v11990_v6, %v16927_v17 }
 0x5db   :  { %v7691_v45 = vpop.f32.mrf.mxu1 }
 0x5dc   :  { %v8090_v11 = vpack.c.bf16 %v7995_v53, %v7994_v19  ;;  %v7692_v31 = vadd.f32 %v16927_v17, %v7691_v45  ;;  %v8000_v60 = vmax.f32 %v7700_v47, 0.0 }
 0x5dd   :  { %v11991_v41 = vpop.f32.mrf.mxu1 }
 0x5de   :  { %v7703_v26 = vadd.f32 %v11991_v41, %v16927_v17  ;;  %12116 = vmatprep.mubr.msk.bf16.mxu0 %vm2098_vm2, %v8090_v11  ;;  %v7998_v52 = vmax.f32 %v7692_v31, 0.0 }
 0x5df   :  { %v7694_v28 = vpop.f32.mrf.mxu1  ;;  %12117 = vmatmul.mubr.msk.bf16.gmra.mxu0 %vm2098_vm2, %v8091_v42 }
 0x5e0   :  { %v7695_v48 = vadd.f32 %v16927_v17, %v7694_v28  ;;  %v8001_v18 = vmax.f32 %v7703_v26, 0.0 }
 0x5e1   :  { %v11994_v37 = vpop.f32.mrf.mxu1 }
 0x5e2   :  { %v7999_v55 = vmax.f32 %v7695_v48, 0.0  ;;  %v8093_v4 = vpack.c.bf16 %v8001_v18, %v8000_v60  ;;  %v7716_v56 = vadd.f32 %v11994_v37, %v16927_v17 }
 0x5e3   :  { %v7707_v7 = vpop.f32.mrf.mxu1 }
 0x5e4   :  { %v8092_v43 = vpack.c.bf16 %v7999_v55, %v7998_v52  ;;  %v7708_v5 = vadd.f32 %v16927_v17, %v7707_v7  ;;  %v8004_v11 = vmax.f32 %v7716_v56, 0.0 }
 0x5e5   :  { %v11995_v3 = vpop.f32.mrf.mxu1 }
 0x5e6   :  { %v7719_v2 = vadd.f32 %v11995_v3, %v16927_v17  ;;  %12120 = vmatprep.mubr.msk.bf16.mxu0 %vm2098_vm2, %v8092_v43  ;;  %v8002_v51 = vmax.f32 %v7708_v5, 0.0 }
 0x5e7   :  { %v7710_v29 = vpop.f32.mrf.mxu1  ;;  %12121 = vmatmul.mubr.msk.bf16.gmra.mxu0 %vm2098_vm2, %v8093_v4 }
 0x5e8   :  { %v7711_v6 = vadd.f32 %v16927_v17, %v7710_v29  ;;  %v8005_v19 = vmax.f32 %v7719_v2, 0.0 }
 0x5e9   :  { %v11998_v53 = vpop.f32.mrf.mxu1 }
 0x5ea   :  { %v8003_v45 = vmax.f32 %v7711_v6, 0.0  ;;  %v8095_v31 = vpack.c.bf16 %v8005_v19, %v8004_v11  ;;  %v7732_v48 = vadd.f32 %v11998_v53, %v16927_v17 }
 0x5eb   :  { %v7723_v42 = vpop.f32.mrf.mxu1 }
 0x5ec   :  { %v8094_v41 = vpack.c.bf16 %v8003_v45, %v8002_v51  ;;  %v7724_v47 = vadd.f32 %v16927_v17, %v7723_v42  ;;  %v8008_v43 = vmax.f32 %v7732_v48, 0.0 }
 0x5ed   :  { %v11999_v26 = vpop.f32.mrf.mxu1 }
 0x5ee   :  { %v7735_v28 = vadd.f32 %v11999_v26, %v16927_v17  ;;  %12124 = vmatprep.mubr.msk.bf16.mxu0 %vm2098_vm2, %v8094_v41  ;;  %v8006_v60 = vmax.f32 %v7724_v47, 0.0 }
 0x5ef   :  { %v7726_v18 = vpop.f32.mrf.mxu1  ;;  %12125 = vmatmul.mubr.msk.bf16.gmra.mxu0 %vm2098_vm2, %v8095_v31 }
 0x5f0   :  { %v7727_v37 = vadd.f32 %v16927_v17, %v7726_v18  ;;  %v8009_v52 = vmax.f32 %v7735_v28, 0.0  ;;  %v17241_v18 = vld [vmem:[%s17778_s4 + $0x2] ss:$0 sm:$0xff] }
 0x5f1   :  { %v12002_v55 = vpop.f32.mrf.mxu1 }
 0x5f2   :  { %v8007_v7 = vmax.f32 %v7727_v37, 0.0  ;;  %v8097_v5 = vpack.c.bf16 %v8009_v52, %v8008_v43  ;;  %v7748_v6 = vadd.f32 %v12002_v55, %v16927_v17 }
 0x5f3   :  { %v7739_v4 = vpop.f32.mrf.mxu1 }
 0x5f4   :  { %v8096_v3 = vpack.c.bf16 %v8007_v7, %v8006_v60  ;;  %v7740_v56 = vadd.f32 %v16927_v17, %v7739_v4  ;;  %v8012_v41 = vmax.f32 %v7748_v6, 0.0 }
 0x5f5   :  { %v12003_v2 = vpop.f32.mrf.mxu1 }
 0x5f6   :  { %v7751_v29 = vadd.f32 %v12003_v2, %v16927_v17  ;;  %12128 = vmatprep.mubr.msk.bf16.mxu0 %vm2098_vm2, %v8096_v3  ;;  %v8010_v11 = vmax.f32 %v7740_v56, 0.0 }
 0x5f7   :  { %v7742_v19 = vpop.f32.mrf.mxu1  ;;  %12129 = vmatmul.mubr.msk.bf16.gmra.mxu0 %vm2098_vm2, %v8097_v5 }
 0x5f8   :  { %v7743_v53 = vadd.f32 %v16927_v17, %v7742_v19  ;;  %v8013_v51 = vmax.f32 %v7751_v29, 0.0 }
 0x5f9   :  { %v12006_v45 = vpop.f32.mrf.mxu1 }
 0x5fa   :  { %v8011_v42 = vmax.f32 %v7743_v53, 0.0  ;;  %v8099_v47 = vpack.c.bf16 %v8013_v51, %v8012_v41  ;;  %v7764_v52 = vadd.f32 %v17241_v18, %v12006_v45 }
 0x5fb   :  { %v7755_v31 = vpop.f32.mrf.mxu1 }
 0x5fc   :  { %v8098_v26 = vpack.c.bf16 %v8011_v42, %v8010_v11  ;;  %v7756_v48 = vadd.f32 %v16927_v17, %v7755_v31  ;;  %v8016_v3 = vmax.f32 %v7764_v52, 0.0 }
 0x5fd   :  { %v12007_v28 = vpop.f32.mrf.mxu1 }
 0x5fe   :  { %v7767_v37 = vadd.f32 %v17241_v18, %v12007_v28  ;;  %12132 = vmatprep.mubr.msk.bf16.mxu0 %vm2098_vm2, %v8098_v26  ;;  %v8014_v4 = vmax.f32 %v7756_v48, 0.0 }
 0x5ff   :  { %v7758_v55 = vpop.f32.mrf.mxu1  ;;  %12133 = vmatmul.mubr.msk.bf16.gmra.mxu0 %vm2098_vm2, %v8099_v47 }
 0x600   :  { %v7759_v60 = vadd.f32 %v17241_v18, %v7758_v55  ;;  %v8017_v7 = vmax.f32 %v7767_v37, 0.0 }
 0x601   :  { %v12010_v43 = vpop.f32.mrf.mxu1 }
 0x602   :  { %v8015_v17 = vmax.f32 %v7759_v60, 0.0  ;;  %v8101_v56 = vpack.c.bf16 %v8017_v7, %v8016_v3  ;;  %v7780_v53 = vadd.f32 %v17241_v18, %v12010_v43 }
 0x603   :  { %v7771_v5 = vpop.f32.mrf.mxu1 }
 0x604   :  { %v8100_v2 = vpack.c.bf16 %v8015_v17, %v8014_v4  ;;  %v7772_v6 = vadd.f32 %v17241_v18, %v7771_v5  ;;  %v8020_v26 = vmax.f32 %v7780_v53, 0.0 }
 0x605   :  { %v12011_v29 = vpop.f32.mrf.mxu1 }
 0x606   :  { %v7783_v19 = vadd.f32 %v17241_v18, %v12011_v29  ;;  %12136 = vmatprep.mubr.msk.bf16.mxu0 %vm2098_vm2, %v8100_v2  ;;  %v8018_v41 = vmax.f32 %v7772_v6, 0.0 }
 0x607   :  { %v7774_v51 = vpop.f32.mrf.mxu1  ;;  %12137 = vmatmul.mubr.msk.bf16.gmra.mxu0 %vm2098_vm2, %v8101_v56 }
 0x608   :  { %v7775_v45 = vadd.f32 %v17241_v18, %v7774_v51  ;;  %v8021_v11 = vmax.f32 %v7783_v19, 0.0 }
 0x609   :  { %v12014_v42 = vpop.f32.mrf.mxu1 }
 0x60a   :  { %v8019_v31 = vmax.f32 %v7775_v45, 0.0  ;;  %v8103_v48 = vpack.c.bf16 %v8021_v11, %v8020_v26  ;;  %v7796_v60 = vadd.f32 %v17241_v18, %v12014_v42 }
 0x60b   :  { %v7787_v47 = vpop.f32.mrf.mxu1 }
 0x60c   :  { %v8102_v28 = vpack.c.bf16 %v8019_v31, %v8018_v41  ;;  %v7788_v52 = vadd.f32 %v17241_v18, %v7787_v47  ;;  %v8024_v2 = vmax.f32 %v7796_v60, 0.0  ;;  %v17269_v60 = vld [vmem:[%s17780_s6 + $0x2] ss:$0 sm:$0xff] }
 0x60d   :  { %v12015_v37 = vpop.f32.mrf.mxu1 }
 0x60e   :  { %v7799_v55 = vadd.f32 %v17241_v18, %v12015_v37  ;;  %12140 = vmatprep.mubr.msk.bf16.mxu0 %vm2098_vm2, %v8102_v28  ;;  %v8022_v3 = vmax.f32 %v7788_v52, 0.0 }
 0x60f   :  { %v7790_v7 = vpop.f32.mrf.mxu1  ;;  %12141 = vmatmul.mubr.msk.bf16.gmra.mxu0 %vm2098_vm2, %v8103_v48 }
 0x610   :  { %v7791_v43 = vadd.f32 %v17241_v18, %v7790_v7  ;;  %v8025_v4 = vmax.f32 %v7799_v55, 0.0 }
 0x611   :  { %v12018_v17 = vpop.f32.mrf.mxu1 }
 0x612   :  { %v8023_v5 = vmax.f32 %v7791_v43, 0.0  ;;  %v8105_v6 = vpack.c.bf16 %v8025_v4, %v8024_v2  ;;  %v7812_v45 = vadd.f32 %v17241_v18, %v12018_v17 }
 0x613   :  { %v7803_v56 = vpop.f32.mrf.mxu1 }
 0x614   :  { %v8104_v29 = vpack.c.bf16 %v8023_v5, %v8022_v3  ;;  %v7804_v53 = vadd.f32 %v17241_v18, %v7803_v56  ;;  %v8028_v28 = vmax.f32 %v7812_v45, 0.0 }
 0x615   :  { %v12019_v19 = vpop.f32.mrf.mxu1 }
 0x616   :  { %v7815_v51 = vadd.f32 %v17241_v18, %v12019_v19  ;;  %12144 = vmatprep.mubr.msk.bf16.mxu0 %vm2098_vm2, %v8104_v29  ;;  %v8026_v26 = vmax.f32 %v7804_v53, 0.0 }
 0x617   :  { %v7806_v11 = vpop.f32.mrf.mxu1  ;;  %12145 = vmatmul.mubr.msk.bf16.gmra.mxu0 %vm2098_vm2, %v8105_v6 }
 0x618   :  { %v7807_v42 = vadd.f32 %v17241_v18, %v7806_v11  ;;  %v8029_v41 = vmax.f32 %v7815_v51, 0.0 }
 0x619   :  { %v12022_v31 = vpop.f32.mrf.mxu1 }
 0x61a   :  { %v8027_v47 = vmax.f32 %v7807_v42, 0.0  ;;  %v8107_v55 = vpack.c.bf16 %v8029_v41, %v8028_v28  ;;  %v7828_v3 = vadd.f32 %v17241_v18, %v12022_v31 }
 0x61b   :  { %v7819_v48 = vpop.f32.mrf.mxu1  ;;  %v12054_v37 = vpop.f32.mrf.mxu0 }
 0x61c   :  { %v8106_v52 = vpack.c.bf16 %v8027_v47, %v8026_v26  ;;  %v7820_v4 = vadd.f32 %v17241_v18, %v7819_v48  ;;  %v8382_v29 = vadd.f32 %v12054_v37, %v17269_v60  ;;  %v8032_v41 = vmax.f32 %v7828_v3, 0.0  ;;  %v19444_v26 = vld [vmem:[#allocation188_spill] sm:$0xff]  ;;  %v19445_v47 = vld [vmem:[#allocation191_spill] sm:$0xff] }
 0x61d   :  { %v12023_v7 = vpop.f32.mrf.mxu1  ;;  %v8373_v43 = vpop.f32.mrf.mxu0 }
 0x61e   :  { %v7831_v17 = vadd.f32 %v17241_v18, %v12023_v7  ;;  %12148 = vmatprep.mubr.msk.bf16.mxu0 %vm2098_vm2, %v8106_v52  ;;  %v8374_v5 = vadd.f32 %v17269_v60, %v8373_v43  ;;  %v8030_v11 = vmax.f32 %v7820_v4, 0.0  ;;  %v19446_v43 = vld [vmem:[#allocation89_spill] sm:$0xff] }
 0x61f   :  { %v7822_v2 = vpop.f32.mrf.mxu1  ;;  %12149 = vmatmul.mubr.msk.bf16.gmra.mxu0 %vm2098_vm2, %v8107_v55  ;;  %v12055_v56 = vpop.f32.mrf.mxu0  ;;  %v8886_v55 = vadd.f32 %v8382_v29, %v16100_v46 }
 0x620   :  { %v7823_v6 = vadd.f32 %v17241_v18, %v7822_v2  ;;  %v8033_v19 = vmax.f32 %v7831_v17, 0.0  ;;  %v8385_v53 = vadd.f32 %v12055_v56, %v17269_v60  ;;  %v8884_v31 = vadd.f32 %v8374_v5, %v19444_v26 }
 0x621   :  { %v12026_v51 = vpop.f32.mrf.mxu1  ;;  %v8376_v45 = vpop.f32.mrf.mxu0  ;;  %v9014_v46 = vmax.f32 %v8886_v55, 0.0 }
 0x622   :  { %v8031_v42 = vmax.f32 %v7823_v6, 0.0  ;;  %v8887_v28 = vadd.f32 %v8385_v53, %v19445_v47  ;;  %v8377_v48 = vadd.f32 %v17269_v60, %v8376_v45  ;;  %v8109_v7 = vpack.c.bf16 %v8033_v19, %v8032_v41 }
 0x623   :  { %v7835_v52 = vpop.f32.mrf.mxu1  ;;  %v9012_v3 = vmax.f32 %v8884_v31, 0.0  ;;  %v7844_v5 = vadd.f32 %v17241_v18, %v12026_v51 }
 0x624   :  { %v8108_v37 = vpack.c.bf16 %v8031_v42, %v8030_v11  ;;  %v8885_v17 = vadd.f32 %v8377_v48, %v19446_v43  ;;  %v9015_v56 = vmax.f32 %v8887_v28, 0.0  ;;  %v7836_v27 = vadd.f32 %v17241_v18, %v7835_v52 }
 0x625   :  { %v12027_v2 = vpop.f32.mrf.mxu1  ;;  %v8036_v48 = vmax.f32 %v7844_v5, 0.0 }
 0x626   :  { %v7847_v4 = vadd.f32 %v17241_v18, %v12027_v2  ;;  %12152 = vmatprep.mubr.msk.bf16.mxu0 %vm2098_vm2, %v8108_v37  ;;  %v9013_v6 = vmax.f32 %v8885_v17, 0.0  ;;  %v9141_v26 = vpack.c.bf16 %v9015_v56, %v9014_v46  ;;  %v8034_v47 = vmax.f32 %v7836_v27, 0.0  ;;  %v19447_v56 = vld [vmem:[#allocation90_spill] sm:$0xff]  ;;  %v19449_v46 = vld [vmem:[#allocation284_spill] sm:$0xff] }
 0x627   :  { %v7838_v53 = vpop.f32.mrf.mxu1  ;;  %v12058_v45 = vpop.f32.mrf.mxu0  ;;  %12153 = vmatmul.mubr.msk.bf16.gmra.mxu0 %vm2098_vm2, %v8109_v7 }
 0x628   :  { %v7839_v29 = vadd.f32 %v17241_v18, %v7838_v53  ;;  %v9140_v19 = vpack.c.bf16 %v9013_v6, %v9012_v3  ;;  %v8037_v11 = vmax.f32 %v7847_v4, 0.0  ;;  %v8398_v31 = vadd.f32 %v12058_v45, %v17269_v60  ;;  %v19448_v6 = vld [vmem:[#allocation187_spill] sm:$0xff] }
 0x629   :  { %v12030_v42 = vpop.f32.mrf.mxu1  ;;  %v8389_v41 = vpop.f32.mrf.mxu0 }
 0x62a   :  { %v8035_v28 = vmax.f32 %v7839_v29, 0.0  ;;  %v8390_v51 = vadd.f32 %v17269_v60, %v8389_v41  ;;  %12184 = vmatprep.mubr.msk.bf16.mxu1 %vm2098_vm2, %v9140_v19  ;;  %v8111_v55 = vpack.c.bf16 %v8037_v11, %v8036_v48  ;;  %v8890_v53 = vadd.f32 %v8398_v31, %v19448_v6  ;;  %v19450_v41 = vld [vmem:[#allocation283_spill] sm:$0xff] }
 0x62b   :  { %v7851_v52 = vpop.f32.mrf.mxu1  ;;  %v12059_v37 = vpop.f32.mrf.mxu0  ;;  %12185 = vmatmul.mubr.msk.bf16.vlgmr.msra.gmra.mxu1 %vm2098_vm2, %v9141_v26  ;;  %v7860_v45 = vadd.f32 %v17241_v18, %v12030_v42 }
 0x62c   :  { %v8110_v7 = vpack.c.bf16 %v8035_v28, %v8034_v47  ;;  %v8401_v43 = vadd.f32 %v12059_v37, %v17269_v60  ;;  %v8888_v27 = vadd.f32 %v8390_v51, %v19447_v56  ;;  %v7852_v4 = vadd.f32 %v17241_v18, %v7851_v52 }
 0x62d   :  { %v12031_v17 = vpop.f32.mrf.mxu1  ;;  %v8392_v2 = vpop.f32.mrf.mxu0  ;;  %v8040_v42 = vmax.f32 %v7860_v45, 0.0 }
 0x62e   :  { %v7863_v3 = vadd.f32 %v17241_v18, %v12031_v17  ;;  %v8393_v5 = vadd.f32 %v17269_v60, %v8392_v2  ;;  %12156 = vmatprep.mubr.msk.bf16.mxu0 %vm2098_vm2, %v8110_v7  ;;  %v8891_v29 = vadd.f32 %v8401_v43, %v19449_v46  ;;  %v9016_v37 = vmax.f32 %v8888_v27, 0.0 }
 0x62f   :  { %v7854_v19 = vpop.f32.mrf.mxu1  ;;  %v12062_v11 = vpop.f32.mrf.mxu0  ;;  %12157 = vmatmul.mubr.msk.bf16.gmra.mxu0 %vm2098_vm2, %v8111_v55  ;;  %v8038_v7 = vmax.f32 %v7852_v4, 0.0  ;;  %v9018_v2 = vmax.f32 %v8890_v53, 0.0 }
 0x630   :  { %v8889_v26 = vadd.f32 %v8393_v5, %v19450_v41  ;;  %v7855_v47 = vadd.f32 %v17241_v18, %v7854_v19  ;;  %v9019_v28 = vmax.f32 %v8891_v29, 0.0  ;;  %v8041_v48 = vmax.f32 %v7863_v3, 0.0 }
 0x631   :  { %v12034_v51 = vpop.f32.mrf.mxu1  ;;  %v8405_v52 = vpop.f32.mrf.mxu0  ;;  %v8414_v43 = vadd.f32 %v12062_v11, %v17269_v60 }
 0x632   :  { %v9017_v17 = vmax.f32 %v8889_v26, 0.0  ;;  %v8039_v31 = vmax.f32 %v7855_v47, 0.0  ;;  %v8406_v56 = vadd.f32 %v17269_v60, %v8405_v52  ;;  %v9143_v41 = vpack.c.bf16 %v9019_v28, %v9018_v2 }
 0x633   :  { %v7867_v6 = vpop.f32.mrf.mxu1  ;;  %v12063_v55 = vpop.f32.mrf.mxu0  ;;  %v8113_v19 = vpack.c.bf16 %v8041_v48, %v8040_v42  ;;  %v8894_v11 = vadd.f32 %v8414_v43, %v16182_v58  ;;  %v7876_v47 = vadd.f32 %v17241_v18, %v12034_v51 }
 0x634   :  { %v9142_v46 = vpack.c.bf16 %v9017_v17, %v9016_v37  ;;  %v8112_v5 = vpack.c.bf16 %v8039_v31, %v8038_v7  ;;  %v7868_v3 = vadd.f32 %v17241_v18, %v7867_v6  ;;  %v8417_v29 = vadd.f32 %v12063_v55, %v17269_v60 }
 0x635   :  { %v12035_v27 = vpop.f32.mrf.mxu1  ;;  %v8408_v4 = vpop.f32.mrf.mxu0  ;;  %v8892_v26 = vadd.f32 %v8406_v56, %v16175_v14  ;;  %v19451_v14 = vld [vmem:[#allocation94_spill] sm:$0xff]  ;;  %v9022_v6 = vmax.f32 %v8894_v11, 0.0 }
 0x636   :  { %v7879_v53 = vadd.f32 %v17241_v18, %v12035_v27  ;;  %v8409_v45 = vadd.f32 %v17269_v60, %v8408_v4  ;;  %12160 = vmatprep.mubr.msk.bf16.mxu0 %vm2098_vm2, %v8112_v5  ;;  %12188 = vmatprep.mubr.msk.bf16.mxu1 %vm2098_vm2, %v9142_v46  ;;  %v8895_v28 = vadd.f32 %v8417_v29, %v16178_v13  ;;  %v8042_v58 = vmax.f32 %v7868_v3, 0.0 }
 0x637   :  { %v7870_v48 = vpop.f32.mrf.mxu1  ;;  %v12066_v52 = vpop.f32.mrf.mxu0  ;;  %12161 = vmatmul.mubr.msk.bf16.gmra.mxu0 %vm2098_vm2, %v8113_v19  ;;  %12189 = vmatmul.mubr.msk.bf16.gmra.mxu1 %vm2098_vm2, %v9143_v41  ;;  %v9020_v56 = vmax.f32 %v8892_v26, 0.0  ;;  %v8044_v13 = vmax.f32 %v7876_v47, 0.0 }
 0x638   :  { %v8893_v37 = vadd.f32 %v8409_v45, %v19451_v14  ;;  %v7871_v7 = vadd.f32 %v17241_v18, %v7870_v48  ;;  %v9023_v17 = vmax.f32 %v8895_v28, 0.0  ;;  %v8045_v31 = vmax.f32 %v7879_v53, 0.0  ;;  %v19452_v48 = vld [vmem:[#allocation93_spill] sm:$0xff] }
 0x639   :  { %v12038_v2 = vpop.f32.mrf.mxu1  ;;  %v8421_v42 = vpop.f32.mrf.mxu0  ;;  %v8430_v55 = vadd.f32 %v12066_v52, %v17269_v60 }
 0x63a   :  { %v9021_v43 = vmax.f32 %v8893_v37, 0.0  ;;  %v8043_v51 = vmax.f32 %v7871_v7, 0.0  ;;  %v8422_v46 = vadd.f32 %v17269_v60, %v8421_v42  ;;  %v9145_v27 = vpack.c.bf16 %v9023_v17, %v9022_v6  ;;  %v19453_v37 = vld [vmem:[#allocation192_spill] sm:$0xff] }
 0x63b   :  { %v7883_v5 = vpop.f32.mrf.mxu1  ;;  %v12067_v41 = vpop.f32.mrf.mxu0  ;;  %v8115_v4 = vpack.c.bf16 %v8045_v31, %v8044_v13  ;;  %v8898_v52 = vadd.f32 %v8430_v55, %v19452_v48  ;;  %v7892_v14 = vadd.f32 %v17241_v18, %v12038_v2 }
 0x63c   :  { %v9144_v19 = vpack.c.bf16 %v9021_v43, %v9020_v56  ;;  %v8114_v29 = vpack.c.bf16 %v8043_v51, %v8042_v58  ;;  %v7884_v53 = vadd.f32 %v17241_v18, %v7883_v5  ;;  %v8433_v45 = vadd.f32 %v12067_v41, %v17269_v60 }
 0x63d   :  { %v12039_v26 = vpop.f32.mrf.mxu1  ;;  %v8424_v3 = vpop.f32.mrf.mxu0  ;;  %v8896_v28 = vadd.f32 %v8422_v46, %v16213_v21  ;;  %v19454_v21 = vld [vmem:[#allocation196_spill] sm:$0xff]  ;;  %v9026_v5 = vmax.f32 %v8898_v52, 0.0  ;;  %v8048_v41 = vmax.f32 %v7892_v14, 0.0 }
 0x63e   :  { %v7895_v11 = vadd.f32 %v17241_v18, %v12039_v26  ;;  %v8425_v47 = vadd.f32 %v17269_v60, %v8424_v3  ;;  %12164 = vmatprep.mubr.msk.bf16.mxu0 %vm2098_vm2, %v8114_v29  ;;  %12192 = vmatprep.mubr.msk.bf16.mxu1 %vm2098_vm2, %v9144_v19  ;;  %v8899_v7 = vadd.f32 %v8433_v45, %v19453_v37  ;;  %v8046_v55 = vmax.f32 %v7884_v53, 0.0  ;;  %v19455_v37 = vld [vmem:[#allocation199_spill] sm:$0xff] }
 0x63f   :  { %v7886_v17 = vpop.f32.mrf.mxu1  ;;  %v12070_v31 = vpop.f32.mrf.mxu0  ;;  %12165 = vmatmul.mubr.msk.bf16.gmra.mxu0 %vm2098_vm2, %v8115_v4  ;;  %12193 = vmatmul.mubr.msk.bf16.gmra.mxu1 %vm2098_vm2, %v9145_v27  ;;  %v9024_v13 = vmax.f32 %v8896_v28, 0.0 }
 0x640   :  { %v8897_v42 = vadd.f32 %v8425_v47, %v19454_v21  ;;  %v7887_v56 = vadd.f32 %v17241_v18, %v7886_v17  ;;  %v9027_v58 = vmax.f32 %v8899_v7, 0.0  ;;  %v8049_v43 = vmax.f32 %v7895_v11, 0.0  ;;  %v19456_v17 = vld [vmem:[#allocation195_spill] sm:$0xff] }
 0x641   :  { %v12042_v51 = vpop.f32.mrf.mxu1  ;;  %v8437_v6 = vpop.f32.mrf.mxu0  ;;  %v8446_v19 = vadd.f32 %v12070_v31, %v17269_v60 }
 0x642   :  { %v9025_v46 = vmax.f32 %v8897_v42, 0.0  ;;  %v8047_v2 = vmax.f32 %v7887_v56, 0.0  ;;  %v8438_v29 = vadd.f32 %v17269_v60, %v8437_v6  ;;  %v9147_v3 = vpack.c.bf16 %v9027_v58, %v9026_v5  ;;  %v19457_v42 = vld [vmem:[#allocation97_spill] sm:$0xff]  ;;  %v19458_v6 = vld [vmem:[#allocation98_spill] sm:$0xff] }
 0x643   :  { %v7899_v4 = vpop.f32.mrf.mxu1  ;;  %v12071_v27 = vpop.f32.mrf.mxu0  ;;  %v8117_v47 = vpack.c.bf16 %v8049_v43, %v8048_v41  ;;  %v8902_v31 = vadd.f32 %v8446_v19, %v19456_v17  ;;  %v7908_v21 = vadd.f32 %v17241_v18, %v12042_v51 }
 0x644   :  { %v9146_v45 = vpack.c.bf16 %v9025_v46, %v9024_v13  ;;  %v8116_v26 = vpack.c.bf16 %v8047_v2, %v8046_v55  ;;  %v7900_v11 = vadd.f32 %v17241_v18, %v7899_v4  ;;  %v8449_v48 = vadd.f32 %v12071_v27, %v17269_v60 }
 0x645   :  { %v12043_v28 = vpop.f32.mrf.mxu1  ;;  %v8440_v53 = vpop.f32.mrf.mxu0  ;;  %v8900_v7 = vadd.f32 %v8438_v29, %v19455_v37  ;;  %v9030_v27 = vmax.f32 %v8902_v31, 0.0 }
 0x646   :  { %v7911_v52 = vadd.f32 %v17241_v18, %v12043_v28  ;;  %v8441_v14 = vadd.f32 %v17269_v60, %v8440_v53  ;;  %12168 = vmatprep.mubr.msk.bf16.mxu0 %vm2098_vm2, %v8116_v26  ;;  %12196 = vmatprep.mubr.msk.bf16.mxu1 %vm2098_vm2, %v9146_v45  ;;  %v8903_v56 = vadd.f32 %v8449_v48, %v19457_v42  ;;  %v8050_v19 = vmax.f32 %v7900_v11, 0.0 }
 0x647   :  { %v7902_v58 = vpop.f32.mrf.mxu1  ;;  %v12074_v43 = vpop.f32.mrf.mxu0  ;;  %12169 = vmatmul.mubr.msk.bf16.gmra.mxu0 %vm2098_vm2, %v8117_v47  ;;  %12197 = vmatmul.mubr.msk.bf16.gmra.mxu1 %vm2098_vm2, %v9147_v3  ;;  %v9028_v29 = vmax.f32 %v8900_v7, 0.0  ;;  %v8052_v45 = vmax.f32 %v7908_v21, 0.0 }
 0x648   :  { %v8901_v13 = vadd.f32 %v8441_v14, %v19458_v6  ;;  %v7903_v55 = vadd.f32 %v17241_v18, %v7902_v58  ;;  %v9031_v46 = vmax.f32 %v8903_v56, 0.0  ;;  %v8053_v2 = vmax.f32 %v7911_v52, 0.0 }
 0x649   :  { %v12046_v5 = vpop.f32.mrf.mxu1  ;;  %v8453_v41 = vpop.f32.mrf.mxu0  ;;  %v8462_v26 = vadd.f32 %v12074_v43, %v17269_v60 }
 0x64a   :  { %v9029_v4 = vmax.f32 %v8901_v13, 0.0  ;;  %v8051_v51 = vmax.f32 %v7903_v55, 0.0  ;;  %v8454_v47 = vadd.f32 %v17269_v60, %v8453_v41  ;;  %v9149_v37 = vpack.c.bf16 %v9031_v46, %v9030_v27 }
 0x64b   :  { %v7915_v48 = vpop.f32.mrf.mxu1  ;;  %v12075_v3 = vpop.f32.mrf.mxu0  ;;  %v8119_v14 = vpack.c.bf16 %v8053_v2, %v8052_v45  ;;  %v8906_v56 = vadd.f32 %v8462_v26, %v16289_v32  ;;  %v7924_v58 = vadd.f32 %v17241_v18, %v12046_v5 }
 0x64c   :  { %v9148_v28 = vpack.c.bf16 %v9029_v4, %v9028_v29  ;;  %v8118_v53 = vpack.c.bf16 %v8051_v51, %v8050_v19  ;;  %v7916_v52 = vadd.f32 %v17241_v18, %v7915_v48  ;;  %v8465_v17 = vadd.f32 %v12075_v3, %v17269_v60 }
 0x64d   :  { %v12047_v7 = vpop.f32.mrf.mxu1  ;;  %v8456_v11 = vpop.f32.mrf.mxu0  ;;  %v8904_v42 = vadd.f32 %v8454_v47, %v16284_v25  ;;  %v9034_v5 = vmax.f32 %v8906_v56, 0.0  ;;  %v8056_v51 = vmax.f32 %v7924_v58, 0.0 }
 0x64e   :  { %v7927_v31 = vadd.f32 %v17241_v18, %v12047_v7  ;;  %v8457_v21 = vadd.f32 %v17269_v60, %v8456_v11  ;;  %12172 = vmatprep.mubr.msk.bf16.mxu0 %vm2098_vm2, %v8118_v53  ;;  %12200 = vmatprep.mubr.msk.bf16.mxu1 %vm2098_vm2, %v9148_v28  ;;  %v8907_v43 = vadd.f32 %v8465_v17, %v16292_v35  ;;  %v8054_v19 = vmax.f32 %v7916_v52, 0.0  ;;  %v19459_v17 = vld [vmem:[#allocation286_spill] sm:$0xff] }
 0x64f   :  { %v7918_v6 = vpop.f32.mrf.mxu1  ;;  %v12078_v13 = vpop.f32.mrf.mxu0  ;;  %12173 = vmatmul.mubr.msk.bf16.gmra.mxu0 %vm2098_vm2, %v8119_v14  ;;  %12201 = vmatmul.mubr.msk.bf16.gmra.mxu1 %vm2098_vm2, %v9149_v37  ;;  %v9032_v29 = vmax.f32 %v8904_v42, 0.0 }
 0x650   :  { %v8905_v25 = vadd.f32 %v8457_v21, %v16296_v49  ;;  %v7919_v55 = vadd.f32 %v17241_v18, %v7918_v6  ;;  %v9035_v46 = vmax.f32 %v8907_v43, 0.0  ;;  %v8057_v2 = vmax.f32 %v7927_v31, 0.0 }
 0x651   :  { %v8469_v41 = vpop.f32.mrf.mxu0  ;;  %v8478_v35 = vadd.f32 %v12078_v13, %v17269_v60 }
 0x652   :  { %v9033_v32 = vmax.f32 %v8905_v25, 0.0  ;;  %v8055_v4 = vmax.f32 %v7919_v55, 0.0  ;;  %v8470_v27 = vadd.f32 %v17269_v60, %v8469_v41  ;;  %v9151_v48 = vpack.c.bf16 %v9035_v46, %v9034_v5  ;;  %v19460_v55 = vld [vmem:[#allocation289_spill] sm:$0xff]  ;;  %v19461_v41 = vld [vmem:[#allocation288_spill] sm:$0xff] }
 0x653   :  { %v12079_v45 = vpop.f32.mrf.mxu0  ;;  %v8121_v18 = vpack.c.bf16 %v8057_v2, %v8056_v51  ;;  %v8910_v14 = vadd.f32 %v8478_v35, %v16330_v24 }
 0x654   :  { %v9150_v26 = vpack.c.bf16 %v9033_v32, %v9032_v29  ;;  %v8120_v47 = vpack.c.bf16 %v8055_v4, %v8054_v19  ;;  %v8481_v49 = vadd.f32 %v12079_v45, %v17269_v60  ;;  %v8908_v28 = vadd.f32 %v8470_v27, %v16320_v10  ;;  %v19462_v32 = vld [vmem:[#allocation287_spill] sm:$0xff] }
 0x655   :  { %v8472_v3 = vpop.f32.mrf.mxu0  ;;  %v9038_v21 = vmax.f32 %v8910_v14, 0.0 }
 0x656   :  { %v8911_v53 = vadd.f32 %v8481_v49, %v16323_v1  ;;  %v8473_v37 = vadd.f32 %v17269_v60, %v8472_v3  ;;  %12176 = vmatprep.mubr.msk.bf16.mxu0 %vm2098_vm2, %v8120_v47  ;;  %12204 = vmatprep.mubr.msk.bf16.mxu1 %vm2098_vm2, %v9150_v26  ;;  %v9036_v10 = vmax.f32 %v8908_v28, 0.0  ;;  %v19463_v28 = vld [vmem:[#allocation102_spill] sm:$0xff] }
 0x657   :  { %v12082_v52 = vpop.f32.mrf.mxu0  ;;  %12177 = vmatmul.mubr.msk.bf16.gmra.mxu0 %vm2098_vm2, %v8121_v18  ;;  %12205 = vmatmul.mubr.msk.bf16.gmra.mxu1 %vm2098_vm2, %v9151_v48 }
 0x658   :  { %v8909_v7 = vadd.f32 %v8473_v37, %v19459_v17  ;;  %v9039_v11 = vmax.f32 %v8911_v53, 0.0  ;;  %v8494_v56 = vadd.f32 %v12082_v52, %v17269_v60  ;;  %v19464_v37 = vld [vmem:[#allocation200_spill] sm:$0xff]  ;;  %v19465_v17 = vld [vmem:[#allocation101_spill] sm:$0xff] }
 0x659   :  { %v8485_v42 = vpop.f32.mrf.mxu0 }
 0x65a   :  { %v9037_v31 = vmax.f32 %v8909_v7, 0.0  ;;  %v8486_v1 = vadd.f32 %v17269_v60, %v8485_v42  ;;  %v9153_v6 = vpack.c.bf16 %v9039_v11, %v9038_v21  ;;  %v8914_v29 = vadd.f32 %v8494_v56, %v19461_v41  ;;  %v19466_v42 = vld [vmem:[#allocation203_spill] sm:$0xff] }
 0x65b   :  { %v12083_v58 = vpop.f32.mrf.mxu0 }
 0x65c   :  { %v9152_v43 = vpack.c.bf16 %v9037_v31, %v9036_v10  ;;  %v8497_v24 = vadd.f32 %v12083_v58, %v17269_v60  ;;  %v8912_v25 = vadd.f32 %v8486_v1, %v16356_v39  ;;  %v9042_v39 = vmax.f32 %v8914_v29, 0.0  ;;  %v19468_v29 = vld [vmem:[#allocation105_spill] sm:$0xff] }
 0x65d   :  { %v8488_v13 = vpop.f32.mrf.mxu0 }
 0x65e   :  { %v8915_v46 = vadd.f32 %v8497_v24, %v19460_v55  ;;  %v8489_v2 = vadd.f32 %v17269_v60, %v8488_v13  ;;  %12208 = vmatprep.mubr.msk.bf16.mxu1 %vm2098_vm2, %v9152_v43  ;;  %v9040_v35 = vmax.f32 %v8912_v25, 0.0 }
 0x65f   :  { %v12086_v19 = vpop.f32.mrf.mxu0  ;;  %12209 = vmatmul.mubr.msk.bf16.gmra.mxu1 %vm2098_vm2, %v9153_v6 }
 0x660   :  { %v8913_v4 = vadd.f32 %v8489_v2, %v19462_v32  ;;  %v9043_v5 = vmax.f32 %v8915_v46, 0.0  ;;  %v8510_v26 = vadd.f32 %v12086_v19, %v17269_v60  ;;  %v19467_v2 = vld [vmem:[#allocation204_spill] sm:$0xff] }
 0x661   :  { %v8501_v51 = vpop.f32.mrf.mxu0 }
 0x662   :  { %v9041_v27 = vmax.f32 %v8913_v4, 0.0  ;;  %v8502_v45 = vadd.f32 %v17269_v60, %v8501_v51  ;;  %v9155_v18 = vpack.c.bf16 %v9043_v5, %v9042_v39  ;;  %v8918_v7 = vadd.f32 %v8510_v26, %v19465_v17  ;;  %v19469_v4 = vld [vmem:[#allocation290_spill] sm:$0xff] }
 0x663   :  { %v12087_v47 = vpop.f32.mrf.mxu0 }
 0x664   :  { %v9154_v49 = vpack.c.bf16 %v9041_v27, %v9040_v35  ;;  %v8513_v48 = vadd.f32 %v12087_v47, %v17269_v60  ;;  %v8916_v53 = vadd.f32 %v8502_v45, %v19463_v28  ;;  %v9046_v43 = vmax.f32 %v8918_v7, 0.0  ;;  %v19470_v35 = vld [vmem:[#allocation6_spill] sm:$0xff] }
 0x665   :  { %v8504_v3 = vpop.f32.mrf.mxu0  ;;  %v19472_v7 = vld [vmem:[#allocation106_spill] sm:$0xff] }
 0x666   :  { %v8919_v14 = vadd.f32 %v8513_v48, %v19464_v37  ;;  %v8505_v52 = vadd.f32 %v17269_v60, %v8504_v3  ;;  %12212 = vmatprep.mubr.msk.bf16.mxu1 %vm2098_vm2, %v9154_v49  ;;  %v9044_v21 = vmax.f32 %v8916_v53, 0.0 }
 0x667   :  { %v12090_v11 = vpop.f32.mrf.mxu0  ;;  %12213 = vmatmul.mubr.msk.bf16.gmra.mxu1 %vm2098_vm2, %v9155_v18 }
 0x668   :  { %v8917_v10 = vadd.f32 %v8505_v52, %v19466_v42  ;;  %v9047_v31 = vmax.f32 %v8919_v14, 0.0  ;;  %v8526_v24 = vadd.f32 %v12090_v11, %v17269_v60  ;;  %v19471_v52 = vld [vmem:[#allocation202_spill] sm:$0xff] }
 0x669   :  { %v8517_v1 = vpop.f32.mrf.mxu0 }
 0x66a   :  { %v9045_v56 = vmax.f32 %v8917_v10, 0.0  ;;  %v8518_v58 = vadd.f32 %v17269_v60, %v8517_v1  ;;  %v9157_v55 = vpack.c.bf16 %v9047_v31, %v9046_v43  ;;  %v8922_v5 = vadd.f32 %v8526_v24, %v19469_v4  ;;  %v19473_v10 = vld [vmem:[#allocation292_spill] sm:$0xff] }
 0x66b   :  { %v12091_v6 = vpop.f32.mrf.mxu0 }
 0x66c   :  { %v9156_v13 = vpack.c.bf16 %v9045_v56, %v9044_v21  ;;  %v8529_v25 = vadd.f32 %v12091_v6, %v17269_v60  ;;  %v8920_v41 = vadd.f32 %v8518_v58, %v19467_v2  ;;  %v9050_v48 = vmax.f32 %v8922_v5, 0.0  ;;  %v19474_v21 = vld [vmem:[#allocation291_spill] sm:$0xff]  ;;  %v19476_v5 = vld [vmem:[#allocation109_spill] sm:$0xff] }
 0x66d   :  { %v8520_v46 = vpop.f32.mrf.mxu0 }
 0x66e   :  { %v8923_v19 = vadd.f32 %v8529_v25, %v19468_v29  ;;  %v8521_v32 = vadd.f32 %v17269_v60, %v8520_v46  ;;  %12216 = vmatprep.mubr.msk.bf16.mxu1 %vm2098_vm2, %v9156_v13  ;;  %v9048_v26 = vmax.f32 %v8920_v41, 0.0 }
 0x66f   :  { %v12094_v51 = vpop.f32.mrf.mxu0  ;;  %12217 = vmatmul.mubr.msk.bf16.gmra.mxu1 %vm2098_vm2, %v9157_v55 }
 0x670   :  { %v8921_v27 = vadd.f32 %v8521_v32, %v19470_v35  ;;  %v9051_v45 = vmax.f32 %v8923_v19, 0.0  ;;  %v8542_v18 = vadd.f32 %v12094_v51, %v17269_v60  ;;  %v19475_v32 = vld [vmem:[#allocation110_spill] sm:$0xff] }
 0x671   :  { %v8533_v39 = vpop.f32.mrf.mxu0 }
 0x672   :  { %v9049_v47 = vmax.f32 %v8921_v27, 0.0  ;;  %v8534_v49 = vadd.f32 %v17269_v60, %v8533_v39  ;;  %v9159_v37 = vpack.c.bf16 %v9051_v45, %v9050_v48  ;;  %v8926_v31 = vadd.f32 %v8542_v18, %v19473_v10  ;;  %v19477_v27 = vld [vmem:[#allocation205_spill] sm:$0xff]  ;;  %v19479_v10 = vld [vmem:[#allocation208_spill] sm:$0xff] }
 0x673   :  { %v12095_v3 = vpop.f32.mrf.mxu0 }
 0x674   :  { %v9158_v28 = vpack.c.bf16 %v9049_v47, %v9048_v26  ;;  %v8545_v53 = vadd.f32 %v12095_v3, %v17269_v60  ;;  %v8924_v17 = vadd.f32 %v8534_v49, %v19471_v52  ;;  %v9054_v25 = vmax.f32 %v8926_v31, 0.0  ;;  %v19478_v26 = vld [vmem:[#allocation207_spill] sm:$0xff] }
 0x675   :  { %v8536_v14 = vpop.f32.mrf.mxu0 }
 0x676   :  { %v8927_v11 = vadd.f32 %v8545_v53, %v19472_v7  ;;  %v8537_v42 = vadd.f32 %v17269_v60, %v8536_v14  ;;  %12220 = vmatprep.mubr.msk.bf16.mxu1 %vm2098_vm2, %v9158_v28  ;;  %v9052_v24 = vmax.f32 %v8924_v17, 0.0 }
 0x677   :  { %v12098_v1 = vpop.f32.mrf.mxu0  ;;  %12221 = vmatmul.mubr.msk.bf16.gmra.mxu1 %vm2098_vm2, %v9159_v37 }
 0x678   :  { %v8925_v56 = vadd.f32 %v8537_v42, %v19474_v21  ;;  %v9055_v58 = vmax.f32 %v8927_v11, 0.0  ;;  %v8558_v55 = vadd.f32 %v12098_v1, %v17269_v60 }
 0x679   :  { %v8549_v43 = vpop.f32.mrf.mxu0 }
 0x67a   :  { %v9053_v6 = vmax.f32 %v8925_v56, 0.0  ;;  %v8550_v13 = vadd.f32 %v17269_v60, %v8549_v43  ;;  %v9161_v29 = vpack.c.bf16 %v9055_v58, %v9054_v25  ;;  %v8930_v45 = vadd.f32 %v8558_v55, %v19477_v27  ;;  %v19480_v58 = vld [vmem:[#allocation113_spill] sm:$0xff] }
 0x67b   :  { %v12099_v46 = vpop.f32.mrf.mxu0 }
 0x67c   :  { %v9160_v2 = vpack.c.bf16 %v9053_v6, %v9052_v24  ;;  %v8561_v41 = vadd.f32 %v12099_v46, %v17269_v60  ;;  %v8928_v4 = vadd.f32 %v8550_v13, %v19475_v32  ;;  %v9058_v53 = vmax.f32 %v8930_v45, 0.0  ;;  %v19482_v45 = vld [vmem:[#allocation114_spill] sm:$0xff] }
 0x67d   :  { %v8552_v19 = vpop.f32.mrf.mxu0 }
 0x67e   :  { %v8931_v51 = vadd.f32 %v8561_v41, %v19476_v5  ;;  %v8553_v35 = vadd.f32 %v17269_v60, %v8552_v19  ;;  %12224 = vmatprep.mubr.msk.bf16.mxu1 %vm2098_vm2, %v9160_v2  ;;  %v9056_v18 = vmax.f32 %v8928_v4, 0.0  ;;  %v19481_v4 = vld [vmem:[#allocation206_spill] sm:$0xff] }
 0x67f   :  { %v12102_v39 = vpop.f32.mrf.mxu0  ;;  %12225 = vmatmul.mubr.msk.bf16.gmra.mxu1 %vm2098_vm2, %v9161_v29 }
 0x680   :  { %v8929_v47 = vadd.f32 %v8553_v35, %v19478_v26  ;;  %v9059_v49 = vmax.f32 %v8931_v51, 0.0  ;;  %v8574_v37 = vadd.f32 %v12102_v39, %v17269_v60 }
 0x681   :  { %v8565_v48 = vpop.f32.mrf.mxu0 }
 0x682   :  { %v9057_v3 = vmax.f32 %v8929_v47, 0.0  ;;  %v8566_v28 = vadd.f32 %v17269_v60, %v8565_v48  ;;  %v9163_v7 = vpack.c.bf16 %v9059_v49, %v9058_v53  ;;  %v8934_v21 = vadd.f32 %v8574_v37, %v16518_v54 }
 0x683   :  { %v12103_v14 = vpop.f32.mrf.mxu0 }
 0x684   :  { %v9162_v52 = vpack.c.bf16 %v9057_v3, %v9056_v18  ;;  %v8577_v17 = vadd.f32 %v12103_v14, %v17269_v60  ;;  %v8932_v42 = vadd.f32 %v8566_v28, %v16508_v61  ;;  %v9062_v61 = vmax.f32 %v8934_v21, 0.0  ;;  %v19486_v21 = vld [vmem:[#allocation8_spill] sm:$0xff] }
 0x685   :  { %v8568_v11 = vpop.f32.mrf.mxu0 }
 0x686   :  { %v8935_v31 = vadd.f32 %v8577_v17, %v19479_v10  ;;  %v8569_v1 = vadd.f32 %v17269_v60, %v8568_v11  ;;  %12228 = vmatprep.mubr.msk.bf16.mxu1 %vm2098_vm2, %v9162_v52  ;;  %v9060_v13 = vmax.f32 %v8932_v42, 0.0  ;;  %v19483_v52 = vld [vmem:[#allocation293_spill] sm:$0xff] }
 0x687   :  { %v12106_v56 = vpop.f32.mrf.mxu0  ;;  %12229 = vmatmul.mubr.msk.bf16.gmra.mxu1 %vm2098_vm2, %v9163_v7  ;;  %v19484_v7 = vld [vmem:[#allocation7_spill] sm:$0xff]  ;;  %v19485_v10 = vld [vmem:[#allocation5_spill] sm:$0xff] }
 0x688   :  { %v8933_v43 = vadd.f32 %v8569_v1, %v19480_v58  ;;  %v9063_v24 = vmax.f32 %v8935_v31, 0.0  ;;  %v8590_v46 = vadd.f32 %v12106_v56, %v17269_v60 }
 0x689   :  { %v8581_v6 = vpop.f32.mrf.mxu0 }
 0x68a   :  { %v9061_v25 = vmax.f32 %v8933_v43, 0.0  ;;  %v8582_v55 = vadd.f32 %v17269_v60, %v8581_v6  ;;  %v9165_v19 = vpack.c.bf16 %v9063_v24, %v9062_v61  ;;  %v8938_v35 = vadd.f32 %v8590_v46, %v16550_v44 }
 0x68b   :  { %v12107_v2 = vpop.f32.mrf.mxu0 }
 0x68c   :  { %v9164_v41 = vpack.c.bf16 %v9061_v25, %v9060_v13  ;;  %v8593_v29 = vadd.f32 %v12107_v2, %v17269_v60  ;;  %v8936_v32 = vadd.f32 %v8582_v55, %v16544_v0  ;;  %v9066_v0 = vmax.f32 %v8938_v35, 0.0  ;;  %v19488_v35 = vld [vmem:[#allocation209_spill] sm:$0xff] }
 0x68d   :  { %v8584_v54 = vpop.f32.mrf.mxu0 }
 0x68e   :  { %v8939_v5 = vadd.f32 %v8593_v29, %v19481_v4  ;;  %v8585_v51 = vadd.f32 %v17269_v60, %v8584_v54  ;;  %12232 = vmatprep.mubr.msk.bf16.mxu1 %vm2098_vm2, %v9164_v41  ;;  %v9064_v49 = vmax.f32 %v8936_v32, 0.0  ;;  %v19487_v4 = vld [vmem:[#allocation118_spill] sm:$0xff] }
 0x68f   :  { %v12110_v27 = vpop.f32.mrf.mxu0  ;;  %12233 = vmatmul.mubr.msk.bf16.gmra.mxu1 %vm2098_vm2, %v9165_v19 }
 0x690   :  { %v8937_v39 = vadd.f32 %v8585_v51, %v19482_v45  ;;  %v9067_v26 = vmax.f32 %v8939_v5, 0.0  ;;  %v8606_v3 = vadd.f32 %v12110_v27, %v17269_v60 }
 0x691   :  { %v8597_v47 = vpop.f32.mrf.mxu0 }
 0x692   :  { %v9065_v48 = vmax.f32 %v8937_v39, 0.0  ;;  %v8598_v18 = vadd.f32 %v17269_v60, %v8597_v47  ;;  %v9167_v14 = vpack.c.bf16 %v9067_v26, %v9066_v0  ;;  %v8942_v31 = vadd.f32 %v8606_v3, %v19485_v10 }
 0x693   :  { %v12111_v28 = vpop.f32.mrf.mxu0 }
 0x694   :  { %v9166_v53 = vpack.c.bf16 %v9065_v48, %v9064_v49  ;;  %v8609_v37 = vadd.f32 %v12111_v28, %v17269_v60  ;;  %v8940_v17 = vadd.f32 %v8598_v18, %v19483_v52  ;;  %v9070_v25 = vmax.f32 %v8942_v31, 0.0 }
 0x695   :  { %v8600_v44 = vpop.f32.mrf.mxu0 }
 0x696   :  { %v8943_v11 = vadd.f32 %v8609_v37, %v19484_v7  ;;  %v8601_v42 = vadd.f32 %v17269_v60, %v8600_v44  ;;  %12236 = vmatprep.mubr.msk.bf16.mxu1 %vm2098_vm2, %v9166_v53  ;;  %v9068_v24 = vmax.f32 %v8940_v17, 0.0  ;;  %v19489_v37 = vld [vmem:[#allocation117_spill] sm:$0xff]  ;;  %v19490_v7 = vld [vmem:[#allocation211_spill] sm:$0xff] }
 0x697   :  { %v12114_v1 = vpop.f32.mrf.mxu0  ;;  %12237 = vmatmul.mubr.msk.bf16.gmra.mxu1 %vm2098_vm2, %v9167_v14 }
 0x698   :  { %v8941_v56 = vadd.f32 %v8601_v42, %v19486_v21  ;;  %v9071_v58 = vmax.f32 %v8943_v11, 0.0  ;;  %v8622_v55 = vadd.f32 %v12114_v1, %v17269_v60 }
 0x699   :  { %v8613_v43 = vpop.f32.mrf.mxu0 }
 0x69a   :  { %v9069_v6 = vmax.f32 %v8941_v56, 0.0  ;;  %v8614_v13 = vadd.f32 %v17269_v60, %v8613_v43  ;;  %v9169_v41 = vpack.c.bf16 %v9071_v58, %v9070_v25  ;;  %v8946_v5 = vadd.f32 %v8622_v55, %v19487_v4  ;;  %v19492_v55 = vld [vmem:[#allocation121_spill] sm:$0xff] }
 0x69b   :  { %v12115_v61 = vpop.f32.mrf.mxu0 }
 0x69c   :  { %v9168_v46 = vpack.c.bf16 %v9069_v6, %v9068_v24  ;;  %v8625_v2 = vadd.f32 %v12115_v61, %v17269_v60  ;;  %v8944_v19 = vadd.f32 %v8614_v13, %v16609_v15  ;;  %v9074_v15 = vmax.f32 %v8946_v5, 0.0  ;;  %v19491_v13 = vld [vmem:[#allocation212_spill] sm:$0xff] }
 0x69d   :  { %v8616_v29 = vpop.f32.mrf.mxu0 }
 0x69e   :  { %v8947_v54 = vadd.f32 %v8625_v2, %v16612_v30  ;;  %v8617_v32 = vadd.f32 %v17269_v60, %v8616_v29  ;;  %12240 = vmatprep.mubr.msk.bf16.mxu1 %vm2098_vm2, %v9168_v46  ;;  %v9072_v26 = vmax.f32 %v8944_v19, 0.0  ;;  %v19493_v2 = vld [vmem:[#allocation9_spill] sm:$0xff]  ;;  %v19494_v19 = vld [vmem:[#allocation210_spill] sm:$0xff] }
 0x69f   :  { %v12118_v51 = vpop.f32.mrf.mxu0  ;;  %12241 = vmatmul.mubr.msk.bf16.gmra.mxu1 %vm2098_vm2, %v9169_v41 }
 0x6a0   :  { %v8945_v27 = vadd.f32 %v8617_v32, %v19488_v35  ;;  %v9075_v45 = vmax.f32 %v8947_v54, 0.0  ;;  %v8638_v30 = vadd.f32 %v12118_v51, %v17269_v60 }
 0x6a1   :  { %v8629_v39 = vpop.f32.mrf.mxu0 }
 0x6a2   :  { %v9073_v47 = vmax.f32 %v8945_v27, 0.0  ;;  %v8630_v49 = vadd.f32 %v17269_v60, %v8629_v39  ;;  %v9171_v3 = vpack.c.bf16 %v9075_v45, %v9074_v15  ;;  %v8950_v52 = vadd.f32 %v8638_v30, %v16649_v8 }
 0x6a3   :  { %v12119_v48 = vpop.f32.mrf.mxu0 }
 0x6a4   :  { %v9170_v18 = vpack.c.bf16 %v9073_v47, %v9072_v26  ;;  %v8641_v0 = vadd.f32 %v12119_v48, %v17269_v60  ;;  %v8948_v53 = vadd.f32 %v8630_v49, %v16639_v34  ;;  %v9078_v34 = vmax.f32 %v8950_v52, 0.0  ;;  %v19495_v48 = vld [vmem:[#allocation122_spill] sm:$0xff] }
 0x6a5   :  { %v8632_v28 = vpop.f32.mrf.mxu0 }
 0x6a6   :  { %v8951_v14 = vadd.f32 %v8641_v0, %v19489_v37  ;;  %v8633_v44 = vadd.f32 %v17269_v60, %v8632_v28  ;;  %12244 = vmatprep.mubr.msk.bf16.mxu1 %vm2098_vm2, %v9170_v18  ;;  %v9076_v31 = vmax.f32 %v8948_v53, 0.0  ;;  %v19496_v53 = vld [vmem:[#allocation10_spill] sm:$0xff] }
 0x6a7   :  { %v12122_v17 = vpop.f32.mrf.mxu0  ;;  %12245 = vmatmul.mubr.msk.bf16.gmra.mxu1 %vm2098_vm2, %v9171_v3 }
 0x6a8   :  { %v8949_v11 = vadd.f32 %v8633_v44, %v19490_v7  ;;  %v9079_v42 = vmax.f32 %v8951_v14, 0.0  ;;  %v8654_v56 = vadd.f32 %v12122_v17, %v17269_v60 }
 0x6a9   :  { %v8645_v10 = vpop.f32.mrf.mxu0 }
 0x6aa   :  { %v9077_v1 = vmax.f32 %v8949_v11, 0.0  ;;  %v8646_v21 = vadd.f32 %v17269_v60, %v8645_v10  ;;  %v9173_v6 = vpack.c.bf16 %v9079_v42, %v9078_v34  ;;  %v8954_v41 = vadd.f32 %v8654_v56, %v19493_v2  ;;  %v19497_v34 = vld [vmem:[#allocation11_spill] sm:$0xff] }
 0x6ab   :  { %v12123_v58 = vpop.f32.mrf.mxu0 }
 0x6ac   :  { %v9172_v43 = vpack.c.bf16 %v9077_v1, %v9076_v31  ;;  %v8657_v24 = vadd.f32 %v12123_v58, %v17269_v60  ;;  %v8952_v25 = vadd.f32 %v8646_v21, %v19491_v13  ;;  %v9082_v27 = vmax.f32 %v8954_v41, 0.0 }
 0x6ad   :  { %v8648_v8 = vpop.f32.mrf.mxu0 }
 0x6ae   :  { %v8955_v61 = vadd.f32 %v8657_v24, %v19492_v55  ;;  %v8649_v46 = vadd.f32 %v17269_v60, %v8648_v8  ;;  %12248 = vmatprep.mubr.msk.bf16.mxu1 %vm2098_vm2, %v9172_v43  ;;  %v9080_v5 = vmax.f32 %v8952_v25, 0.0 }
 0x6af   :  { %v12126_v29 = vpop.f32.mrf.mxu0  ;;  %12249 = vmatmul.mubr.msk.bf16.gmra.mxu1 %vm2098_vm2, %v9173_v6  ;;  %v19498_v6 = vld [vmem:[#allocation126_spill] sm:$0xff] }
 0x6b0   :  { %v8953_v54 = vadd.f32 %v8649_v46, %v19494_v19  ;;  %v9083_v32 = vmax.f32 %v8955_v61, 0.0  ;;  %v8670_v45 = vadd.f32 %v12126_v29, %v17269_v60 }
 0x6b1   :  { %v8661_v4 = vpop.f32.mrf.mxu0 }
 0x6b2   :  { %v9081_v51 = vmax.f32 %v8953_v54, 0.0  ;;  %v8662_v35 = vadd.f32 %v17269_v60, %v8661_v4  ;;  %v9175_v49 = vpack.c.bf16 %v9083_v32, %v9082_v27  ;;  %v8958_v3 = vadd.f32 %v8670_v45, %v16711_v59  ;;  %v19499_v4 = vld [vmem:[#allocation125_spill] sm:$0xff] }
 0x6b3   :  { %v12127_v39 = vpop.f32.mrf.mxu0 }
 0x6b4   :  { %v9174_v26 = vpack.c.bf16 %v9081_v51, %v9080_v5  ;;  %v8673_v47 = vadd.f32 %v12127_v39, %v17269_v60  ;;  %v8956_v30 = vadd.f32 %v8662_v35, %v16701_v40  ;;  %v9086_v40 = vmax.f32 %v8958_v3, 0.0  ;;  %v19500_v51 = vld [vmem:[#allocation213_spill] sm:$0xff] }
 0x6b5   :  { %v8664_v15 = vpop.f32.mrf.mxu0 }
 0x6b6   :  { %v8959_v18 = vadd.f32 %v8673_v47, %v19495_v48  ;;  %v8665_v0 = vadd.f32 %v17269_v60, %v8664_v15  ;;  %12252 = vmatprep.mubr.msk.bf16.mxu1 %vm2098_vm2, %v9174_v26  ;;  %v9084_v52 = vmax.f32 %v8956_v30, 0.0  ;;  %v19502_v26 = vld [vmem:[#allocation216_spill] sm:$0xff] }
 0x6b7   :  { %v12130_v28 = vpop.f32.mrf.mxu0  ;;  %12253 = vmatmul.mubr.msk.bf16.gmra.mxu1 %vm2098_vm2, %v9175_v49 }
 0x6b8   :  { %v8957_v37 = vadd.f32 %v8665_v0, %v19496_v53  ;;  %v9087_v14 = vmax.f32 %v8959_v18, 0.0  ;;  %v8686_v11 = vadd.f32 %v12130_v28, %v17269_v60 }
 0x6b9   :  { %v8677_v44 = vpop.f32.mrf.mxu0 }
 0x6ba   :  { %v9085_v17 = vmax.f32 %v8957_v37, 0.0  ;;  %v8678_v7 = vadd.f32 %v17269_v60, %v8677_v44  ;;  %v9177_v1 = vpack.c.bf16 %v9087_v14, %v9086_v40  ;;  %v8962_v43 = vadd.f32 %v8686_v11, %v16743_v22  ;;  %v17518_v22 = vld [vmem:[%s17780_s6 + $0x2] ss:$0 sm:$0xff]  ;;  %v19504_v11 = vld [vmem:[#allocation214_spill] sm:$0xff] }
 0x6bb   :  { %v12131_v42 = vpop.f32.mrf.mxu0 }
 0x6bc   :  { %v9176_v10 = vpack.c.bf16 %v9085_v17, %v9084_v52  ;;  %v8689_v31 = vadd.f32 %v12131_v42, %v17269_v60  ;;  %v8960_v21 = vadd.f32 %v8678_v7, %v16737_v62  ;;  %v9090_v62 = vmax.f32 %v8962_v43, 0.0  ;;  %v19503_v17 = vld [vmem:[#allocation129_spill] sm:$0xff] }
 0x6bd   :  { %v8680_v59 = vpop.f32.mrf.mxu0 }
 0x6be   :  { %v8963_v56 = vadd.f32 %v8689_v31, %v19497_v34  ;;  %v8681_v58 = vadd.f32 %v17269_v60, %v8680_v59  ;;  %12256 = vmatprep.mubr.msk.bf16.mxu1 %vm2098_vm2, %v9176_v10  ;;  %v9088_v55 = vmax.f32 %v8960_v21, 0.0  ;;  %v19505_v31 = vld [vmem:[#allocation130_spill] sm:$0xff] }
 0x6bf   :  { %v12134_v24 = vpop.f32.mrf.mxu0  ;;  %12257 = vmatmul.mubr.msk.bf16.gmra.mxu1 %vm2098_vm2, %v9177_v1 }
 0x6c0   :  { %v8961_v8 = vadd.f32 %v8681_v58, %v19498_v6  ;;  %v9091_v13 = vmax.f32 %v8963_v56, 0.0  ;;  %v8702_v2 = vadd.f32 %v12134_v24, %v17269_v60 }
 0x6c1   :  { %v8693_v25 = vpop.f32.mrf.mxu0 }
 0x6c2   :  { %v9089_v61 = vmax.f32 %v8961_v8, 0.0  ;;  %v8694_v46 = vadd.f32 %v17269_v60, %v8693_v25  ;;  %v9179_v54 = vpack.c.bf16 %v9091_v13, %v9090_v62  ;;  %v19501_v60 = vld [vmem:[#allocation215_spill] sm:$0xff] }
 0x6c3   :  { %v12135_v41 = vpop.f32.mrf.mxu0  ;;  %v8966_v45 = vadd.f32 %v8702_v2, %v19501_v60  ;;  %v19507_v2 = vld [vmem:[#allocation15_spill] sm:$0xff] }
 0x6c4   :  { %v9178_v29 = vpack.c.bf16 %v9089_v61, %v9088_v55  ;;  %v8705_v19 = vadd.f32 %v17518_v22, %v12135_v41  ;;  %v8964_v5 = vadd.f32 %v8694_v46, %v19499_v4  ;;  %v19506_v61 = vld [vmem:[#allocation65_spill] sm:$0xff] }
 0x6c5   :  { %v8696_v32 = vpop.f32.mrf.mxu0  ;;  %v9094_v0 = vmax.f32 %v8966_v45, 0.0 }
 0x6c6   :  { %v8967_v35 = vadd.f32 %v8705_v19, %v19500_v51  ;;  %v8697_v27 = vadd.f32 %v17518_v22, %v8696_v32  ;;  %12260 = vmatprep.mubr.msk.bf16.mxu1 %vm2098_vm2, %v9178_v29  ;;  %v9092_v30 = vmax.f32 %v8964_v5, 0.0  ;;  %v19508_v19 = vld [vmem:[#allocation134_spill] sm:$0xff] }
 0x6c7   :  { %v12138_v39 = vpop.f32.mrf.mxu0  ;;  %12261 = vmatmul.mubr.msk.bf16.gmra.mxu1 %vm2098_vm2, %v9179_v54 }
 0x6c8   :  { %v8965_v47 = vadd.f32 %v8697_v27, %v19502_v26  ;;  %v9095_v49 = vmax.f32 %v8967_v35, 0.0  ;;  %v8718_v3 = vadd.f32 %v17518_v22, %v12138_v39 }
 0x6c9   :  { %v8709_v15 = vpop.f32.mrf.mxu0 }
 0x6ca   :  { %v9093_v48 = vmax.f32 %v8965_v47, 0.0  ;;  %v8710_v18 = vadd.f32 %v17518_v22, %v8709_v15  ;;  %v9181_v14 = vpack.c.bf16 %v9095_v49, %v9094_v0  ;;  %v8970_v42 = vadd.f32 %v8718_v3, %v19504_v11  ;;  %v19509_v49 = vld [vmem:[#allocation217_spill] sm:$0xff]  ;;  %v19511_v0 = vld [vmem:[#allocation219_spill] sm:$0xff] }
 0x6cb   :  { %v12139_v28 = vpop.f32.mrf.mxu0 }
 0x6cc   :  { %v9180_v53 = vpack.c.bf16 %v9093_v48, %v9092_v30  ;;  %v8721_v37 = vadd.f32 %v17518_v22, %v12139_v28  ;;  %v8968_v52 = vadd.f32 %v8710_v18, %v16797_v12  ;;  %v9098_v12 = vmax.f32 %v8970_v42, 0.0  ;;  %v19510_v30 = vld [vmem:[#allocation133_spill] sm:$0xff] }
 0x6cd   :  { %v8712_v44 = vpop.f32.mrf.mxu0 }
 0x6ce   :  { %v8971_v7 = vadd.f32 %v8721_v37, %v19503_v17  ;;  %v8713_v40 = vadd.f32 %v17518_v22, %v8712_v44  ;;  %12264 = vmatprep.mubr.msk.bf16.mxu1 %vm2098_vm2, %v9180_v53  ;;  %v9096_v34 = vmax.f32 %v8968_v52, 0.0  ;;  %v19512_v53 = vld [vmem:[#allocation220_spill] sm:$0xff] }
 0x6cf   :  { %v12142_v10 = vpop.f32.mrf.mxu0  ;;  %12265 = vmatmul.mubr.msk.bf16.gmra.mxu1 %vm2098_vm2, %v9181_v14 }
 0x6d0   :  { %v8969_v1 = vadd.f32 %v8713_v40, %v19505_v31  ;;  %v9099_v59 = vmax.f32 %v8971_v7, 0.0  ;;  %v8734_v43 = vadd.f32 %v17518_v22, %v12142_v10 }
 0x6d1   :  { %v8725_v21 = vpop.f32.mrf.mxu0 }
 0x6d2   :  { %v9097_v56 = vmax.f32 %v8969_v1, 0.0  ;;  %v8726_v58 = vadd.f32 %v17518_v22, %v8725_v21  ;;  %v9183_v13 = vpack.c.bf16 %v9099_v59, %v9098_v12  ;;  %v8974_v41 = vadd.f32 %v8734_v43, %v19507_v2  ;;  %v19513_v21 = vld [vmem:[#allocation137_spill] sm:$0xff]  ;;  %v19515_v43 = vld [vmem:[#allocation138_spill] sm:$0xff] }
 0x6d3   :  { %v12143_v24 = vpop.f32.mrf.mxu0  ;;  %v17572_v2 = vld [vmem:[%s17782_s8] ss:$0 sm:$0xff] }
 0x6d4   :  { %v9182_v6 = vpack.c.bf16 %v9097_v56, %v9096_v34  ;;  %v8737_v8 = vadd.f32 %v17518_v22, %v12143_v24  ;;  %v8972_v55 = vadd.f32 %v8726_v58, %v16830_v20  ;;  %v9102_v20 = vmax.f32 %v8974_v41, 0.0  ;;  %v19514_v56 = vld [vmem:[#allocation218_spill] sm:$0xff] }
 0x6d5   :  { %v8728_v25 = vpop.f32.mrf.mxu0 }
 0x6d6   :  { %v8975_v46 = vadd.f32 %v8737_v8, %v19506_v61  ;;  %v8729_v62 = vadd.f32 %v17518_v22, %v8728_v25  ;;  %12268 = vmatprep.mubr.msk.bf16.mxu1 %vm2098_vm2, %v9182_v6  ;;  %v9100_v5 = vmax.f32 %v8972_v55, 0.0  ;;  %v19516_v8 = vld [vmem:[#allocation76_spill] sm:$0xff] }
 0x6d7   :  { %v12146_v29 = vpop.f32.mrf.mxu0  ;;  %12269 = vmatmul.mubr.msk.bf16.gmra.mxu1 %vm2098_vm2, %v9183_v13 }
 0x6d8   :  { %v8973_v54 = vadd.f32 %v8729_v62, %v19508_v19  ;;  %v9103_v32 = vmax.f32 %v8975_v46, 0.0  ;;  %v8750_v27 = vadd.f32 %v17518_v22, %v12146_v29 }
 0x6d9   :  { %v8741_v4 = vpop.f32.mrf.mxu0 }
 0x6da   :  { %v9101_v51 = vmax.f32 %v8973_v54, 0.0  ;;  %v8742_v35 = vadd.f32 %v17518_v22, %v8741_v4  ;;  %v9185_v26 = vpack.c.bf16 %v9103_v32, %v9102_v20  ;;  %v8978_v3 = vadd.f32 %v8750_v27, %v19511_v0  ;;  %v19517_v20 = vld [vmem:[#allocation142_spill] sm:$0xff] }
 0x6db   :  { %v12147_v60 = vpop.f32.mrf.mxu0 }
 0x6dc   :  { %v9184_v45 = vpack.c.bf16 %v9101_v51, %v9100_v5  ;;  %v8753_v39 = vadd.f32 %v17518_v22, %v12147_v60  ;;  %v8976_v15 = vadd.f32 %v8742_v35, %v19509_v49  ;;  %v9106_v40 = vmax.f32 %v8978_v3, 0.0  ;;  %v19518_v60 = vld [vmem:[#allocation141_spill] sm:$0xff] }
 0x6dd   :  { %v8744_v47 = vpop.f32.mrf.mxu0 }
 0x6de   :  { %v8979_v48 = vadd.f32 %v8753_v39, %v19510_v30  ;;  %v8745_v18 = vadd.f32 %v17518_v22, %v8744_v47  ;;  %12272 = vmatprep.mubr.msk.bf16.mxu1 %vm2098_vm2, %v9184_v45  ;;  %v9104_v52 = vmax.f32 %v8976_v15, 0.0  ;;  %v19519_v47 = vld [vmem:[#allocation221_spill] sm:$0xff] }
 0x6df   :  { %v12150_v28 = vpop.f32.mrf.mxu0  ;;  %12273 = vmatmul.mubr.msk.bf16.gmra.mxu1 %vm2098_vm2, %v9185_v26 }
 0x6e0   :  { %v8977_v37 = vadd.f32 %v8745_v18, %v19512_v53  ;;  %v9107_v14 = vmax.f32 %v8979_v48, 0.0  ;;  %v8766_v11 = vadd.f32 %v17518_v22, %v12150_v28  ;;  %v19520_v48 = vld [vmem:[#allocation223_spill] sm:$0xff] }
 0x6e1   :  { %v8757_v44 = vpop.f32.mrf.mxu0 }
 0x6e2   :  { %v9105_v17 = vmax.f32 %v8977_v37, 0.0  ;;  %v8758_v7 = vadd.f32 %v17518_v22, %v8757_v44  ;;  %v9187_v1 = vpack.c.bf16 %v9107_v14, %v9106_v40  ;;  %v8982_v24 = vadd.f32 %v8766_v11, %v19515_v43 }
 0x6e3   :  { %v12151_v42 = vpop.f32.mrf.mxu0 }
 0x6e4   :  { %v9186_v10 = vpack.c.bf16 %v9105_v17, %v9104_v52  ;;  %v8769_v31 = vadd.f32 %v17518_v22, %v12151_v42  ;;  %v8980_v34 = vadd.f32 %v8758_v7, %v19513_v21  ;;  %v9110_v41 = vmax.f32 %v8982_v24, 0.0  ;;  %v19521_v21 = vld [vmem:[#allocation224_spill] sm:$0xff] }
 0x6e5   :  { %v8760_v59 = vpop.f32.mrf.mxu0 }
 0x6e6   :  { %v8983_v58 = vadd.f32 %v8769_v31, %v19514_v56  ;;  %v8761_v12 = vadd.f32 %v17518_v22, %v8760_v59  ;;  %12276 = vmatprep.mubr.msk.bf16.mxu1 %vm2098_vm2, %v9186_v10  ;;  %v9108_v61 = vmax.f32 %v8980_v34, 0.0 }
 0x6e7   :  { %v12154_v6 = vpop.f32.mrf.mxu0  ;;  %12277 = vmatmul.mubr.msk.bf16.gmra.mxu1 %vm2098_vm2, %v9187_v1 }
 0x6e8   :  { %v8981_v13 = vadd.f32 %v8761_v12, %v19516_v8  ;;  %v9111_v25 = vmax.f32 %v8983_v58, 0.0  ;;  %v8782_v29 = vadd.f32 %v17518_v22, %v12154_v6  ;;  %v19522_v58 = vld [vmem:[#allocation145_spill] sm:$0xff]  ;;  %v19523_v6 = vld [vmem:[#allocation222_spill] sm:$0xff] }
 0x6e9   :  { %v8773_v55 = vpop.f32.mrf.mxu0 }
 0x6ea   :  { %v9109_v46 = vmax.f32 %v8981_v13, 0.0  ;;  %v8774_v62 = vadd.f32 %v17518_v22, %v8773_v55  ;;  %v9189_v5 = vpack.c.bf16 %v9111_v25, %v9110_v41  ;;  %v8986_v49 = vadd.f32 %v8782_v29, %v19519_v47 }
 0x6eb   :  { %v12155_v19 = vpop.f32.mrf.mxu0  ;;  %v12186_v4 = vpop.f32.mrf.mxu1 }
 0x6ec   :  { %v9188_v54 = vpack.c.bf16 %v9109_v46, %v9108_v61  ;;  %v8785_v32 = vadd.f32 %v17518_v22, %v12155_v19  ;;  %v9462_v51 = vadd.f32 %v12186_v4, %v17572_v2  ;;  %v8984_v27 = vadd.f32 %v8774_v62, %v19517_v20 }
 0x6ed   :  { %v8776_v35 = vpop.f32.mrf.mxu0  ;;  %v9453_v26 = vpop.f32.mrf.mxu1  ;;  %v9114_v17 = vmax.f32 %v8986_v49, 0.0  ;;  %v19525_v49 = vld [vmem:[#allocation150_spill] sm:$0xff] }
 0x6ee   :  { %v8987_v45 = vadd.f32 %v8785_v32, %v19518_v60  ;;  %v8777_v39 = vadd.f32 %v17518_v22, %v8776_v35  ;;  %12280 = vmatprep.mubr.msk.bf16.mxu1 %vm2098_vm2, %v9188_v54  ;;  %9966 = vst [vmem:[#allocation2 + $0x10] sm:$0xff] %v9462_v51  ;;  %v9454_v15 = vadd.f32 %v17572_v2, %v9453_v26  ;;  %v9112_v37 = vmax.f32 %v8984_v27, 0.0 }
 0x6ef   :  { %v12158_v30 = vpop.f32.mrf.mxu0  ;;  %12281 = vmatmul.mubr.msk.bf16.gmra.mxu1 %vm2098_vm2, %v9189_v5  ;;  %v12187_v0 = vpop.f32.mrf.mxu1 }
 0x6f0   :  { %v8985_v18 = vadd.f32 %v8777_v39, %v19520_v48  ;;  %v9115_v3 = vmax.f32 %v8987_v45, 0.0  ;;  %9964 = vst [vmem:[#allocation2] sm:$0xff] %v9454_v15  ;;  %v9465_v28 = vadd.f32 %v12187_v0, %v17572_v2  ;;  %v8798_v7 = vadd.f32 %v17518_v22, %v12158_v30  ;;  %v19524_v45 = vld [vmem:[#allocation146_spill] sm:$0xff] }
 0x6f1   :  { %v8789_v53 = vpop.f32.mrf.mxu0  ;;  %v9456_v52 = vpop.f32.mrf.mxu1 }
 0x6f2   :  { %v9113_v14 = vmax.f32 %v8985_v18, 0.0  ;;  %v8790_v44 = vadd.f32 %v17518_v22, %v8789_v53  ;;  %9967 = vst [vmem:[#allocation2 + $0x18] sm:$0xff] %v9465_v28  ;;  %v9457_v40 = vadd.f32 %v17572_v2, %v9456_v52  ;;  %v9191_v31 = vpack.c.bf16 %v9115_v3, %v9114_v17  ;;  %v19526_v18 = vld [vmem:[#allocation225_spill] sm:$0xff] }
 0x6f3   :  { %v12159_v11 = vpop.f32.mrf.mxu0  ;;  %v8990_v12 = vadd.f32 %v8798_v7, %v19522_v58  ;;  %v19528_v58 = vld [vmem:[#allocation227_spill] sm:$0xff] }
 0x6f4   :  { %v9190_v42 = vpack.c.bf16 %v9113_v14, %v9112_v37  ;;  %v8801_v10 = vadd.f32 %v17518_v22, %v12159_v11  ;;  %9965 = vst [vmem:[#allocation2 + $0x8] sm:$0xff] %v9457_v40  ;;  %v8988_v59 = vadd.f32 %v8790_v44, %v16965_v9 }
 0x6f5   :  { %v8792_v1 = vpop.f32.mrf.mxu0  ;;  %v9118_v41 = vmax.f32 %v8990_v12, 0.0 }
 0x6f6   :  { %v8991_v34 = vadd.f32 %v8801_v10, %v19521_v21  ;;  %v8793_v56 = vadd.f32 %v17518_v22, %v8792_v1  ;;  %12284 = vmatprep.mubr.msk.bf16.mxu1 %vm2098_vm2, %v9190_v42  ;;  %v9116_v9 = vmax.f32 %v8988_v59, 0.0 }
 0x6f7   :  { %v12162_v43 = vpop.f32.mrf.mxu0  ;;  %v12190_v24 = vpop.f32.mrf.mxu1  ;;  %12285 = vmatmul.mubr.msk.bf16.gmra.mxu1 %vm2098_vm2, %v9191_v31 }
 0x6f8   :  { %v8989_v8 = vadd.f32 %v8793_v56, %v19523_v6  ;;  %v9478_v13 = vadd.f32 %v12190_v24, %v17572_v2  ;;  %v9119_v25 = vmax.f32 %v8991_v34, 0.0  ;;  %v8814_v29 = vadd.f32 %v17518_v22, %v12162_v43  ;;  %v19527_v34 = vld [vmem:[#allocation149_spill] sm:$0xff]  ;;  %v19529_v6 = vld [vmem:[#allocation228_spill] sm:$0xff] }
 0x6f9   :  { %v8805_v55 = vpop.f32.mrf.mxu0  ;;  %v9469_v61 = vpop.f32.mrf.mxu1 }
 0x6fa   :  { %v9117_v46 = vmax.f32 %v8989_v8, 0.0  ;;  %9970 = vst [vmem:[#allocation2 + $0x30] sm:$0xff] %v9478_v13  ;;  %v8806_v62 = vadd.f32 %v17518_v22, %v8805_v55  ;;  %v9470_v19 = vadd.f32 %v17572_v2, %v9469_v61  ;;  %v9193_v51 = vpack.c.bf16 %v9119_v25, %v9118_v41  ;;  %v19530_v55 = vld [vmem:[#allocation153_spill] sm:$0xff] }
 0x6fb   :  { %v12163_v54 = vpop.f32.mrf.mxu0  ;;  %v12191_v32 = vpop.f32.mrf.mxu1  ;;  %v8994_v15 = vadd.f32 %v8814_v29, %v19525_v49 }
 0x6fc   :  { %v9192_v4 = vpack.c.bf16 %v9117_v46, %v9116_v9  ;;  %v8817_v5 = vadd.f32 %v17518_v22, %v12163_v54  ;;  %9968 = vst [vmem:[#allocation2 + $0x20] sm:$0xff] %v9470_v19  ;;  %v9481_v35 = vadd.f32 %v12191_v32, %v17572_v2  ;;  %v8992_v60 = vadd.f32 %v8806_v62, %v17002_v33 }
 0x6fd   :  { %v8808_v20 = vpop.f32.mrf.mxu0  ;;  %v9472_v27 = vpop.f32.mrf.mxu1  ;;  %v9122_v52 = vmax.f32 %v8994_v15, 0.0 }
 0x6fe   :  { %v8995_v39 = vadd.f32 %v8817_v5, %v19524_v45  ;;  %v8809_v26 = vadd.f32 %v17518_v22, %v8808_v20  ;;  %v9473_v47 = vadd.f32 %v17572_v2, %v9472_v27  ;;  %12288 = vmatprep.mubr.msk.bf16.mxu1 %vm2098_vm2, %v9192_v4  ;;  %9971 = vst [vmem:[#allocation2 + $0x38] sm:$0xff] %v9481_v35  ;;  %v9120_v37 = vmax.f32 %v8992_v60, 0.0 }
 0x6ff   :  { %v12166_v30 = vpop.f32.mrf.mxu0  ;;  %v12194_v48 = vpop.f32.mrf.mxu1  ;;  %12289 = vmatmul.mubr.msk.bf16.gmra.mxu1 %vm2098_vm2, %v9193_v51 }
 0x700   :  { %v8993_v0 = vadd.f32 %v8809_v26, %v19526_v18  ;;  %9969 = vst [vmem:[#allocation2 + $0x28] sm:$0xff] %v9473_v47  ;;  %v9494_v33 = vadd.f32 %v12194_v48, %v17572_v2  ;;  %v9123_v3 = vmax.f32 %v8995_v39, 0.0  ;;  %v8830_v17 = vadd.f32 %v17518_v22, %v12166_v30 }
 0x701   :  { %v8821_v28 = vpop.f32.mrf.mxu0  ;;  %v9485_v53 = vpop.f32.mrf.mxu1 }
 0x702   :  { %v9121_v14 = vmax.f32 %v8993_v0, 0.0  ;;  %9974 = vst [vmem:[#allocation2 + $0x50] sm:$0xff] %v9494_v33  ;;  %v8822_v44 = vadd.f32 %v17518_v22, %v8821_v28  ;;  %v9486_v7 = vadd.f32 %v17572_v2, %v9485_v53  ;;  %v9195_v31 = vpack.c.bf16 %v9123_v3, %v9122_v52  ;;  %v19531_v33 = vld [vmem:[#allocation226_spill] sm:$0xff] }
 0x703   :  { %v12167_v40 = vpop.f32.mrf.mxu0  ;;  %v12195_v11 = vpop.f32.mrf.mxu1  ;;  %v8998_v8 = vadd.f32 %v8830_v17, %v19529_v6 }
 0x704   :  { %v9194_v42 = vpack.c.bf16 %v9121_v14, %v9120_v37  ;;  %v8833_v10 = vadd.f32 %v17518_v22, %v12167_v40  ;;  %9972 = vst [vmem:[#allocation2 + $0x40] sm:$0xff] %v9486_v7  ;;  %v9497_v1 = vadd.f32 %v12195_v11, %v17572_v2  ;;  %v8996_v56 = vadd.f32 %v8822_v44, %v19527_v34  ;;  %v19532_v34 = vld [vmem:[#allocation154_spill] sm:$0xff] }
 0x705   :  { %v8824_v59 = vpop.f32.mrf.mxu0  ;;  %v9488_v21 = vpop.f32.mrf.mxu1  ;;  %v9126_v32 = vmax.f32 %v8998_v8, 0.0 }
 0x706   :  { %v8999_v12 = vadd.f32 %v8833_v10, %v19528_v58  ;;  %v8825_v43 = vadd.f32 %v17518_v22, %v8824_v59  ;;  %v9489_v24 = vadd.f32 %v17572_v2, %v9488_v21  ;;  %12292 = vmatprep.mubr.msk.bf16.mxu1 %vm2098_vm2, %v9194_v42  ;;  %9975 = vst [vmem:[#allocation2 + $0x58] sm:$0xff] %v9497_v1  ;;  %v9124_v29 = vmax.f32 %v8996_v56, 0.0 }
 0x707   :  { %v12170_v13 = vpop.f32.mrf.mxu0  ;;  %v12198_v25 = vpop.f32.mrf.mxu1  ;;  %12293 = vmatmul.mubr.msk.bf16.gmra.mxu1 %vm2098_vm2, %v9195_v31 }
 0x708   :  { %v8997_v61 = vadd.f32 %v8825_v43, %v19530_v55  ;;  %9973 = vst [vmem:[#allocation2 + $0x48] sm:$0xff] %v9489_v24  ;;  %v9510_v9 = vadd.f32 %v12198_v25, %v17572_v2  ;;  %v9127_v46 = vmax.f32 %v8999_v12, 0.0  ;;  %v8846_v4 = vadd.f32 %v17518_v22, %v12170_v13  ;;  %v19533_v43 = vld [vmem:[#allocation158_spill] sm:$0xff]  ;;  %v19534_v13 = vld [vmem:[#allocation157_spill] sm:$0xff] }
 0x709   :  { %v8837_v62 = vpop.f32.mrf.mxu0  ;;  %v9501_v41 = vpop.f32.mrf.mxu1 }
 0x70a   :  { %v9125_v19 = vmax.f32 %v8997_v61, 0.0  ;;  %9978 = vst [vmem:[#allocation2 + $0x70] sm:$0xff] %v9510_v9  ;;  %v8838_v54 = vadd.f32 %v17518_v22, %v8837_v62  ;;  %v9502_v5 = vadd.f32 %v17572_v2, %v9501_v41  ;;  %v9197_v60 = vpack.c.bf16 %v9127_v46, %v9126_v32 }
 0x70b   :  { %v12171_v51 = vpop.f32.mrf.mxu0  ;;  %v12199_v35 = vpop.f32.mrf.mxu1  ;;  %v9002_v48 = vadd.f32 %v8846_v4, %v17078_v57 }
 0x70c   :  { %v9196_v20 = vpack.c.bf16 %v9125_v19, %v9124_v29  ;;  %v8849_v27 = vadd.f32 %v17518_v22, %v12171_v51  ;;  %9976 = vst [vmem:[#allocation2 + $0x60] sm:$0xff] %v9502_v5  ;;  %v9513_v45 = vadd.f32 %v12199_v35, %v17572_v2  ;;  %v9000_v47 = vadd.f32 %v8838_v54, %v17072_v38 }
 0x70d   :  { %v8840_v39 = vpop.f32.mrf.mxu0  ;;  %v9504_v26 = vpop.f32.mrf.mxu1  ;;  %v9130_v52 = vmax.f32 %v9002_v48, 0.0 }
 0x70e   :  { %v9003_v49 = vadd.f32 %v8849_v27, %v17074_v63  ;;  %v8841_v15 = vadd.f32 %v17518_v22, %v8840_v39  ;;  %v9505_v30 = vadd.f32 %v17572_v2, %v9504_v26  ;;  %12296 = vmatprep.mubr.msk.bf16.mxu1 %vm2098_vm2, %v9196_v20  ;;  %9979 = vst [vmem:[#allocation2 + $0x78] sm:$0xff] %v9513_v45  ;;  %v9128_v37 = vmax.f32 %v9000_v47, 0.0 }
 0x70f   :  { %v12174_v18 = vpop.f32.mrf.mxu0  ;;  %v12202_v0 = vpop.f32.mrf.mxu1  ;;  %12297 = vmatmul.mubr.msk.bf16.gmra.mxu1 %vm2098_vm2, %v9197_v60 }
 0x710   :  { %v9001_v3 = vadd.f32 %v8841_v15, %v19531_v33  ;;  %9977 = vst [vmem:[#allocation2 + $0x68] sm:$0xff] %v9505_v30  ;;  %v9526_v38 = vadd.f32 %v12202_v0, %v17572_v2  ;;  %v9131_v28 = vmax.f32 %v9003_v49, 0.0  ;;  %v8862_v57 = vadd.f32 %v17518_v22, %v12174_v18  ;;  %v19535_v30 = vld [vmem:[#allocation229_spill] sm:$0xff] }
 0x711   :  { %v8853_v63 = vpop.f32.mrf.mxu0  ;;  %v9517_v53 = vpop.f32.mrf.mxu1 }
 0x712   :  { %v9129_v14 = vmax.f32 %v9001_v3, 0.0  ;;  %9982 = vst [vmem:[#allocation2 + $0x90] sm:$0xff] %v9526_v38  ;;  %v8854_v44 = vadd.f32 %v17518_v22, %v8853_v63  ;;  %v9518_v17 = vadd.f32 %v17572_v2, %v9517_v53  ;;  %v9199_v10 = vpack.c.bf16 %v9131_v28, %v9130_v52 }
 0x713   :  { %v12175_v7 = vpop.f32.mrf.mxu0  ;;  %v12203_v40 = vpop.f32.mrf.mxu1  ;;  %v9006_v24 = vadd.f32 %v8862_v57, %v19533_v43 }
 0x714   :  { %v9198_v11 = vpack.c.bf16 %v9129_v14, %v9128_v37  ;;  %v8865_v42 = vadd.f32 %v17518_v22, %v12175_v7  ;;  %9980 = vst [vmem:[#allocation2 + $0x80] sm:$0xff] %v9518_v17  ;;  %v9529_v31 = vadd.f32 %v12203_v40, %v17572_v2  ;;  %v9004_v21 = vadd.f32 %v8854_v44, %v17098_v50 }
 0x715   :  { %v8856_v1 = vpop.f32.mrf.mxu0  ;;  %v9520_v59 = vpop.f32.mrf.mxu1  ;;  %v9134_v29 = vmax.f32 %v9006_v24, 0.0 }
 0x716   :  { %v9007_v56 = vadd.f32 %v8865_v42, %v19532_v34  ;;  %v8857_v58 = vadd.f32 %v17518_v22, %v8856_v1  ;;  %v9521_v12 = vadd.f32 %v17572_v2, %v9520_v59  ;;  %12300 = vmatprep.mubr.msk.bf16.mxu1 %vm2098_vm2, %v9198_v11  ;;  %9983 = vst [vmem:[#allocation2 + $0x98] sm:$0xff] %v9529_v31  ;;  %v9132_v46 = vmax.f32 %v9004_v21, 0.0 }
 0x717   :  { %v12178_v6 = vpop.f32.mrf.mxu0  ;;  %v12206_v8 = vpop.f32.mrf.mxu1  ;;  %12301 = vmatmul.mubr.msk.bf16.gmra.mxu1 %vm2098_vm2, %v9199_v10 }
 0x718   :  { %v9005_v25 = vadd.f32 %v8857_v58, %v19534_v13  ;;  %9981 = vst [vmem:[#allocation2 + $0x88] sm:$0xff] %v9521_v12  ;;  %v9542_v50 = vadd.f32 %v12206_v8, %v17572_v2  ;;  %v9135_v55 = vmax.f32 %v9007_v56, 0.0  ;;  %v8878_v19 = vadd.f32 %v17518_v22, %v12178_v6 }
 0x719   :  { %v8869_v61 = vpop.f32.mrf.mxu0  ;;  %v9533_v9 = vpop.f32.mrf.mxu1 }
 0x71a   :  { %v9133_v62 = vmax.f32 %v9005_v25, 0.0  ;;  %9986 = vst [vmem:[#allocation2 + $0xb0] sm:$0xff] %v9542_v50  ;;  %v8870_v41 = vadd.f32 %v17518_v22, %v8869_v61  ;;  %v9534_v54 = vadd.f32 %v17572_v2, %v9533_v9  ;;  %v9201_v35 = vpack.c.bf16 %v9135_v55, %v9134_v29 }
 0x71b   :  { %v12179_v32 = vpop.f32.mrf.mxu0  ;;  %v12207_v4 = vpop.f32.mrf.mxu1  ;;  %v9010_v49 = vadd.f32 %v8878_v19, %v17136_v23 }
 0x71c   :  { %v9200_v5 = vpack.c.bf16 %v9133_v62, %v9132_v46  ;;  %v8881_v51 = vadd.f32 %v17518_v22, %v12179_v32  ;;  %9984 = vst [vmem:[#allocation2 + $0xa0] sm:$0xff] %v9534_v54  ;;  %v9545_v20 = vadd.f32 %v12207_v4, %v17572_v2  ;;  %v9008_v45 = vadd.f32 %v8870_v41, %v17128_v36 }
 0x71d   :  { %v8872_v27 = vpop.f32.mrf.mxu0  ;;  %v9536_v60 = vpop.f32.mrf.mxu1  ;;  %v9138_v3 = vmax.f32 %v9010_v49, 0.0 }
 0x71e   :  { %v9011_v39 = vadd.f32 %v8881_v51, %v17133_v16  ;;  %v8873_v26 = vadd.f32 %v17518_v22, %v8872_v27  ;;  %v9537_v47 = vadd.f32 %v17572_v2, %v9536_v60  ;;  %12304 = vmatprep.mubr.msk.bf16.mxu1 %vm2098_vm2, %v9200_v5  ;;  %9987 = vst [vmem:[#allocation2 + $0xb8] sm:$0xff] %v9545_v20  ;;  %v9136_v16 = vmax.f32 %v9008_v45, 0.0 }
 0x71f   :  { %v12210_v15 = vpop.f32.mrf.mxu1  ;;  %12305 = vmatmul.mubr.msk.bf16.gmra.mxu1 %vm2098_vm2, %v9201_v35 }
 0x720   :  { %v9009_v48 = vadd.f32 %v8873_v26, %v19535_v30  ;;  %9985 = vst [vmem:[#allocation2 + $0xa8] sm:$0xff] %v9537_v47  ;;  %v9558_v18 = vadd.f32 %v12210_v15, %v17572_v2  ;;  %v9139_v36 = vmax.f32 %v9011_v39, 0.0 }
 0x721   :  { %v9549_v0 = vpop.f32.mrf.mxu1 }
 0x722   :  { %v9137_v33 = vmax.f32 %v9009_v48, 0.0  ;;  %9990 = vst [vmem:[#allocation2 + $0xd0] sm:$0xff] %v9558_v18  ;;  %v9550_v22 = vadd.f32 %v17572_v2, %v9549_v0  ;;  %v9203_v63 = vpack.c.bf16 %v9139_v36, %v9138_v3 }
 0x723   :  { %v12211_v38 = vpop.f32.mrf.mxu1 }
 0x724   :  { %v9202_v28 = vpack.c.bf16 %v9137_v33, %v9136_v16  ;;  %9988 = vst [vmem:[#allocation2 + $0xc0] sm:$0xff] %v9550_v22  ;;  %v9561_v23 = vadd.f32 %v12211_v38, %v17572_v2 }
 0x725   :  { %v9552_v53 = vpop.f32.mrf.mxu1 }
 0x726   :  { %9991 = vst [vmem:[#allocation2 + $0xd8] sm:$0xff] %v9561_v23  ;;  %v9553_v37 = vadd.f32 %v17572_v2, %v9552_v53  ;;  %12308 = vmatprep.mubr.msk.bf16.mxu1 %vm2098_vm2, %v9202_v28 }
 0x727   :  { %v12214_v14 = vpop.f32.mrf.mxu1  ;;  %12309 = vmatmul.mubr.msk.bf16.gmra.mxu1 %vm2098_vm2, %v9203_v63 }
 0x728   :  { %9989 = vst [vmem:[#allocation2 + $0xc8] sm:$0xff] %v9553_v37  ;;  %v9574_v44 = vadd.f32 %v12214_v14, %v17572_v2 }
 0x729   :  { %v9565_v52 = vpop.f32.mrf.mxu1 }
 0x72a   :  { %9994 = vst [vmem:[#allocation2 + $0xf0] sm:$0xff] %v9574_v44  ;;  %v9566_v57 = vadd.f32 %v17572_v2, %v9565_v52 }
 0x72b   :  { %v12215_v17 = vpop.f32.mrf.mxu1 }
 0x72c   :  { %9992 = vst [vmem:[#allocation2 + $0xe0] sm:$0xff] %v9566_v57  ;;  %v9577_v7 = vadd.f32 %v12215_v17, %v17572_v2 }
 0x72d   :  { %v9568_v40 = vpop.f32.mrf.mxu1 }
 0x72e   :  { %9995 = vst [vmem:[#allocation2 + $0xf8] sm:$0xff] %v9577_v7  ;;  %v9569_v11 = vadd.f32 %v17572_v2, %v9568_v40 }
 0x72f   :  { %v12218_v42 = vpop.f32.mrf.mxu1 }
 0x730   :  { %9993 = vst [vmem:[#allocation2 + $0xe8] sm:$0xff] %v9569_v11  ;;  %v9590_v10 = vadd.f32 %v12218_v42, %v17572_v2 }
 0x731   :  { %v9581_v31 = vpop.f32.mrf.mxu1 }
 0x732   :  { %9998 = vst [vmem:[#allocation2 + $0x110] sm:$0xff] %v9590_v10  ;;  %v9582_v1 = vadd.f32 %v17572_v2, %v9581_v31 }
 0x733   :  { %v12219_v59 = vpop.f32.mrf.mxu1 }
 0x734   :  { %9996 = vst [vmem:[#allocation2 + $0x100] sm:$0xff] %v9582_v1  ;;  %v9593_v21 = vadd.f32 %v12219_v59, %v17572_v2 }
 0x735   :  { %v9584_v34 = vpop.f32.mrf.mxu1 }
 0x736   :  { %9999 = vst [vmem:[#allocation2 + $0x118] sm:$0xff] %v9593_v21  ;;  %v9585_v56 = vadd.f32 %v17572_v2, %v9584_v34 }
 0x737   :  { %v12222_v58 = vpop.f32.mrf.mxu1 }
 0x738   :  { %9997 = vst [vmem:[#allocation2 + $0x108] sm:$0xff] %v9585_v56  ;;  %v9606_v12 = vadd.f32 %v12222_v58, %v17572_v2 }
 0x739   :  { %v9597_v43 = vpop.f32.mrf.mxu1 }
 0x73a   :  { %10002 = vst [vmem:[#allocation2 + $0x130] sm:$0xff] %v9606_v12  ;;  %v9598_v24 = vadd.f32 %v17572_v2, %v9597_v43 }
 0x73b   :  { %v12223_v6 = vpop.f32.mrf.mxu1 }
 0x73c   :  { %10000 = vst [vmem:[#allocation2 + $0x120] sm:$0xff] %v9598_v24  ;;  %v9609_v8 = vadd.f32 %v12223_v6, %v17572_v2 }
 0x73d   :  { %v9600_v13 = vpop.f32.mrf.mxu1 }
 0x73e   :  { %10003 = vst [vmem:[#allocation2 + $0x138] sm:$0xff] %v9609_v8  ;;  %v9601_v25 = vadd.f32 %v17572_v2, %v9600_v13 }
 0x73f   :  { %v12226_v50 = vpop.f32.mrf.mxu1 }
 0x740   :  { %10001 = vst [vmem:[#allocation2 + $0x128] sm:$0xff] %v9601_v25  ;;  %v9622_v55 = vadd.f32 %v12226_v50, %v17572_v2 }
 0x741   :  { %v9613_v61 = vpop.f32.mrf.mxu1 }
 0x742   :  { %10006 = vst [vmem:[#allocation2 + $0x150] sm:$0xff] %v9622_v55  ;;  %v9614_v9 = vadd.f32 %v17572_v2, %v9613_v61 }
 0x743   :  { %v12227_v46 = vpop.f32.mrf.mxu1 }
 0x744   :  { %10004 = vst [vmem:[#allocation2 + $0x140] sm:$0xff] %v9614_v9  ;;  %v9625_v62 = vadd.f32 %v12227_v46, %v17572_v2 }
 0x745   :  { %v9616_v41 = vpop.f32.mrf.mxu1 }
 0x746   :  { %10007 = vst [vmem:[#allocation2 + $0x158] sm:$0xff] %v9625_v62  ;;  %v9617_v29 = vadd.f32 %v17572_v2, %v9616_v41 }
 0x747   :  { %v12230_v19 = vpop.f32.mrf.mxu1 }
 0x748   :  { %10005 = vst [vmem:[#allocation2 + $0x148] sm:$0xff] %v9617_v29  ;;  %v9638_v54 = vadd.f32 %v12230_v19, %v17572_v2 }
 0x749   :  { %v9629_v32 = vpop.f32.mrf.mxu1 }
 0x74a   :  { %10010 = vst [vmem:[#allocation2 + $0x170] sm:$0xff] %v9638_v54  ;;  %v9630_v4 = vadd.f32 %v17572_v2, %v9629_v32 }
 0x74b   :  { %v12231_v5 = vpop.f32.mrf.mxu1 }
 0x74c   :  { %10008 = vst [vmem:[#allocation2 + $0x160] sm:$0xff] %v9630_v4  ;;  %v9641_v51 = vadd.f32 %v12231_v5, %v17572_v2 }
 0x74d   :  { %v9632_v35 = vpop.f32.mrf.mxu1 }
 0x74e   :  { %10011 = vst [vmem:[#allocation2 + $0x178] sm:$0xff] %v9641_v51  ;;  %v9633_v20 = vadd.f32 %v17572_v2, %v9632_v35 }
 0x74f   :  { %v12234_v27 = vpop.f32.mrf.mxu1 }
 0x750   :  { %10009 = vst [vmem:[#allocation2 + $0x168] sm:$0xff] %v9633_v20  ;;  %v9654_v60 = vadd.f32 %v12234_v27, %v17572_v2 }
 0x751   :  { %v9645_v45 = vpop.f32.mrf.mxu1 }
 0x752   :  { %10014 = vst [vmem:[#allocation2 + $0x190] sm:$0xff] %v9654_v60  ;;  %v9646_v39 = vadd.f32 %v17572_v2, %v9645_v45 }
 0x753   :  { %v12235_v26 = vpop.f32.mrf.mxu1 }
 0x754   :  { %10012 = vst [vmem:[#allocation2 + $0x180] sm:$0xff] %v9646_v39  ;;  %v9657_v47 = vadd.f32 %v12235_v26, %v17572_v2 }
 0x755   :  { %v9648_v49 = vpop.f32.mrf.mxu1 }
 0x756   :  { %10015 = vst [vmem:[#allocation2 + $0x198] sm:$0xff] %v9657_v47  ;;  %v9649_v15 = vadd.f32 %v17572_v2, %v9648_v49 }
 0x757   :  { %v12238_v30 = vpop.f32.mrf.mxu1 }
 0x758   :  { %10013 = vst [vmem:[#allocation2 + $0x188] sm:$0xff] %v9649_v15  ;;  %v9670_v48 = vadd.f32 %v12238_v30, %v17572_v2 }
 0x759   :  { %v9661_v18 = vpop.f32.mrf.mxu1 }
 0x75a   :  { %10018 = vst [vmem:[#allocation2 + $0x1b0] sm:$0xff] %v9670_v48  ;;  %v9662_v36 = vadd.f32 %v17572_v2, %v9661_v18 }
 0x75b   :  { %v12239_v0 = vpop.f32.mrf.mxu1 }
 0x75c   :  { %10016 = vst [vmem:[#allocation2 + $0x1a0] sm:$0xff] %v9662_v36  ;;  %v9673_v16 = vadd.f32 %v12239_v0, %v17572_v2 }
 0x75d   :  { %v9664_v33 = vpop.f32.mrf.mxu1 }
 0x75e   :  { %10019 = vst [vmem:[#allocation2 + $0x1b8] sm:$0xff] %v9673_v16  ;;  %v9665_v22 = vadd.f32 %v17572_v2, %v9664_v33 }
 0x75f   :  { %v12242_v3 = vpop.f32.mrf.mxu1 }
 0x760   :  { %10017 = vst [vmem:[#allocation2 + $0x1a8] sm:$0xff] %v9665_v22  ;;  %v9686_v38 = vadd.f32 %v12242_v3, %v17572_v2 }
 0x761   :  { %v9677_v28 = vpop.f32.mrf.mxu1 }
 0x762   :  { %10022 = vst [vmem:[#allocation2 + $0x1d0] sm:$0xff] %v9686_v38  ;;  %v9678_v23 = vadd.f32 %v17572_v2, %v9677_v28 }
 0x763   :  { %v12243_v63 = vpop.f32.mrf.mxu1 }
 0x764   :  { %10020 = vst [vmem:[#allocation2 + $0x1c0] sm:$0xff] %v9678_v23  ;;  %v9689_v53 = vadd.f32 %v12243_v63, %v17572_v2 }
 0x765   :  { %v9680_v37 = vpop.f32.mrf.mxu1 }
 0x766   :  { %10023 = vst [vmem:[#allocation2 + $0x1d8] sm:$0xff] %v9689_v53  ;;  %v9681_v14 = vadd.f32 %v17572_v2, %v9680_v37 }
 0x767   :  { %v12246_v44 = vpop.f32.mrf.mxu1 }
 0x768   :  { %10021 = vst [vmem:[#allocation2 + $0x1c8] sm:$0xff] %v9681_v14  ;;  %v9702_v52 = vadd.f32 %v12246_v44, %v17572_v2 }
 0x769   :  { %v9693_v57 = vpop.f32.mrf.mxu1 }
 0x76a   :  { %10026 = vst [vmem:[#allocation2 + $0x1f0] sm:$0xff] %v9702_v52  ;;  %v9694_v17 = vadd.f32 %v17572_v2, %v9693_v57 }
 0x76b   :  { %v12247_v7 = vpop.f32.mrf.mxu1 }
 0x76c   :  { %10024 = vst [vmem:[#allocation2 + $0x1e0] sm:$0xff] %v9694_v17  ;;  %v9705_v40 = vadd.f32 %v12247_v7, %v17572_v2 }
 0x76d   :  { %v9696_v11 = vpop.f32.mrf.mxu1 }
 0x76e   :  { %10027 = vst [vmem:[#allocation2 + $0x1f8] sm:$0xff] %v9705_v40  ;;  %v9697_v42 = vadd.f32 %v17572_v2, %v9696_v11 }
 0x76f   :  { %v12250_v10 = vpop.f32.mrf.mxu1 }
 0x770   :  { %10025 = vst [vmem:[#allocation2 + $0x1e8] sm:$0xff] %v9697_v42  ;;  %v9718_v31 = vadd.f32 %v12250_v10, %v17572_v2 }
 0x771   :  { %v9709_v1 = vpop.f32.mrf.mxu1 }
 0x772   :  { %10030 = vst [vmem:[#allocation2 + $0x210] sm:$0xff] %v9718_v31  ;;  %v9710_v59 = vadd.f32 %v17572_v2, %v9709_v1 }
 0x773   :  { %v12251_v21 = vpop.f32.mrf.mxu1 }
 0x774   :  { %10028 = vst [vmem:[#allocation2 + $0x200] sm:$0xff] %v9710_v59  ;;  %v9721_v34 = vadd.f32 %v12251_v21, %v17572_v2 }
 0x775   :  { %v9712_v56 = vpop.f32.mrf.mxu1 }
 0x776   :  { %10031 = vst [vmem:[#allocation2 + $0x218] sm:$0xff] %v9721_v34  ;;  %v9713_v58 = vadd.f32 %v17572_v2, %v9712_v56 }
 0x777   :  { %v12254_v12 = vpop.f32.mrf.mxu1 }
 0x778   :  { %10029 = vst [vmem:[#allocation2 + $0x208] sm:$0xff] %v9713_v58  ;;  %v9734_v43 = vadd.f32 %v12254_v12, %v17572_v2 }
 0x779   :  { %v9725_v24 = vpop.f32.mrf.mxu1 }
 0x77a   :  { %10034 = vst [vmem:[#allocation2 + $0x230] sm:$0xff] %v9734_v43  ;;  %v9726_v6 = vadd.f32 %v17572_v2, %v9725_v24 }
 0x77b   :  { %v12255_v8 = vpop.f32.mrf.mxu1 }
 0x77c   :  { %10032 = vst [vmem:[#allocation2 + $0x220] sm:$0xff] %v9726_v6  ;;  %v9737_v13 = vadd.f32 %v12255_v8, %v17572_v2 }
 0x77d   :  { %v9728_v25 = vpop.f32.mrf.mxu1 }
 0x77e   :  { %10035 = vst [vmem:[#allocation2 + $0x238] sm:$0xff] %v9737_v13  ;;  %v9729_v50 = vadd.f32 %v17572_v2, %v9728_v25 }
 0x77f   :  { %v12258_v55 = vpop.f32.mrf.mxu1 }
 0x780   :  { %10033 = vst [vmem:[#allocation2 + $0x228] sm:$0xff] %v9729_v50  ;;  %v9750_v61 = vadd.f32 %v12258_v55, %v17572_v2 }
 0x781   :  { %v9741_v9 = vpop.f32.mrf.mxu1 }
 0x782   :  { %10038 = vst [vmem:[#allocation2 + $0x250] sm:$0xff] %v9750_v61  ;;  %v9742_v46 = vadd.f32 %v17572_v2, %v9741_v9 }
 0x783   :  { %v12259_v62 = vpop.f32.mrf.mxu1 }
 0x784   :  { %10036 = vst [vmem:[#allocation2 + $0x240] sm:$0xff] %v9742_v46  ;;  %v9753_v41 = vadd.f32 %v12259_v62, %v17572_v2 }
 0x785   :  { %v9744_v29 = vpop.f32.mrf.mxu1 }
 0x786   :  { %10039 = vst [vmem:[#allocation2 + $0x258] sm:$0xff] %v9753_v41  ;;  %v9745_v19 = vadd.f32 %v17572_v2, %v9744_v29 }
 0x787   :  { %v12262_v54 = vpop.f32.mrf.mxu1 }
 0x788   :  { %10037 = vst [vmem:[#allocation2 + $0x248] sm:$0xff] %v9745_v19  ;;  %v9766_v32 = vadd.f32 %v12262_v54, %v17572_v2 }
 0x789   :  { %v9757_v4 = vpop.f32.mrf.mxu1 }
 0x78a   :  { %10042 = vst [vmem:[#allocation2 + $0x270] sm:$0xff] %v9766_v32  ;;  %v9758_v5 = vadd.f32 %v17572_v2, %v9757_v4 }
 0x78b   :  { %v12263_v51 = vpop.f32.mrf.mxu1 }
 0x78c   :  { %10040 = vst [vmem:[#allocation2 + $0x260] sm:$0xff] %v9758_v5  ;;  %v9769_v35 = vadd.f32 %v12263_v51, %v17572_v2 }
 0x78d   :  { %v9760_v20 = vpop.f32.mrf.mxu1 }
 0x78e   :  { %10043 = vst [vmem:[#allocation2 + $0x278] sm:$0xff] %v9769_v35  ;;  %v9761_v27 = vadd.f32 %v17572_v2, %v9760_v20 }
 0x78f   :  { %v12266_v60 = vpop.f32.mrf.mxu1 }
 0x790   :  { %10041 = vst [vmem:[#allocation2 + $0x268] sm:$0xff] %v9761_v27  ;;  %v9782_v45 = vadd.f32 %v12266_v60, %v17572_v2 }
 0x791   :  { %v9773_v39 = vpop.f32.mrf.mxu1 }
 0x792   :  { %10046 = vst [vmem:[#allocation2 + $0x290] sm:$0xff] %v9782_v45  ;;  %v9774_v26 = vadd.f32 %v17572_v2, %v9773_v39 }
 0x793   :  { %v12267_v47 = vpop.f32.mrf.mxu1 }
 0x794   :  { %10044 = vst [vmem:[#allocation2 + $0x280] sm:$0xff] %v9774_v26  ;;  %v9785_v49 = vadd.f32 %v12267_v47, %v17572_v2 }
 0x795   :  { %v9776_v15 = vpop.f32.mrf.mxu1 }
 0x796   :  { %10047 = vst [vmem:[#allocation2 + $0x298] sm:$0xff] %v9785_v49  ;;  %v9777_v30 = vadd.f32 %v17572_v2, %v9776_v15 }
 0x797   :  { %v12270_v48 = vpop.f32.mrf.mxu1 }
 0x798   :  { %10045 = vst [vmem:[#allocation2 + $0x288] sm:$0xff] %v9777_v30  ;;  %v9798_v18 = vadd.f32 %v12270_v48, %v17572_v2 }
 0x799   :  { %v9789_v36 = vpop.f32.mrf.mxu1 }
 0x79a   :  { %10050 = vst [vmem:[#allocation2 + $0x2b0] sm:$0xff] %v9798_v18  ;;  %v9790_v0 = vadd.f32 %v17572_v2, %v9789_v36 }
 0x79b   :  { %v12271_v16 = vpop.f32.mrf.mxu1 }
 0x79c   :  { %10048 = vst [vmem:[#allocation2 + $0x2a0] sm:$0xff] %v9790_v0  ;;  %v9801_v33 = vadd.f32 %v12271_v16, %v17572_v2 }
 0x79d   :  { %v9792_v22 = vpop.f32.mrf.mxu1 }
 0x79e   :  { %10051 = vst [vmem:[#allocation2 + $0x2b8] sm:$0xff] %v9801_v33  ;;  %v9793_v3 = vadd.f32 %v17572_v2, %v9792_v22 }
 0x79f   :  { %v12274_v38 = vpop.f32.mrf.mxu1 }
 0x7a0   :  { %10049 = vst [vmem:[#allocation2 + $0x2a8] sm:$0xff] %v9793_v3  ;;  %v9814_v28 = vadd.f32 %v12274_v38, %v17572_v2 }
 0x7a1   :  { %v9805_v23 = vpop.f32.mrf.mxu1 }
 0x7a2   :  { %10054 = vst [vmem:[#allocation2 + $0x2d0] sm:$0xff] %v9814_v28  ;;  %v9806_v63 = vadd.f32 %v17572_v2, %v9805_v23 }
 0x7a3   :  { %v12275_v53 = vpop.f32.mrf.mxu1 }
 0x7a4   :  { %10052 = vst [vmem:[#allocation2 + $0x2c0] sm:$0xff] %v9806_v63  ;;  %v9817_v37 = vadd.f32 %v12275_v53, %v17572_v2 }
 0x7a5   :  { %v9808_v14 = vpop.f32.mrf.mxu1 }
 0x7a6   :  { %10055 = vst [vmem:[#allocation2 + $0x2d8] sm:$0xff] %v9817_v37  ;;  %v9809_v44 = vadd.f32 %v17572_v2, %v9808_v14 }
 0x7a7   :  { %v12278_v52 = vpop.f32.mrf.mxu1 }
 0x7a8   :  { %10053 = vst [vmem:[#allocation2 + $0x2c8] sm:$0xff] %v9809_v44  ;;  %v9830_v57 = vadd.f32 %v12278_v52, %v17572_v2  ;;  %v12408_v52 = vld [vmem:[%s17782_s8] ss:$0 sm:$0xff] }
 0x7a9   :  { %v9821_v17 = vpop.f32.mrf.mxu1 }
 0x7aa   :  { %10058 = vst [vmem:[#allocation2 + $0x2f0] sm:$0xff] %v9830_v57  ;;  %v9822_v7 = vadd.f32 %v17572_v2, %v9821_v17 }
 0x7ab   :  { %v12279_v40 = vpop.f32.mrf.mxu1 }
 0x7ac   :  { %10056 = vst [vmem:[#allocation2 + $0x2e0] sm:$0xff] %v9822_v7  ;;  %v9833_v11 = vadd.f32 %v12279_v40, %v17572_v2 }
 0x7ad   :  { %v9824_v42 = vpop.f32.mrf.mxu1 }
 0x7ae   :  { %10059 = vst [vmem:[#allocation2 + $0x2f8] sm:$0xff] %v9833_v11  ;;  %v9825_v10 = vadd.f32 %v17572_v2, %v9824_v42 }
 0x7af   :  { %v12282_v31 = vpop.f32.mrf.mxu1 }
 0x7b0   :  { %10057 = vst [vmem:[#allocation2 + $0x2e8] sm:$0xff] %v9825_v10  ;;  %v9846_v1 = vadd.f32 %v12282_v31, %v17572_v2 }
 0x7b1   :  { %v9837_v59 = vpop.f32.mrf.mxu1 }
 0x7b2   :  { %10062 = vst [vmem:[#allocation2 + $0x310] sm:$0xff] %v9846_v1  ;;  %v9838_v21 = vadd.f32 %v17572_v2, %v9837_v59 }
 0x7b3   :  { %v12283_v34 = vpop.f32.mrf.mxu1 }
 0x7b4   :  { %10060 = vst [vmem:[#allocation2 + $0x300] sm:$0xff] %v9838_v21  ;;  %v9849_v56 = vadd.f32 %v12283_v34, %v17572_v2 }
 0x7b5   :  { %v9840_v58 = vpop.f32.mrf.mxu1 }
 0x7b6   :  { %10063 = vst [vmem:[#allocation2 + $0x318] sm:$0xff] %v9849_v56  ;;  %v9841_v12 = vadd.f32 %v17572_v2, %v9840_v58 }
 0x7b7   :  { %v12286_v43 = vpop.f32.mrf.mxu1 }
 0x7b8   :  { %10061 = vst [vmem:[#allocation2 + $0x308] sm:$0xff] %v9841_v12  ;;  %v9862_v24 = vadd.f32 %v12286_v43, %v17572_v2 }
 0x7b9   :  { %v9853_v6 = vpop.f32.mrf.mxu1 }
 0x7ba   :  { %10066 = vst [vmem:[#allocation2 + $0x330] sm:$0xff] %v9862_v24  ;;  %v9854_v8 = vadd.f32 %v17572_v2, %v9853_v6 }
 0x7bb   :  { %v12287_v13 = vpop.f32.mrf.mxu1 }
 0x7bc   :  { %10064 = vst [vmem:[#allocation2 + $0x320] sm:$0xff] %v9854_v8  ;;  %v9865_v25 = vadd.f32 %v12287_v13, %v17572_v2 }
 0x7bd   :  { %v9856_v50 = vpop.f32.mrf.mxu1 }
 0x7be   :  { %10067 = vst [vmem:[#allocation2 + $0x338] sm:$0xff] %v9865_v25  ;;  %v9857_v55 = vadd.f32 %v17572_v2, %v9856_v50 }
 0x7bf   :  { %v12290_v61 = vpop.f32.mrf.mxu1 }
 0x7c0   :  { %10065 = vst [vmem:[#allocation2 + $0x328] sm:$0xff] %v9857_v55  ;;  %v9878_v9 = vadd.f32 %v12290_v61, %v17572_v2 }
 0x7c1   :  { %v9869_v46 = vpop.f32.mrf.mxu1 }
 0x7c2   :  { %10070 = vst [vmem:[#allocation2 + $0x350] sm:$0xff] %v9878_v9  ;;  %v9870_v62 = vadd.f32 %v17572_v2, %v9869_v46 }
 0x7c3   :  { %v12291_v41 = vpop.f32.mrf.mxu1 }
 0x7c4   :  { %10068 = vst [vmem:[#allocation2 + $0x340] sm:$0xff] %v9870_v62  ;;  %v9881_v29 = vadd.f32 %v12291_v41, %v17572_v2 }
 0x7c5   :  { %v9872_v19 = vpop.f32.mrf.mxu1 }
 0x7c6   :  { %10071 = vst [vmem:[#allocation2 + $0x358] sm:$0xff] %v9881_v29  ;;  %v9873_v54 = vadd.f32 %v17572_v2, %v9872_v19 }
 0x7c7   :  { %v12294_v32 = vpop.f32.mrf.mxu1 }
 0x7c8   :  { %10069 = vst [vmem:[#allocation2 + $0x348] sm:$0xff] %v9873_v54  ;;  %v9894_v4 = vadd.f32 %v12294_v32, %v17572_v2 }
 0x7c9   :  { %v9885_v5 = vpop.f32.mrf.mxu1 }
 0x7ca   :  { %10074 = vst [vmem:[#allocation2 + $0x370] sm:$0xff] %v9894_v4  ;;  %v9886_v51 = vadd.f32 %v17572_v2, %v9885_v5 }
 0x7cb   :  { %v12295_v35 = vpop.f32.mrf.mxu1 }
 0x7cc   :  { %10072 = vst [vmem:[#allocation2 + $0x360] sm:$0xff] %v9886_v51  ;;  %v9897_v20 = vadd.f32 %v12295_v35, %v17572_v2 }
 0x7cd   :  { %v9888_v27 = vpop.f32.mrf.mxu1 }
 0x7ce   :  { %10075 = vst [vmem:[#allocation2 + $0x378] sm:$0xff] %v9897_v20  ;;  %v9889_v60 = vadd.f32 %v17572_v2, %v9888_v27 }
 0x7cf   :  { %v12298_v45 = vpop.f32.mrf.mxu1 }
 0x7d0   :  { %10073 = vst [vmem:[#allocation2 + $0x368] sm:$0xff] %v9889_v60  ;;  %v9910_v39 = vadd.f32 %v12298_v45, %v17572_v2 }
 0x7d1   :  { %v9901_v26 = vpop.f32.mrf.mxu1 }
 0x7d2   :  { %10078 = vst [vmem:[#allocation2 + $0x390] sm:$0xff] %v9910_v39  ;;  %v9902_v47 = vadd.f32 %v17572_v2, %v9901_v26 }
 0x7d3   :  { %v12299_v49 = vpop.f32.mrf.mxu1 }
 0x7d4   :  { %10076 = vst [vmem:[#allocation2 + $0x380] sm:$0xff] %v9902_v47  ;;  %v9913_v15 = vadd.f32 %v12299_v49, %v17572_v2 }
 0x7d5   :  { %v9904_v30 = vpop.f32.mrf.mxu1 }
 0x7d6   :  { %10079 = vst [vmem:[#allocation2 + $0x398] sm:$0xff] %v9913_v15  ;;  %v9905_v48 = vadd.f32 %v17572_v2, %v9904_v30 }
 0x7d7   :  { %v12302_v18 = vpop.f32.mrf.mxu1 }
 0x7d8   :  { %10077 = vst [vmem:[#allocation2 + $0x388] sm:$0xff] %v9905_v48  ;;  %v9926_v36 = vadd.f32 %v12302_v18, %v17572_v2 }
 0x7d9   :  { %v9917_v0 = vpop.f32.mrf.mxu1 }
 0x7da   :  { %10082 = vst [vmem:[#allocation2 + $0x3b0] sm:$0xff] %v9926_v36  ;;  %v9918_v16 = vadd.f32 %v17572_v2, %v9917_v0 }
 0x7db   :  { %v12303_v33 = vpop.f32.mrf.mxu1 }
 0x7dc   :  { %10080 = vst [vmem:[#allocation2 + $0x3a0] sm:$0xff] %v9918_v16  ;;  %v9929_v22 = vadd.f32 %v12303_v33, %v17572_v2 }
 0x7dd   :  { %v9920_v3 = vpop.f32.mrf.mxu1 }
 0x7de   :  { %10083 = vst [vmem:[#allocation2 + $0x3b8] sm:$0xff] %v9929_v22  ;;  %v9921_v38 = vadd.f32 %v17572_v2, %v9920_v3 }
 0x7df   :  { %v12306_v28 = vpop.f32.mrf.mxu1 }
 0x7e0   :  { %10081 = vst [vmem:[#allocation2 + $0x3a8] sm:$0xff] %v9921_v38  ;;  %v9942_v23 = vadd.f32 %v12306_v28, %v17572_v2 }
 0x7e1   :  { %v9933_v63 = vpop.f32.mrf.mxu1 }
 0x7e2   :  { %10086 = vst [vmem:[#allocation2 + $0x3d0] sm:$0xff] %v9942_v23  ;;  %v9934_v53 = vadd.f32 %v17572_v2, %v9933_v63 }
 0x7e3   :  { %v12307_v37 = vpop.f32.mrf.mxu1 }
 0x7e4   :  { %10084 = vst [vmem:[#allocation2 + $0x3c0] sm:$0xff] %v9934_v53  ;;  %v9945_v14 = vadd.f32 %v12307_v37, %v17572_v2 }
 0x7e5   :  { %v9936_v44 = vpop.f32.mrf.mxu1 }
 0x7e6   :  { %10087 = vst [vmem:[#allocation2 + $0x3d8] sm:$0xff] %v9945_v14  ;;  %v9937_v57 = vadd.f32 %v12408_v52, %v9936_v44 }
 0x7e7   :  { %v12310_v17 = vpop.f32.mrf.mxu1 }
 0x7e8   :  { %10085 = vst [vmem:[#allocation2 + $0x3c8] sm:$0xff] %v9937_v57  ;;  %v9958_v7 = vadd.f32 %v12408_v52, %v12310_v17 }
 0x7e9   :  { %v9949_v40 = vpop.f32.mrf.mxu1 }
 0x7ea   :  { %10090 = vst [vmem:[#allocation2 + $0x3f0] sm:$0xff] %v9958_v7  ;;  %v9950_v11 = vadd.f32 %v12408_v52, %v9949_v40 }
 0x7eb   :  { %v12311_v42 = vpop.f32.mrf.mxu1 }
 0x7ec   :  { %10088 = vst [vmem:[#allocation2 + $0x3e0] sm:$0xff] %v9950_v11  ;;  %v9961_v10 = vadd.f32 %v12408_v52, %v12311_v42 }
 0x7ed   :  { %v9952_v31 = vpop.f32.mrf.mxu1 }
 0x7ee   :  { %10091 = vst [vmem:[#allocation2 + $0x3f8] sm:$0xff] %v9961_v10  ;;  %v9953_v2 = vadd.f32 %v12408_v52, %v9952_v31 }
 0x7f0   :  { %10089 = vst [vmem:[#allocation2 + $0x3e8] sm:$0xff] %v9953_v2 }
 0x7f1   :  { %12420 = shalt.err (!%p12417_p4)
}
 0x7f2   :  { %s12435_s8 = smov 128   ;;  %s12436_s13 = smov 8  }
 0x7f3   :  { %10103 = dma.vmem_to_hbm [thread:$0]  %s10098_s22, 16384, %s17783_s9, [#allocation3], %s12435_s8, %s12435_s8, %s12436_s13  }
 0x7f4   :  { %12429 = dma.done.wait [#allocation3], 16384  }
 0x7f5   :  { %12430 = vsyncadd [#allocation3], 4294950912 }
 0x7f6   :  { %10107 = vsyncpa [#allocation3], 1 }

</bundles_post_ra>
